<compile_context>
chip_gen: v7x
topology: tpu7x:2x2x1
jax: 0.10.0
libtpu: 0.0.40
codegen_flags: <defaults>
</compile_context>

<pallas_src>
import jax
import jax.numpy as jnp
from jax import lax
from jax.experimental import pallas as pl
from jax.experimental.pallas import tpu as pltpu

F32 = jnp.float32

# ---------------------------------------------------------------------------
# Geometry (input 40x40, as implied by AvgPool2d(16) + Linear(17, 32)).
# ---------------------------------------------------------------------------
IMG = 40                      # input spatial size
H1 = IMG - 2                  # 38  conv1 output
H2 = H1 - 2                   # 36  conv2 output
HP = H2 // 2                  # 18  after 2x2 max pool
H3 = HP - 2                   # 16  conv3 output -> AvgPool2d(16) is a full mean
ROWSTRIDE = IMG               # flattened row stride (overshoot layout)
XCOLS = 13 * 128              # 1664 padded flattened input width (>= 82 + A1COLS)
C2COLS = H2 * ROWSTRIDE       # 1440 conv2 output columns (incl. overshoot x=36..39)
A1COLS = 1536                 # conv1 output cols: >= 82 + C2COLS, <= XCOLS - 82
PCOLS = HP * HP               # 324 pooled-map columns (no overshoot)


# ---------------------------------------------------------------------------
# Fused kernel: one grid step == one sample, both Q branches.
# Activation layout: (channels, y*40 + x) in VMEM scratch.
# ---------------------------------------------------------------------------
def _critic_kernel(x_ref, u_ref,
                   w1t_ref, b1_ref, w2t_ref, b2_ref, w3t_ref, b3_ref,
                   msum_ref, sele_ref, selo_ref,
                   fc1w_ref, fc1u_ref, fc1b_ref, fc2w_ref, fc2b_ref,
                   out_ref,
                   act1_ref, c2_ref, p3_ref):
    # ---- conv1 + ReLU: 1 -> 16 channels (A:0..7, B:8..15), VPU shift-and-MAC.
    act1_ref[...] = jnp.broadcast_to(b1_ref[...], (16, A1COLS))
    for dy in range(3):
        for dx in range(3):
            k = dy * 3 + dx
            off = dy * ROWSTRIDE + dx
            act1_ref[...] += w1t_ref[:, k:k + 1] * x_ref[0, 0:1, off:off + A1COLS]
    act1_ref[...] = jnp.maximum(act1_ref[...], 0.0)

    # ---- conv2 + ReLU: 16 -> 32 channels, 9 shifted MXU matmuls.
    c2_ref[...] = jnp.broadcast_to(b2_ref[...], (32, C2COLS))
    for dy in range(3):
        for dx in range(3):
            k = dy * 3 + dx
            off = dy * ROWSTRIDE + dx
            c2_ref[...] += jnp.dot(w2t_ref[:, k * 16:(k + 1) * 16],
                                   act1_ref[:, off:off + C2COLS],
                                   preferred_element_type=F32)
    c2_ref[...] = jnp.maximum(c2_ref[...], 0.0)

    # ---- 2x2 max pool (36x36 -> 18x18), fused.  Dropout2d = identity at eval.
    # TODO(synk): train-mode Dropout2d / Dropout (random masking) not implemented.
    for r in range(HP):
        row_a = c2_ref[:, (2 * r) * ROWSTRIDE:(2 * r) * ROWSTRIDE + H2]       # (32,36)
        row_b = c2_ref[:, (2 * r + 1) * ROWSTRIDE:(2 * r + 1) * ROWSTRIDE + H2]
        m = jnp.maximum(row_a, row_b)
        p_even = jnp.dot(m, sele_ref[...], preferred_element_type=F32)        # (32,18)
        p_odd = jnp.dot(m, selo_ref[...], preferred_element_type=F32)
        p3_ref[:, r * HP:(r + 1) * HP] = jnp.maximum(p_even, p_odd)

    # ---- conv3 fused with AvgPool2d(16) via linearity:
    #      feat = b3 + sum_k W3_k^T @ (1/256 * window_sum_k(pooled))
    wsum = jnp.dot(p3_ref[...], msum_ref[...], preferred_element_type=F32)    # (32,9)
    feat = b3_ref[...]                                                        # (32,1)
    for k in range(9):
        feat = feat + jnp.dot(w3t_ref[:, k * 32:(k + 1) * 32], wsum[:, k:k + 1],
                              preferred_element_type=F32)

    # ---- cat(u) + fc1 + ReLU + fc2 (both branches via block-diagonal weights).
    h = jnp.dot(fc1w_ref[...], feat, preferred_element_type=F32)              # (64,1)
    h = h + fc1u_ref[...] * u_ref[0]                                          # concat(u)
    h = jnp.maximum(h + fc1b_ref[...], 0.0)
    q = jnp.dot(fc2w_ref[...], h, preferred_element_type=F32) + fc2b_ref[...] # (2,1)
    out_ref[0] = q                                                            # [Q1, Q2]


# ---------------------------------------------------------------------------
# Host-side weight packing: both branches combined with block-diagonal weights.
# Per-branch conv weights are HWIO flattened: (9*Cin, Cout) with rows (dy,dx,ci).
# ---------------------------------------------------------------------------
def _combine_params(pa, pb):
    def _block_diag_conv(wa, wb, cin, cout):
        wa3 = wa.reshape(9, cin, cout)
        wb3 = wb.reshape(9, cin, cout)
        z = jnp.zeros((9, cin, cout), F32)
        top = jnp.concatenate([wa3, z], axis=2)       # A inputs -> A outputs only
        bot = jnp.concatenate([z, wb3], axis=2)       # B inputs -> B outputs only
        return jnp.concatenate([top, bot], axis=1).reshape(9 * 2 * cin, 2 * cout)

    w1 = jnp.concatenate([pa['w1'], pb['w1']], axis=1)              # (9, 16)
    b1 = jnp.concatenate([pa['b1'], pb['b1']], axis=0)
    w2 = _block_diag_conv(pa['w2'], pb['w2'], 8, 16)                # (144, 32)
    b2 = jnp.concatenate([pa['b2'], pb['b2']], axis=0)
    w3 = _block_diag_conv(pa['w3'], pb['w3'], 16, 16)               # (288, 32)
    b3 = jnp.concatenate([pa['b3'], pb['b3']], axis=0)

    z16 = jnp.zeros((16, 32), F32)
    fc1 = jnp.concatenate([
        jnp.concatenate([pa['fc1_w'][:16], z16], axis=1),
        jnp.concatenate([z16, pb['fc1_w'][:16]], axis=1)], axis=0)  # (32, 64)
    fc1u = jnp.concatenate([pa['fc1_w'][16], pb['fc1_w'][16]], axis=0)  # (64,)
    fc1b = jnp.concatenate([pa['fc1_b'], pb['fc1_b']], axis=0)

    z32 = jnp.zeros((32, 1), F32)
    fc2 = jnp.concatenate([
        jnp.concatenate([pa['fc2_w'], z32], axis=1),
        jnp.concatenate([z32, pb['fc2_w']], axis=1)], axis=0)       # (64, 2)
    fc2b = jnp.concatenate([pa['fc2_b'], pb['fc2_b']], axis=0)

    return dict(
        w1t=w1.T, b1=b1.reshape(16, 1),
        w2t=w2.T, b2=b2.reshape(32, 1),
        w3t=w3.T, b3=b3.reshape(32, 1),
        fc1wt=fc1.T, fc1u=fc1u.reshape(64, 1), fc1b=fc1b.reshape(64, 1),
        fc2wt=fc2.T, fc2b=fc2b.reshape(2, 1),
    )


def _pool_constants():
    # Even/odd lane-selection matrices for the 2x2 max pool along x.
    x_idx = jnp.arange(H2)[:, None]
    s_idx = jnp.arange(HP)[None, :]
    sele = (x_idx == 2 * s_idx).astype(F32)           # (36, 18)
    selo = (x_idx == 2 * s_idx + 1).astype(F32)
    # 16x16 window-sum matrix (AvgPool2d(16) folded in via the 1/256 scale).
    q = jnp.arange(PCOLS)
    r = (q // HP)[:, None]
    s = (q % HP)[:, None]
    k = jnp.arange(9)[None, :]
    dy, dx = k // 3, k % 3
    inside = (r >= dy) & (r < dy + H3) & (s >= dx) & (s < dx + H3)
    msum = inside.astype(F32) / float(H3 * H3)        # (324, 9)
    return sele, selo, msum


@jax.jit
def critic_forward(x_nchw, u, params_a, params_b):
    B = x_nchw.shape[0]
    cp = _combine_params(params_a, params_b)
    sele, selo, msum = _pool_constants()

    x_flat = x_nchw.astype(F32).reshape(B, 1, IMG * IMG)
    x_flat = jnp.pad(x_flat, ((0, 0), (0, 0), (0, XCOLS - IMG * IMG)))
    u3 = u.astype(F32).reshape(B, 1, 1)

    weights = (cp['w1t'], cp['b1'], cp['w2t'], cp['b2'], cp['w3t'], cp['b3'],
               msum, sele, selo,
               cp['fc1wt'], cp['fc1u'], cp['fc1b'], cp['fc2wt'], cp['fc2b'])

    def _full_spec(arr):
        nd = arr.ndim
        return pl.BlockSpec(arr.shape, lambda b, _nd=nd: (0,) * _nd)

    in_specs = [pl.BlockSpec((1, 1, XCOLS), lambda b: (b, 0, 0)),
                pl.BlockSpec((1, 1, 1), lambda b: (b, 0, 0))]
    in_specs += [_full_spec(w) for w in weights]

    out = pl.pallas_call(
        _critic_kernel,
        out_shape=jax.ShapeDtypeStruct((B, 2, 1), F32),
        grid_spec=pltpu.PrefetchScalarGridSpec(
            num_scalar_prefetch=0,
            grid=(B,),
            in_specs=in_specs,
            out_specs=pl.BlockSpec((1, 2, 1), lambda b: (b, 0, 0)),
            scratch_shapes=[pltpu.VMEM((16, A1COLS), F32),
                            pltpu.VMEM((32, C2COLS), F32),
                            pltpu.VMEM((32, PCOLS), F32)]),
        compiler_params=pltpu.CompilerParams(
            dimension_semantics=("parallel",)),
    )(x_flat, u3, *weights)

    q = out[:, :, 0]
    return q[:, 0:1], q[:, 1:2]


# ---------------------------------------------------------------------------
# Deterministic parameter init (shapes per the PyTorch module __init__).
# ---------------------------------------------------------------------------
def init_branch_params(key):
    ks = jax.random.split(key, 10)

    def w(k, fan_in, shape):
        return jax.random.normal(k, shape, F32) / jnp.sqrt(fan_in)

    return dict(
        w1=w(ks[0], 9 * 1, (9 * 1, 8)),    b1=w(ks[1], 9, (8,)) * 0.1,
        w2=w(ks[2], 9 * 8, (9 * 8, 16)),   b2=w(ks[3], 72, (16,)) * 0.1,
        w3=w(ks[4], 9 * 16, (9 * 16, 16)), b3=w(ks[5], 144, (16,)) * 0.1,
        fc1_w=w(ks[6], 17, (17, 32)),      fc1_b=w(ks[7], 17, (32,)) * 0.1,
        fc2_w=w(ks[8], 32, (32, 1)),       fc2_b=w(ks[9], 32, (1,)) * 0.1,
    )


# ---------------------------------------------------------------------------
# Pure-JAX reference (single branch) for correctness checking.
# ---------------------------------------------------------------------------
def reference_branch(x_nchw, u, p):
    x = jnp.transpose(x_nchw, (0, 2, 3, 1))

    def conv(z, w2d, b, ci, co):
        w = w2d.reshape(3, 3, ci, co)
        y = lax.conv_general_dilated(z, w, (1, 1), 'VALID',
                                     dimension_numbers=('NHWC', 'HWIO', 'NHWC'),
                                     precision=lax.Precision.HIGHEST)
        return y + b

    y = jax.nn.relu(conv(x, p['w1'], p['b1'], 1, 8))
    y = jax.nn.relu(conv(y, p['w2'], p['b2'], 8, 16))
    y = lax.reduce_window(y, -jnp.inf, lax.max, (1, 2, 2, 1), (1, 2, 2, 1), 'VALID')
    y = conv(y, p['w3'], p['b3'], 16, 16)
    pooled = jnp.mean(y, axis=(1, 2))                 # AvgPool2d(16) on 16x16
    feat = jnp.concatenate([pooled, u], axis=1)       # (B, 17)
    h = jax.nn.relu(feat @ p['fc1_w'] + p['fc1_b'])
    return h @ p['fc2_w'] + p['fc2_b']


if __name__ == "__main__":
    key = jax.random.PRNGKey(0)
    kx, ku, kpa, kpb = jax.random.split(key, 4)

    B = 2
    x = jax.random.normal(kx, (B, 1, IMG, IMG), F32)   # NCHW, like the PyTorch module
    u = jax.random.normal(ku, (B, 1), F32)             # action_dim = 1

    params_a = init_branch_params(kpa)   # conv1-3 / fc1-2  (Q1 branch)
    params_b = init_branch_params(kpb)   # conv4-6 / fc3-4  (Q2 branch)

    q1, q2 = critic_forward(x, u, params_a, params_b)
    jax.block_until_ready((q1, q2))

    r1 = reference_branch(x, u, params_a)
    r2 = reference_branch(x, u, params_b)
    assert q1.shape == (B, 1) and q2.shape == (B, 1)
    # Kernel uses default MXU precision (per perf review); reference is HIGHEST.
    assert jnp.allclose(q1, r1, rtol=3e-2, atol=3e-2), (q1, r1)
    assert jnp.allclose(q2, r2, rtol=3e-2, atol=3e-2), (q2, r2)

    print("KERNEL_OK")
</pallas_src>

<mosaic_0001>
module attributes {stable_mosaic.version = 11 : i64} {
  func.func @_critic_kernel(%arg0: i32, %arg1: memref<1x1x1664xf32, #tpu.memory_space<vmem>>, %arg2: memref<1x1x1xf32, #tpu.memory_space<vmem>>, %arg3: memref<16x9xf32, #tpu.memory_space<vmem>>, %arg4: memref<16x1xf32, #tpu.memory_space<vmem>>, %arg5: memref<32x144xf32, #tpu.memory_space<vmem>>, %arg6: memref<32x1xf32, #tpu.memory_space<vmem>>, %arg7: memref<32x288xf32, #tpu.memory_space<vmem>>, %arg8: memref<32x1xf32, #tpu.memory_space<vmem>>, %arg9: memref<324x9xf32, #tpu.memory_space<vmem>>, %arg10: memref<36x18xf32, #tpu.memory_space<vmem>>, %arg11: memref<36x18xf32, #tpu.memory_space<vmem>>, %arg12: memref<64x32xf32, #tpu.memory_space<vmem>>, %arg13: memref<64x1xf32, #tpu.memory_space<vmem>>, %arg14: memref<64x1xf32, #tpu.memory_space<vmem>>, %arg15: memref<2x64xf32, #tpu.memory_space<vmem>>, %arg16: memref<2x1xf32, #tpu.memory_space<vmem>>, %arg17: memref<1x2x1xf32, #tpu.memory_space<vmem>>, %arg18: memref<16x1536xf32, #tpu.memory_space<vmem>>, %arg19: memref<32x1440xf32, #tpu.memory_space<vmem>>, %arg20: memref<32x324xf32, #tpu.memory_space<vmem>>) attributes {dimension_semantics = [#tpu.dimension_semantics<parallel>], iteration_bounds = array<i64: 2>, scalar_prefetch = 0 : i64, scratch_operands = 3 : i64, tpu.core_type = #tpu.core_type<tc>, window_params = [{transform_indices = @transform_0, window_bounds = array<i64: 1, 1, 1664>}, {transform_indices = @transform_1, window_bounds = array<i64: 1, 1, 1>}, {pipeline_mode = #tpu.pipeline_mode<synchronous>, transform_indices = @transform_2, window_bounds = array<i64: 16, 9>}, {pipeline_mode = #tpu.pipeline_mode<synchronous>, transform_indices = @transform_3, window_bounds = array<i64: 16, 1>}, {pipeline_mode = #tpu.pipeline_mode<synchronous>, transform_indices = @transform_4, window_bounds = array<i64: 32, 144>}, {pipeline_mode = #tpu.pipeline_mode<synchronous>, transform_indices = @transform_5, window_bounds = array<i64: 32, 1>}, {pipeline_mode = #tpu.pipeline_mode<synchronous>, transform_indices = @transform_6, window_bounds = array<i64: 32, 288>}, {pipeline_mode = #tpu.pipeline_mode<synchronous>, transform_indices = @transform_7, window_bounds = array<i64: 32, 1>}, {pipeline_mode = #tpu.pipeline_mode<synchronous>, transform_indices = @transform_8, window_bounds = array<i64: 324, 9>}, {pipeline_mode = #tpu.pipeline_mode<synchronous>, transform_indices = @transform_9, window_bounds = array<i64: 36, 18>}, {pipeline_mode = #tpu.pipeline_mode<synchronous>, transform_indices = @transform_10, window_bounds = array<i64: 36, 18>}, {pipeline_mode = #tpu.pipeline_mode<synchronous>, transform_indices = @transform_11, window_bounds = array<i64: 64, 32>}, {pipeline_mode = #tpu.pipeline_mode<synchronous>, transform_indices = @transform_12, window_bounds = array<i64: 64, 1>}, {pipeline_mode = #tpu.pipeline_mode<synchronous>, transform_indices = @transform_13, window_bounds = array<i64: 64, 1>}, {pipeline_mode = #tpu.pipeline_mode<synchronous>, transform_indices = @transform_14, window_bounds = array<i64: 2, 64>}, {pipeline_mode = #tpu.pipeline_mode<synchronous>, transform_indices = @transform_15, window_bounds = array<i64: 2, 1>}, {transform_indices = @transform_16, window_bounds = array<i64: 1, 2, 1>}]} {
    %c0 = arith.constant 0 : index
    %c0_0 = arith.constant 0 : index
    %0 = vector.load %arg4[%c0, %c0_0] : memref<16x1xf32, #tpu.memory_space<vmem>>, vector<16x1xf32>
    %1 = vector.shape_cast %0 : vector<16x1xf32> to vector<16x1xf32>
    %2 = vector.broadcast %1 : vector<16x1xf32> to vector<16x1536xf32>
    %c0_1 = arith.constant 0 : index
    %c0_2 = arith.constant 0 : index
    %3 = vector.load %arg18[%c0_1, %c0_2] : memref<16x1536xf32, #tpu.memory_space<vmem>>, vector<16x1536xf32>
    tpu.vector_store %arg18[%c0_1, %c0_2], %2 {strides = array<i32>} : memref<16x1536xf32, #tpu.memory_space<vmem>>, vector<16x1536xf32>,
    %c0_3 = arith.constant 0 : index
    %c0_4 = arith.constant 0 : index
    %4 = vector.load %arg18[%c0_3, %c0_4] : memref<16x1536xf32, #tpu.memory_space<vmem>>, vector<16x1536xf32>
    %c0_5 = arith.constant 0 : index
    %c0_6 = arith.constant 0 : index
    %5 = vector.load %arg3[%c0_5, %c0_6] : memref<16x9xf32, #tpu.memory_space<vmem>>, vector<16x1xf32>
    %c0_7 = arith.constant 0 : index
    %c0_8 = arith.constant 0 : index
    %c0_9 = arith.constant 0 : index
    %6 = vector.load %arg1[%c0_7, %c0_8, %c0_9] : memref<1x1x1664xf32, #tpu.memory_space<vmem>>, vector<1x1x1536xf32>
    %7 = vector.shape_cast %6 : vector<1x1x1536xf32> to vector<1x1536xf32>
    %8 = vector.broadcast %5 : vector<16x1xf32> to vector<16x1536xf32>
    %9 = vector.broadcast %7 : vector<1x1536xf32> to vector<16x1536xf32>
    %10 = arith.mulf %8, %9 : vector<16x1536xf32>
    %11 = arith.addf %4, %10 : vector<16x1536xf32>
    %c0_10 = arith.constant 0 : index
    %c0_11 = arith.constant 0 : index
    %12 = vector.load %arg18[%c0_10, %c0_11] : memref<16x1536xf32, #tpu.memory_space<vmem>>, vector<16x1536xf32>
    tpu.vector_store %arg18[%c0_10, %c0_11], %11 {strides = array<i32>} : memref<16x1536xf32, #tpu.memory_space<vmem>>, vector<16x1536xf32>,
    %c0_12 = arith.constant 0 : index
    %c0_13 = arith.constant 0 : index
    %13 = vector.load %arg18[%c0_12, %c0_13] : memref<16x1536xf32, #tpu.memory_space<vmem>>, vector<16x1536xf32>
    %c0_14 = arith.constant 0 : index
    %c1 = arith.constant 1 : index
    %14 = vector.load %arg3[%c0_14, %c1] : memref<16x9xf32, #tpu.memory_space<vmem>>, vector<16x1xf32>
    %c0_15 = arith.constant 0 : index
    %c0_16 = arith.constant 0 : index
    %c1_17 = arith.constant 1 : index
    %15 = vector.load %arg1[%c0_15, %c0_16, %c1_17] : memref<1x1x1664xf32, #tpu.memory_space<vmem>>, vector<1x1x1536xf32>
    %16 = vector.shape_cast %15 : vector<1x1x1536xf32> to vector<1x1536xf32>
    %17 = vector.broadcast %14 : vector<16x1xf32> to vector<16x1536xf32>
    %18 = vector.broadcast %16 : vector<1x1536xf32> to vector<16x1536xf32>
    %19 = arith.mulf %17, %18 : vector<16x1536xf32>
    %20 = arith.addf %13, %19 : vector<16x1536xf32>
    %c0_18 = arith.constant 0 : index
    %c0_19 = arith.constant 0 : index
    %21 = vector.load %arg18[%c0_18, %c0_19] : memref<16x1536xf32, #tpu.memory_space<vmem>>, vector<16x1536xf32>
    tpu.vector_store %arg18[%c0_18, %c0_19], %20 {strides = array<i32>} : memref<16x1536xf32, #tpu.memory_space<vmem>>, vector<16x1536xf32>,
    %c0_20 = arith.constant 0 : index
    %c0_21 = arith.constant 0 : index
    %22 = vector.load %arg18[%c0_20, %c0_21] : memref<16x1536xf32, #tpu.memory_space<vmem>>, vector<16x1536xf32>
    %c0_22 = arith.constant 0 : index
    %c2 = arith.constant 2 : index
    %23 = vector.load %arg3[%c0_22, %c2] : memref<16x9xf32, #tpu.memory_space<vmem>>, vector<16x1xf32>
    %c0_23 = arith.constant 0 : index
    %c0_24 = arith.constant 0 : index
    %c2_25 = arith.constant 2 : index
    %24 = vector.load %arg1[%c0_23, %c0_24, %c2_25] : memref<1x1x1664xf32, #tpu.memory_space<vmem>>, vector<1x1x1536xf32>
    %25 = vector.shape_cast %24 : vector<1x1x1536xf32> to vector<1x1536xf32>
    %26 = vector.broadcast %23 : vector<16x1xf32> to vector<16x1536xf32>
    %27 = vector.broadcast %25 : vector<1x1536xf32> to vector<16x1536xf32>
    %28 = arith.mulf %26, %27 : vector<16x1536xf32>
    %29 = arith.addf %22, %28 : vector<16x1536xf32>
    %c0_26 = arith.constant 0 : index
    %c0_27 = arith.constant 0 : index
    %30 = vector.load %arg18[%c0_26, %c0_27] : memref<16x1536xf32, #tpu.memory_space<vmem>>, vector<16x1536xf32>
    tpu.vector_store %arg18[%c0_26, %c0_27], %29 {strides = array<i32>} : memref<16x1536xf32, #tpu.memory_space<vmem>>, vector<16x1536xf32>,
    %c0_28 = arith.constant 0 : index
    %c0_29 = arith.constant 0 : index
    %31 = vector.load %arg18[%c0_28, %c0_29] : memref<16x1536xf32, #tpu.memory_space<vmem>>, vector<16x1536xf32>
    %c0_30 = arith.constant 0 : index
    %c3 = arith.constant 3 : index
    %32 = vector.load %arg3[%c0_30, %c3] : memref<16x9xf32, #tpu.memory_space<vmem>>, vector<16x1xf32>
    %c0_31 = arith.constant 0 : index
    %c0_32 = arith.constant 0 : index
    %c40 = arith.constant 40 : index
    %33 = vector.load %arg1[%c0_31, %c0_32, %c40] : memref<1x1x1664xf32, #tpu.memory_space<vmem>>, vector<1x1x1536xf32>
    %34 = vector.shape_cast %33 : vector<1x1x1536xf32> to vector<1x1536xf32>
    %35 = vector.broadcast %32 : vector<16x1xf32> to vector<16x1536xf32>
    %36 = vector.broadcast %34 : vector<1x1536xf32> to vector<16x1536xf32>
    %37 = arith.mulf %35, %36 : vector<16x1536xf32>
    %38 = arith.addf %31, %37 : vector<16x1536xf32>
    %c0_33 = arith.constant 0 : index
    %c0_34 = arith.constant 0 : index
    %39 = vector.load %arg18[%c0_33, %c0_34] : memref<16x1536xf32, #tpu.memory_space<vmem>>, vector<16x1536xf32>
    tpu.vector_store %arg18[%c0_33, %c0_34], %38 {strides = array<i32>} : memref<16x1536xf32, #tpu.memory_space<vmem>>, vector<16x1536xf32>,
    %c0_35 = arith.constant 0 : index
    %c0_36 = arith.constant 0 : index
    %40 = vector.load %arg18[%c0_35, %c0_36] : memref<16x1536xf32, #tpu.memory_space<vmem>>, vector<16x1536xf32>
    %c0_37 = arith.constant 0 : index
    %c4 = arith.constant 4 : index
    %41 = vector.load %arg3[%c0_37, %c4] : memref<16x9xf32, #tpu.memory_space<vmem>>, vector<16x1xf32>
    %c0_38 = arith.constant 0 : index
    %c0_39 = arith.constant 0 : index
    %c41 = arith.constant 41 : index
    %42 = vector.load %arg1[%c0_38, %c0_39, %c41] : memref<1x1x1664xf32, #tpu.memory_space<vmem>>, vector<1x1x1536xf32>
    %43 = vector.shape_cast %42 : vector<1x1x1536xf32> to vector<1x1536xf32>
    %44 = vector.broadcast %41 : vector<16x1xf32> to vector<16x1536xf32>
    %45 = vector.broadcast %43 : vector<1x1536xf32> to vector<16x1536xf32>
    %46 = arith.mulf %44, %45 : vector<16x1536xf32>
    %47 = arith.addf %40, %46 : vector<16x1536xf32>
    %c0_40 = arith.constant 0 : index
    %c0_41 = arith.constant 0 : index
    %48 = vector.load %arg18[%c0_40, %c0_41] : memref<16x1536xf32, #tpu.memory_space<vmem>>, vector<16x1536xf32>
    tpu.vector_store %arg18[%c0_40, %c0_41], %47 {strides = array<i32>} : memref<16x1536xf32, #tpu.memory_space<vmem>>, vector<16x1536xf32>,
    %c0_42 = arith.constant 0 : index
    %c0_43 = arith.constant 0 : index
    %49 = vector.load %arg18[%c0_42, %c0_43] : memref<16x1536xf32, #tpu.memory_space<vmem>>, vector<16x1536xf32>
    %c0_44 = arith.constant 0 : index
    %c5 = arith.constant 5 : index
    %50 = vector.load %arg3[%c0_44, %c5] : memref<16x9xf32, #tpu.memory_space<vmem>>, vector<16x1xf32>
    %c0_45 = arith.constant 0 : index
    %c0_46 = arith.constant 0 : index
    %c42 = arith.constant 42 : index
    %51 = vector.load %arg1[%c0_45, %c0_46, %c42] : memref<1x1x1664xf32, #tpu.memory_space<vmem>>, vector<1x1x1536xf32>
    %52 = vector.shape_cast %51 : vector<1x1x1536xf32> to vector<1x1536xf32>
    %53 = vector.broadcast %50 : vector<16x1xf32> to vector<16x1536xf32>
    %54 = vector.broadcast %52 : vector<1x1536xf32> to vector<16x1536xf32>
    %55 = arith.mulf %53, %54 : vector<16x1536xf32>
    %56 = arith.addf %49, %55 : vector<16x1536xf32>
    %c0_47 = arith.constant 0 : index
    %c0_48 = arith.constant 0 : index
    %57 = vector.load %arg18[%c0_47, %c0_48] : memref<16x1536xf32, #tpu.memory_space<vmem>>, vector<16x1536xf32>
    tpu.vector_store %arg18[%c0_47, %c0_48], %56 {strides = array<i32>} : memref<16x1536xf32, #tpu.memory_space<vmem>>, vector<16x1536xf32>,
    %c0_49 = arith.constant 0 : index
    %c0_50 = arith.constant 0 : index
    %58 = vector.load %arg18[%c0_49, %c0_50] : memref<16x1536xf32, #tpu.memory_space<vmem>>, vector<16x1536xf32>
    %c0_51 = arith.constant 0 : index
    %c6 = arith.constant 6 : index
    %59 = vector.load %arg3[%c0_51, %c6] : memref<16x9xf32, #tpu.memory_space<vmem>>, vector<16x1xf32>
    %c0_52 = arith.constant 0 : index
    %c0_53 = arith.constant 0 : index
    %c80 = arith.constant 80 : index
    %60 = vector.load %arg1[%c0_52, %c0_53, %c80] : memref<1x1x1664xf32, #tpu.memory_space<vmem>>, vector<1x1x1536xf32>
    %61 = vector.shape_cast %60 : vector<1x1x1536xf32> to vector<1x1536xf32>
    %62 = vector.broadcast %59 : vector<16x1xf32> to vector<16x1536xf32>
    %63 = vector.broadcast %61 : vector<1x1536xf32> to vector<16x1536xf32>
    %64 = arith.mulf %62, %63 : vector<16x1536xf32>
    %65 = arith.addf %58, %64 : vector<16x1536xf32>
    %c0_54 = arith.constant 0 : index
    %c0_55 = arith.constant 0 : index
    %66 = vector.load %arg18[%c0_54, %c0_55] : memref<16x1536xf32, #tpu.memory_space<vmem>>, vector<16x1536xf32>
    tpu.vector_store %arg18[%c0_54, %c0_55], %65 {strides = array<i32>} : memref<16x1536xf32, #tpu.memory_space<vmem>>, vector<16x1536xf32>,
    %c0_56 = arith.constant 0 : index
    %c0_57 = arith.constant 0 : index
    %67 = vector.load %arg18[%c0_56, %c0_57] : memref<16x1536xf32, #tpu.memory_space<vmem>>, vector<16x1536xf32>
    %c0_58 = arith.constant 0 : index
    %c7 = arith.constant 7 : index
    %68 = vector.load %arg3[%c0_58, %c7] : memref<16x9xf32, #tpu.memory_space<vmem>>, vector<16x1xf32>
    %c0_59 = arith.constant 0 : index
    %c0_60 = arith.constant 0 : index
    %c81 = arith.constant 81 : index
    %69 = vector.load %arg1[%c0_59, %c0_60, %c81] : memref<1x1x1664xf32, #tpu.memory_space<vmem>>, vector<1x1x1536xf32>
    %70 = vector.shape_cast %69 : vector<1x1x1536xf32> to vector<1x1536xf32>
    %71 = vector.broadcast %68 : vector<16x1xf32> to vector<16x1536xf32>
    %72 = vector.broadcast %70 : vector<1x1536xf32> to vector<16x1536xf32>
    %73 = arith.mulf %71, %72 : vector<16x1536xf32>
    %74 = arith.addf %67, %73 : vector<16x1536xf32>
    %c0_61 = arith.constant 0 : index
    %c0_62 = arith.constant 0 : index
    %75 = vector.load %arg18[%c0_61, %c0_62] : memref<16x1536xf32, #tpu.memory_space<vmem>>, vector<16x1536xf32>
    tpu.vector_store %arg18[%c0_61, %c0_62], %74 {strides = array<i32>} : memref<16x1536xf32, #tpu.memory_space<vmem>>, vector<16x1536xf32>,
    %c0_63 = arith.constant 0 : index
    %c0_64 = arith.constant 0 : index
    %76 = vector.load %arg18[%c0_63, %c0_64] : memref<16x1536xf32, #tpu.memory_space<vmem>>, vector<16x1536xf32>
    %c0_65 = arith.constant 0 : index
    %c8 = arith.constant 8 : index
    %77 = vector.load %arg3[%c0_65, %c8] : memref<16x9xf32, #tpu.memory_space<vmem>>, vector<16x1xf32>
    %c0_66 = arith.constant 0 : index
    %c0_67 = arith.constant 0 : index
    %c82 = arith.constant 82 : index
    %78 = vector.load %arg1[%c0_66, %c0_67, %c82] : memref<1x1x1664xf32, #tpu.memory_space<vmem>>, vector<1x1x1536xf32>
    %79 = vector.shape_cast %78 : vector<1x1x1536xf32> to vector<1x1536xf32>
    %80 = vector.broadcast %77 : vector<16x1xf32> to vector<16x1536xf32>
    %81 = vector.broadcast %79 : vector<1x1536xf32> to vector<16x1536xf32>
    %82 = arith.mulf %80, %81 : vector<16x1536xf32>
    %83 = arith.addf %76, %82 : vector<16x1536xf32>
    %c0_68 = arith.constant 0 : index
    %c0_69 = arith.constant 0 : index
    %84 = vector.load %arg18[%c0_68, %c0_69] : memref<16x1536xf32, #tpu.memory_space<vmem>>, vector<16x1536xf32>
    tpu.vector_store %arg18[%c0_68, %c0_69], %83 {strides = array<i32>} : memref<16x1536xf32, #tpu.memory_space<vmem>>, vector<16x1536xf32>,
    %c0_70 = arith.constant 0 : index
    %c0_71 = arith.constant 0 : index
    %85 = vector.load %arg18[%c0_70, %c0_71] : memref<16x1536xf32, #tpu.memory_space<vmem>>, vector<16x1536xf32>
    %cst = arith.constant 0.000000e+00 : f32
    %86 = vector.broadcast %cst : f32 to vector<16x1536xf32>
    %87 = arith.maximumf %85, %86 : vector<16x1536xf32>
    %c0_72 = arith.constant 0 : index
    %c0_73 = arith.constant 0 : index
    %88 = vector.load %arg18[%c0_72, %c0_73] : memref<16x1536xf32, #tpu.memory_space<vmem>>, vector<16x1536xf32>
    tpu.vector_store %arg18[%c0_72, %c0_73], %87 {strides = array<i32>} : memref<16x1536xf32, #tpu.memory_space<vmem>>, vector<16x1536xf32>,
    %c0_74 = arith.constant 0 : index
    %c0_75 = arith.constant 0 : index
    %89 = vector.load %arg6[%c0_74, %c0_75] : memref<32x1xf32, #tpu.memory_space<vmem>>, vector<32x1xf32>
    %90 = vector.shape_cast %89 : vector<32x1xf32> to vector<32x1xf32>
    %91 = vector.broadcast %90 : vector<32x1xf32> to vector<32x1440xf32>
    %c0_76 = arith.constant 0 : index
    %c0_77 = arith.constant 0 : index
    %92 = vector.load %arg19[%c0_76, %c0_77] : memref<32x1440xf32, #tpu.memory_space<vmem>>, vector<32x1440xf32>
    tpu.vector_store %arg19[%c0_76, %c0_77], %91 {strides = array<i32>} : memref<32x1440xf32, #tpu.memory_space<vmem>>, vector<32x1440xf32>,
    %c0_78 = arith.constant 0 : index
    %c0_79 = arith.constant 0 : index
    %93 = vector.load %arg19[%c0_78, %c0_79] : memref<32x1440xf32, #tpu.memory_space<vmem>>, vector<32x1440xf32>
    %c0_80 = arith.constant 0 : index
    %c0_81 = arith.constant 0 : index
    %94 = vector.load %arg5[%c0_80, %c0_81] : memref<32x144xf32, #tpu.memory_space<vmem>>, vector<32x16xf32>
    %c0_82 = arith.constant 0 : index
    %c0_83 = arith.constant 0 : index
    %95 = vector.load %arg18[%c0_82, %c0_83] : memref<16x1536xf32, #tpu.memory_space<vmem>>, vector<16x1440xf32>
    %cst_84 = arith.constant dense<0.000000e+00> : vector<32x1440xf32>
    %96 = tpu.matmul %94, %95, %cst_84 {dimension_numbers = #tpu.dot_dimension_numbers<[1], [0], [0], [1], [0, 0, 1, 1], [], []>} : vector<32x16xf32>, vector<16x1440xf32>, vector<32x1440xf32> -> vector<32x1440xf32>
    %97 = arith.addf %93, %96 : vector<32x1440xf32>
    %c0_85 = arith.constant 0 : index
    %c0_86 = arith.constant 0 : index
    %98 = vector.load %arg19[%c0_85, %c0_86] : memref<32x1440xf32, #tpu.memory_space<vmem>>, vector<32x1440xf32>
    tpu.vector_store %arg19[%c0_85, %c0_86], %97 {strides = array<i32>} : memref<32x1440xf32, #tpu.memory_space<vmem>>, vector<32x1440xf32>,
    %c0_87 = arith.constant 0 : index
    %c0_88 = arith.constant 0 : index
    %99 = vector.load %arg19[%c0_87, %c0_88] : memref<32x1440xf32, #tpu.memory_space<vmem>>, vector<32x1440xf32>
    %c0_89 = arith.constant 0 : index
    %c16 = arith.constant 16 : index
    %100 = vector.load %arg5[%c0_89, %c16] : memref<32x144xf32, #tpu.memory_space<vmem>>, vector<32x16xf32>
    %c0_90 = arith.constant 0 : index
    %c1_91 = arith.constant 1 : index
    %101 = vector.load %arg18[%c0_90, %c1_91] : memref<16x1536xf32, #tpu.memory_space<vmem>>, vector<16x1440xf32>
    %cst_92 = arith.constant dense<0.000000e+00> : vector<32x1440xf32>
    %102 = tpu.matmul %100, %101, %cst_92 {dimension_numbers = #tpu.dot_dimension_numbers<[1], [0], [0], [1], [0, 0, 1, 1], [], []>} : vector<32x16xf32>, vector<16x1440xf32>, vector<32x1440xf32> -> vector<32x1440xf32>
    %103 = arith.addf %99, %102 : vector<32x1440xf32>
    %c0_93 = arith.constant 0 : index
    %c0_94 = arith.constant 0 : index
    %104 = vector.load %arg19[%c0_93, %c0_94] : memref<32x1440xf32, #tpu.memory_space<vmem>>, vector<32x1440xf32>
    tpu.vector_store %arg19[%c0_93, %c0_94], %103 {strides = array<i32>} : memref<32x1440xf32, #tpu.memory_space<vmem>>, vector<32x1440xf32>,
    %c0_95 = arith.constant 0 : index
    %c0_96 = arith.constant 0 : index
    %105 = vector.load %arg19[%c0_95, %c0_96] : memref<32x1440xf32, #tpu.memory_space<vmem>>, vector<32x1440xf32>
    %c0_97 = arith.constant 0 : index
    %c32 = arith.constant 32 : index
    %106 = vector.load %arg5[%c0_97, %c32] : memref<32x144xf32, #tpu.memory_space<vmem>>, vector<32x16xf32>
    %c0_98 = arith.constant 0 : index
    %c2_99 = arith.constant 2 : index
    %107 = vector.load %arg18[%c0_98, %c2_99] : memref<16x1536xf32, #tpu.memory_space<vmem>>, vector<16x1440xf32>
    %cst_100 = arith.constant dense<0.000000e+00> : vector<32x1440xf32>
    %108 = tpu.matmul %106, %107, %cst_100 {dimension_numbers = #tpu.dot_dimension_numbers<[1], [0], [0], [1], [0, 0, 1, 1], [], []>} : vector<32x16xf32>, vector<16x1440xf32>, vector<32x1440xf32> -> vector<32x1440xf32>
    %109 = arith.addf %105, %108 : vector<32x1440xf32>
    %c0_101 = arith.constant 0 : index
    %c0_102 = arith.constant 0 : index
    %110 = vector.load %arg19[%c0_101, %c0_102] : memref<32x1440xf32, #tpu.memory_space<vmem>>, vector<32x1440xf32>
    tpu.vector_store %arg19[%c0_101, %c0_102], %109 {strides = array<i32>} : memref<32x1440xf32, #tpu.memory_space<vmem>>, vector<32x1440xf32>,
    %c0_103 = arith.constant 0 : index
    %c0_104 = arith.constant 0 : index
    %111 = vector.load %arg19[%c0_103, %c0_104] : memref<32x1440xf32, #tpu.memory_space<vmem>>, vector<32x1440xf32>
    %c0_105 = arith.constant 0 : index
    %c48 = arith.constant 48 : index
    %112 = vector.load %arg5[%c0_105, %c48] : memref<32x144xf32, #tpu.memory_space<vmem>>, vector<32x16xf32>
    %c0_106 = arith.constant 0 : index
    %c40_107 = arith.constant 40 : index
    %113 = vector.load %arg18[%c0_106, %c40_107] : memref<16x1536xf32, #tpu.memory_space<vmem>>, vector<16x1440xf32>
    %cst_108 = arith.constant dense<0.000000e+00> : vector<32x1440xf32>
    %114 = tpu.matmul %112, %113, %cst_108 {dimension_numbers = #tpu.dot_dimension_numbers<[1], [0], [0], [1], [0, 0, 1, 1], [], []>} : vector<32x16xf32>, vector<16x1440xf32>, vector<32x1440xf32> -> vector<32x1440xf32>
    %115 = arith.addf %111, %114 : vector<32x1440xf32>
    %c0_109 = arith.constant 0 : index
    %c0_110 = arith.constant 0 : index
    %116 = vector.load %arg19[%c0_109, %c0_110] : memref<32x1440xf32, #tpu.memory_space<vmem>>, vector<32x1440xf32>
    tpu.vector_store %arg19[%c0_109, %c0_110], %115 {strides = array<i32>} : memref<32x1440xf32, #tpu.memory_space<vmem>>, vector<32x1440xf32>,
    %c0_111 = arith.constant 0 : index
    %c0_112 = arith.constant 0 : index
    %117 = vector.load %arg19[%c0_111, %c0_112] : memref<32x1440xf32, #tpu.memory_space<vmem>>, vector<32x1440xf32>
    %c0_113 = arith.constant 0 : index
    %c64 = arith.constant 64 : index
    %118 = vector.load %arg5[%c0_113, %c64] : memref<32x144xf32, #tpu.memory_space<vmem>>, vector<32x16xf32>
    %c0_114 = arith.constant 0 : index
    %c41_115 = arith.constant 41 : index
    %119 = vector.load %arg18[%c0_114, %c41_115] : memref<16x1536xf32, #tpu.memory_space<vmem>>, vector<16x1440xf32>
    %cst_116 = arith.constant dense<0.000000e+00> : vector<32x1440xf32>
    %120 = tpu.matmul %118, %119, %cst_116 {dimension_numbers = #tpu.dot_dimension_numbers<[1], [0], [0], [1], [0, 0, 1, 1], [], []>} : vector<32x16xf32>, vector<16x1440xf32>, vector<32x1440xf32> -> vector<32x1440xf32>
    %121 = arith.addf %117, %120 : vector<32x1440xf32>
    %c0_117 = arith.constant 0 : index
    %c0_118 = arith.constant 0 : index
    %122 = vector.load %arg19[%c0_117, %c0_118] : memref<32x1440xf32, #tpu.memory_space<vmem>>, vector<32x1440xf32>
    tpu.vector_store %arg19[%c0_117, %c0_118], %121 {strides = array<i32>} : memref<32x1440xf32, #tpu.memory_space<vmem>>, vector<32x1440xf32>,
    %c0_119 = arith.constant 0 : index
    %c0_120 = arith.constant 0 : index
    %123 = vector.load %arg19[%c0_119, %c0_120] : memref<32x1440xf32, #tpu.memory_space<vmem>>, vector<32x1440xf32>
    %c0_121 = arith.constant 0 : index
    %c80_122 = arith.constant 80 : index
    %124 = vector.load %arg5[%c0_121, %c80_122] : memref<32x144xf32, #tpu.memory_space<vmem>>, vector<32x16xf32>
    %c0_123 = arith.constant 0 : index
    %c42_124 = arith.constant 42 : index
    %125 = vector.load %arg18[%c0_123, %c42_124] : memref<16x1536xf32, #tpu.memory_space<vmem>>, vector<16x1440xf32>
    %cst_125 = arith.constant dense<0.000000e+00> : vector<32x1440xf32>
    %126 = tpu.matmul %124, %125, %cst_125 {dimension_numbers = #tpu.dot_dimension_numbers<[1], [0], [0], [1], [0, 0, 1, 1], [], []>} : vector<32x16xf32>, vector<16x1440xf32>, vector<32x1440xf32> -> vector<32x1440xf32>
    %127 = arith.addf %123, %126 : vector<32x1440xf32>
    %c0_126 = arith.constant 0 : index
    %c0_127 = arith.constant 0 : index
    %128 = vector.load %arg19[%c0_126, %c0_127] : memref<32x1440xf32, #tpu.memory_space<vmem>>, vector<32x1440xf32>
    tpu.vector_store %arg19[%c0_126, %c0_127], %127 {strides = array<i32>} : memref<32x1440xf32, #tpu.memory_space<vmem>>, vector<32x1440xf32>,
    %c0_128 = arith.constant 0 : index
    %c0_129 = arith.constant 0 : index
    %129 = vector.load %arg19[%c0_128, %c0_129] : memref<32x1440xf32, #tpu.memory_space<vmem>>, vector<32x1440xf32>
    %c0_130 = arith.constant 0 : index
    %c96 = arith.constant 96 : index
    %130 = vector.load %arg5[%c0_130, %c96] : memref<32x144xf32, #tpu.memory_space<vmem>>, vector<32x16xf32>
    %c0_131 = arith.constant 0 : index
    %c80_132 = arith.constant 80 : index
    %131 = vector.load %arg18[%c0_131, %c80_132] : memref<16x1536xf32, #tpu.memory_space<vmem>>, vector<16x1440xf32>
    %cst_133 = arith.constant dense<0.000000e+00> : vector<32x1440xf32>
    %132 = tpu.matmul %130, %131, %cst_133 {dimension_numbers = #tpu.dot_dimension_numbers<[1], [0], [0], [1], [0, 0, 1, 1], [], []>} : vector<32x16xf32>, vector<16x1440xf32>, vector<32x1440xf32> -> vector<32x1440xf32>
    %133 = arith.addf %129, %132 : vector<32x1440xf32>
    %c0_134 = arith.constant 0 : index
    %c0_135 = arith.constant 0 : index
    %134 = vector.load %arg19[%c0_134, %c0_135] : memref<32x1440xf32, #tpu.memory_space<vmem>>, vector<32x1440xf32>
    tpu.vector_store %arg19[%c0_134, %c0_135], %133 {strides = array<i32>} : memref<32x1440xf32, #tpu.memory_space<vmem>>, vector<32x1440xf32>,
    %c0_136 = arith.constant 0 : index
    %c0_137 = arith.constant 0 : index
    %135 = vector.load %arg19[%c0_136, %c0_137] : memref<32x1440xf32, #tpu.memory_space<vmem>>, vector<32x1440xf32>
    %c0_138 = arith.constant 0 : index
    %c112 = arith.constant 112 : index
    %136 = vector.load %arg5[%c0_138, %c112] : memref<32x144xf32, #tpu.memory_space<vmem>>, vector<32x16xf32>
    %c0_139 = arith.constant 0 : index
    %c81_140 = arith.constant 81 : index
    %137 = vector.load %arg18[%c0_139, %c81_140] : memref<16x1536xf32, #tpu.memory_space<vmem>>, vector<16x1440xf32>
    %cst_141 = arith.constant dense<0.000000e+00> : vector<32x1440xf32>
    %138 = tpu.matmul %136, %137, %cst_141 {dimension_numbers = #tpu.dot_dimension_numbers<[1], [0], [0], [1], [0, 0, 1, 1], [], []>} : vector<32x16xf32>, vector<16x1440xf32>, vector<32x1440xf32> -> vector<32x1440xf32>
    %139 = arith.addf %135, %138 : vector<32x1440xf32>
    %c0_142 = arith.constant 0 : index
    %c0_143 = arith.constant 0 : index
    %140 = vector.load %arg19[%c0_142, %c0_143] : memref<32x1440xf32, #tpu.memory_space<vmem>>, vector<32x1440xf32>
    tpu.vector_store %arg19[%c0_142, %c0_143], %139 {strides = array<i32>} : memref<32x1440xf32, #tpu.memory_space<vmem>>, vector<32x1440xf32>,
    %c0_144 = arith.constant 0 : index
    %c0_145 = arith.constant 0 : index
    %141 = vector.load %arg19[%c0_144, %c0_145] : memref<32x1440xf32, #tpu.memory_space<vmem>>, vector<32x1440xf32>
    %c0_146 = arith.constant 0 : index
    %c128 = arith.constant 128 : index
    %142 = vector.load %arg5[%c0_146, %c128] : memref<32x144xf32, #tpu.memory_space<vmem>>, vector<32x16xf32>
    %c0_147 = arith.constant 0 : index
    %c82_148 = arith.constant 82 : index
    %143 = vector.load %arg18[%c0_147, %c82_148] : memref<16x1536xf32, #tpu.memory_space<vmem>>, vector<16x1440xf32>
    %cst_149 = arith.constant dense<0.000000e+00> : vector<32x1440xf32>
    %144 = tpu.matmul %142, %143, %cst_149 {dimension_numbers = #tpu.dot_dimension_numbers<[1], [0], [0], [1], [0, 0, 1, 1], [], []>} : vector<32x16xf32>, vector<16x1440xf32>, vector<32x1440xf32> -> vector<32x1440xf32>
    %145 = arith.addf %141, %144 : vector<32x1440xf32>
    %c0_150 = arith.constant 0 : index
    %c0_151 = arith.constant 0 : index
    %146 = vector.load %arg19[%c0_150, %c0_151] : memref<32x1440xf32, #tpu.memory_space<vmem>>, vector<32x1440xf32>
    tpu.vector_store %arg19[%c0_150, %c0_151], %145 {strides = array<i32>} : memref<32x1440xf32, #tpu.memory_space<vmem>>, vector<32x1440xf32>,
    %c0_152 = arith.constant 0 : index
    %c0_153 = arith.constant 0 : index
    %147 = vector.load %arg19[%c0_152, %c0_153] : memref<32x1440xf32, #tpu.memory_space<vmem>>, vector<32x1440xf32>
    %cst_154 = arith.constant 0.000000e+00 : f32
    %148 = vector.broadcast %cst_154 : f32 to vector<32x1440xf32>
    %149 = arith.maximumf %147, %148 : vector<32x1440xf32>
    %c0_155 = arith.constant 0 : index
    %c0_156 = arith.constant 0 : index
    %150 = vector.load %arg19[%c0_155, %c0_156] : memref<32x1440xf32, #tpu.memory_space<vmem>>, vector<32x1440xf32>
    tpu.vector_store %arg19[%c0_155, %c0_156], %149 {strides = array<i32>} : memref<32x1440xf32, #tpu.memory_space<vmem>>, vector<32x1440xf32>,
    %c0_157 = arith.constant 0 : index
    %c0_158 = arith.constant 0 : index
    %151 = vector.load %arg19[%c0_157, %c0_158] : memref<32x1440xf32, #tpu.memory_space<vmem>>, vector<32x36xf32>
    %c0_159 = arith.constant 0 : index
    %c40_160 = arith.constant 40 : index
    %152 = vector.load %arg19[%c0_159, %c40_160] : memref<32x1440xf32, #tpu.memory_space<vmem>>, vector<32x36xf32>
    %153 = arith.maximumf %151, %152 : vector<32x36xf32>
    %c0_161 = arith.constant 0 : index
    %c0_162 = arith.constant 0 : index
    %154 = vector.load %arg10[%c0_161, %c0_162] : memref<36x18xf32, #tpu.memory_space<vmem>>, vector<36x18xf32>
    %cst_163 = arith.constant dense<0.000000e+00> : vector<32x18xf32>
    %155 = tpu.matmul %153, %154, %cst_163 {dimension_numbers = #tpu.dot_dimension_numbers<[1], [0], [0], [1], [0, 0, 1, 1], [], []>} : vector<32x36xf32>, vector<36x18xf32>, vector<32x18xf32> -> vector<32x18xf32>
    %c0_164 = arith.constant 0 : index
    %c0_165 = arith.constant 0 : index
    %156 = vector.load %arg11[%c0_164, %c0_165] : memref<36x18xf32, #tpu.memory_space<vmem>>, vector<36x18xf32>
    %cst_166 = arith.constant dense<0.000000e+00> : vector<32x18xf32>
    %157 = tpu.matmul %153, %156, %cst_166 {dimension_numbers = #tpu.dot_dimension_numbers<[1], [0], [0], [1], [0, 0, 1, 1], [], []>} : vector<32x36xf32>, vector<36x18xf32>, vector<32x18xf32> -> vector<32x18xf32>
    %158 = arith.maximumf %155, %157 : vector<32x18xf32>
    %c0_167 = arith.constant 0 : index
    %c0_168 = arith.constant 0 : index
    %159 = vector.load %arg20[%c0_167, %c0_168] : memref<32x324xf32, #tpu.memory_space<vmem>>, vector<32x18xf32>
    tpu.vector_store %arg20[%c0_167, %c0_168], %158 {strides = array<i32>} : memref<32x324xf32, #tpu.memory_space<vmem>>, vector<32x18xf32>,
    %c0_169 = arith.constant 0 : index
    %c80_170 = arith.constant 80 : index
    %160 = vector.load %arg19[%c0_169, %c80_170] : memref<32x1440xf32, #tpu.memory_space<vmem>>, vector<32x36xf32>
    %c0_171 = arith.constant 0 : index
    %c120 = arith.constant 120 : index
    %161 = vector.load %arg19[%c0_171, %c120] : memref<32x1440xf32, #tpu.memory_space<vmem>>, vector<32x36xf32>
    %162 = arith.maximumf %160, %161 : vector<32x36xf32>
    %c0_172 = arith.constant 0 : index
    %c0_173 = arith.constant 0 : index
    %163 = vector.load %arg10[%c0_172, %c0_173] : memref<36x18xf32, #tpu.memory_space<vmem>>, vector<36x18xf32>
    %cst_174 = arith.constant dense<0.000000e+00> : vector<32x18xf32>
    %164 = tpu.matmul %162, %163, %cst_174 {dimension_numbers = #tpu.dot_dimension_numbers<[1], [0], [0], [1], [0, 0, 1, 1], [], []>} : vector<32x36xf32>, vector<36x18xf32>, vector<32x18xf32> -> vector<32x18xf32>
    %c0_175 = arith.constant 0 : index
    %c0_176 = arith.constant 0 : index
    %165 = vector.load %arg11[%c0_175, %c0_176] : memref<36x18xf32, #tpu.memory_space<vmem>>, vector<36x18xf32>
    %cst_177 = arith.constant dense<0.000000e+00> : vector<32x18xf32>
    %166 = tpu.matmul %162, %165, %cst_177 {dimension_numbers = #tpu.dot_dimension_numbers<[1], [0], [0], [1], [0, 0, 1, 1], [], []>} : vector<32x36xf32>, vector<36x18xf32>, vector<32x18xf32> -> vector<32x18xf32>
    %167 = arith.maximumf %164, %166 : vector<32x18xf32>
    %c0_178 = arith.constant 0 : index
    %c18 = arith.constant 18 : index
    %168 = vector.load %arg20[%c0_178, %c18] : memref<32x324xf32, #tpu.memory_space<vmem>>, vector<32x18xf32>
    tpu.vector_store %arg20[%c0_178, %c18], %167 {strides = array<i32>} : memref<32x324xf32, #tpu.memory_space<vmem>>, vector<32x18xf32>,
    %c0_179 = arith.constant 0 : index
    %c160 = arith.constant 160 : index
    %169 = vector.load %arg19[%c0_179, %c160] : memref<32x1440xf32, #tpu.memory_space<vmem>>, vector<32x36xf32>
    %c0_180 = arith.constant 0 : index
    %c200 = arith.constant 200 : index
    %170 = vector.load %arg19[%c0_180, %c200] : memref<32x1440xf32, #tpu.memory_space<vmem>>, vector<32x36xf32>
    %171 = arith.maximumf %169, %170 : vector<32x36xf32>
    %c0_181 = arith.constant 0 : index
    %c0_182 = arith.constant 0 : index
    %172 = vector.load %arg10[%c0_181, %c0_182] : memref<36x18xf32, #tpu.memory_space<vmem>>, vector<36x18xf32>
    %cst_183 = arith.constant dense<0.000000e+00> : vector<32x18xf32>
    %173 = tpu.matmul %171, %172, %cst_183 {dimension_numbers = #tpu.dot_dimension_numbers<[1], [0], [0], [1], [0, 0, 1, 1], [], []>} : vector<32x36xf32>, vector<36x18xf32>, vector<32x18xf32> -> vector<32x18xf32>
    %c0_184 = arith.constant 0 : index
    %c0_185 = arith.constant 0 : index
    %174 = vector.load %arg11[%c0_184, %c0_185] : memref<36x18xf32, #tpu.memory_space<vmem>>, vector<36x18xf32>
    %cst_186 = arith.constant dense<0.000000e+00> : vector<32x18xf32>
    %175 = tpu.matmul %171, %174, %cst_186 {dimension_numbers = #tpu.dot_dimension_numbers<[1], [0], [0], [1], [0, 0, 1, 1], [], []>} : vector<32x36xf32>, vector<36x18xf32>, vector<32x18xf32> -> vector<32x18xf32>
    %176 = arith.maximumf %173, %175 : vector<32x18xf32>
    %c0_187 = arith.constant 0 : index
    %c36 = arith.constant 36 : index
    %177 = vector.load %arg20[%c0_187, %c36] : memref<32x324xf32, #tpu.memory_space<vmem>>, vector<32x18xf32>
    tpu.vector_store %arg20[%c0_187, %c36], %176 {strides = array<i32>} : memref<32x324xf32, #tpu.memory_space<vmem>>, vector<32x18xf32>,
    %c0_188 = arith.constant 0 : index
    %c240 = arith.constant 240 : index
    %178 = vector.load %arg19[%c0_188, %c240] : memref<32x1440xf32, #tpu.memory_space<vmem>>, vector<32x36xf32>
    %c0_189 = arith.constant 0 : index
    %c280 = arith.constant 280 : index
    %179 = vector.load %arg19[%c0_189, %c280] : memref<32x1440xf32, #tpu.memory_space<vmem>>, vector<32x36xf32>
    %180 = arith.maximumf %178, %179 : vector<32x36xf32>
    %c0_190 = arith.constant 0 : index
    %c0_191 = arith.constant 0 : index
    %181 = vector.load %arg10[%c0_190, %c0_191] : memref<36x18xf32, #tpu.memory_space<vmem>>, vector<36x18xf32>
    %cst_192 = arith.constant dense<0.000000e+00> : vector<32x18xf32>
    %182 = tpu.matmul %180, %181, %cst_192 {dimension_numbers = #tpu.dot_dimension_numbers<[1], [0], [0], [1], [0, 0, 1, 1], [], []>} : vector<32x36xf32>, vector<36x18xf32>, vector<32x18xf32> -> vector<32x18xf32>
    %c0_193 = arith.constant 0 : index
    %c0_194 = arith.constant 0 : index
    %183 = vector.load %arg11[%c0_193, %c0_194] : memref<36x18xf32, #tpu.memory_space<vmem>>, vector<36x18xf32>
    %cst_195 = arith.constant dense<0.000000e+00> : vector<32x18xf32>
    %184 = tpu.matmul %180, %183, %cst_195 {dimension_numbers = #tpu.dot_dimension_numbers<[1], [0], [0], [1], [0, 0, 1, 1], [], []>} : vector<32x36xf32>, vector<36x18xf32>, vector<32x18xf32> -> vector<32x18xf32>
    %185 = arith.maximumf %182, %184 : vector<32x18xf32>
    %c0_196 = arith.constant 0 : index
    %c54 = arith.constant 54 : index
    %186 = vector.load %arg20[%c0_196, %c54] : memref<32x324xf32, #tpu.memory_space<vmem>>, vector<32x18xf32>
    tpu.vector_store %arg20[%c0_196, %c54], %185 {strides = array<i32>} : memref<32x324xf32, #tpu.memory_space<vmem>>, vector<32x18xf32>,
    %c0_197 = arith.constant 0 : index
    %c320 = arith.constant 320 : index
    %187 = vector.load %arg19[%c0_197, %c320] : memref<32x1440xf32, #tpu.memory_space<vmem>>, vector<32x36xf32>
    %c0_198 = arith.constant 0 : index
    %c360 = arith.constant 360 : index
    %188 = vector.load %arg19[%c0_198, %c360] : memref<32x1440xf32, #tpu.memory_space<vmem>>, vector<32x36xf32>
    %189 = arith.maximumf %187, %188 : vector<32x36xf32>
    %c0_199 = arith.constant 0 : index
    %c0_200 = arith.constant 0 : index
    %190 = vector.load %arg10[%c0_199, %c0_200] : memref<36x18xf32, #tpu.memory_space<vmem>>, vector<36x18xf32>
    %cst_201 = arith.constant dense<0.000000e+00> : vector<32x18xf32>
    %191 = tpu.matmul %189, %190, %cst_201 {dimension_numbers = #tpu.dot_dimension_numbers<[1], [0], [0], [1], [0, 0, 1, 1], [], []>} : vector<32x36xf32>, vector<36x18xf32>, vector<32x18xf32> -> vector<32x18xf32>
    %c0_202 = arith.constant 0 : index
    %c0_203 = arith.constant 0 : index
    %192 = vector.load %arg11[%c0_202, %c0_203] : memref<36x18xf32, #tpu.memory_space<vmem>>, vector<36x18xf32>
    %cst_204 = arith.constant dense<0.000000e+00> : vector<32x18xf32>
    %193 = tpu.matmul %189, %192, %cst_204 {dimension_numbers = #tpu.dot_dimension_numbers<[1], [0], [0], [1], [0, 0, 1, 1], [], []>} : vector<32x36xf32>, vector<36x18xf32>, vector<32x18xf32> -> vector<32x18xf32>
    %194 = arith.maximumf %191, %193 : vector<32x18xf32>
    %c0_205 = arith.constant 0 : index
    %c72 = arith.constant 72 : index
    %195 = vector.load %arg20[%c0_205, %c72] : memref<32x324xf32, #tpu.memory_space<vmem>>, vector<32x18xf32>
    tpu.vector_store %arg20[%c0_205, %c72], %194 {strides = array<i32>} : memref<32x324xf32, #tpu.memory_space<vmem>>, vector<32x18xf32>,
    %c0_206 = arith.constant 0 : index
    %c400 = arith.constant 400 : index
    %196 = vector.load %arg19[%c0_206, %c400] : memref<32x1440xf32, #tpu.memory_space<vmem>>, vector<32x36xf32>
    %c0_207 = arith.constant 0 : index
    %c440 = arith.constant 440 : index
    %197 = vector.load %arg19[%c0_207, %c440] : memref<32x1440xf32, #tpu.memory_space<vmem>>, vector<32x36xf32>
    %198 = arith.maximumf %196, %197 : vector<32x36xf32>
    %c0_208 = arith.constant 0 : index
    %c0_209 = arith.constant 0 : index
    %199 = vector.load %arg10[%c0_208, %c0_209] : memref<36x18xf32, #tpu.memory_space<vmem>>, vector<36x18xf32>
    %cst_210 = arith.constant dense<0.000000e+00> : vector<32x18xf32>
    %200 = tpu.matmul %198, %199, %cst_210 {dimension_numbers = #tpu.dot_dimension_numbers<[1], [0], [0], [1], [0, 0, 1, 1], [], []>} : vector<32x36xf32>, vector<36x18xf32>, vector<32x18xf32> -> vector<32x18xf32>
    %c0_211 = arith.constant 0 : index
    %c0_212 = arith.constant 0 : index
    %201 = vector.load %arg11[%c0_211, %c0_212] : memref<36x18xf32, #tpu.memory_space<vmem>>, vector<36x18xf32>
    %cst_213 = arith.constant dense<0.000000e+00> : vector<32x18xf32>
    %202 = tpu.matmul %198, %201, %cst_213 {dimension_numbers = #tpu.dot_dimension_numbers<[1], [0], [0], [1], [0, 0, 1, 1], [], []>} : vector<32x36xf32>, vector<36x18xf32>, vector<32x18xf32> -> vector<32x18xf32>
    %203 = arith.maximumf %200, %202 : vector<32x18xf32>
    %c0_214 = arith.constant 0 : index
    %c90 = arith.constant 90 : index
    %204 = vector.load %arg20[%c0_214, %c90] : memref<32x324xf32, #tpu.memory_space<vmem>>, vector<32x18xf32>
    tpu.vector_store %arg20[%c0_214, %c90], %203 {strides = array<i32>} : memref<32x324xf32, #tpu.memory_space<vmem>>, vector<32x18xf32>,
    %c0_215 = arith.constant 0 : index
    %c480 = arith.constant 480 : index
    %205 = vector.load %arg19[%c0_215, %c480] : memref<32x1440xf32, #tpu.memory_space<vmem>>, vector<32x36xf32>
    %c0_216 = arith.constant 0 : index
    %c520 = arith.constant 520 : index
    %206 = vector.load %arg19[%c0_216, %c520] : memref<32x1440xf32, #tpu.memory_space<vmem>>, vector<32x36xf32>
    %207 = arith.maximumf %205, %206 : vector<32x36xf32>
    %c0_217 = arith.constant 0 : index
    %c0_218 = arith.constant 0 : index
    %208 = vector.load %arg10[%c0_217, %c0_218] : memref<36x18xf32, #tpu.memory_space<vmem>>, vector<36x18xf32>
    %cst_219 = arith.constant dense<0.000000e+00> : vector<32x18xf32>
    %209 = tpu.matmul %207, %208, %cst_219 {dimension_numbers = #tpu.dot_dimension_numbers<[1], [0], [0], [1], [0, 0, 1, 1], [], []>} : vector<32x36xf32>, vector<36x18xf32>, vector<32x18xf32> -> vector<32x18xf32>
    %c0_220 = arith.constant 0 : index
    %c0_221 = arith.constant 0 : index
    %210 = vector.load %arg11[%c0_220, %c0_221] : memref<36x18xf32, #tpu.memory_space<vmem>>, vector<36x18xf32>
    %cst_222 = arith.constant dense<0.000000e+00> : vector<32x18xf32>
    %211 = tpu.matmul %207, %210, %cst_222 {dimension_numbers = #tpu.dot_dimension_numbers<[1], [0], [0], [1], [0, 0, 1, 1], [], []>} : vector<32x36xf32>, vector<36x18xf32>, vector<32x18xf32> -> vector<32x18xf32>
    %212 = arith.maximumf %209, %211 : vector<32x18xf32>
    %c0_223 = arith.constant 0 : index
    %c108 = arith.constant 108 : index
    %213 = vector.load %arg20[%c0_223, %c108] : memref<32x324xf32, #tpu.memory_space<vmem>>, vector<32x18xf32>
    tpu.vector_store %arg20[%c0_223, %c108], %212 {strides = array<i32>} : memref<32x324xf32, #tpu.memory_space<vmem>>, vector<32x18xf32>,
    %c0_224 = arith.constant 0 : index
    %c560 = arith.constant 560 : index
    %214 = vector.load %arg19[%c0_224, %c560] : memref<32x1440xf32, #tpu.memory_space<vmem>>, vector<32x36xf32>
    %c0_225 = arith.constant 0 : index
    %c600 = arith.constant 600 : index
    %215 = vector.load %arg19[%c0_225, %c600] : memref<32x1440xf32, #tpu.memory_space<vmem>>, vector<32x36xf32>
    %216 = arith.maximumf %214, %215 : vector<32x36xf32>
    %c0_226 = arith.constant 0 : index
    %c0_227 = arith.constant 0 : index
    %217 = vector.load %arg10[%c0_226, %c0_227] : memref<36x18xf32, #tpu.memory_space<vmem>>, vector<36x18xf32>
    %cst_228 = arith.constant dense<0.000000e+00> : vector<32x18xf32>
    %218 = tpu.matmul %216, %217, %cst_228 {dimension_numbers = #tpu.dot_dimension_numbers<[1], [0], [0], [1], [0, 0, 1, 1], [], []>} : vector<32x36xf32>, vector<36x18xf32>, vector<32x18xf32> -> vector<32x18xf32>
    %c0_229 = arith.constant 0 : index
    %c0_230 = arith.constant 0 : index
    %219 = vector.load %arg11[%c0_229, %c0_230] : memref<36x18xf32, #tpu.memory_space<vmem>>, vector<36x18xf32>
    %cst_231 = arith.constant dense<0.000000e+00> : vector<32x18xf32>
    %220 = tpu.matmul %216, %219, %cst_231 {dimension_numbers = #tpu.dot_dimension_numbers<[1], [0], [0], [1], [0, 0, 1, 1], [], []>} : vector<32x36xf32>, vector<36x18xf32>, vector<32x18xf32> -> vector<32x18xf32>
    %221 = arith.maximumf %218, %220 : vector<32x18xf32>
    %c0_232 = arith.constant 0 : index
    %c126 = arith.constant 126 : index
    %222 = vector.load %arg20[%c0_232, %c126] : memref<32x324xf32, #tpu.memory_space<vmem>>, vector<32x18xf32>
    tpu.vector_store %arg20[%c0_232, %c126], %221 {strides = array<i32>} : memref<32x324xf32, #tpu.memory_space<vmem>>, vector<32x18xf32>,
    %c0_233 = arith.constant 0 : index
    %c640 = arith.constant 640 : index
    %223 = vector.load %arg19[%c0_233, %c640] : memref<32x1440xf32, #tpu.memory_space<vmem>>, vector<32x36xf32>
    %c0_234 = arith.constant 0 : index
    %c680 = arith.constant 680 : index
    %224 = vector.load %arg19[%c0_234, %c680] : memref<32x1440xf32, #tpu.memory_space<vmem>>, vector<32x36xf32>
    %225 = arith.maximumf %223, %224 : vector<32x36xf32>
    %c0_235 = arith.constant 0 : index
    %c0_236 = arith.constant 0 : index
    %226 = vector.load %arg10[%c0_235, %c0_236] : memref<36x18xf32, #tpu.memory_space<vmem>>, vector<36x18xf32>
    %cst_237 = arith.constant dense<0.000000e+00> : vector<32x18xf32>
    %227 = tpu.matmul %225, %226, %cst_237 {dimension_numbers = #tpu.dot_dimension_numbers<[1], [0], [0], [1], [0, 0, 1, 1], [], []>} : vector<32x36xf32>, vector<36x18xf32>, vector<32x18xf32> -> vector<32x18xf32>
    %c0_238 = arith.constant 0 : index
    %c0_239 = arith.constant 0 : index
    %228 = vector.load %arg11[%c0_238, %c0_239] : memref<36x18xf32, #tpu.memory_space<vmem>>, vector<36x18xf32>
    %cst_240 = arith.constant dense<0.000000e+00> : vector<32x18xf32>
    %229 = tpu.matmul %225, %228, %cst_240 {dimension_numbers = #tpu.dot_dimension_numbers<[1], [0], [0], [1], [0, 0, 1, 1], [], []>} : vector<32x36xf32>, vector<36x18xf32>, vector<32x18xf32> -> vector<32x18xf32>
    %230 = arith.maximumf %227, %229 : vector<32x18xf32>
    %c0_241 = arith.constant 0 : index
    %c144 = arith.constant 144 : index
    %231 = vector.load %arg20[%c0_241, %c144] : memref<32x324xf32, #tpu.memory_space<vmem>>, vector<32x18xf32>
    tpu.vector_store %arg20[%c0_241, %c144], %230 {strides = array<i32>} : memref<32x324xf32, #tpu.memory_space<vmem>>, vector<32x18xf32>,
    %c0_242 = arith.constant 0 : index
    %c720 = arith.constant 720 : index
    %232 = vector.load %arg19[%c0_242, %c720] : memref<32x1440xf32, #tpu.memory_space<vmem>>, vector<32x36xf32>
    %c0_243 = arith.constant 0 : index
    %c760 = arith.constant 760 : index
    %233 = vector.load %arg19[%c0_243, %c760] : memref<32x1440xf32, #tpu.memory_space<vmem>>, vector<32x36xf32>
    %234 = arith.maximumf %232, %233 : vector<32x36xf32>
    %c0_244 = arith.constant 0 : index
    %c0_245 = arith.constant 0 : index
    %235 = vector.load %arg10[%c0_244, %c0_245] : memref<36x18xf32, #tpu.memory_space<vmem>>, vector<36x18xf32>
    %cst_246 = arith.constant dense<0.000000e+00> : vector<32x18xf32>
    %236 = tpu.matmul %234, %235, %cst_246 {dimension_numbers = #tpu.dot_dimension_numbers<[1], [0], [0], [1], [0, 0, 1, 1], [], []>} : vector<32x36xf32>, vector<36x18xf32>, vector<32x18xf32> -> vector<32x18xf32>
    %c0_247 = arith.constant 0 : index
    %c0_248 = arith.constant 0 : index
    %237 = vector.load %arg11[%c0_247, %c0_248] : memref<36x18xf32, #tpu.memory_space<vmem>>, vector<36x18xf32>
    %cst_249 = arith.constant dense<0.000000e+00> : vector<32x18xf32>
    %238 = tpu.matmul %234, %237, %cst_249 {dimension_numbers = #tpu.dot_dimension_numbers<[1], [0], [0], [1], [0, 0, 1, 1], [], []>} : vector<32x36xf32>, vector<36x18xf32>, vector<32x18xf32> -> vector<32x18xf32>
    %239 = arith.maximumf %236, %238 : vector<32x18xf32>
    %c0_250 = arith.constant 0 : index
    %c162 = arith.constant 162 : index
    %240 = vector.load %arg20[%c0_250, %c162] : memref<32x324xf32, #tpu.memory_space<vmem>>, vector<32x18xf32>
    tpu.vector_store %arg20[%c0_250, %c162], %239 {strides = array<i32>} : memref<32x324xf32, #tpu.memory_space<vmem>>, vector<32x18xf32>,
    %c0_251 = arith.constant 0 : index
    %c800 = arith.constant 800 : index
    %241 = vector.load %arg19[%c0_251, %c800] : memref<32x1440xf32, #tpu.memory_space<vmem>>, vector<32x36xf32>
    %c0_252 = arith.constant 0 : index
    %c840 = arith.constant 840 : index
    %242 = vector.load %arg19[%c0_252, %c840] : memref<32x1440xf32, #tpu.memory_space<vmem>>, vector<32x36xf32>
    %243 = arith.maximumf %241, %242 : vector<32x36xf32>
    %c0_253 = arith.constant 0 : index
    %c0_254 = arith.constant 0 : index
    %244 = vector.load %arg10[%c0_253, %c0_254] : memref<36x18xf32, #tpu.memory_space<vmem>>, vector<36x18xf32>
    %cst_255 = arith.constant dense<0.000000e+00> : vector<32x18xf32>
    %245 = tpu.matmul %243, %244, %cst_255 {dimension_numbers = #tpu.dot_dimension_numbers<[1], [0], [0], [1], [0, 0, 1, 1], [], []>} : vector<32x36xf32>, vector<36x18xf32>, vector<32x18xf32> -> vector<32x18xf32>
    %c0_256 = arith.constant 0 : index
    %c0_257 = arith.constant 0 : index
    %246 = vector.load %arg11[%c0_256, %c0_257] : memref<36x18xf32, #tpu.memory_space<vmem>>, vector<36x18xf32>
    %cst_258 = arith.constant dense<0.000000e+00> : vector<32x18xf32>
    %247 = tpu.matmul %243, %246, %cst_258 {dimension_numbers = #tpu.dot_dimension_numbers<[1], [0], [0], [1], [0, 0, 1, 1], [], []>} : vector<32x36xf32>, vector<36x18xf32>, vector<32x18xf32> -> vector<32x18xf32>
    %248 = arith.maximumf %245, %247 : vector<32x18xf32>
    %c0_259 = arith.constant 0 : index
    %c180 = arith.constant 180 : index
    %249 = vector.load %arg20[%c0_259, %c180] : memref<32x324xf32, #tpu.memory_space<vmem>>, vector<32x18xf32>
    tpu.vector_store %arg20[%c0_259, %c180], %248 {strides = array<i32>} : memref<32x324xf32, #tpu.memory_space<vmem>>, vector<32x18xf32>,
    %c0_260 = arith.constant 0 : index
    %c880 = arith.constant 880 : index
    %250 = vector.load %arg19[%c0_260, %c880] : memref<32x1440xf32, #tpu.memory_space<vmem>>, vector<32x36xf32>
    %c0_261 = arith.constant 0 : index
    %c920 = arith.constant 920 : index
    %251 = vector.load %arg19[%c0_261, %c920] : memref<32x1440xf32, #tpu.memory_space<vmem>>, vector<32x36xf32>
    %252 = arith.maximumf %250, %251 : vector<32x36xf32>
    %c0_262 = arith.constant 0 : index
    %c0_263 = arith.constant 0 : index
    %253 = vector.load %arg10[%c0_262, %c0_263] : memref<36x18xf32, #tpu.memory_space<vmem>>, vector<36x18xf32>
    %cst_264 = arith.constant dense<0.000000e+00> : vector<32x18xf32>
    %254 = tpu.matmul %252, %253, %cst_264 {dimension_numbers = #tpu.dot_dimension_numbers<[1], [0], [0], [1], [0, 0, 1, 1], [], []>} : vector<32x36xf32>, vector<36x18xf32>, vector<32x18xf32> -> vector<32x18xf32>
    %c0_265 = arith.constant 0 : index
    %c0_266 = arith.constant 0 : index
    %255 = vector.load %arg11[%c0_265, %c0_266] : memref<36x18xf32, #tpu.memory_space<vmem>>, vector<36x18xf32>
    %cst_267 = arith.constant dense<0.000000e+00> : vector<32x18xf32>
    %256 = tpu.matmul %252, %255, %cst_267 {dimension_numbers = #tpu.dot_dimension_numbers<[1], [0], [0], [1], [0, 0, 1, 1], [], []>} : vector<32x36xf32>, vector<36x18xf32>, vector<32x18xf32> -> vector<32x18xf32>
    %257 = arith.maximumf %254, %256 : vector<32x18xf32>
    %c0_268 = arith.constant 0 : index
    %c198 = arith.constant 198 : index
    %258 = vector.load %arg20[%c0_268, %c198] : memref<32x324xf32, #tpu.memory_space<vmem>>, vector<32x18xf32>
    tpu.vector_store %arg20[%c0_268, %c198], %257 {strides = array<i32>} : memref<32x324xf32, #tpu.memory_space<vmem>>, vector<32x18xf32>,
    %c0_269 = arith.constant 0 : index
    %c960 = arith.constant 960 : index
    %259 = vector.load %arg19[%c0_269, %c960] : memref<32x1440xf32, #tpu.memory_space<vmem>>, vector<32x36xf32>
    %c0_270 = arith.constant 0 : index
    %c1000 = arith.constant 1000 : index
    %260 = vector.load %arg19[%c0_270, %c1000] : memref<32x1440xf32, #tpu.memory_space<vmem>>, vector<32x36xf32>
    %261 = arith.maximumf %259, %260 : vector<32x36xf32>
    %c0_271 = arith.constant 0 : index
    %c0_272 = arith.constant 0 : index
    %262 = vector.load %arg10[%c0_271, %c0_272] : memref<36x18xf32, #tpu.memory_space<vmem>>, vector<36x18xf32>
    %cst_273 = arith.constant dense<0.000000e+00> : vector<32x18xf32>
    %263 = tpu.matmul %261, %262, %cst_273 {dimension_numbers = #tpu.dot_dimension_numbers<[1], [0], [0], [1], [0, 0, 1, 1], [], []>} : vector<32x36xf32>, vector<36x18xf32>, vector<32x18xf32> -> vector<32x18xf32>
    %c0_274 = arith.constant 0 : index
    %c0_275 = arith.constant 0 : index
    %264 = vector.load %arg11[%c0_274, %c0_275] : memref<36x18xf32, #tpu.memory_space<vmem>>, vector<36x18xf32>
    %cst_276 = arith.constant dense<0.000000e+00> : vector<32x18xf32>
    %265 = tpu.matmul %261, %264, %cst_276 {dimension_numbers = #tpu.dot_dimension_numbers<[1], [0], [0], [1], [0, 0, 1, 1], [], []>} : vector<32x36xf32>, vector<36x18xf32>, vector<32x18xf32> -> vector<32x18xf32>
    %266 = arith.maximumf %263, %265 : vector<32x18xf32>
    %c0_277 = arith.constant 0 : index
    %c216 = arith.constant 216 : index
    %267 = vector.load %arg20[%c0_277, %c216] : memref<32x324xf32, #tpu.memory_space<vmem>>, vector<32x18xf32>
    tpu.vector_store %arg20[%c0_277, %c216], %266 {strides = array<i32>} : memref<32x324xf32, #tpu.memory_space<vmem>>, vector<32x18xf32>,
    %c0_278 = arith.constant 0 : index
    %c1040 = arith.constant 1040 : index
    %268 = vector.load %arg19[%c0_278, %c1040] : memref<32x1440xf32, #tpu.memory_space<vmem>>, vector<32x36xf32>
    %c0_279 = arith.constant 0 : index
    %c1080 = arith.constant 1080 : index
    %269 = vector.load %arg19[%c0_279, %c1080] : memref<32x1440xf32, #tpu.memory_space<vmem>>, vector<32x36xf32>
    %270 = arith.maximumf %268, %269 : vector<32x36xf32>
    %c0_280 = arith.constant 0 : index
    %c0_281 = arith.constant 0 : index
    %271 = vector.load %arg10[%c0_280, %c0_281] : memref<36x18xf32, #tpu.memory_space<vmem>>, vector<36x18xf32>
    %cst_282 = arith.constant dense<0.000000e+00> : vector<32x18xf32>
    %272 = tpu.matmul %270, %271, %cst_282 {dimension_numbers = #tpu.dot_dimension_numbers<[1], [0], [0], [1], [0, 0, 1, 1], [], []>} : vector<32x36xf32>, vector<36x18xf32>, vector<32x18xf32> -> vector<32x18xf32>
    %c0_283 = arith.constant 0 : index
    %c0_284 = arith.constant 0 : index
    %273 = vector.load %arg11[%c0_283, %c0_284] : memref<36x18xf32, #tpu.memory_space<vmem>>, vector<36x18xf32>
    %cst_285 = arith.constant dense<0.000000e+00> : vector<32x18xf32>
    %274 = tpu.matmul %270, %273, %cst_285 {dimension_numbers = #tpu.dot_dimension_numbers<[1], [0], [0], [1], [0, 0, 1, 1], [], []>} : vector<32x36xf32>, vector<36x18xf32>, vector<32x18xf32> -> vector<32x18xf32>
    %275 = arith.maximumf %272, %274 : vector<32x18xf32>
    %c0_286 = arith.constant 0 : index
    %c234 = arith.constant 234 : index
    %276 = vector.load %arg20[%c0_286, %c234] : memref<32x324xf32, #tpu.memory_space<vmem>>, vector<32x18xf32>
    tpu.vector_store %arg20[%c0_286, %c234], %275 {strides = array<i32>} : memref<32x324xf32, #tpu.memory_space<vmem>>, vector<32x18xf32>,
    %c0_287 = arith.constant 0 : index
    %c1120 = arith.constant 1120 : index
    %277 = vector.load %arg19[%c0_287, %c1120] : memref<32x1440xf32, #tpu.memory_space<vmem>>, vector<32x36xf32>
    %c0_288 = arith.constant 0 : index
    %c1160 = arith.constant 1160 : index
    %278 = vector.load %arg19[%c0_288, %c1160] : memref<32x1440xf32, #tpu.memory_space<vmem>>, vector<32x36xf32>
    %279 = arith.maximumf %277, %278 : vector<32x36xf32>
    %c0_289 = arith.constant 0 : index
    %c0_290 = arith.constant 0 : index
    %280 = vector.load %arg10[%c0_289, %c0_290] : memref<36x18xf32, #tpu.memory_space<vmem>>, vector<36x18xf32>
    %cst_291 = arith.constant dense<0.000000e+00> : vector<32x18xf32>
    %281 = tpu.matmul %279, %280, %cst_291 {dimension_numbers = #tpu.dot_dimension_numbers<[1], [0], [0], [1], [0, 0, 1, 1], [], []>} : vector<32x36xf32>, vector<36x18xf32>, vector<32x18xf32> -> vector<32x18xf32>
    %c0_292 = arith.constant 0 : index
    %c0_293 = arith.constant 0 : index
    %282 = vector.load %arg11[%c0_292, %c0_293] : memref<36x18xf32, #tpu.memory_space<vmem>>, vector<36x18xf32>
    %cst_294 = arith.constant dense<0.000000e+00> : vector<32x18xf32>
    %283 = tpu.matmul %279, %282, %cst_294 {dimension_numbers = #tpu.dot_dimension_numbers<[1], [0], [0], [1], [0, 0, 1, 1], [], []>} : vector<32x36xf32>, vector<36x18xf32>, vector<32x18xf32> -> vector<32x18xf32>
    %284 = arith.maximumf %281, %283 : vector<32x18xf32>
    %c0_295 = arith.constant 0 : index
    %c252 = arith.constant 252 : index
    %285 = vector.load %arg20[%c0_295, %c252] : memref<32x324xf32, #tpu.memory_space<vmem>>, vector<32x18xf32>
    tpu.vector_store %arg20[%c0_295, %c252], %284 {strides = array<i32>} : memref<32x324xf32, #tpu.memory_space<vmem>>, vector<32x18xf32>,
    %c0_296 = arith.constant 0 : index
    %c1200 = arith.constant 1200 : index
    %286 = vector.load %arg19[%c0_296, %c1200] : memref<32x1440xf32, #tpu.memory_space<vmem>>, vector<32x36xf32>
    %c0_297 = arith.constant 0 : index
    %c1240 = arith.constant 1240 : index
    %287 = vector.load %arg19[%c0_297, %c1240] : memref<32x1440xf32, #tpu.memory_space<vmem>>, vector<32x36xf32>
    %288 = arith.maximumf %286, %287 : vector<32x36xf32>
    %c0_298 = arith.constant 0 : index
    %c0_299 = arith.constant 0 : index
    %289 = vector.load %arg10[%c0_298, %c0_299] : memref<36x18xf32, #tpu.memory_space<vmem>>, vector<36x18xf32>
    %cst_300 = arith.constant dense<0.000000e+00> : vector<32x18xf32>
    %290 = tpu.matmul %288, %289, %cst_300 {dimension_numbers = #tpu.dot_dimension_numbers<[1], [0], [0], [1], [0, 0, 1, 1], [], []>} : vector<32x36xf32>, vector<36x18xf32>, vector<32x18xf32> -> vector<32x18xf32>
    %c0_301 = arith.constant 0 : index
    %c0_302 = arith.constant 0 : index
    %291 = vector.load %arg11[%c0_301, %c0_302] : memref<36x18xf32, #tpu.memory_space<vmem>>, vector<36x18xf32>
    %cst_303 = arith.constant dense<0.000000e+00> : vector<32x18xf32>
    %292 = tpu.matmul %288, %291, %cst_303 {dimension_numbers = #tpu.dot_dimension_numbers<[1], [0], [0], [1], [0, 0, 1, 1], [], []>} : vector<32x36xf32>, vector<36x18xf32>, vector<32x18xf32> -> vector<32x18xf32>
    %293 = arith.maximumf %290, %292 : vector<32x18xf32>
    %c0_304 = arith.constant 0 : index
    %c270 = arith.constant 270 : index
    %294 = vector.load %arg20[%c0_304, %c270] : memref<32x324xf32, #tpu.memory_space<vmem>>, vector<32x18xf32>
    tpu.vector_store %arg20[%c0_304, %c270], %293 {strides = array<i32>} : memref<32x324xf32, #tpu.memory_space<vmem>>, vector<32x18xf32>,
    %c0_305 = arith.constant 0 : index
    %c1280 = arith.constant 1280 : index
    %295 = vector.load %arg19[%c0_305, %c1280] : memref<32x1440xf32, #tpu.memory_space<vmem>>, vector<32x36xf32>
    %c0_306 = arith.constant 0 : index
    %c1320 = arith.constant 1320 : index
    %296 = vector.load %arg19[%c0_306, %c1320] : memref<32x1440xf32, #tpu.memory_space<vmem>>, vector<32x36xf32>
    %297 = arith.maximumf %295, %296 : vector<32x36xf32>
    %c0_307 = arith.constant 0 : index
    %c0_308 = arith.constant 0 : index
    %298 = vector.load %arg10[%c0_307, %c0_308] : memref<36x18xf32, #tpu.memory_space<vmem>>, vector<36x18xf32>
    %cst_309 = arith.constant dense<0.000000e+00> : vector<32x18xf32>
    %299 = tpu.matmul %297, %298, %cst_309 {dimension_numbers = #tpu.dot_dimension_numbers<[1], [0], [0], [1], [0, 0, 1, 1], [], []>} : vector<32x36xf32>, vector<36x18xf32>, vector<32x18xf32> -> vector<32x18xf32>
    %c0_310 = arith.constant 0 : index
    %c0_311 = arith.constant 0 : index
    %300 = vector.load %arg11[%c0_310, %c0_311] : memref<36x18xf32, #tpu.memory_space<vmem>>, vector<36x18xf32>
    %cst_312 = arith.constant dense<0.000000e+00> : vector<32x18xf32>
    %301 = tpu.matmul %297, %300, %cst_312 {dimension_numbers = #tpu.dot_dimension_numbers<[1], [0], [0], [1], [0, 0, 1, 1], [], []>} : vector<32x36xf32>, vector<36x18xf32>, vector<32x18xf32> -> vector<32x18xf32>
    %302 = arith.maximumf %299, %301 : vector<32x18xf32>
    %c0_313 = arith.constant 0 : index
    %c288 = arith.constant 288 : index
    %303 = vector.load %arg20[%c0_313, %c288] : memref<32x324xf32, #tpu.memory_space<vmem>>, vector<32x18xf32>
    tpu.vector_store %arg20[%c0_313, %c288], %302 {strides = array<i32>} : memref<32x324xf32, #tpu.memory_space<vmem>>, vector<32x18xf32>,
    %c0_314 = arith.constant 0 : index
    %c1360 = arith.constant 1360 : index
    %304 = vector.load %arg19[%c0_314, %c1360] : memref<32x1440xf32, #tpu.memory_space<vmem>>, vector<32x36xf32>
    %c0_315 = arith.constant 0 : index
    %c1400 = arith.constant 1400 : index
    %305 = vector.load %arg19[%c0_315, %c1400] : memref<32x1440xf32, #tpu.memory_space<vmem>>, vector<32x36xf32>
    %306 = arith.maximumf %304, %305 : vector<32x36xf32>
    %c0_316 = arith.constant 0 : index
    %c0_317 = arith.constant 0 : index
    %307 = vector.load %arg10[%c0_316, %c0_317] : memref<36x18xf32, #tpu.memory_space<vmem>>, vector<36x18xf32>
    %cst_318 = arith.constant dense<0.000000e+00> : vector<32x18xf32>
    %308 = tpu.matmul %306, %307, %cst_318 {dimension_numbers = #tpu.dot_dimension_numbers<[1], [0], [0], [1], [0, 0, 1, 1], [], []>} : vector<32x36xf32>, vector<36x18xf32>, vector<32x18xf32> -> vector<32x18xf32>
    %c0_319 = arith.constant 0 : index
    %c0_320 = arith.constant 0 : index
    %309 = vector.load %arg11[%c0_319, %c0_320] : memref<36x18xf32, #tpu.memory_space<vmem>>, vector<36x18xf32>
    %cst_321 = arith.constant dense<0.000000e+00> : vector<32x18xf32>
    %310 = tpu.matmul %306, %309, %cst_321 {dimension_numbers = #tpu.dot_dimension_numbers<[1], [0], [0], [1], [0, 0, 1, 1], [], []>} : vector<32x36xf32>, vector<36x18xf32>, vector<32x18xf32> -> vector<32x18xf32>
    %311 = arith.maximumf %308, %310 : vector<32x18xf32>
    %c0_322 = arith.constant 0 : index
    %c306 = arith.constant 306 : index
    %312 = vector.load %arg20[%c0_322, %c306] : memref<32x324xf32, #tpu.memory_space<vmem>>, vector<32x18xf32>
    tpu.vector_store %arg20[%c0_322, %c306], %311 {strides = array<i32>} : memref<32x324xf32, #tpu.memory_space<vmem>>, vector<32x18xf32>,
    %c0_323 = arith.constant 0 : index
    %c0_324 = arith.constant 0 : index
    %313 = vector.load %arg20[%c0_323, %c0_324] : memref<32x324xf32, #tpu.memory_space<vmem>>, vector<32x324xf32>
    %c0_325 = arith.constant 0 : index
    %c0_326 = arith.constant 0 : index
    %314 = vector.load %arg9[%c0_325, %c0_326] : memref<324x9xf32, #tpu.memory_space<vmem>>, vector<324x9xf32>
    %cst_327 = arith.constant dense<0.000000e+00> : vector<32x9xf32>
    %315 = tpu.matmul %313, %314, %cst_327 {dimension_numbers = #tpu.dot_dimension_numbers<[1], [0], [0], [1], [0, 0, 1, 1], [], []>} : vector<32x324xf32>, vector<324x9xf32>, vector<32x9xf32> -> vector<32x9xf32>
    %c0_328 = arith.constant 0 : index
    %c0_329 = arith.constant 0 : index
    %316 = vector.load %arg8[%c0_328, %c0_329] : memref<32x1xf32, #tpu.memory_space<vmem>>, vector<32x1xf32>
    %c0_330 = arith.constant 0 : index
    %c0_331 = arith.constant 0 : index
    %317 = vector.load %arg7[%c0_330, %c0_331] : memref<32x288xf32, #tpu.memory_space<vmem>>, vector<32x32xf32>
    %318 = vector.extract_strided_slice %315 {offsets = [0, 0], sizes = [32, 1], strides = [1, 1]} : vector<32x9xf32> to vector<32x1xf32>
    %cst_332 = arith.constant dense<0.000000e+00> : vector<32x1xf32>
    %319 = tpu.matmul %317, %318, %cst_332 {dimension_numbers = #tpu.dot_dimension_numbers<[1], [0], [0], [1], [0, 0, 1, 1], [], []>} : vector<32x32xf32>, vector<32x1xf32>, vector<32x1xf32> -> vector<32x1xf32>
    %320 = arith.addf %316, %319 : vector<32x1xf32>
    %c0_333 = arith.constant 0 : index
    %c32_334 = arith.constant 32 : index
    %321 = vector.load %arg7[%c0_333, %c32_334] : memref<32x288xf32, #tpu.memory_space<vmem>>, vector<32x32xf32>
    %322 = vector.extract_strided_slice %315 {offsets = [0, 1], sizes = [32, 1], strides = [1, 1]} : vector<32x9xf32> to vector<32x1xf32>
    %cst_335 = arith.constant dense<0.000000e+00> : vector<32x1xf32>
    %323 = tpu.matmul %321, %322, %cst_335 {dimension_numbers = #tpu.dot_dimension_numbers<[1], [0], [0], [1], [0, 0, 1, 1], [], []>} : vector<32x32xf32>, vector<32x1xf32>, vector<32x1xf32> -> vector<32x1xf32>
    %324 = arith.addf %320, %323 : vector<32x1xf32>
    %c0_336 = arith.constant 0 : index
    %c64_337 = arith.constant 64 : index
    %325 = vector.load %arg7[%c0_336, %c64_337] : memref<32x288xf32, #tpu.memory_space<vmem>>, vector<32x32xf32>
    %326 = vector.extract_strided_slice %315 {offsets = [0, 2], sizes = [32, 1], strides = [1, 1]} : vector<32x9xf32> to vector<32x1xf32>
    %cst_338 = arith.constant dense<0.000000e+00> : vector<32x1xf32>
    %327 = tpu.matmul %325, %326, %cst_338 {dimension_numbers = #tpu.dot_dimension_numbers<[1], [0], [0], [1], [0, 0, 1, 1], [], []>} : vector<32x32xf32>, vector<32x1xf32>, vector<32x1xf32> -> vector<32x1xf32>
    %328 = arith.addf %324, %327 : vector<32x1xf32>
    %c0_339 = arith.constant 0 : index
    %c96_340 = arith.constant 96 : index
    %329 = vector.load %arg7[%c0_339, %c96_340] : memref<32x288xf32, #tpu.memory_space<vmem>>, vector<32x32xf32>
    %330 = vector.extract_strided_slice %315 {offsets = [0, 3], sizes = [32, 1], strides = [1, 1]} : vector<32x9xf32> to vector<32x1xf32>
    %cst_341 = arith.constant dense<0.000000e+00> : vector<32x1xf32>
    %331 = tpu.matmul %329, %330, %cst_341 {dimension_numbers = #tpu.dot_dimension_numbers<[1], [0], [0], [1], [0, 0, 1, 1], [], []>} : vector<32x32xf32>, vector<32x1xf32>, vector<32x1xf32> -> vector<32x1xf32>
    %332 = arith.addf %328, %331 : vector<32x1xf32>
    %c0_342 = arith.constant 0 : index
    %c128_343 = arith.constant 128 : index
    %333 = vector.load %arg7[%c0_342, %c128_343] : memref<32x288xf32, #tpu.memory_space<vmem>>, vector<32x32xf32>
    %334 = vector.extract_strided_slice %315 {offsets = [0, 4], sizes = [32, 1], strides = [1, 1]} : vector<32x9xf32> to vector<32x1xf32>
    %cst_344 = arith.constant dense<0.000000e+00> : vector<32x1xf32>
    %335 = tpu.matmul %333, %334, %cst_344 {dimension_numbers = #tpu.dot_dimension_numbers<[1], [0], [0], [1], [0, 0, 1, 1], [], []>} : vector<32x32xf32>, vector<32x1xf32>, vector<32x1xf32> -> vector<32x1xf32>
    %336 = arith.addf %332, %335 : vector<32x1xf32>
    %c0_345 = arith.constant 0 : index
    %c160_346 = arith.constant 160 : index
    %337 = vector.load %arg7[%c0_345, %c160_346] : memref<32x288xf32, #tpu.memory_space<vmem>>, vector<32x32xf32>
    %338 = vector.extract_strided_slice %315 {offsets = [0, 5], sizes = [32, 1], strides = [1, 1]} : vector<32x9xf32> to vector<32x1xf32>
    %cst_347 = arith.constant dense<0.000000e+00> : vector<32x1xf32>
    %339 = tpu.matmul %337, %338, %cst_347 {dimension_numbers = #tpu.dot_dimension_numbers<[1], [0], [0], [1], [0, 0, 1, 1], [], []>} : vector<32x32xf32>, vector<32x1xf32>, vector<32x1xf32> -> vector<32x1xf32>
    %340 = arith.addf %336, %339 : vector<32x1xf32>
    %c0_348 = arith.constant 0 : index
    %c192 = arith.constant 192 : index
    %341 = vector.load %arg7[%c0_348, %c192] : memref<32x288xf32, #tpu.memory_space<vmem>>, vector<32x32xf32>
    %342 = vector.extract_strided_slice %315 {offsets = [0, 6], sizes = [32, 1], strides = [1, 1]} : vector<32x9xf32> to vector<32x1xf32>
    %cst_349 = arith.constant dense<0.000000e+00> : vector<32x1xf32>
    %343 = tpu.matmul %341, %342, %cst_349 {dimension_numbers = #tpu.dot_dimension_numbers<[1], [0], [0], [1], [0, 0, 1, 1], [], []>} : vector<32x32xf32>, vector<32x1xf32>, vector<32x1xf32> -> vector<32x1xf32>
    %344 = arith.addf %340, %343 : vector<32x1xf32>
    %c0_350 = arith.constant 0 : index
    %c224 = arith.constant 224 : index
    %345 = vector.load %arg7[%c0_350, %c224] : memref<32x288xf32, #tpu.memory_space<vmem>>, vector<32x32xf32>
    %346 = vector.extract_strided_slice %315 {offsets = [0, 7], sizes = [32, 1], strides = [1, 1]} : vector<32x9xf32> to vector<32x1xf32>
    %cst_351 = arith.constant dense<0.000000e+00> : vector<32x1xf32>
    %347 = tpu.matmul %345, %346, %cst_351 {dimension_numbers = #tpu.dot_dimension_numbers<[1], [0], [0], [1], [0, 0, 1, 1], [], []>} : vector<32x32xf32>, vector<32x1xf32>, vector<32x1xf32> -> vector<32x1xf32>
    %348 = arith.addf %344, %347 : vector<32x1xf32>
    %c0_352 = arith.constant 0 : index
    %c256 = arith.constant 256 : index
    %349 = vector.load %arg7[%c0_352, %c256] : memref<32x288xf32, #tpu.memory_space<vmem>>, vector<32x32xf32>
    %350 = vector.extract_strided_slice %315 {offsets = [0, 8], sizes = [32, 1], strides = [1, 1]} : vector<32x9xf32> to vector<32x1xf32>
    %cst_353 = arith.constant dense<0.000000e+00> : vector<32x1xf32>
    %351 = tpu.matmul %349, %350, %cst_353 {dimension_numbers = #tpu.dot_dimension_numbers<[1], [0], [0], [1], [0, 0, 1, 1], [], []>} : vector<32x32xf32>, vector<32x1xf32>, vector<32x1xf32> -> vector<32x1xf32>
    %352 = arith.addf %348, %351 : vector<32x1xf32>
    %c0_354 = arith.constant 0 : index
    %c0_355 = arith.constant 0 : index
    %353 = vector.load %arg12[%c0_354, %c0_355] : memref<64x32xf32, #tpu.memory_space<vmem>>, vector<64x32xf32>
    %cst_356 = arith.constant dense<0.000000e+00> : vector<64x1xf32>
    %354 = tpu.matmul %353, %352, %cst_356 {dimension_numbers = #tpu.dot_dimension_numbers<[1], [0], [0], [1], [0, 0, 1, 1], [], []>} : vector<64x32xf32>, vector<32x1xf32>, vector<64x1xf32> -> vector<64x1xf32>
    %c0_357 = arith.constant 0 : index
    %c0_358 = arith.constant 0 : index
    %355 = vector.load %arg13[%c0_357, %c0_358] : memref<64x1xf32, #tpu.memory_space<vmem>>, vector<64x1xf32>
    %c0_359 = arith.constant 0 : index
    %c0_360 = arith.constant 0 : index
    %c0_361 = arith.constant 0 : index
    %356 = vector.load %arg2[%c0_359, %c0_360, %c0_361] : memref<1x1x1xf32, #tpu.memory_space<vmem>>, vector<1x1x1xf32>
    %357 = vector.shape_cast %356 : vector<1x1x1xf32> to vector<1x1xf32>
    %358 = vector.broadcast %357 : vector<1x1xf32> to vector<64x1xf32>
    %359 = arith.mulf %355, %358 : vector<64x1xf32>
    %360 = arith.addf %354, %359 : vector<64x1xf32>
    %c0_362 = arith.constant 0 : index
    %c0_363 = arith.constant 0 : index
    %361 = vector.load %arg14[%c0_362, %c0_363] : memref<64x1xf32, #tpu.memory_space<vmem>>, vector<64x1xf32>
    %362 = arith.addf %360, %361 : vector<64x1xf32>
    %cst_364 = arith.constant 0.000000e+00 : f32
    %363 = vector.broadcast %cst_364 : f32 to vector<64x1xf32>
    %364 = arith.maximumf %362, %363 : vector<64x1xf32>
    %c0_365 = arith.constant 0 : index
    %c0_366 = arith.constant 0 : index
    %365 = vector.load %arg15[%c0_365, %c0_366] : memref<2x64xf32, #tpu.memory_space<vmem>>, vector<2x64xf32>
    %cst_367 = arith.constant dense<0.000000e+00> : vector<2x1xf32>
    %366 = tpu.matmul %365, %364, %cst_367 {dimension_numbers = #tpu.dot_dimension_numbers<[1], [0], [0], [1], [0, 0, 1, 1], [], []>} : vector<2x64xf32>, vector<64x1xf32>, vector<2x1xf32> -> vector<2x1xf32>
    %c0_368 = arith.constant 0 : index
    %c0_369 = arith.constant 0 : index
    %367 = vector.load %arg16[%c0_368, %c0_369] : memref<2x1xf32, #tpu.memory_space<vmem>>, vector<2x1xf32>
    %368 = arith.addf %366, %367 : vector<2x1xf32>
    %c0_370 = arith.constant 0 : index
    %c0_371 = arith.constant 0 : index
    %c0_372 = arith.constant 0 : index
    %369 = vector.load %arg17[%c0_370, %c0_371, %c0_372] : memref<1x2x1xf32, #tpu.memory_space<vmem>>, vector<1x2x1xf32>
    %370 = vector.shape_cast %369 : vector<1x2x1xf32> to vector<2x1xf32>
    %371 = vector.shape_cast %368 : vector<2x1xf32> to vector<1x2x1xf32>
    tpu.vector_store %arg17[%c0_370, %c0_371, %c0_372], %371 {strides = array<i32>} : memref<1x2x1xf32, #tpu.memory_space<vmem>>, vector<1x2x1xf32>,
    return
  }
  func.func @transform_0(%arg0: i32) -> (i32, i32, i32) {
    %c0_i32 = arith.constant 0 : i32
    %c0_i32_0 = arith.constant 0 : i32
    %c0_i32_1 = arith.constant 0 : i32
    return %arg0, %c0_i32, %c0_i32_0 : i32, i32, i32
  }
  func.func @transform_1(%arg0: i32) -> (i32, i32, i32) {
    %c0_i32 = arith.constant 0 : i32
    %c0_i32_0 = arith.constant 0 : i32
    %c0_i32_1 = arith.constant 0 : i32
    return %arg0, %c0_i32, %c0_i32_0 : i32, i32, i32
  }
  func.func @transform_2(%arg0: i32) -> (i32, i32) {
    %c0_i32 = arith.constant 0 : i32
    %c0_i32_0 = arith.constant 0 : i32
    %c0_i32_1 = arith.constant 0 : i32
    return %c0_i32, %c0_i32_0 : i32, i32
  }
  func.func @transform_3(%arg0: i32) -> (i32, i32) {
    %c0_i32 = arith.constant 0 : i32
    %c0_i32_0 = arith.constant 0 : i32
    %c0_i32_1 = arith.constant 0 : i32
    return %c0_i32, %c0_i32_0 : i32, i32
  }
  func.func @transform_4(%arg0: i32) -> (i32, i32) {
    %c0_i32 = arith.constant 0 : i32
    %c0_i32_0 = arith.constant 0 : i32
    %c0_i32_1 = arith.constant 0 : i32
    return %c0_i32, %c0_i32_0 : i32, i32
  }
  func.func @transform_5(%arg0: i32) -> (i32, i32) {
    %c0_i32 = arith.constant 0 : i32
    %c0_i32_0 = arith.constant 0 : i32
    %c0_i32_1 = arith.constant 0 : i32
    return %c0_i32, %c0_i32_0 : i32, i32
  }
  func.func @transform_6(%arg0: i32) -> (i32, i32) {
    %c0_i32 = arith.constant 0 : i32
    %c0_i32_0 = arith.constant 0 : i32
    %c0_i32_1 = arith.constant 0 : i32
    return %c0_i32, %c0_i32_0 : i32, i32
  }
  func.func @transform_7(%arg0: i32) -> (i32, i32) {
    %c0_i32 = arith.constant 0 : i32
    %c0_i32_0 = arith.constant 0 : i32
    %c0_i32_1 = arith.constant 0 : i32
    return %c0_i32, %c0_i32_0 : i32, i32
  }
  func.func @transform_8(%arg0: i32) -> (i32, i32) {
    %c0_i32 = arith.constant 0 : i32
    %c0_i32_0 = arith.constant 0 : i32
    %c0_i32_1 = arith.constant 0 : i32
    return %c0_i32, %c0_i32_0 : i32, i32
  }
  func.func @transform_9(%arg0: i32) -> (i32, i32) {
    %c0_i32 = arith.constant 0 : i32
    %c0_i32_0 = arith.constant 0 : i32
    %c0_i32_1 = arith.constant 0 : i32
    return %c0_i32, %c0_i32_0 : i32, i32
  }
  func.func @transform_10(%arg0: i32) -> (i32, i32) {
    %c0_i32 = arith.constant 0 : i32
    %c0_i32_0 = arith.constant 0 : i32
    %c0_i32_1 = arith.constant 0 : i32
    return %c0_i32, %c0_i32_0 : i32, i32
  }
  func.func @transform_11(%arg0: i32) -> (i32, i32) {
    %c0_i32 = arith.constant 0 : i32
    %c0_i32_0 = arith.constant 0 : i32
    %c0_i32_1 = arith.constant 0 : i32
    return %c0_i32, %c0_i32_0 : i32, i32
  }
  func.func @transform_12(%arg0: i32) -> (i32, i32) {
    %c0_i32 = arith.constant 0 : i32
    %c0_i32_0 = arith.constant 0 : i32
    %c0_i32_1 = arith.constant 0 : i32
    return %c0_i32, %c0_i32_0 : i32, i32
  }
  func.func @transform_13(%arg0: i32) -> (i32, i32) {
    %c0_i32 = arith.constant 0 : i32
    %c0_i32_0 = arith.constant 0 : i32
    %c0_i32_1 = arith.constant 0 : i32
    return %c0_i32, %c0_i32_0 : i32, i32
  }
  func.func @transform_14(%arg0: i32) -> (i32, i32) {
    %c0_i32 = arith.constant 0 : i32
    %c0_i32_0 = arith.constant 0 : i32
    %c0_i32_1 = arith.constant 0 : i32
    return %c0_i32, %c0_i32_0 : i32, i32
  }
  func.func @transform_15(%arg0: i32) -> (i32, i32) {
    %c0_i32 = arith.constant 0 : i32
    %c0_i32_0 = arith.constant 0 : i32
    %c0_i32_1 = arith.constant 0 : i32
    return %c0_i32, %c0_i32_0 : i32, i32
  }
  func.func @transform_16(%arg0: i32) -> (i32, i32, i32) {
    %c0_i32 = arith.constant 0 : i32
    %c0_i32_0 = arith.constant 0 : i32
    %c0_i32_1 = arith.constant 0 : i32
    return %arg0, %c0_i32, %c0_i32_0 : i32, i32, i32
  }
}

</mosaic_0001>

<bundles_post_ra>
// kernel: critic_forward.1
= control target key start
LH: loop header
LB: loop body
LE: loop exit
PB: predicated region body
PF: predicated region fallthrough
CT: control target
= control target key end

     0   :  { %s20463_s21 = smov 0   ;;  %s27220_s0 = inlined_call_operand.vmem [shape: f32[2,1,1664], index: 0, kind: input, shape index: {}]   ;;  %s27221_s1 = inlined_call_operand.vmem [shape: f32[2,1,1], index: 1, kind: input, shape index: {}]   ;;  %s27222_s2 = inlined_call_operand.vmem [shape: f32[16,9], index: 2, kind: input, shape index: {}]   ;;  %s27223_s3 = inlined_call_operand.vmem [shape: f32[16,1], index: 3, kind: input, shape index: {}]   ;;  %s27224_s4 = inlined_call_operand.vmem [shape: f32[32,144], index: 4, kind: input, shape index: {}]   ;;  %s27225_s5 = inlined_call_operand.vmem [shape: f32[32,1], index: 5, kind: input, shape index: {}]   ;;  %s27226_s6 = inlined_call_operand.vmem [shape: f32[32,288], index: 6, kind: input, shape index: {}]   ;;  %s27227_s7 = inlined_call_operand.vmem [shape: f32[32,1], index: 7, kind: input, shape index: {}]   ;;  %s27228_s8 = inlined_call_operand.vmem [shape: f32[324,9], index: 8, kind: input, shape index: {}]   ;;  %s27229_s9 = inlined_call_operand.vmem [shape: f32[36,18], index: 9, kind: input, shape index: {}]   ;;  %s27230_s10 = inlined_call_operand.vmem [shape: f32[36,18], index: 10, kind: input, shape index: {}]   ;;  %s27231_s11 = inlined_call_operand.vmem [shape: f32[64,32], index: 11, kind: input, shape index: {}]   ;;  %s27232_s12 = inlined_call_operand.vmem [shape: f32[64,1], index: 12, kind: input, shape index: {}]   ;;  %s27233_s13 = inlined_call_operand.vmem [shape: f32[64,1], index: 13, kind: input, shape index: {}]   ;;  %s27234_s14 = inlined_call_operand.vmem [shape: f32[2,64], index: 14, kind: input, shape index: {}]   ;;  %s27235_s15 = inlined_call_operand.vmem [shape: f32[2,1], index: 15, kind: input, shape index: {}]   ;;  %s27236_s16 = inlined_call_operand.vmem [shape: f32[2,2,1], index: 16, kind: output, shape index: {}]  }
   0x1   :  { %27505 = sst [smem:[#allocation87_spill]] %s27220_s0 }
   0x2 LB: > { %s17308_s22 = sadd.s32 4294967295, %s20332_s21   ;;  %p17312_p0 = scmp.ge.s32.totalorder %s20332_s21, 1  ;;  %s20332_s21 = sphi %s20463_s21, %s26_s21  }
   0x3   : > { %p469_p1 = scmp.lt.s32.totalorder %s20332_s21, 3 }
   0x5   : > { %p470_p2 = pnand %p17312_p0, %p469_p1 }
   0x7   : > { %473 = sbr.rel (%p470_p2) target bundleno = 3249 (0xcb1), region = 84 }
   0xe   : > { %v763_v0 = vld [vmem:[%s27222_s2] sm:$0xff]  ;;  %v20334_v1 = vmov 1   ;;  %v20335_v2 = vmov 2   ;;  %v764_v3 = vld [vmem:[%s27222_s2 + $0x8] sm:$0xff]  ;;  %v20336_v4 = vmov 3   ;;  %v20337_v5 = vmov 4  }
   0xf   : > { %19735 = vset.pattern.permute.xlu0 %v20334_v1  ;;  %19736 = vset.pattern.permute.xlu1 %v20335_v2  ;;  %v20338_v6 = vmov 5   ;;  %v20339_v7 = vmov 6   ;;  %v20340_v8 = vmov 7   ;;  %v20341_v9 = vmov 0   ;;  %v532_v10 = vld [vmem:[%s27223_s3 + $0x8] sm:$0xff]  ;;  %v531_v12 = vld [vmem:[%s27223_s3] sm:$0xff] }
  0x10   : > { %769 = vperm.xlu0 %19735, %v763_v0   ;;  %1075 = vperm.xlu1 %19736, %v763_v0   ;;  %v20342_v11 = vmov 8   ;;  %p520_p3 = scmp.lt.s32.totalorder %s17308_s22, 1  ;;  %v607_v13 = vlaneseq  ;;  %s27507_s19 = sld [smem:[#allocation87_spill]]  ;;  %vm948_vm0 = vcmask 1039360   ;;  %vm1254_vm1 = vcmask 1031168  }
  0x11   : > { %s27423_s23 = smov 127   ;;  %s27488_s24 = smov 126   ;;  %vm1560_vm2 = vcmask 719872   ;;  %vm1866_vm3 = vcmask 711680   ;;  %vm2172_vm4 = vcmask 703488   ;;  %vm2478_vm5 = vcmask 392192  }
  0x12   : > { %s28150_s22 = smov (!%p520_p3, %s17308_s22), 1  ;;  %v20490_v14 = vshrl.u32 %v607_v13, 7  ;;  %s20345_s25 = smov 88   ;;  %vm2784_vm6 = vcmask 384000   ;;  %vm3090_vm7 = vcmask 375808   ;;  %vm3408_vm8 = vcmask 130048  }
  0x13   : > { %s19682_s0 = smul.u32 13, %s28150_s22  ;;  %s20346_s26 = smov 87   ;;  %vm3294_vm9 = vcmask 261120   ;;  %vm10981_vm10 = vcmask 1043456   ;;  %vm10968_vm11 = vcmask 293888   ;;  %vm11167_vm12 = vcmask 146432  }
  0x14   : > { %774 = vperm.xlu0 %19735, %v764_v3   ;;  %1080 = vperm.xlu1 %19736, %v764_v3   ;;  %27506 = vst [vmem:[#allocation5_spill] sm:$0xff] %v20490_v14  ;;  %v20498_v15 = vsub.s32 2, %v20490_v14  ;;  %v20501_v16 = vsub.s32 1, %v20490_v14  ;;  %v20515_v20 = vsub.s32 3, %v20490_v14  ;;  %v20536_v28 = vsub.s32 0, %v20490_v14  ;;  %s20347_s27 = smov 86  }
  0x15   : > { %s20348_s28 = smov 48   ;;  %s20349_s29 = smov 47   ;;  %vm11442_vm13 = vcmask 294032   ;;  %vm11697_vm14 = vcmask 441632   ;;  %vm11976_vm15 = vcmask 589232  }
  0x16   : > { %s20495_s20 = scalar_lea.vmem %s27507_s19, %s19682_s0  ;;  %27508 = vst [vmem:[#allocation6_spill] sm:$0xff] %v20498_v15  ;;  %27509 = vst [vmem:[#allocation7_spill] sm:$0xff] %v20501_v16  ;;  %s20350_s30 = smov 46  }
  0x17   : > { %v20504_v17 = vld [vmem:[%s20495_s20] sm:$0xff]  ;;  %27510 = vst [vmem:[#allocation8_spill] sm:$0xff] %v20515_v20  ;;  %27513 = vst [vmem:[#allocation11_spill] sm:$0xff] %v20536_v28  ;;  %s27494_s0 = smov 112   ;;  %s27490_s19 = smov 80  }
  0x18   : > { %19737 = vset.pattern.permute.xlu0 %v20336_v4  ;;  %19738 = vset.pattern.permute.xlu1 %v20336_v4  ;;  %v20508_v18 = vrot.slane %v20504_v17, %v20498_v15  ;;  %v20512_v19 = vrot.slane %v20504_v17, %v20501_v16  ;;  %v20525_v24 = vrot.slane %v20504_v17, %v20515_v20  ;;  %s20358_s17 = smov 18   ;;  %s20366_s18 = smov 70  }
  0x19   : > { %1381 = vperm.xlu0 %19737, %v763_v0   ;;  %1386 = vperm.xlu1 %19738, %v764_v3   ;;  %v20546_v31 = vrot.slane %v20504_v17, %v20536_v28 }
  0x1d   : > { %19739 = vset.pattern.permute.xlu1 %v20337_v5  ;;  %19740 = vset.pattern.permute.xlu0 %v20337_v5 }
  0x1e   : > { %1687 = vperm.xlu1 %19739, %v763_v0   ;;  %1692 = vperm.xlu0 %19740, %v764_v3  }
  0x22   : > { %19741 = vset.pattern.permute.xlu1 %v20338_v6  ;;  %19742 = vset.pattern.permute.xlu0 %v20339_v7 }
  0x23   : > { %1993 = vperm.xlu1 %19741, %v763_v0   ;;  %2299 = vperm.xlu0 %19742, %v763_v0  }
  0x27   : > { %1998 = vperm.xlu1 %19741, %v764_v3   ;;  %19745 = vset.pattern.permute.xlu0 %v20340_v8 }
  0x28   : > { %2610 = vperm.xlu0 %19745, %v764_v3  }
  0x2b   : > { %19743 = vset.pattern.permute.xlu1 %v20339_v7 }
  0x2c   : > { %2304 = vperm.xlu1 %19743, %v764_v3   ;;  %19747 = vset.pattern.permute.xlu0 %v20341_v9 }
  0x2d   : > { %597 = vperm.xlu0 %19747, %v763_v0  }
  0x30   : > { %19744 = vset.pattern.permute.xlu1 %v20340_v8 }
  0x31   : > { %2605 = vperm.xlu1 %19744, %v763_v0   ;;  %540 = vperm.xlu0 %19747, %v532_v10  }
  0x35   : > { %19746 = vset.pattern.permute.xlu1 %v20342_v11 }
  0x36   : > { %2911 = vperm.xlu1 %19746, %v763_v0  }
  0x3a   : > { %2916 = vperm.xlu1 %19746, %v764_v3  }
  0x3e   : > { %19748 = vset.pattern.permute.xlu1 %v20341_v9 }
  0x3f   : > { %602 = vperm.xlu1 %19748, %v764_v3  }
  0x43   : > { %535 = vperm.xlu1 %19748, %v531_v12  }
  0x8f   : > { %v20517_v21 = vpop.permute.xlu0 %769  ;;  %v20550_v32 = vpop.permute.xlu1 %1075 }
  0x90   : > { %27511 = vst [vmem:[#allocation9_spill] sm:$0xff] %v20517_v21  ;;  %v846_v22 = vmul.f32 %v20508_v18, %v20517_v21  ;;  %v845_v23 = vmul.f32 %v20512_v19, %v20517_v21  ;;  %v847_v27 = vmul.f32 %v20525_v24, %v20517_v21  ;;  %27514 = vst [vmem:[#allocation12_spill] sm:$0xff] %v20550_v32 }
  0x91   : > { %v844_v34 = vmul.f32 %v20546_v31, %v20517_v21  ;;  %v1152_v35 = vmul.f32 %v20550_v32, %v20508_v18  ;;  %v1151_v36 = vmul.f32 %v20550_v32, %v20512_v19  ;;  %v1153_v39 = vmul.f32 %v20550_v32, %v20525_v24 }
  0x92   : > { %900 = vrot.lane.b32.xlu0 %v846_v22, %s27423_s23  ;;  %898 = vrot.lane.b32.xlu1 %v845_v23, %s27423_s23  ;;  %v1150_v44 = vmul.f32 %v20550_v32, %v20546_v31 }
  0x93   : > { %v20529_v25 = vpop.permute.xlu0 %774  ;;  %v20562_v37 = vpop.permute.xlu1 %1080 }
  0x94   : > { %27512 = vst [vmem:[#allocation10_spill] sm:$0xff] %v20529_v25  ;;  %v858_v26 = vmul.f32 %v20512_v19, %v20529_v25  ;;  %v860_v29 = vmul.f32 %v20525_v24, %v20529_v25  ;;  %v859_v30 = vmul.f32 %v20508_v18, %v20529_v25  ;;  %v857_v33 = vmul.f32 %v20546_v31, %v20529_v25 }
  0x95   : > { %27515 = vst [vmem:[#allocation13_spill] sm:$0xff] %v20562_v37  ;;  %v1164_v38 = vmul.f32 %v20562_v37, %v20512_v19  ;;  %v1166_v40 = vmul.f32 %v20562_v37, %v20525_v24  ;;  %v1165_v41 = vmul.f32 %v20562_v37, %v20508_v18  ;;  %v1163_v43 = vmul.f32 %v20562_v37, %v20546_v31 }
  0x96   : > { %924 = vrot.lane.b32.xlu0 %v858_v26, %s27423_s23  ;;  %902 = vrot.lane.b32.xlu1 %v847_v27, %s27423_s23 }
  0x98   : > { %v20578_v42 = vpop.permute.xlu0 %1381  ;;  %v20590_v47 = vpop.permute.xlu1 %1386 }
  0x99   : > { %27516 = vst [vmem:[#allocation14_spill] sm:$0xff] %v20578_v42  ;;  %v1458_v45 = vmul.f32 %v20578_v42, %v20508_v18  ;;  %v1457_v46 = vmul.f32 %v20578_v42, %v20512_v19  ;;  %27517 = vst [vmem:[#allocation15_spill] sm:$0xff] %v20590_v47  ;;  %v1470_v48 = vmul.f32 %v20590_v47, %v20512_v19 }
  0x9a   : > { %928 = vrot.lane.b32.xlu0 %v860_v29, %s27423_s23  ;;  %926 = vrot.lane.b32.xlu1 %v859_v30, %s27423_s23  ;;  %v1459_v49 = vmul.f32 %v20578_v42, %v20525_v24  ;;  %v1472_v50 = vmul.f32 %v20590_v47, %v20525_v24  ;;  %v1471_v51 = vmul.f32 %v20590_v47, %v20508_v18 }
  0x9b   : > { %v1469_v53 = vmul.f32 %v20590_v47, %v20546_v31  ;;  %v1456_v54 = vmul.f32 %v20578_v42, %v20546_v31 }
  0x9d   : > { %v20606_v52 = vpop.permute.xlu1 %1687  ;;  %v20618_v57 = vpop.permute.xlu0 %1692 }
  0x9e   : > { %922 = vrot.lane.b32.xlu0 %v857_v33, %s27423_s23  ;;  %896 = vrot.lane.b32.xlu1 %v844_v34, %s27423_s23  ;;  %27518 = vst [vmem:[#allocation16_spill] sm:$0xff] %v20606_v52  ;;  %v1764_v55 = vmul.f32 %v20606_v52, %v20508_v18  ;;  %v1763_v56 = vmul.f32 %v20606_v52, %v20512_v19  ;;  %27519 = vst [vmem:[#allocation17_spill] sm:$0xff] %v20618_v57 }
  0x9f   : > { %v1776_v58 = vmul.f32 %v20618_v57, %v20512_v19  ;;  %v1765_v59 = vmul.f32 %v20606_v52, %v20525_v24  ;;  %v1778_v60 = vmul.f32 %v20618_v57, %v20525_v24  ;;  %v1777_v61 = vmul.f32 %v20618_v57, %v20508_v18 }
  0xa0   : > { %v1775_v63 = vmul.f32 %v20618_v57, %v20546_v31  ;;  %v1762_v0 = vmul.f32 %v20606_v52, %v20546_v31 }
  0xa2   : > { %1206 = vrot.lane.b32.xlu0 %v1152_v35, %s27488_s24  ;;  %1204 = vrot.lane.b32.xlu1 %v1151_v36, %s27488_s24  ;;  %v20634_v62 = vpop.permute.xlu1 %1993  ;;  %v20662_v8 = vpop.permute.xlu0 %2299 }
  0xa3   : > { %27520 = vst [vmem:[#allocation18_spill] sm:$0xff] %v20634_v62  ;;  %v2070_v1 = vmul.f32 %v20634_v62, %v20508_v18  ;;  %v2069_v2 = vmul.f32 %v20634_v62, %v20512_v19  ;;  %v2071_v5 = vmul.f32 %v20634_v62, %v20525_v24  ;;  %27522 = vst [vmem:[#allocation20_spill] sm:$0xff] %v20662_v8 }
  0xa4   : > { %v2068_v10 = vmul.f32 %v20634_v62, %v20546_v31  ;;  %v2376_v11 = vmul.f32 %v20662_v8, %v20508_v18  ;;  %v2375_v12 = vmul.f32 %v20662_v8, %v20512_v19  ;;  %v2377_v23 = vmul.f32 %v20662_v8, %v20525_v24 }
  0xa5   : > { %v2374_v33 = vmul.f32 %v20662_v8, %v20546_v31 }
  0xa6   : > { %1230 = vrot.lane.b32.xlu0 %v1164_v38, %s27488_s24  ;;  %1208 = vrot.lane.b32.xlu1 %v1153_v39, %s27488_s24  ;;  %v20646_v3 = vpop.permute.xlu1 %1998 }
  0xa7   : > { %27521 = vst [vmem:[#allocation19_spill] sm:$0xff] %v20646_v3  ;;  %v2082_v4 = vmul.f32 %v20646_v3, %v20512_v19  ;;  %v2084_v6 = vmul.f32 %v20646_v3, %v20525_v24  ;;  %v2083_v7 = vmul.f32 %v20646_v3, %v20508_v18  ;;  %v2081_v9 = vmul.f32 %v20646_v3, %v20546_v31  ;;  %v20704_v38 = vpop.permute.xlu0 %2610 }
  0xa8   : > { %27526 = vst [vmem:[#allocation24_spill] sm:$0xff] %v20704_v38  ;;  %v2694_v39 = vmul.f32 %v20704_v38, %v20512_v19 }
  0xaa   : > { %1234 = vrot.lane.b32.xlu0 %v1166_v40, %s27488_s24  ;;  %1232 = vrot.lane.b32.xlu1 %v1165_v41, %s27488_s24 }
  0xab   : > { %v20674_v13 = vpop.permute.xlu1 %2304 }
  0xac   : > { %27523 = vst [vmem:[#allocation21_spill] sm:$0xff] %v20674_v13  ;;  %v2388_v22 = vmul.f32 %v20674_v13, %v20512_v19  ;;  %v2390_v26 = vmul.f32 %v20674_v13, %v20525_v24  ;;  %v2389_v27 = vmul.f32 %v20674_v13, %v20508_v18  ;;  %v2387_v30 = vmul.f32 %v20674_v13, %v20546_v31 }
  0xae   : > { %1228 = vrot.lane.b32.xlu0 %v1163_v43, %s27488_s24  ;;  %1202 = vrot.lane.b32.xlu1 %v1150_v44, %s27488_s24  ;;  %v2696_v43 = vmul.f32 %v20704_v38, %v20525_v24  ;;  %v2695_v44 = vmul.f32 %v20704_v38, %v20508_v18 }
  0xb0   : > { %v20688_v29 = vpop.permute.xlu1 %2605 }
  0xb1   : > { %27524 = vst [vmem:[#allocation22_spill] sm:$0xff] %v20688_v29  ;;  %v2682_v35 = vmul.f32 %v20688_v29, %v20508_v18  ;;  %v2681_v36 = vmul.f32 %v20688_v29, %v20512_v19  ;;  %v2683_v41 = vmul.f32 %v20688_v29, %v20525_v24 }
  0xb2   : > { %1512 = vrot.lane.b32.xlu0 %v1458_v45, %s20345_s25  ;;  %1510 = vrot.lane.b32.xlu1 %v1457_v46, %s20345_s25  ;;  %v20722_v46 = vpop.permute.xlu0 %597 }
  0xb3   : > { %27529 = vst [vmem:[#allocation27_spill] sm:$0xff] %v20722_v46 }
  0xb5   : > { %v20698_v34 = vpop.permute.xlu1 %2911 }
  0xb6   : > { %1536 = vrot.lane.b32.xlu0 %v1470_v48, %s20345_s25  ;;  %1514 = vrot.lane.b32.xlu1 %v1459_v49, %s20345_s25  ;;  %27525 = vst [vmem:[#allocation23_spill] sm:$0xff] %v20698_v34  ;;  %v2693_v48 = vmul.f32 %v20704_v38, %v20546_v31  ;;  %v2680_v49 = vmul.f32 %v20688_v29, %v20546_v31 }
  0xb9   : > { %v20710_v40 = vpop.permute.xlu1 %2916 }
  0xba   : > { %1540 = vrot.lane.b32.xlu0 %v1472_v50, %s20345_s25  ;;  %1538 = vrot.lane.b32.xlu1 %v1471_v51, %s20345_s25  ;;  %27527 = vst [vmem:[#allocation25_spill] sm:$0xff] %v20710_v40  ;;  %v20732_v50 = vpop.permute.xlu0 %540 }
  0xbb   : > { %27530 = vst [vmem:[#allocation28_spill] sm:$0xff] %v20732_v50 }
  0xbe   : > { %1534 = vrot.lane.b32.xlu0 %v1469_v53, %s20345_s25  ;;  %1508 = vrot.lane.b32.xlu1 %v1456_v54, %s20345_s25  ;;  %v20720_v45 = vpop.permute.xlu1 %602  ;;  %v2988_v53 = vmul.f32 %v20698_v34, %v20508_v18  ;;  %v2987_v54 = vmul.f32 %v20698_v34, %v20512_v19 }
  0xbf   : > { %27528 = vst [vmem:[#allocation26_spill] sm:$0xff] %v20720_v45 }
  0xc2   : > { %1818 = vrot.lane.b32.xlu0 %v1764_v55, %s20346_s26  ;;  %1816 = vrot.lane.b32.xlu1 %v1763_v56, %s20346_s26  ;;  %v20734_v51 = vpop.permute.xlu1 %535 }
  0xc3   : > { %27531 = vst [vmem:[#allocation29_spill] sm:$0xff] %v20734_v51 }
  0xc6   : > { %1842 = vrot.lane.b32.xlu0 %v1776_v58, %s20346_s26  ;;  %1820 = vrot.lane.b32.xlu1 %v1765_v59, %s20346_s26  ;;  %v3000_v58 = vmul.f32 %v20710_v40, %v20512_v19  ;;  %v2989_v59 = vmul.f32 %v20698_v34, %v20525_v24 }
  0xca   : > { %1846 = vrot.lane.b32.xlu0 %v1778_v60, %s20346_s26  ;;  %1844 = vrot.lane.b32.xlu1 %v1777_v61, %s20346_s26 }
  0xce   : > { %1840 = vrot.lane.b32.xlu0 %v1775_v63, %s20346_s26  ;;  %1814 = vrot.lane.b32.xlu1 %v1762_v0, %s20346_s26  ;;  %v3002_v63 = vmul.f32 %v20710_v40, %v20525_v24  ;;  %v3001_v0 = vmul.f32 %v20710_v40, %v20508_v18  ;;  %v2999_v24 = vmul.f32 %v20710_v40, %v20546_v31 }
  0xd2   : > { %2124 = vrot.lane.b32.xlu0 %v2070_v1, %s20347_s27  ;;  %2122 = vrot.lane.b32.xlu1 %v2069_v2, %s20347_s27  ;;  %v633_v1 = vsub.s32 6, %v20490_v14  ;;  %v629_v2 = vsub.s32 5, %v20490_v14 }
  0xd6   : > { %2148 = vrot.lane.b32.xlu0 %v2082_v4, %s20347_s27  ;;  %2126 = vrot.lane.b32.xlu1 %v2071_v5, %s20347_s27  ;;  %v27237_v4 = vsub.s32 7, %v20490_v14 }
  0xda   : > { %2152 = vrot.lane.b32.xlu0 %v2084_v6, %s20347_s27  ;;  %2150 = vrot.lane.b32.xlu1 %v2083_v7, %s20347_s27  ;;  %v2986_v7 = vmul.f32 %v20698_v34, %v20546_v31 }
  0xde   : > { %2146 = vrot.lane.b32.xlu0 %v2081_v9, %s20347_s27  ;;  %2120 = vrot.lane.b32.xlu1 %v2068_v10, %s20347_s27  ;;  %v20774_v9 = vrot.slane %v20504_v17, %v633_v1  ;;  %v20777_v10 = vrot.slane %v20504_v17, %v629_v2 }
  0xe0   : > { %27532 = vst [vmem:[#allocation30_spill] sm:$0xff] %v20774_v9  ;;  %27533 = vst [vmem:[#allocation31_spill] sm:$0xff] %v20777_v10 }
  0xe2   : > { %2430 = vrot.lane.b32.xlu0 %v2376_v11, %s20348_s28  ;;  %2428 = vrot.lane.b32.xlu1 %v2375_v12, %s20348_s28 }
  0xe6   : > { %2454 = vrot.lane.b32.xlu0 %v2388_v22, %s20348_s28  ;;  %2432 = vrot.lane.b32.xlu1 %v2377_v23, %s20348_s28  ;;  %v850_v22 = vmul.f32 %v20774_v9, %v20517_v21  ;;  %v849_v23 = vmul.f32 %v20777_v10, %v20517_v21 }
  0xea   : > { %2458 = vrot.lane.b32.xlu0 %v2390_v26, %s20348_s28  ;;  %2456 = vrot.lane.b32.xlu1 %v2389_v27, %s20348_s28  ;;  %v20792_v26 = vrot.slane %v20504_v17, %v27237_v4 }
  0xec   : > { %27534 = vst [vmem:[#allocation32_spill] sm:$0xff] %v20792_v26 }
  0xee   : > { %2452 = vrot.lane.b32.xlu0 %v2387_v30, %s20348_s28  ;;  %2426 = vrot.lane.b32.xlu1 %v2374_v33, %s20348_s28  ;;  %v862_v33 = vmul.f32 %v20777_v10, %v20529_v25 }
  0xf2   : > { %2736 = vrot.lane.b32.xlu0 %v2682_v35, %s20349_s29  ;;  %2734 = vrot.lane.b32.xlu1 %v2681_v36, %s20349_s29  ;;  %v851_v35 = vmul.f32 %v20792_v26, %v20517_v21  ;;  %v20805_v36 = vsub.s32 4, %v20490_v14 }
  0xf4   : > { %27535 = vst [vmem:[#allocation33_spill] sm:$0xff] %v20805_v36 }
  0xf6   : > { %2760 = vrot.lane.b32.xlu0 %v2694_v39, %s20349_s29  ;;  %2738 = vrot.lane.b32.xlu1 %v2683_v41, %s20349_s29 }
  0xfa   : > { %2764 = vrot.lane.b32.xlu0 %v2696_v43, %s20349_s29  ;;  %2762 = vrot.lane.b32.xlu1 %v2695_v44, %s20349_s29  ;;  %v864_v43 = vmul.f32 %v20792_v26, %v20529_v25  ;;  %v863_v44 = vmul.f32 %v20774_v9, %v20529_v25 }
  0xfe   : > { %2758 = vrot.lane.b32.xlu0 %v2693_v48, %s20349_s29  ;;  %2732 = vrot.lane.b32.xlu1 %v2680_v49, %s20349_s29  ;;  %v20819_v48 = vrot.slane %v20504_v17, %v20805_v36 }
 0x100   : > { %27536 = vst [vmem:[#allocation34_spill] sm:$0xff] %v20819_v48 }
 0x102   : > { %3042 = vrot.lane.b32.xlu0 %v2988_v53, %s20350_s30  ;;  %3040 = vrot.lane.b32.xlu1 %v2987_v54, %s20350_s30  ;;  %v861_v54 = vmul.f32 %v20819_v48, %v20529_v25 }
 0x104   : > { %v20742_v55 = vpop.permute.xlu0 %900  ;;  %v20744_v56 = vpop.permute.xlu1 %898 }
 0x106   : > { %3066 = vrot.lane.b32.xlu0 %v3000_v58, %s20350_s30  ;;  %3044 = vrot.lane.b32.xlu1 %v2989_v59, %s20350_s30  ;;  %v848_v58 = vmul.f32 %v20819_v48, %v20517_v21 }
 0x108   : > { %v20752_v60 = vpop.permute.xlu0 %924  ;;  %v20754_v61 = vpop.permute.xlu1 %902 }
 0x10a   : > { %3070 = vrot.lane.b32.xlu0 %v3002_v63, %s20350_s30  ;;  %3068 = vrot.lane.b32.xlu1 %v3001_v0, %s20350_s30  ;;  %v1156_v63 = vmul.f32 %v20550_v32, %v20774_v9  ;;  %v1155_v0 = vmul.f32 %v20550_v32, %v20777_v10 }
 0x10c   : > { %v20765_v5 = vpop.permute.xlu0 %928  ;;  %v20767_v6 = vpop.permute.xlu1 %926 }
 0x10e   : > { %3064 = vrot.lane.b32.xlu0 %v2999_v24, %s20350_s30  ;;  %3038 = vrot.lane.b32.xlu1 %v2986_v7, %s20350_s30  ;;  %v1168_v24 = vmul.f32 %v20562_v37, %v20777_v10  ;;  %v1157_v7 = vmul.f32 %v20550_v32, %v20792_v26 }
 0x110   : > { %v20781_v11 = vpop.permute.xlu0 %922  ;;  %v20783_v12 = vpop.permute.xlu1 %896 }
 0x112   : > { %908 = vrot.lane.b32.xlu0 %v850_v22, %s27423_s23  ;;  %906 = vrot.lane.b32.xlu1 %v849_v23, %s27423_s23 }
 0x114   : > { %v20796_v27 = vpop.permute.xlu0 %1206  ;;  %v20798_v30 = vpop.permute.xlu1 %1204 }
 0x116   : > { %932 = vrot.lane.b32.xlu0 %v862_v33, %s27423_s23  ;;  %910 = vrot.lane.b32.xlu1 %v851_v35, %s27423_s23  ;;  %v1170_v33 = vmul.f32 %v20562_v37, %v20792_v26  ;;  %v1169_v35 = vmul.f32 %v20562_v37, %v20774_v9 }
 0x118   : > { %v20809_v39 = vpop.permute.xlu0 %1230  ;;  %v20811_v41 = vpop.permute.xlu1 %1208 }
 0x11a   : > { %936 = vrot.lane.b32.xlu0 %v864_v43, %s27423_s23  ;;  %934 = vrot.lane.b32.xlu1 %v863_v44, %s27423_s23 }
 0x11c   : > { %v20823_v49 = vpop.permute.xlu0 %1234  ;;  %v20825_v53 = vpop.permute.xlu1 %1232 }
 0x11e   : > { %930 = vrot.lane.b32.xlu0 %v861_v54, %s27423_s23  ;;  %904 = vrot.lane.b32.xlu1 %v848_v58, %s27423_s23  ;;  %v1167_v54 = vmul.f32 %v20562_v37, %v20819_v48  ;;  %v1154_v58 = vmul.f32 %v20550_v32, %v20819_v48 }
 0x120   : > { %v20833_v17 = vpop.permute.xlu0 %1228  ;;  %v20835_v59 = vpop.permute.xlu1 %1202 }
 0x122   : > { %1214 = vrot.lane.b32.xlu0 %v1156_v63, %s27488_s24  ;;  %1212 = vrot.lane.b32.xlu1 %v1155_v0, %s27488_s24 }
 0x124   : > { %v20843_v1 = vpop.permute.xlu0 %1512  ;;  %v20845_v2 = vpop.permute.xlu1 %1510 }
 0x126   : > { %1238 = vrot.lane.b32.xlu0 %v1168_v24, %s27488_s24  ;;  %1216 = vrot.lane.b32.xlu1 %v1157_v7, %s27488_s24  ;;  %v1462_v24 = vmul.f32 %v20578_v42, %v20774_v9  ;;  %v1461_v7 = vmul.f32 %v20578_v42, %v20777_v10 }
 0x128   : > { %v20853_v22 = vpop.permute.xlu0 %1536  ;;  %v20855_v23 = vpop.permute.xlu1 %1514 }
 0x129   : > { %27537 = vst [vmem:[#allocation35_spill] sm:$0xff] %v20855_v23 }
 0x12a   : > { %1242 = vrot.lane.b32.xlu0 %v1170_v33, %s27488_s24  ;;  %1240 = vrot.lane.b32.xlu1 %v1169_v35, %s27488_s24 }
 0x12c   : > { %v20863_v43 = vpop.permute.xlu0 %1540  ;;  %v20865_v44 = vpop.permute.xlu1 %1538 }
 0x12d   : > { %27538 = vst [vmem:[#allocation36_spill] sm:$0xff] %v20863_v43 }
 0x12e   : > { %1236 = vrot.lane.b32.xlu0 %v1167_v54, %s27488_s24  ;;  %1210 = vrot.lane.b32.xlu1 %v1154_v58, %s27488_s24  ;;  %v1474_v54 = vmul.f32 %v20590_v47, %v20777_v10  ;;  %v1463_v58 = vmul.f32 %v20578_v42, %v20792_v26 }
 0x130   : > { %v20873_v63 = vpop.permute.xlu0 %1534  ;;  %v20875_v0 = vpop.permute.xlu1 %1508 }
 0x132   : > { %1520 = vrot.lane.b32.xlu0 %v1462_v24, %s20345_s25  ;;  %1518 = vrot.lane.b32.xlu1 %v1461_v7, %s20345_s25  ;;  %v1476_v24 = vmul.f32 %v20590_v47, %v20792_v26  ;;  %v1475_v7 = vmul.f32 %v20590_v47, %v20774_v9 }
 0x134   : > { %v20883_v33 = vpop.permute.xlu0 %1818  ;;  %v20885_v35 = vpop.permute.xlu1 %1816 }
 0x136   : > { %1544 = vrot.lane.b32.xlu0 %v1474_v54, %s20345_s25  ;;  %1522 = vrot.lane.b32.xlu1 %v1463_v58, %s20345_s25  ;;  %v1473_v54 = vmul.f32 %v20590_v47, %v20819_v48  ;;  %v1460_v58 = vmul.f32 %v20578_v42, %v20819_v48 }
 0x138   : > { %v20893_v4 = vpop.permute.xlu0 %1842  ;;  %v20895_v14 = vpop.permute.xlu1 %1820 }
 0x139   : > { %27539 = vst [vmem:[#allocation37_spill] sm:$0xff] %v20895_v14 }
 0x13a   : > { %1548 = vrot.lane.b32.xlu0 %v1476_v24, %s20345_s25  ;;  %1546 = vrot.lane.b32.xlu1 %v1475_v7, %s20345_s25  ;;  %v1768_v24 = vmul.f32 %v20606_v52, %v20774_v9  ;;  %v1767_v7 = vmul.f32 %v20606_v52, %v20777_v10 }
 0x13c   : > { %v20903_v36 = vpop.permute.xlu0 %1846  ;;  %v20905_v37 = vpop.permute.xlu1 %1844 }
 0x13d   : > { %27540 = vst [vmem:[#allocation38_spill] sm:$0xff] %v20903_v36 }
 0x13e   : > { %1542 = vrot.lane.b32.xlu0 %v1473_v54, %s20345_s25  ;;  %1516 = vrot.lane.b32.xlu1 %v1460_v58, %s20345_s25  ;;  %v1780_v54 = vmul.f32 %v20618_v57, %v20777_v10  ;;  %v1769_v58 = vmul.f32 %v20606_v52, %v20792_v26 }
 0x140   : > { %v20913_v32 = vpop.permute.xlu0 %1840  ;;  %v20915_v28 = vpop.permute.xlu1 %1814 }
 0x142   : > { %1826 = vrot.lane.b32.xlu0 %v1768_v24, %s20346_s26  ;;  %1824 = vrot.lane.b32.xlu1 %v1767_v7, %s20346_s26  ;;  %v1782_v24 = vmul.f32 %v20618_v57, %v20792_v26  ;;  %v1781_v7 = vmul.f32 %v20618_v57, %v20774_v9 }
 0x144   : > { %v20923_v47 = vpop.permute.xlu0 %2124  ;;  %v20925_v42 = vpop.permute.xlu1 %2122 }
 0x146   : > { %1850 = vrot.lane.b32.xlu0 %v1780_v54, %s20346_s26  ;;  %1828 = vrot.lane.b32.xlu1 %v1769_v58, %s20346_s26  ;;  %v1779_v54 = vmul.f32 %v20618_v57, %v20819_v48  ;;  %v1766_v58 = vmul.f32 %v20606_v52, %v20819_v48 }
 0x148   : > { %v20933_v25 = vpop.permute.xlu0 %2148  ;;  %v20935_v20 = vpop.permute.xlu1 %2126 }
 0x149   : > { %27541 = vst [vmem:[#allocation39_spill] sm:$0xff] %v20933_v25  ;;  %27542 = vst [vmem:[#allocation40_spill] sm:$0xff] %v20935_v20  ;;  %v21019_v25 = vmul.f32 %v20704_v38, %v20792_v26 }
 0x14a   : > { %1854 = vrot.lane.b32.xlu0 %v1782_v24, %s20346_s26  ;;  %1852 = vrot.lane.b32.xlu1 %v1781_v7, %s20346_s26  ;;  %v2074_v24 = vmul.f32 %v20634_v62, %v20774_v9  ;;  %v2073_v7 = vmul.f32 %v20634_v62, %v20777_v10 }
 0x14b   : > { %27554 = vst [vmem:[#allocation52_spill] sm:$0xff] %v21019_v25 }
 0x14c   : > { %v20943_v21 = vpop.permute.xlu0 %2152  ;;  %v20945_v16 = vpop.permute.xlu1 %2150 }
 0x14d   : > { %27543 = vst [vmem:[#allocation41_spill] sm:$0xff] %v20943_v21  ;;  %27544 = vst [vmem:[#allocation42_spill] sm:$0xff] %v20945_v16  ;;  %v669_v16 = vmul.f32 %v20508_v18, %v20722_v46 }
 0x14e   : > { %1848 = vrot.lane.b32.xlu0 %v1779_v54, %s20346_s26  ;;  %1822 = vrot.lane.b32.xlu1 %v1766_v58, %s20346_s26  ;;  %v2086_v54 = vmul.f32 %v20646_v3, %v20777_v10  ;;  %v2075_v58 = vmul.f32 %v20634_v62, %v20792_v26 }
 0x150   : > { %v20953_v15 = vpop.permute.xlu0 %2146  ;;  %v20955_v40 = vpop.permute.xlu1 %2120 }
 0x151   : > { %27545 = vst [vmem:[#allocation43_spill] sm:$0xff] %v20953_v15  ;;  %27546 = vst [vmem:[#allocation44_spill] sm:$0xff] %v20955_v40 }
 0x152   : > { %2132 = vrot.lane.b32.xlu0 %v2074_v24, %s20347_s27  ;;  %2130 = vrot.lane.b32.xlu1 %v2073_v7, %s20347_s27  ;;  %v2088_v24 = vmul.f32 %v20646_v3, %v20792_v26  ;;  %v2087_v7 = vmul.f32 %v20646_v3, %v20774_v9 }
 0x154   : > { %v20963_v57 = vpop.permute.xlu0 %2430  ;;  %v20965_v52 = vpop.permute.xlu1 %2428 }
 0x156   : > { %2156 = vrot.lane.b32.xlu0 %v2086_v54, %s20347_s27  ;;  %2134 = vrot.lane.b32.xlu1 %v2075_v58, %s20347_s27  ;;  %v2085_v54 = vmul.f32 %v20646_v3, %v20819_v48  ;;  %v2072_v58 = vmul.f32 %v20634_v62, %v20819_v48  ;;  %v2381_v3 = vmul.f32 %v20662_v8, %v20792_v26 }
 0x157   : > { %v21003_v62 = vmul.f32 %v20662_v8, %v20819_v48 }
 0x158   : > { %v20973_v34 = vpop.permute.xlu0 %2454  ;;  %v20975_v40 = vpop.permute.xlu1 %2432 }
 0x159   : > { %27547 = vst [vmem:[#allocation45_spill] sm:$0xff] %v20973_v34  ;;  %27548 = vst [vmem:[#allocation46_spill] sm:$0xff] %v20975_v40  ;;  %v679_v34 = vmul.f32 %v20546_v31, %v20720_v45 }
 0x15a   : > { %2160 = vrot.lane.b32.xlu0 %v2088_v24, %s20347_s27  ;;  %2158 = vrot.lane.b32.xlu1 %v2087_v7, %s20347_s27  ;;  %v2380_v24 = vmul.f32 %v20662_v8, %v20774_v9  ;;  %v2379_v7 = vmul.f32 %v20662_v8, %v20777_v10  ;;  %v21023_v8 = vmul.f32 %v20704_v38, %v20774_v9 }
 0x15c   : > { %v20983_v15 = vpop.permute.xlu0 %2458  ;;  %v20985_v21 = vpop.permute.xlu1 %2456  ;;  %27555 = vst [vmem:[#allocation53_spill] sm:$0xff] %v21023_v8 }
 0x15d   : > { %27549 = vst [vmem:[#allocation47_spill] sm:$0xff] %v20983_v15  ;;  %27550 = vst [vmem:[#allocation48_spill] sm:$0xff] %v20985_v21  ;;  %v680_v15 = vmul.f32 %v20512_v19, %v20720_v45 }
 0x15e   : > { %2154 = vrot.lane.b32.xlu0 %v2085_v54, %s20347_s27  ;;  %2128 = vrot.lane.b32.xlu1 %v2072_v58, %s20347_s27  ;;  %v21007_v54 = vmul.f32 %v20704_v38, %v20777_v10  ;;  %v681_v58 = vmul.f32 %v20508_v18, %v20720_v45  ;;  %v667_v45 = vmul.f32 %v20546_v31, %v20722_v46 }
 0x15f   : > { %v2394_v38 = vmul.f32 %v20674_v13, %v20792_v26  ;;  %v2391_v18 = vmul.f32 %v20674_v13, %v20819_v48  ;;  %v704_v8 = vadd.f32 %v680_v15, %v20732_v50  ;;  %v21044_v31 = vmul.f32 %v20688_v29, %v20774_v9 }
 0x160   : > { %27551 = vst [vmem:[#allocation49_spill] sm:$0xff] %v21007_v54  ;;  %v21013_v21 = vpop.permute.xlu0 %2452  ;;  %v21015_v40 = vpop.permute.xlu1 %2426  ;;  %v668_v54 = vmul.f32 %v20512_v19, %v20722_v46  ;;  %v2393_v19 = vmul.f32 %v20674_v13, %v20774_v9  ;;  %v950_v46 = vsel %vm948_vm0, %v20744_v56, %v20742_v55  ;;  %v951_v15 = vsel %vm948_vm0, %v20742_v55, %v20754_v61 }
 0x161   : > { %27552 = vst [vmem:[#allocation50_spill] sm:$0xff] %v21013_v21  ;;  %27553 = vst [vmem:[#allocation51_spill] sm:$0xff] %v21015_v40  ;;  %v2392_v40 = vmul.f32 %v20674_v13, %v20777_v10  ;;  %v705_v13 = vadd.f32 %v681_v58, %v20732_v50  ;;  %v703_v9 = vadd.f32 %v679_v34, %v20732_v50 }
 0x162   : > { %2438 = vrot.lane.b32.xlu0 %v2380_v24, %s20348_s28  ;;  %2436 = vrot.lane.b32.xlu1 %v2379_v7, %s20348_s28  ;;  %v21048_v24 = vmul.f32 %v20688_v29, %v20777_v10  ;;  %v21052_v7 = vmul.f32 %v20688_v29, %v20792_v26  ;;  %v692_v25 = vadd.f32 %v668_v54, %v20734_v51 }
 0x163   : > { %v693_v26 = vadd.f32 %v669_v16, %v20734_v51  ;;  %v962_v29 = vsel %vm948_vm0, %v20752_v60, %v20767_v6  ;;  %v691_v21 = vadd.f32 %v667_v45, %v20734_v51  ;;  %v963_v55 = vsel %vm948_vm0, %v20767_v6, %v20765_v5 }
 0x164   : > { %v21062_v48 = vpop.permute.xlu0 %2736  ;;  %v21064_v10 = vpop.permute.xlu1 %2734  ;;  %v961_v34 = vsel %vm948_vm0, %v20781_v11, %v20752_v60  ;;  %v949_v54 = vsel %vm948_vm0, %v20783_v12, %v20744_v56  ;;  %v998_v16 = vadd.f32 %v950_v46, %v692_v25  ;;  %v1256_v45 = vsel %vm1254_vm1, %v20798_v30, %v20796_v27 }
 0x165   : > { %v999_v58 = vadd.f32 %v951_v15, %v693_v26  ;;  %v1010_v6 = vadd.f32 %v962_v29, %v704_v8  ;;  %v1257_v60 = vsel %vm1254_vm1, %v20796_v27, %v20811_v41  ;;  %v1268_v56 = vsel %vm1254_vm1, %v20809_v39, %v20825_v53 }
 0x166   : > { %2462 = vrot.lane.b32.xlu0 %v2392_v40, %s20348_s28  ;;  %2440 = vrot.lane.b32.xlu1 %v2381_v3, %s20348_s28  ;;  %v1269_v3 = vsel %vm1254_vm1, %v20825_v53, %v20823_v49  ;;  %v1011_v46 = vadd.f32 %v963_v55, %v705_v13  ;;  %v1009_v11 = vadd.f32 %v961_v34, %v703_v9 }
 0x167   : > { %v997_v12 = vadd.f32 %v949_v54, %v691_v21  ;;  %v1267_v8 = vsel %vm1254_vm1, %v20833_v17, %v20809_v39  ;;  %v1304_v29 = vadd.f32 %v1256_v45, %v998_v16  ;;  %v1255_v26 = vsel %vm1254_vm1, %v20835_v59, %v20798_v30 }
 0x168   : > { %v21095_v25 = vpop.permute.xlu0 %2760  ;;  %v21097_v40 = vpop.permute.xlu1 %2738  ;;  %v1562_v27 = vsel %vm1560_vm2, %v20845_v2, %v20843_v1  ;;  %v1305_v13 = vadd.f32 %v1257_v60, %v999_v58  ;;  %v1316_v21 = vadd.f32 %v1268_v56, %v1010_v6  ;;  %v1317_v9 = vadd.f32 %v1269_v3, %v1011_v46 }
 0x169   : > { %27556 = vst [vmem:[#allocation54_spill] sm:$0xff] %v21097_v40  ;;  %v1563_v39 = vsel %vm1560_vm2, %v20843_v1, %v20855_v23  ;;  %v1315_v53 = vadd.f32 %v1267_v8, %v1009_v11  ;;  %v1574_v30 = vsel %vm1560_vm2, %v20853_v22, %v20865_v44  ;;  %v1575_v17 = vsel %vm1560_vm2, %v20865_v44, %v20863_v43  ;;  %v27559_v8 = vld [vmem:[#allocation39_spill] sm:$0xff] }
 0x16a   : > { %2466 = vrot.lane.b32.xlu0 %v2394_v38, %s20348_s28  ;;  %2464 = vrot.lane.b32.xlu1 %v2393_v19, %s20348_s28  ;;  %v1573_v38 = vsel %vm1560_vm2, %v20873_v63, %v20853_v22  ;;  %v1303_v15 = vadd.f32 %v1255_v26, %v997_v12  ;;  %v1610_v55 = vadd.f32 %v1562_v27, %v1304_v29  ;;  %v27558_v12 = vld [vmem:[#allocation42_spill] sm:$0xff]  ;;  %v27561_v27 = vld [vmem:[#allocation41_spill] sm:$0xff] }
 0x16b   : > { %v1561_v1 = vsel %vm1560_vm2, %v20875_v0, %v20845_v2  ;;  %v1868_v34 = vsel %vm1866_vm3, %v20885_v35, %v20883_v33  ;;  %v1611_v54 = vadd.f32 %v1563_v39, %v1305_v13  ;;  %v1869_v44 = vsel %vm1866_vm3, %v20883_v33, %v20895_v14  ;;  %v27560_v29 = vld [vmem:[#allocation46_spill] sm:$0xff] }
 0x16c   : > { %v21122_v59 = vpop.permute.xlu0 %2764  ;;  %v21124_v19 = vpop.permute.xlu1 %2762  ;;  %v1880_v22 = vsel %vm1866_vm3, %v20893_v4, %v20905_v37  ;;  %v1622_v2 = vadd.f32 %v1574_v30, %v1316_v21  ;;  %v1623_v63 = vadd.f32 %v1575_v17, %v1317_v9  ;;  %v1621_v0 = vadd.f32 %v1573_v38, %v1315_v53  ;;  %v27563_v38 = vld [vmem:[#allocation44_spill] sm:$0xff] }
 0x16d   : > { %27557 = vst [vmem:[#allocation55_spill] sm:$0xff] %v21122_v59  ;;  %v2174_v16 = vsel %vm2172_vm4, %v20925_v42, %v20923_v47  ;;  %v1609_v58 = vadd.f32 %v1561_v1, %v1303_v15  ;;  %v1916_v45 = vadd.f32 %v1868_v34, %v1610_v55  ;;  %v1881_v33 = vsel %vm1866_vm3, %v20905_v37, %v20903_v36  ;;  %v27564_v34 = vld [vmem:[#allocation49_spill] sm:$0xff] }
 0x16e   : > { %2460 = vrot.lane.b32.xlu0 %v2391_v18, %s20348_s28  ;;  %2434 = vrot.lane.b32.xlu1 %v21003_v62, %s20348_s28  ;;  %v1879_v18 = vsel %vm1866_vm3, %v20913_v32, %v20893_v4  ;;  %v1917_v62 = vadd.f32 %v1869_v44, %v1611_v54  ;;  %v1928_v56 = vadd.f32 %v1880_v22, %v1622_v2  ;;  %v27565_v22 = vld [vmem:[#allocation48_spill] sm:$0xff]  ;;  %v27566_v2 = vld [vmem:[#allocation45_spill] sm:$0xff] }
 0x16f   : > { %v2175_v3 = vsel %vm2172_vm4, %v20923_v47, %v20935_v20  ;;  %v2480_v46 = vsel %vm2478_vm5, %v20965_v52, %v20963_v57  ;;  %v1867_v37 = vsel %vm1866_vm3, %v20915_v28, %v20885_v35  ;;  %v2222_v11 = vadd.f32 %v2174_v16, %v1916_v45  ;;  %v27622_v20 = vld [vmem:[#allocation17_spill] sm:$0xff] }
 0x170   : > { %v2759_v6 = vpop.permute.xlu0 %2758  ;;  %v2733_v60 = vpop.permute.xlu1 %2732  ;;  %v2186_v32 = vsel %vm2172_vm4, %v27559_v8, %v27558_v12  ;;  %v1929_v47 = vadd.f32 %v1881_v33, %v1623_v63  ;;  %v1927_v4 = vadd.f32 %v1879_v18, %v1621_v0  ;;  %v2481_v26 = vsel %vm2478_vm5, %v20963_v57, %v27560_v29  ;;  %v27567_v63 = vld [vmem:[#allocation47_spill] sm:$0xff] }
 0x171   : > { %v2786_v28 = vsel %vm2784_vm6, %v21064_v10, %v21062_v48  ;;  %v2223_v35 = vadd.f32 %v2175_v3, %v1917_v62  ;;  %v2187_v13 = vsel %vm2172_vm4, %v27558_v12, %v27561_v27  ;;  %v2528_v21 = vadd.f32 %v2480_v46, %v2222_v11 }
 0x172   : > { %2744 = vrot.lane.b32.xlu0 %v21044_v31, %s20349_s29  ;;  %2742 = vrot.lane.b32.xlu1 %v21048_v24, %s20349_s29  ;;  %v27562_v31 = vld [vmem:[#allocation43_spill] sm:$0xff]  ;;  %v1915_v53 = vadd.f32 %v1867_v37, %v1609_v58  ;;  %v2234_v30 = vadd.f32 %v2186_v32, %v1928_v56  ;;  %v2787_v57 = vsel %vm2784_vm6, %v21062_v48, %v21097_v40  ;;  %v27573_v32 = vld [vmem:[#allocation53_spill] sm:$0xff] }
 0x173   : > { %v2185_v24 = vsel %vm2172_vm4, %v27562_v31, %v27559_v8  ;;  %v2173_v15 = vsel %vm2172_vm4, %v27563_v38, %v20925_v42  ;;  %v2529_v55 = vadd.f32 %v2481_v26, %v2223_v35  ;;  %v2834_v1 = vadd.f32 %v2786_v28, %v2528_v21  ;;  %v27568_v42 = vld [vmem:[#allocation50_spill] sm:$0xff]  ;;  %v27569_v58 = vld [vmem:[#allocation51_spill] sm:$0xff]  ;;  %v27572_v8 = vld [vmem:[#allocation52_spill] sm:$0xff] }
 0x174   : > { %v3043_v9 = vpop.permute.xlu0 %3042  ;;  %v3041_v39 = vpop.permute.xlu1 %3040  ;;  %v2235_v54 = vadd.f32 %v2187_v13, %v1929_v47  ;;  %v2233_v44 = vadd.f32 %v2185_v24, %v1927_v4  ;;  %v2492_v48 = vsel %vm2478_vm5, %v27566_v2, %v27565_v22  ;;  %v2493_v0 = vsel %vm2478_vm5, %v27565_v22, %v27567_v63  ;;  %v27574_v26 = vld [vmem:[#allocation34_spill] sm:$0xff]  ;;  %v27575_v28 = vld [vmem:[#allocation24_spill] sm:$0xff] }
 0x175   : > { %v3092_v17 = vsel %vm3090_vm7, %v3041_v39, %v3043_v9  ;;  %v2491_v16 = vsel %vm2478_vm5, %v27568_v42, %v27566_v2  ;;  %v2479_v45 = vsel %vm2478_vm5, %v27569_v58, %v20965_v52  ;;  %v2835_v33 = vadd.f32 %v2787_v57, %v2529_v55 }
 0x176   : > { %2768 = vrot.lane.b32.xlu0 %v27564_v34, %s20349_s29  ;;  %2746 = vrot.lane.b32.xlu1 %v21052_v7, %s20349_s29  ;;  %v3140_v7 = vadd.f32 %v3092_v17, %v2834_v1  ;;  %v2221_v56 = vadd.f32 %v2173_v15, %v1915_v53  ;;  %v2798_v3 = vsel %vm2784_vm6, %v21095_v25, %v21124_v19 }
 0x177   : > { %v2799_v46 = vsel %vm2784_vm6, %v21124_v19, %v21122_v59  ;;  %v2540_v11 = vadd.f32 %v2492_v48, %v2234_v30  ;;  %v2541_v12 = vadd.f32 %v2493_v0, %v2235_v54  ;;  %v2539_v47 = vadd.f32 %v2491_v16, %v2233_v44  ;;  %v27576_v19 = vld [vmem:[#allocation22_spill] sm:$0xff] }
 0x178   : > { %v3067_v18 = vpop.permute.xlu0 %3066  ;;  %v21201_v62 = vpop.permute.xlu1 %3044  ;;  %v2527_v4 = vadd.f32 %v2479_v45, %v2221_v56  ;;  %v2697_v35 = vmul.f32 %v27575_v28, %v27574_v26  ;;  %v2684_v13 = vmul.f32 %v27576_v19, %v27574_v26  ;;  %v3212_v21 = vmax.f32 %v3140_v7, 0.0  ;;  %v21414_v59 = vld [vmem:[%s20495_s20 + $0x8] sm:$0x1f] }
 0x179   : > { %27570 = vst [vmem:[#allocation42_spill] sm:$0xff] %v21201_v62  ;;  %v3093_v37 = vsel %vm3090_vm7, %v3043_v9, %v21201_v62  ;;  %v2846_v31 = vadd.f32 %v2798_v3, %v2540_v11  ;;  %v2847_v24 = vadd.f32 %v2799_v46, %v2541_v12  ;;  %v2797_v57 = vsel %vm2784_vm6, %v2759_v6, %v21095_v25  ;;  %v27580_v25 = vld [vmem:[#allocation30_spill] sm:$0xff]  ;;  %v27581_v6 = vld [vmem:[#allocation23_spill] sm:$0xff]  ;;  %v27585_v12 = vld [vmem:[#allocation32_spill] sm:$0xff] }
 0x17a   : > { %v21211_v52 = vadd.f32 %v3093_v37, %v2835_v33  ;;  %2772 = vrot.lane.b32.xlu0 %v27572_v8, %s20349_s29  ;;  %2770 = vrot.lane.b32.xlu1 %v27573_v32, %s20349_s29  ;;  %v2785_v17 = vsel %vm2784_vm6, %v2733_v60, %v21064_v10  ;;  %v2992_v54 = vmul.f32 %v27581_v6, %v27580_v25  ;;  %v27582_v10 = vld [vmem:[#allocation31_spill] sm:$0xff] }
 0x17b   : > { %v2991_v60 = vmul.f32 %v27581_v6, %v27582_v10  ;;  %v2845_v44 = vadd.f32 %v2797_v57, %v2539_v47  ;;  %v2833_v22 = vadd.f32 %v2785_v17, %v2527_v4  ;;  %v2993_v8 = vmul.f32 %v27581_v6, %v27585_v12  ;;  %27611 = vst [vmem:[#allocation60_spill] sm:$0xff] %v21414_v59 }
 0x17c   : > { %27571 = vst [vmem:[#allocation39_spill] sm:$0xff] %v21211_v52  ;;  %v27301_v9 = vmax.f32 %v21211_v52, 0.0  ;;  %v21222_v53 = vpop.permute.xlu0 %3070  ;;  %v3069_v30 = vpop.permute.xlu1 %3068 }
 0x17d   : > { %27577 = vst [vmem:[#allocation43_spill] sm:$0xff] %v21222_v53  ;;  %v3104_v38 = vsel %vm3090_vm7, %v3067_v18, %v3069_v30  ;;  %v3105_v15 = vsel %vm3090_vm7, %v3069_v30, %v21222_v53  ;;  %v21282_v30 = vld [vmem:[%s27224_s4] sm:$0xff] }
 0x17e   : > { %v3152_v55 = vadd.f32 %v3104_v38, %v2846_v31  ;;  %v21231_v1 = vadd.f32 %v3105_v15, %v2847_v24  ;;  %2766 = vrot.lane.b32.xlu0 %v2697_v35, %s20349_s29  ;;  %2740 = vrot.lane.b32.xlu1 %v2684_v13, %s20349_s29  ;;  %v21237_v34 = vpack.i.bf16 %v27301_v9, %v3212_v21  ;;  %v27302_v24 = vmov 0.0  }
 0x17f   : > { %3485 = vmatprep.mubr.f32.mxu0 %v27302_v24  ;;  %3574 = vmatprep.mubr.f32.mxu1 %v27302_v24  ;;  %27589 = vst [vmem:[#allocation52_spill] sm:$0xff] %v21282_v30  ;;  %v2990_v15 = vmul.f32 %v27581_v6, %v27574_v26 }
 0x180   : > { %27578 = vst [vmem:[#allocation44_spill] sm:$0xff] %v21231_v1  ;;  %27579 = vst [vmem:[#allocation49_spill] sm:$0xff] %v21237_v34  ;;  %v3224_v2 = vmax.f32 %v3152_v55, 0.0  ;;  %v27300_v48 = vmax.f32 %v21231_v1, 0.0  ;;  %v3065_v0 = vpop.permute.xlu0 %3064  ;;  %v3039_v42 = vpop.permute.xlu1 %3038  ;;  %v27591_v55 = vld [vmem:[#allocation6_spill] sm:$0xff] }
 0x181   : > { %v3103_v16 = vsel %vm3090_vm7, %v3065_v0, %v3067_v18  ;;  %v3091_v58 = vsel %vm3090_vm7, %v3039_v42, %v3041_v39  ;;  %v27584_v39 = vld [vmem:[#allocation25_spill] sm:$0xff] }
 0x182   : > { %v3151_v45 = vadd.f32 %v3103_v16, %v2845_v44  ;;  %v3139_v33 = vadd.f32 %v3091_v58, %v2833_v22  ;;  %3050 = vrot.lane.b32.xlu0 %v2992_v54, %s20350_s30  ;;  %3048 = vrot.lane.b32.xlu1 %v2991_v60, %s20350_s30  ;;  %v19002_v7 = vpack.c.bf16 %v3224_v2, %v3212_v21  ;;  %v21274_v21 = vld [vmem:[%s20495_s20 + $0x8] sm:$0x1f]  ;;  %v27592_v60 = vld [vmem:[#allocation7_spill] sm:$0xff]  ;;  %v27593_v0 = vld [vmem:[#allocation9_spill] sm:$0xff] }
 0x183   : > { %v21250_v56 = vpack.i.bf16 %v27300_v48, %v3224_v2  ;;  %v3004_v18 = vmul.f32 %v27584_v39, %v27582_v10  ;;  %v3006_v13 = vmul.f32 %v27584_v39, %v27585_v12  ;;  %v3005_v31 = vmul.f32 %v27584_v39, %v27580_v25  ;;  %27588 = vst [vmem:[#allocation51_spill] sm:$0xff] %v21274_v21  ;;  %v27594_v58 = vld [vmem:[#allocation8_spill] sm:$0xff] }
 0x184   : > { %v3223_v3 = vmax.f32 %v3151_v45, 0.0  ;;  %v3211_v46 = vmax.f32 %v3139_v33, 0.0  ;;  %v21252_v37 = vpop.permute.xlu0 %908  ;;  %v21254_v11 = vpop.permute.xlu1 %906  ;;  %19003 = vmatprep.subr.bf16.mxu0 %v19002_v7  ;;  %v3003_v38 = vmul.f32 %v27584_v39, %v27574_v26  ;;  %v822_v54 = vrot.slane %v21274_v21, %v27591_v55 }
 0x185   : > { %27583 = vst [vmem:[#allocation48_spill] sm:$0xff] %v21250_v56  ;;  %v818_v44 = vrot.slane %v21274_v21, %v27592_v60  ;;  %v826_v45 = vrot.slane %v21274_v21, %v27594_v58 }
 0x186   : > { %3074 = vrot.lane.b32.xlu0 %v3004_v18, %s20350_s30  ;;  %3052 = vrot.lane.b32.xlu1 %v2993_v8, %s20350_s30  ;;  %v19004_v32 = vpack.c.bf16 %v3223_v3, %v3211_v46  ;;  %v21262_v47 = vpack.i.bf16 %v3223_v3, %v3211_v46  ;;  %v854_v42 = vmul.f32 %v822_v54, %v27593_v0  ;;  %v27595_v3 = vld [vmem:[#allocation10_spill] sm:$0xff] }
 0x187   : > { %v853_v16 = vmul.f32 %v818_v44, %v27593_v0  ;;  %v866_v46 = vmul.f32 %v818_v44, %v27595_v3  ;;  %v855_v18 = vmul.f32 %v826_v45, %v27593_v0 }
 0x188   : > { %27586 = vst [vmem:[#allocation45_spill] sm:$0xff] %v21262_v47  ;;  %v21264_v4 = vpop.permute.xlu0 %932  ;;  %v21266_v35 = vpop.permute.xlu1 %910  ;;  %19005 = vmatpush1.bf16.msra.mxu0 %v19004_v32  ;;  %v868_v32 = vmul.f32 %v826_v45, %v27595_v3 }
 0x189   : > { %27587 = vst [vmem:[#allocation50_spill] sm:$0xff] %v21266_v35 }
 0x18a   : > { %3078 = vrot.lane.b32.xlu0 %v3006_v13, %s20350_s30  ;;  %3076 = vrot.lane.b32.xlu1 %v3005_v31, %s20350_s30  ;;  %v867_v13 = vmul.f32 %v822_v54, %v27595_v3  ;;  %v27596_v31 = vld [vmem:[#allocation11_spill] sm:$0xff] }
 0x18b   : > { %17314 = vmatmul.mubr.msk.f32.vlgmr.msra.gmra.mrb[0].mxu0 %vm3408_vm8, %v21282_v30 }
 0x18c   : > { %v21284_v57 = vpop.permute.xlu0 %936  ;;  %v21286_v17 = vpop.permute.xlu1 %934  ;;  %3491 = vmatprep.mubr.f32.mxu0 %v27302_v24 }
 0x18d   : > { %27590 = vst [vmem:[#allocation53_spill] sm:$0xff] %v21284_v57 }
 0x18e   : > { %3072 = vrot.lane.b32.xlu0 %v3003_v38, %s20350_s30  ;;  %3046 = vrot.lane.b32.xlu1 %v2990_v15, %s20350_s30  ;;  %v814_v38 = vrot.slane %v21274_v21, %v27596_v31  ;;  %v21328_v15 = vld [vmem:[%s20495_s20 + $0x8] sm:$0x1f] }
 0x18f   : > { %27597 = vst [vmem:[#allocation34_spill] sm:$0xff] %v21328_v15  ;;  %v1128_v45 = vrot.slane %v21328_v15, %v27591_v55  ;;  %v1132_v24 = vrot.slane %v21328_v15, %v27594_v58  ;;  %v21371_v21 = vld [vmem:[%s20495_s20 + $0x8] sm:$0x1f] }
 0x190   : > { %v21301_v22 = vpop.permute.xlu0 %930  ;;  %v21303_v2 = vpop.permute.xlu1 %904  ;;  %v852_v54 = vmul.f32 %v814_v38, %v27593_v0  ;;  %27601 = vst [vmem:[#allocation22_spill] sm:$0xff] %v21371_v21  ;;  %v1438_v52 = vrot.slane %v21371_v21, %v27594_v58  ;;  %v1426_v40 = vrot.slane %v21371_v21, %v27596_v31 }
 0x192   : > { %916 = vrot.lane.b32.xlu0 %v854_v42, %s27423_s23  ;;  %914 = vrot.lane.b32.xlu1 %v853_v16, %s27423_s23  ;;  %v865_v16 = vmul.f32 %v814_v38, %v27595_v3 }
 0x194   : > { %v21311_v33 = vpop.permute.xlu0 %1214  ;;  %v21313_v7 = vpop.permute.xlu1 %1212 }
 0x196   : > { %940 = vrot.lane.b32.xlu0 %v866_v46, %s27423_s23  ;;  %918 = vrot.lane.b32.xlu1 %v855_v18, %s27423_s23  ;;  %v1124_v46 = vrot.slane %v21328_v15, %v27592_v60 }
 0x198   : > { %v21319_v12 = vpop.permute.xlu0 %1238  ;;  %v21321_v8 = vpop.permute.xlu1 %1216 }
 0x19a   : > { %944 = vrot.lane.b32.xlu0 %v868_v32, %s27423_s23  ;;  %942 = vrot.lane.b32.xlu1 %v867_v13, %s27423_s23  ;;  %v27598_v13 = vld [vmem:[#allocation12_spill] sm:$0xff] }
 0x19b   : > { %v1160_v48 = vmul.f32 %v1128_v45, %v27598_v13  ;;  %v1159_v9 = vmul.f32 %v1124_v46, %v27598_v13  ;;  %v1161_v34 = vmul.f32 %v1132_v24, %v27598_v13 }
 0x19c   : > { %v21332_v44 = vpop.permute.xlu0 %1242  ;;  %v21334_v42 = vpop.permute.xlu1 %1240 }
 0x19e   : > { %938 = vrot.lane.b32.xlu0 %v865_v16, %s27423_s23  ;;  %912 = vrot.lane.b32.xlu1 %v852_v54, %s27423_s23  ;;  %v27599_v54 = vld [vmem:[#allocation13_spill] sm:$0xff] }
 0x19f   : > { %v1172_v47 = vmul.f32 %v1124_v46, %v27599_v54  ;;  %v1173_v3 = vmul.f32 %v1128_v45, %v27599_v54  ;;  %v1430_v45 = vrot.slane %v21371_v21, %v27592_v60 }
 0x1a0   : > { %v21344_v18 = vpop.permute.xlu0 %1236  ;;  %v21346_v32 = vpop.permute.xlu1 %1210 }
 0x1a2   : > { %1222 = vrot.lane.b32.xlu0 %v1160_v48, %s27488_s24  ;;  %1220 = vrot.lane.b32.xlu1 %v1159_v9, %s27488_s24  ;;  %v1174_v48 = vmul.f32 %v1132_v24, %v27599_v54  ;;  %v1120_v9 = vrot.slane %v21328_v15, %v27596_v31  ;;  %v1434_v24 = vrot.slane %v21371_v21, %v27591_v55  ;;  %v27605_v15 = vld [vmem:[#allocation14_spill] sm:$0xff]  ;;  %v27615_v21 = vmov 0.0  }
 0x1a3   : > { %v1467_v62 = vmul.f32 %v1438_v52, %v27605_v15 }
 0x1a4   : > { %v21354_v38 = vpop.permute.xlu0 %1520  ;;  %v21356_v16 = vpop.permute.xlu1 %1518  ;;  %v1171_v46 = vmul.f32 %v1120_v9, %v27599_v54  ;;  %v1158_v30 = vmul.f32 %v1120_v9, %v27598_v13  ;;  %v1466_v1 = vmul.f32 %v1434_v24, %v27605_v15  ;;  %v1465_v54 = vmul.f32 %v1430_v45, %v27605_v15 }
 0x1a6   : > { %1246 = vrot.lane.b32.xlu0 %v1172_v47, %s27488_s24  ;;  %1224 = vrot.lane.b32.xlu1 %v1161_v34, %s27488_s24 }
 0x1a8   : > { %v21362_v56 = vpop.permute.xlu0 %1544  ;;  %v21364_v0 = vpop.permute.xlu1 %1522 }
 0x1a9   : > { %27600 = vst [vmem:[#allocation24_spill] sm:$0xff] %v21362_v56 }
 0x1aa   : > { %1250 = vrot.lane.b32.xlu0 %v1174_v48, %s27488_s24  ;;  %1248 = vrot.lane.b32.xlu1 %v1173_v3, %s27488_s24 }
 0x1ac   : > { %v21375_v47 = vpop.permute.xlu0 %1548  ;;  %v21377_v34 = vpop.permute.xlu1 %1546 }
 0x1ad   : > { %27602 = vst [vmem:[#allocation30_spill] sm:$0xff] %v21375_v47 }
 0x1ae   : > { %1244 = vrot.lane.b32.xlu0 %v1171_v46, %s27488_s24  ;;  %1218 = vrot.lane.b32.xlu1 %v1158_v30, %s27488_s24  ;;  %v27608_v30 = vld [vmem:[#allocation15_spill] sm:$0xff] }
 0x1af   : > { %v1478_v13 = vmul.f32 %v1430_v45, %v27608_v30 }
 0x1b0   : > { %v21387_v48 = vpop.permute.xlu0 %1542  ;;  %v21389_v3 = vpop.permute.xlu1 %1516 }
 0x1b1   : > { %27603 = vst [vmem:[#allocation31_spill] sm:$0xff] %v21387_v48  ;;  %27604 = vst [vmem:[#allocation32_spill] sm:$0xff] %v21389_v3 }
 0x1b2   : > { %1528 = vrot.lane.b32.xlu0 %v1466_v1, %s20345_s25  ;;  %1526 = vrot.lane.b32.xlu1 %v1465_v54, %s20345_s25  ;;  %v1480_v1 = vmul.f32 %v1438_v52, %v27608_v30  ;;  %v1479_v54 = vmul.f32 %v1434_v24, %v27608_v30  ;;  %v1477_v52 = vmul.f32 %v1426_v40, %v27608_v30  ;;  %v21441_v30 = vld [vmem:[%s27224_s4 + $0x20] sm:$0xff] }
 0x1b3   : > { %v1740_v24 = vrot.slane %v21414_v59, %v27591_v55  ;;  %27616 = vst [vmem:[#allocation64_spill] sm:$0xff] %v21441_v30 }
 0x1b4   : > { %v21397_v9 = vpop.permute.xlu0 %1826  ;;  %v21399_v46 = vpop.permute.xlu1 %1824 }
 0x1b5   : > { %27606 = vst [vmem:[#allocation56_spill] sm:$0xff] %v21397_v9  ;;  %27607 = vst [vmem:[#allocation57_spill] sm:$0xff] %v21399_v46 }
 0x1b6   : > { %1552 = vrot.lane.b32.xlu0 %v1478_v13, %s20345_s25  ;;  %1530 = vrot.lane.b32.xlu1 %v1467_v62, %s20345_s25  ;;  %v21421_v62 = vld [vmem:[%s27224_s4 + $0x10] sm:$0xff] }
 0x1b7   : > { %27612 = vst [vmem:[#allocation61_spill] sm:$0xff] %v21421_v62  ;;  %17315 = vmatmul.mubr.msk.f32.gmra.mrb[2].mxu0 %vm3408_vm8, %v21421_v62  ;;  %v27619_v62 = vld [vmem:[#allocation16_spill] sm:$0xff] }
 0x1b8   : > { %v21405_v53 = vpop.permute.xlu0 %1850  ;;  %v21407_v39 = vpop.permute.xlu1 %1828  ;;  %3497 = vmatprep.mubr.f32.mxu0 %v27615_v21 }
 0x1b9   : > { %27609 = vst [vmem:[#allocation58_spill] sm:$0xff] %v21405_v53  ;;  %27610 = vst [vmem:[#allocation59_spill] sm:$0xff] %v21407_v39  ;;  %v27639_v39 = vld [vmem:[#allocation27_spill] sm:$0xff] }
 0x1ba   : > { %1556 = vrot.lane.b32.xlu0 %v1480_v1, %s20345_s25  ;;  %1554 = vrot.lane.b32.xlu1 %v1479_v54, %s20345_s25  ;;  %v1464_v1 = vmul.f32 %v1426_v40, %v27605_v15  ;;  %v1736_v54 = vrot.slane %v21414_v59, %v27592_v60  ;;  %v1772_v40 = vmul.f32 %v1740_v24, %v27619_v62 }
 0x1bb   : > { %17316 = vmatmul.mubr.msk.f32.gmra.mrb[4].mxu0 %vm3408_vm8, %v21441_v30  ;;  %v672_v46 = vmul.f32 %v27582_v10, %v27639_v39  ;;  %v673_v23 = vmul.f32 %v27580_v25, %v27639_v39  ;;  %v671_v43 = vmul.f32 %v27574_v26, %v27639_v39 }
 0x1bc   : > { %v21423_v13 = vpop.permute.xlu0 %1854  ;;  %v21425_v45 = vpop.permute.xlu1 %1852  ;;  %v1771_v15 = vmul.f32 %v1736_v54, %v27619_v62  ;;  %3503 = vmatprep.mubr.f32.mxu0 %v27615_v21  ;;  %v1784_v27 = vmul.f32 %v1736_v54, %v27622_v20  ;;  %v1732_v21 = vrot.slane %v21414_v59, %v27596_v31 }
 0x1bd   : > { %27613 = vst [vmem:[#allocation62_spill] sm:$0xff] %v21423_v13  ;;  %27614 = vst [vmem:[#allocation63_spill] sm:$0xff] %v21425_v45  ;;  %v21536_v45 = vld [vmem:[%s20495_s20 + $0x8] sm:$0x1f] }
 0x1be   : > { %1550 = vrot.lane.b32.xlu0 %v1477_v52, %s20345_s25  ;;  %1524 = vrot.lane.b32.xlu1 %v1464_v1, %s20345_s25  ;;  %v1744_v52 = vrot.slane %v21414_v59, %v27594_v58  ;;  %v1783_v54 = vmul.f32 %v1732_v21, %v27622_v20  ;;  %27638 = vst [vmem:[#allocation81_spill] sm:$0xff] %v21536_v45 }
 0x1c0   : > { %v21443_v6 = vpop.permute.xlu0 %1848  ;;  %v21445_v29 = vpop.permute.xlu1 %1822  ;;  %v1773_v30 = vmul.f32 %v1744_v52, %v27619_v62 }
 0x1c1   : > { %27617 = vst [vmem:[#allocation65_spill] sm:$0xff] %v21443_v6  ;;  %27618 = vst [vmem:[#allocation66_spill] sm:$0xff] %v21445_v29 }
 0x1c2   : > { %1834 = vrot.lane.b32.xlu0 %v1772_v40, %s20346_s26  ;;  %1832 = vrot.lane.b32.xlu1 %v1771_v15, %s20346_s26  ;;  %v1786_v40 = vmul.f32 %v1744_v52, %v27622_v20  ;;  %v1785_v15 = vmul.f32 %v1740_v24, %v27622_v20  ;;  %v1770_v52 = vmul.f32 %v1732_v21, %v27619_v62  ;;  %v21502_v21 = vld [vmem:[%s20495_s20] sm:$0xff] }
 0x1c3   : > { %27632 = vst [vmem:[#allocation77_spill] sm:$0xff] %v21502_v21 }
 0x1c4   : > { %v21456_v1 = vpop.permute.xlu0 %2132  ;;  %v21458_v63 = vpop.permute.xlu1 %2130 }
 0x1c5   : > { %27620 = vst [vmem:[#allocation67_spill] sm:$0xff] %v21456_v1  ;;  %27621 = vst [vmem:[#allocation68_spill] sm:$0xff] %v21458_v63  ;;  %v21473_v63 = vld [vmem:[%s20495_s20 + $0x8] sm:$0x1f] }
 0x1c6   : > { %1858 = vrot.lane.b32.xlu0 %v1784_v27, %s20346_s26  ;;  %1836 = vrot.lane.b32.xlu1 %v1773_v30, %s20346_s26  ;;  %27625 = vst [vmem:[#allocation71_spill] sm:$0xff] %v21473_v63  ;;  %v2046_v24 = vrot.slane %v21473_v63, %v27591_v55  ;;  %v2042_v59 = vrot.slane %v21473_v63, %v27592_v60 }
 0x1c7   : > { %v2038_v36 = vrot.slane %v21473_v63, %v27596_v31 }
 0x1c8   : > { %v21464_v14 = vpop.permute.xlu0 %2156  ;;  %v21466_v29 = vpop.permute.xlu1 %2134 }
 0x1c9   : > { %27623 = vst [vmem:[#allocation69_spill] sm:$0xff] %v21464_v14  ;;  %27624 = vst [vmem:[#allocation70_spill] sm:$0xff] %v21466_v29  ;;  %v21498_v29 = vld [vmem:[%s20495_s20 + $0x8] sm:$0x1f] }
 0x1ca   : > { %1862 = vrot.lane.b32.xlu0 %v1786_v40, %s20346_s26  ;;  %1860 = vrot.lane.b32.xlu1 %v1785_v15, %s20346_s26  ;;  %27631 = vst [vmem:[#allocation76_spill] sm:$0xff] %v21498_v29 }
 0x1cc   : > { %v21477_v27 = vpop.permute.xlu0 %2160  ;;  %v21479_v30 = vpop.permute.xlu1 %2158 }
 0x1cd   : > { %27626 = vst [vmem:[#allocation72_spill] sm:$0xff] %v21477_v27  ;;  %27627 = vst [vmem:[#allocation73_spill] sm:$0xff] %v21479_v30  ;;  %v27630_v27 = vld [vmem:[#allocation18_spill] sm:$0xff]  ;;  %v2050_v30 = vrot.slane %v21473_v63, %v27594_v58 }
 0x1ce   : > { %1856 = vrot.lane.b32.xlu0 %v1783_v54, %s20346_s26  ;;  %1830 = vrot.lane.b32.xlu1 %v1770_v52, %s20346_s26  ;;  %v2078_v14 = vmul.f32 %v2046_v24, %v27630_v27  ;;  %v2077_v20 = vmul.f32 %v2042_v59, %v27630_v27  ;;  %v622_v54 = vrot.slane %v21502_v21, %v27594_v58  ;;  %v21508_v52 = vld [vmem:[%s20495_s20 + $0x8] sm:$0x1f] }
 0x1cf   : > { %27633 = vst [vmem:[#allocation78_spill] sm:$0xff] %v21508_v52  ;;  %v2079_v6 = vmul.f32 %v2050_v30, %v27630_v27  ;;  %v2356_v21 = vrot.slane %v21498_v29, %v27594_v58  ;;  %v2658_v63 = vrot.slane %v21508_v52, %v27591_v55  ;;  %v2654_v13 = vrot.slane %v21508_v52, %v27592_v60 }
 0x1d0   : > { %v21489_v40 = vpop.permute.xlu0 %2154  ;;  %v21491_v15 = vpop.permute.xlu1 %2128  ;;  %v2662_v53 = vrot.slane %v21508_v52, %v27594_v58  ;;  %v670_v3 = vmul.f32 %v622_v54, %v27639_v39  ;;  %v696_v39 = vadd.f32 %v672_v46, %v20734_v51 }
 0x1d1   : > { %27628 = vst [vmem:[#allocation74_spill] sm:$0xff] %v21489_v40  ;;  %27629 = vst [vmem:[#allocation75_spill] sm:$0xff] %v21491_v15  ;;  %v27636_v40 = vld [vmem:[#allocation19_spill] sm:$0xff] }
 0x1d2   : > { %2140 = vrot.lane.b32.xlu0 %v2078_v14, %s20347_s27  ;;  %2138 = vrot.lane.b32.xlu1 %v2077_v20, %s20347_s27  ;;  %v2090_v1 = vmul.f32 %v2042_v59, %v27636_v40  ;;  %v2352_v14 = vrot.slane %v21498_v29, %v27591_v55  ;;  %v2348_v20 = vrot.slane %v21498_v29, %v27592_v60 }
 0x1d3   : > { %v2092_v47 = vmul.f32 %v2050_v30, %v27636_v40  ;;  %v2091_v56 = vmul.f32 %v2046_v24, %v27636_v40  ;;  %v2076_v30 = vmul.f32 %v2038_v36, %v27630_v27  ;;  %v21573_v24 = vrot.slane %v21536_v45, %v27594_v58 }
 0x1d4   : > { %v21510_v62 = vpop.permute.xlu0 %2438  ;;  %v21512_v15 = vpop.permute.xlu1 %2436 }
 0x1d5   : > { %27634 = vst [vmem:[#allocation79_spill] sm:$0xff] %v21510_v62  ;;  %27635 = vst [vmem:[#allocation80_spill] sm:$0xff] %v21512_v15  ;;  %v2344_v62 = vrot.slane %v21498_v29, %v27596_v31  ;;  %v27637_v15 = vld [vmem:[#allocation26_spill] sm:$0xff] }
 0x1d6   : > { %v684_v59 = vmul.f32 %v27582_v10, %v27637_v15  ;;  %2164 = vrot.lane.b32.xlu0 %v2090_v1, %s20347_s27  ;;  %v685_v29 = vmul.f32 %v27580_v25, %v27637_v15  ;;  %v682_v9 = vmul.f32 %v622_v54, %v27637_v15  ;;  %v683_v1 = vmul.f32 %v27574_v26, %v27637_v15 }
 0x1d7   : > { %2142 = vrot.lane.b32.xlu1 %v2079_v6, %s20347_s27  ;;  %v2650_v15 = vrot.slane %v21508_v52, %v27596_v31  ;;  %v21561_v6 = vrot.slane %v21536_v45, %v27591_v55  ;;  %v21565_v25 = vrot.slane %v21536_v45, %v27592_v60  ;;  %v2089_v54 = vmul.f32 %v2038_v36, %v27636_v40  ;;  %v27645_v40 = vld [vmem:[#allocation20_spill] sm:$0xff]  ;;  %v27646_v45 = vld [vmem:[#allocation21_spill] sm:$0xff] }
 0x1d8   : > { %v21551_v48 = vpop.permute.xlu0 %2462  ;;  %v21553_v10 = vpop.permute.xlu1 %2440  ;;  %v708_v26 = vadd.f32 %v684_v59, %v20732_v50  ;;  %27643 = vst [vmem:[#allocation85_spill] sm:$0xff] %v21573_v24  ;;  %v709_v55 = vadd.f32 %v685_v29, %v20732_v50  ;;  %v706_v52 = vadd.f32 %v682_v9, %v20732_v50  ;;  %v707_v60 = vadd.f32 %v683_v1, %v20732_v50 }
 0x1d9   : > { %27640 = vst [vmem:[#allocation82_spill] sm:$0xff] %v21553_v10  ;;  %27641 = vst [vmem:[#allocation83_spill] sm:$0xff] %v21561_v6  ;;  %v694_v59 = vadd.f32 %v670_v3, %v20734_v51  ;;  %v695_v36 = vadd.f32 %v671_v43, %v20734_v51  ;;  %v2384_v46 = vmul.f32 %v2352_v14, %v27645_v40 }
 0x1da   : > { %27642 = vst [vmem:[#allocation84_spill] sm:$0xff] %v21565_v25  ;;  %2168 = vrot.lane.b32.xlu0 %v2092_v47, %s20347_s27  ;;  %v697_v47 = vadd.f32 %v673_v23, %v20734_v51  ;;  %v2383_v29 = vmul.f32 %v2348_v20, %v27645_v40  ;;  %v2396_v9 = vmul.f32 %v2348_v20, %v27646_v45 }
 0x1db   : > { %2166 = vrot.lane.b32.xlu1 %v2091_v56, %s20347_s27  ;;  %v2385_v1 = vmul.f32 %v2356_v21, %v27645_v40  ;;  %v21592_v56 = vmul.f32 %v2356_v21, %v27646_v45  ;;  %v21596_v23 = vmul.f32 %v2352_v14, %v27646_v45  ;;  %v21599_v43 = vmul.f32 %v2344_v62, %v27646_v45 }
 0x1dc   : > { %v21583_v27 = vpop.permute.xlu0 %2466  ;;  %v21585_v58 = vpop.permute.xlu1 %2464  ;;  %v21602_v3 = vmul.f32 %v2344_v62, %v27645_v40  ;;  %v21605_v50 = vmul.f32 %v2658_v63, %v27576_v19  ;;  %v954_v20 = vsel %vm948_vm0, %v21254_v11, %v21252_v37  ;;  %v955_v21 = vsel %vm948_vm0, %v21252_v37, %v21266_v35 }
 0x1dd   : > { %27644 = vst [vmem:[#allocation86_spill] sm:$0xff] %v21583_v27  ;;  %v21615_v14 = vmul.f32 %v2654_v13, %v27576_v19  ;;  %v966_v62 = vsel %vm948_vm0, %v21264_v4, %v21286_v17  ;;  %v967_v51 = vsel %vm948_vm0, %v21286_v17, %v21284_v57  ;;  %v21631_v37 = vmul.f32 %v2662_v53, %v27576_v19 }
 0x1de   : > { %2162 = vrot.lane.b32.xlu0 %v2089_v54, %s20347_s27  ;;  %v21618_v54 = vmul.f32 %v2654_v13, %v27575_v28  ;;  %v964_v13 = vsel %vm948_vm0, %v20765_v5, %v21301_v22  ;;  %v965_v35 = vsel %vm948_vm0, %v21301_v22, %v21264_v4  ;;  %v21643_v17 = vmul.f32 %v2658_v63, %v27575_v28 }
 0x1df   : > { %2136 = vrot.lane.b32.xlu1 %v2076_v30, %s20347_s27  ;;  %v21634_v30 = vmul.f32 %v2662_v53, %v27575_v28  ;;  %v21646_v57 = vmul.f32 %v2650_v15, %v27575_v28  ;;  %v1002_v31 = vadd.f32 %v954_v20, %v696_v39  ;;  %v1003_v24 = vadd.f32 %v955_v21, %v697_v47  ;;  %v27651_v20 = vld [vmem:[#allocation36_spill] sm:$0xff] }
 0x1e0   : > { %v21626_v40 = vpop.permute.xlu0 %2460  ;;  %v21628_v45 = vpop.permute.xlu1 %2434  ;;  %v952_v53 = vsel %vm948_vm0, %v20754_v61, %v21303_v2  ;;  %v21653_v5 = vmul.f32 %v2650_v15, %v27576_v19  ;;  %v1014_v25 = vadd.f32 %v966_v62, %v708_v26  ;;  %v1015_v6 = vadd.f32 %v967_v51, %v709_v55 }
 0x1e1   : > { %v953_v63 = vsel %vm948_vm0, %v21303_v2, %v21254_v11  ;;  %v1260_v39 = vsel %vm1254_vm1, %v21313_v7, %v21311_v33  ;;  %v1012_v4 = vadd.f32 %v964_v13, %v706_v52  ;;  %v1013_v22 = vadd.f32 %v965_v35, %v707_v60  ;;  %v27652_v13 = vld [vmem:[#allocation32_spill] sm:$0xff] }
 0x1e2   : > { %2446 = vrot.lane.b32.xlu0 %v2384_v46, %s20348_s28  ;;  %v1261_v61 = vsel %vm1254_vm1, %v21311_v33, %v21321_v8  ;;  %v1272_v51 = vsel %vm1254_vm1, %v21319_v12, %v21334_v42  ;;  %v1000_v11 = vadd.f32 %v952_v53, %v694_v59  ;;  %v1273_v2 = vsel %vm1254_vm1, %v21334_v42, %v21332_v44  ;;  %v27653_v53 = vld [vmem:[#allocation35_spill] sm:$0xff] }
 0x1e3   : > { %2444 = vrot.lane.b32.xlu1 %v2383_v29, %s20348_s28  ;;  %v1270_v35 = vsel %vm1254_vm1, %v20823_v49, %v21344_v18  ;;  %v1271_v60 = vsel %vm1254_vm1, %v21344_v18, %v21319_v12  ;;  %v1001_v33 = vadd.f32 %v953_v63, %v695_v36  ;;  %v1308_v52 = vadd.f32 %v1260_v39, %v1002_v31  ;;  %v27647_v36 = vld [vmem:[#allocation24_spill] sm:$0xff]  ;;  %v27649_v29 = vld [vmem:[#allocation30_spill] sm:$0xff] }
 0x1e4   : > { %v21668_v55 = vpop.permute.xlu0 %2744  ;;  %v21670_v15 = vpop.permute.xlu1 %2742  ;;  %v1258_v26 = vsel %vm1254_vm1, %v20811_v41, %v21346_v32  ;;  %v1259_v47 = vsel %vm1254_vm1, %v21346_v32, %v21313_v7  ;;  %v1309_v42 = vadd.f32 %v1261_v61, %v1003_v24  ;;  %v1320_v59 = vadd.f32 %v1272_v51, %v1014_v25  ;;  %v27656_v51 = vld [vmem:[#allocation59_spill] sm:$0xff] }
 0x1e5   : > { %v1566_v49 = vsel %vm1560_vm2, %v21356_v16, %v21354_v38  ;;  %v1567_v12 = vsel %vm1560_vm2, %v21354_v38, %v21364_v0  ;;  %v1321_v31 = vadd.f32 %v1273_v2, %v1015_v6  ;;  %v1318_v41 = vadd.f32 %v1270_v35, %v1012_v4  ;;  %v27650_v38 = vld [vmem:[#allocation31_spill] sm:$0xff]  ;;  %v27654_v4 = vld [vmem:[#allocation56_spill] sm:$0xff] }
 0x1e6   : > { %2470 = vrot.lane.b32.xlu0 %v2396_v9, %s20348_s28  ;;  %v1319_v18 = vadd.f32 %v1271_v60, %v1013_v22  ;;  %v1578_v7 = vsel %vm1560_vm2, %v27647_v36, %v21377_v34  ;;  %v1306_v24 = vadd.f32 %v1258_v26, %v1000_v11  ;;  %v1307_v46 = vadd.f32 %v1259_v47, %v1001_v33  ;;  %v27655_v22 = vld [vmem:[#allocation57_spill] sm:$0xff]  ;;  %v27657_v60 = vld [vmem:[#allocation63_spill] sm:$0xff] }
 0x1e7   : > { %2448 = vrot.lane.b32.xlu1 %v2385_v1, %s20348_s28  ;;  %v1579_v9 = vsel %vm1560_vm2, %v21377_v34, %v27649_v29  ;;  %v1576_v6 = vsel %vm1560_vm2, %v27651_v20, %v27650_v38  ;;  %v1614_v1 = vadd.f32 %v1566_v49, %v1308_v52  ;;  %v1615_v21 = vadd.f32 %v1567_v12, %v1309_v42  ;;  %v27659_v52 = vld [vmem:[#allocation62_spill] sm:$0xff]  ;;  %v27661_v49 = vld [vmem:[#allocation65_spill] sm:$0xff] }
 0x1e8   : > { %v21698_v32 = vpop.permute.xlu0 %2768  ;;  %v21700_v25 = vpop.permute.xlu1 %2746  ;;  %v1577_v62 = vsel %vm1560_vm2, %v27650_v38, %v27647_v36  ;;  %v1564_v63 = vsel %vm1560_vm2, %v27653_v53, %v27652_v13  ;;  %v1626_v39 = vadd.f32 %v1578_v7, %v1320_v59  ;;  %v1565_v34 = vsel %vm1560_vm2, %v27652_v13, %v21356_v16  ;;  %v27662_v12 = vld [vmem:[#allocation38_spill] sm:$0xff]  ;;  %v27664_v38 = vld [vmem:[#allocation37_spill] sm:$0xff]  ;;  %v27666_v13 = vld [vmem:[#allocation68_spill] sm:$0xff] }
 0x1e9   : > { %27648 = vst [vmem:[#allocation24_spill] sm:$0xff] %v21700_v25  ;;  %v1872_v61 = vsel %vm1866_vm3, %v27655_v22, %v27654_v4  ;;  %v1873_v11 = vsel %vm1866_vm3, %v27654_v4, %v27656_v51  ;;  %v1627_v2 = vadd.f32 %v1579_v9, %v1321_v31  ;;  %v1624_v35 = vadd.f32 %v1576_v6, %v1318_v41  ;;  %v27663_v9 = vld [vmem:[#allocation66_spill] sm:$0xff] }
 0x1ea   : > { %2474 = vrot.lane.b32.xlu0 %v21592_v56, %s20348_s28  ;;  %v27658_v56 = vld [vmem:[#allocation58_spill] sm:$0xff]  ;;  %v1885_v16 = vsel %vm1866_vm3, %v27657_v60, %v27659_v52  ;;  %v1625_v42 = vadd.f32 %v1577_v62, %v1319_v18  ;;  %v1612_v59 = vadd.f32 %v1564_v63, %v1306_v24  ;;  %v1882_v36 = vsel %vm1866_vm3, %v27662_v12, %v27661_v49  ;;  %v27665_v62 = vld [vmem:[#allocation67_spill] sm:$0xff] }
 0x1eb   : > { %2472 = vrot.lane.b32.xlu1 %v21596_v23, %s20348_s28  ;;  %v1884_v33 = vsel %vm1866_vm3, %v27658_v56, %v27657_v60  ;;  %v1883_v23 = vsel %vm1866_vm3, %v27661_v49, %v27658_v56  ;;  %v1613_v31 = vadd.f32 %v1565_v34, %v1307_v46  ;;  %v1920_v41 = vadd.f32 %v1872_v61, %v1614_v1  ;;  %v27671_v60 = vld [vmem:[#allocation74_spill] sm:$0xff]  ;;  %v27673_v56 = vld [vmem:[#allocation79_spill] sm:$0xff] }
 0x1ec   : > { %v21733_v26 = vpop.permute.xlu0 %2772  ;;  %v2771_v47 = vpop.permute.xlu1 %2770  ;;  %v1921_v7 = vadd.f32 %v1873_v11, %v1615_v21  ;;  %v1870_v20 = vsel %vm1866_vm3, %v27664_v38, %v27663_v9  ;;  %v1932_v18 = vadd.f32 %v1884_v33, %v1626_v39  ;;  %v1933_v24 = vadd.f32 %v1885_v16, %v1627_v2  ;;  %v27667_v21 = vld [vmem:[#allocation70_spill] sm:$0xff]  ;;  %v27669_v39 = vld [vmem:[#allocation69_spill] sm:$0xff]  ;;  %v27670_v11 = vld [vmem:[#allocation72_spill] sm:$0xff] }
 0x1ed   : > { %27660 = vst [vmem:[#allocation30_spill] sm:$0xff] %v21733_v26  ;;  %v1871_v6 = vsel %vm1866_vm3, %v27663_v9, %v27655_v22  ;;  %v2178_v53 = vsel %vm2172_vm4, %v27666_v13, %v27665_v62  ;;  %v1930_v46 = vadd.f32 %v1882_v36, %v1624_v35  ;;  %v1931_v1 = vadd.f32 %v1883_v23, %v1625_v42  ;;  %v27674_v33 = vld [vmem:[#allocation80_spill] sm:$0xff]  ;;  %v27675_v36 = vld [vmem:[#allocation75_spill] sm:$0xff] }
 0x1ee   : > { %2468 = vrot.lane.b32.xlu0 %v21599_v43, %s20348_s28  ;;  %v2179_v63 = vsel %vm2172_vm4, %v27665_v62, %v27667_v21  ;;  %v27668_v43 = vld [vmem:[#allocation73_spill] sm:$0xff]  ;;  %v1918_v22 = vadd.f32 %v1870_v20, %v1612_v59  ;;  %v2484_v16 = vsel %vm2478_vm5, %v27674_v33, %v27673_v56  ;;  %v1919_v42 = vadd.f32 %v1871_v6, %v1613_v31  ;;  %v27676_v59 = vld [vmem:[#allocation40_spill] sm:$0xff] }
 0x1ef   : > { %2442 = vrot.lane.b32.xlu1 %v21602_v3, %s20348_s28  ;;  %v2190_v34 = vsel %vm2172_vm4, %v27669_v39, %v27668_v43  ;;  %v2191_v2 = vsel %vm2172_vm4, %v27668_v43, %v27670_v11  ;;  %v27672_v3 = vld [vmem:[#allocation41_spill] sm:$0xff]  ;;  %v2226_v49 = vadd.f32 %v2178_v53, %v1920_v41  ;;  %v2189_v12 = vsel %vm2172_vm4, %v27671_v60, %v27669_v39  ;;  %v21790_v41 = vld [vmem:[%s27224_s4 + $0x30] sm:$0xff]  ;;  %v27749_v11 = vld [vmem:[#allocation26_spill] sm:$0xff] }
 0x1f0   : > { %v2767_v4 = vpop.permute.xlu0 %2766  ;;  %v21760_v61 = vpop.permute.xlu1 %2740  ;;  %v2188_v35 = vsel %vm2172_vm4, %v27672_v3, %v27671_v60  ;;  %v2176_v23 = vsel %vm2172_vm4, %v27676_v59, %v27675_v36  ;;  %v2227_v9 = vadd.f32 %v2179_v63, %v1921_v7  ;;  %v2238_v38 = vadd.f32 %v2190_v34, %v1932_v18  ;;  %27677 = vst [vmem:[#allocation31_spill] sm:$0xff] %v21790_v41  ;;  %v27680_v60 = vld [vmem:[#allocation46_spill] sm:$0xff] }
 0x1f1   : > { %v2485_v20 = vsel %vm2478_vm5, %v27673_v56, %v21553_v10  ;;  %v2790_v31 = vsel %vm2784_vm6, %v21670_v15, %v21668_v55  ;;  %v2239_v6 = vadd.f32 %v2191_v2, %v1933_v24  ;;  %v2177_v7 = vsel %vm2172_vm4, %v27675_v36, %v27666_v13  ;;  %17317 = vmatmul.mubr.msk.f32.gmra.mrb[6].mxu0 %vm3408_vm8, %v21790_v41 }
 0x1f2   : > { %2752 = vrot.lane.b32.xlu0 %v21605_v50, %s20349_s29  ;;  %v2236_v50 = vadd.f32 %v2188_v35, %v1930_v46  ;;  %v2532_v18 = vadd.f32 %v2484_v16, %v2226_v49  ;;  %v2237_v63 = vadd.f32 %v2189_v12, %v1931_v1  ;;  %v2791_v43 = vsel %vm2784_vm6, %v21668_v55, %v21700_v25  ;;  %v27679_v55 = vld [vmem:[#allocation47_spill] sm:$0xff] }
 0x1f3   : > { %2750 = vrot.lane.b32.xlu1 %v21615_v14, %s20349_s29  ;;  %v2224_v14 = vadd.f32 %v2176_v23, %v1918_v22  ;;  %v27678_v46 = vmov 0.0   ;;  %v2533_v39 = vadd.f32 %v2485_v20, %v2227_v9  ;;  %v2496_v13 = vsel %vm2478_vm5, %v21551_v48, %v21585_v58  ;;  %v27682_v23 = vld [vmem:[#allocation23_spill] sm:$0xff] }
 0x1f4   : > { %v3051_v62 = vpop.permute.xlu0 %3050  ;;  %v21795_v53 = vpop.permute.xlu1 %3048  ;;  %3663 = vmatprep.mubr.f32.mxu0 %v27678_v46  ;;  %v2497_v34 = vsel %vm2478_vm5, %v21585_v58, %v21583_v27  ;;  %v2838_v1 = vadd.f32 %v2790_v31, %v2532_v18  ;;  %v2494_v22 = vsel %vm2478_vm5, %v27679_v55, %v21626_v40  ;;  %v2495_v2 = vsel %vm2478_vm5, %v21626_v40, %v21551_v48  ;;  %v27683_v9 = vld [vmem:[#allocation83_spill] sm:$0xff]  ;;  %v27688_v55 = vld [vmem:[#allocation84_spill] sm:$0xff] }
 0x1f5   : > { %v3096_v24 = vsel %vm3090_vm7, %v21795_v53, %v3051_v62  ;;  %v2482_v3 = vsel %vm2478_vm5, %v27680_v60, %v21628_v45  ;;  %v2483_v58 = vsel %vm2478_vm5, %v21628_v45, %v27674_v33  ;;  %v2802_v35 = vsel %vm2784_vm6, %v21698_v32, %v2771_v47  ;;  %v27748_v27 = vld [vmem:[#allocation27_spill] sm:$0xff] }
 0x1f6   : > { %2776 = vrot.lane.b32.xlu0 %v21618_v54, %s20349_s29  ;;  %v2839_v54 = vadd.f32 %v2791_v43, %v2533_v39  ;;  %v2803_v56 = vsel %vm2784_vm6, %v2771_v47, %v21733_v26  ;;  %v3144_v16 = vadd.f32 %v3096_v24, %v2838_v1  ;;  %v2225_v49 = vadd.f32 %v2177_v7, %v1919_v42  ;;  %v27684_v42 = vld [vmem:[#allocation55_spill] sm:$0xff] }
 0x1f7   : > { %2754 = vrot.lane.b32.xlu1 %v21631_v37, %s20349_s29  ;;  %v2544_v12 = vadd.f32 %v2496_v13, %v2238_v38  ;;  %v2545_v36 = vadd.f32 %v2497_v34, %v2239_v6  ;;  %v2542_v33 = vadd.f32 %v2494_v22, %v2236_v50  ;;  %v2543_v59 = vadd.f32 %v2495_v2, %v2237_v63  ;;  %v27686_v63 = vld [vmem:[#allocation54_spill] sm:$0xff] }
 0x1f8   : > { %v3075_v48 = vpop.permute.xlu0 %3074  ;;  %v21831_v40 = vpop.permute.xlu1 %3052  ;;  %v2996_v20 = vmul.f32 %v27683_v9, %v27682_v23  ;;  %v2530_v47 = vadd.f32 %v2482_v3, %v2224_v14  ;;  %v2531_v31 = vadd.f32 %v2483_v58, %v2225_v49  ;;  %v2800_v38 = vsel %vm2784_vm6, %v27684_v42, %v2767_v4  ;;  %v27691_v49 = vld [vmem:[#allocation42_spill] sm:$0xff] }
 0x1f9   : > { %27681 = vst [vmem:[#allocation36_spill] sm:$0xff] %v21831_v40  ;;  %v3097_v45 = vsel %vm3090_vm7, %v3051_v62, %v21831_v40  ;;  %v2850_v18 = vadd.f32 %v2802_v35, %v2544_v12  ;;  %v2851_v43 = vadd.f32 %v2803_v56, %v2545_v36  ;;  %v2801_v6 = vsel %vm2784_vm6, %v2767_v4, %v21698_v32 }
 0x1fa   : > { %v3145_v37 = vadd.f32 %v3097_v45, %v2839_v54  ;;  %2780 = vrot.lane.b32.xlu0 %v21634_v30, %s20349_s29  ;;  %v3216_v50 = vmax.f32 %v3144_v16, 0.0  ;;  %v2788_v14 = vsel %vm2784_vm6, %v27686_v63, %v21760_v61  ;;  %v2789_v24 = vsel %vm2784_vm6, %v21760_v61, %v21670_v15  ;;  %v27689_v61 = vld [vmem:[#allocation25_spill] sm:$0xff] }
 0x1fb   : > { %2778 = vrot.lane.b32.xlu1 %v21643_v17, %s20349_s29  ;;  %v2848_v34 = vadd.f32 %v2800_v38, %v2542_v33  ;;  %v2849_v1 = vadd.f32 %v2801_v6, %v2543_v59  ;;  %v2995_v15 = vmul.f32 %v27688_v55, %v27682_v23  ;;  %v3008_v22 = vmul.f32 %v27688_v55, %v27689_v61  ;;  %v27700_v63 = vld [vmem:[#allocation81_spill] sm:$0xff] }
 0x1fc   : > { %v3217_v7 = vmax.f32 %v3145_v37, 0.0  ;;  %v21845_v62 = vpop.permute.xlu0 %3078  ;;  %v3077_v30 = vpop.permute.xlu1 %3076  ;;  %v2836_v2 = vadd.f32 %v2788_v14, %v2530_v47  ;;  %v2837_v60 = vadd.f32 %v2789_v24, %v2531_v31  ;;  %v27701_v24 = vld [vmem:[#allocation39_spill] sm:$0xff] }
 0x1fd   : > { %27685 = vst [vmem:[#allocation32_spill] sm:$0xff] %v21845_v62  ;;  %v3108_v17 = vsel %vm3090_vm7, %v3075_v48, %v3077_v30  ;;  %v3109_v39 = vsel %vm3090_vm7, %v3077_v30, %v21845_v62  ;;  %v27699_v30 = vld [vmem:[#allocation11_spill] sm:$0xff]  ;;  %v27746_v62 = vld [vmem:[#allocation77_spill] sm:$0xff] }
 0x1fe   : > { %v3156_v13 = vadd.f32 %v3108_v17, %v2850_v18  ;;  %v3157_v32 = vadd.f32 %v3109_v39, %v2851_v43  ;;  %2774 = vrot.lane.b32.xlu0 %v21646_v57, %s20349_s29  ;;  %v21858_v4 = vpack.i.bf16 %v3217_v7, %v3216_v50  ;;  %v27690_v57 = vld [vmem:[#allocation43_spill] sm:$0xff]  ;;  %v2956_v14 = vrot.slane %v27700_v63, %v27699_v30  ;;  %v27703_v39 = vld [vmem:[#allocation44_spill] sm:$0xff] }
 0x1ff   : > { %2748 = vrot.lane.b32.xlu1 %v21653_v5, %s20349_s29  ;;  %v27702_v17 = vmax.f32 %v27701_v24, 0.0 }
 0x200   : > { %27687 = vst [vmem:[#allocation35_spill] sm:$0xff] %v21858_v4  ;;  %v3228_v3 = vmax.f32 %v3156_v13, 0.0  ;;  %v3229_v58 = vmax.f32 %v3157_v32, 0.0  ;;  %v3073_v54 = vpop.permute.xlu0 %3072  ;;  %v3047_v35 = vpop.permute.xlu1 %3046  ;;  %v27704_v13 = vmax.f32 %v27703_v39, 0.0  ;;  %v27718_v39 = vld [vmem:[#allocation12_spill] sm:$0xff] }
 0x201   : > { %v3106_v56 = vsel %vm3090_vm7, %v27690_v57, %v3073_v54  ;;  %v3107_v16 = vsel %vm3090_vm7, %v3073_v54, %v3075_v48  ;;  %v3094_v5 = vsel %vm3090_vm7, %v27691_v49, %v3047_v35  ;;  %v3095_v12 = vsel %vm3090_vm7, %v3047_v35, %v21795_v53 }
 0x202   : > { %v3154_v36 = vadd.f32 %v3106_v56, %v2848_v34  ;;  %v3155_v45 = vadd.f32 %v3107_v16, %v2849_v1  ;;  %v3142_v33 = vadd.f32 %v3094_v5, %v2836_v2  ;;  %v3143_v59 = vadd.f32 %v3095_v12, %v2837_v60  ;;  %3058 = vrot.lane.b32.xlu0 %v2996_v20, %s20350_s30  ;;  %v27698_v20 = vld [vmem:[#allocation85_spill] sm:$0xff]  ;;  %v27711_v16 = vld [vmem:[#allocation51_spill] sm:$0xff] }
 0x203   : > { %3056 = vrot.lane.b32.xlu1 %v2995_v15, %s20350_s30  ;;  %v19010_v37 = vpack.c.bf16 %v3228_v3, %v3216_v50  ;;  %v21875_v47 = vpack.i.bf16 %v3229_v58, %v3228_v3  ;;  %v21877_v31 = vpack.c.bf16 %v3229_v58, %v3217_v7  ;;  %v2997_v6 = vmul.f32 %v27698_v20, %v27682_v23  ;;  %v27708_v58 = vld [vmem:[#allocation52_spill] sm:$0xff]  ;;  %v27710_v56 = vld [vmem:[#allocation33_spill] sm:$0xff] }
 0x204   : > { %v21879_v48 = vmax.f32 %v3154_v36, 0.0  ;;  %v21881_v18 = vmax.f32 %v3155_v45, 0.0  ;;  %v21883_v43 = vmax.f32 %v3142_v33, 0.0  ;;  %v21885_v53 = vmax.f32 %v3143_v59, 0.0  ;;  %v21887_v42 = vpop.permute.xlu0 %916  ;;  %v21889_v38 = vpop.permute.xlu1 %914  ;;  %v27712_v5 = vld [vmem:[#allocation61_spill] sm:$0xff]  ;;  %v27713_v36 = vld [vmem:[#allocation10_spill] sm:$0xff] }
 0x205   : > { %27692 = vst [vmem:[#allocation56_spill] sm:$0xff] %v21875_v47  ;;  %27693 = vst [vmem:[#allocation57_spill] sm:$0xff] %v21877_v31  ;;  %19011 = vmatprep.subr.bf16.mxu0 %v19010_v37  ;;  %v19008_v32 = vpack.c.bf16 %v27704_v13, %v27702_v17  ;;  %v3010_v15 = vmul.f32 %v27698_v20, %v27689_v61  ;;  %v3009_v3 = vmul.f32 %v27683_v9, %v27689_v61  ;;  %v27714_v33 = vld [vmem:[#allocation34_spill] sm:$0xff]  ;;  %v27715_v20 = vld [vmem:[#allocation9_spill] sm:$0xff] }
 0x206   : > { %27694 = vst [vmem:[#allocation59_spill] sm:$0xff] %v21879_v48  ;;  %27695 = vst [vmem:[#allocation63_spill] sm:$0xff] %v21881_v18  ;;  %3082 = vrot.lane.b32.xlu0 %v3008_v22, %s20350_s30  ;;  %v19006_v50 = vpack.c.bf16 %v21879_v48, %v21883_v43  ;;  %v19012_v7 = vpack.c.bf16 %v21881_v18, %v21885_v53  ;;  %v21907_v34 = vpack.i.bf16 %v21879_v48, %v21883_v43  ;;  %v27744_v31 = vld [vmem:[#allocation5_spill] sm:$0xff] }
 0x207   : > { %27696 = vst [vmem:[#allocation58_spill] sm:$0xff] %v21883_v43  ;;  %27697 = vst [vmem:[#allocation62_spill] sm:$0xff] %v21885_v53  ;;  %3060 = vrot.lane.b32.xlu1 %v2997_v6, %s20350_s30  ;;  %v21911_v1 = vpack.i.bf16 %v21881_v18, %v21885_v53  ;;  %v3007_v35 = vmul.f32 %v2956_v14, %v27689_v61  ;;  %v2994_v9 = vmul.f32 %v2956_v14, %v27682_v23  ;;  %v27717_v14 = vld [vmem:[#allocation13_spill] sm:$0xff] }
 0x208   : > { %27705 = vst [vmem:[#allocation65_spill] sm:$0xff] %v21907_v34  ;;  %v21913_v55 = vpop.permute.xlu0 %940  ;;  %19007 = vmatprep.subr.bf16.mxu1 %v19006_v50  ;;  %19013 = vmatpush1.bf16.msra.mxu0 %v19012_v7  ;;  %v21921_v60 = vpop.permute.xlu1 %918  ;;  %v830_v49 = vrot.slane %v27711_v16, %v27710_v56  ;;  %v1136_v59 = vrot.slane %v27714_v33, %v27710_v56  ;;  %v27716_v50 = vld [vmem:[#allocation64_spill] sm:$0xff]  ;;  %v27745_v40 = vsub.s32 7, %v27744_v31 }
 0x209   : > { %27706 = vst [vmem:[#allocation38_spill] sm:$0xff] %v21911_v1  ;;  %27707 = vst [vmem:[#allocation66_spill] sm:$0xff] %v21921_v60  ;;  %19009 = vmatpush1.bf16.msra.mxu1 %v19008_v32  ;;  %v27719_v32 = vld [vmem:[#allocation22_spill] sm:$0xff] }
 0x20a   : > { %3086 = vrot.lane.b32.xlu0 %v3010_v15, %s20350_s30  ;;  %v869_v45 = vmul.f32 %v830_v49, %v27713_v36  ;;  %v856_v6 = vmul.f32 %v830_v49, %v27715_v20  ;;  %v1175_v24 = vmul.f32 %v1136_v59, %v27717_v14  ;;  %v1162_v13 = vmul.f32 %v1136_v59, %v27718_v39  ;;  %v27721_v49 = vld [vmem:[#allocation14_spill] sm:$0xff]  ;;  %v27723_v20 = vld [vmem:[#allocation17_spill] sm:$0xff]  ;;  %v27724_v14 = vld [vmem:[#allocation71_spill] sm:$0xff] }
 0x20b   : > { %3084 = vrot.lane.b32.xlu1 %v3009_v3, %s20350_s30  ;;  %17322 = vmatmul.mubr.msk.f32.vlgmr.msra.gmra.mrb[8].mxu0 %vm3408_vm8, %v27708_v58  ;;  %v1442_v15 = vrot.slane %v27719_v32, %v27710_v56  ;;  %v638_v25 = vrot.slane %v27746_v62, %v27745_v40 }
 0x20c   : > { %v21929_v54 = vpop.permute.xlu0 %944  ;;  %17318 = vmatmul.mubr.msk.f32.vlgmr.msra.gmra.mrb[0].mxu1 %vm3408_vm8, %v27708_v58  ;;  %3669 = vmatprep.mubr.f32.mxu0 %v27678_v46  ;;  %v21935_v57 = vpop.permute.xlu1 %942 }
 0x20d   : > { %27709 = vst [vmem:[#allocation37_spill] sm:$0xff] %v21929_v54  ;;  %3580 = vmatprep.mubr.f32.mxu1 %v27678_v46  ;;  %v1468_v36 = vmul.f32 %v1442_v15, %v27721_v49  ;;  %v674_v62 = vmul.f32 %v638_v25, %v27748_v27 }
 0x20e   : > { %3080 = vrot.lane.b32.xlu0 %v3007_v35, %s20350_s30  ;;  %v27720_v35 = vld [vmem:[#allocation15_spill] sm:$0xff] }
 0x20f   : > { %3054 = vrot.lane.b32.xlu1 %v2994_v9, %s20350_s30  ;;  %17323 = vmatmul.mubr.msk.f32.gmra.mrb[10].mxu0 %vm3408_vm8, %v27712_v5  ;;  %v1481_v9 = vmul.f32 %v1442_v15, %v27720_v35  ;;  %v27726_v35 = vld [vmem:[#allocation19_spill] sm:$0xff] }
 0x210   : > { %v21945_v12 = vpop.permute.xlu0 %938  ;;  %17319 = vmatmul.mubr.msk.f32.gmra.mrb[2].mxu1 %vm3408_vm8, %v27712_v5  ;;  %3675 = vmatprep.mubr.f32.mxu0 %v27678_v46  ;;  %v21953_v37 = vpop.permute.xlu1 %912 }
 0x211   : > { %3586 = vmatprep.mubr.f32.mxu1 %v27678_v46 }
 0x212   : > { %946 = vrot.lane.b32.xlu0 %v869_v45, %s27423_s23  ;;  %v27722_v45 = vld [vmem:[#allocation60_spill] sm:$0xff] }
 0x213   : > { %920 = vrot.lane.b32.xlu1 %v856_v6, %s27423_s23  ;;  %17324 = vmatmul.mubr.msk.f32.gmra.mrb[12].mxu0 %vm3408_vm8, %v27716_v50  ;;  %v1748_v33 = vrot.slane %v27722_v45, %v27710_v56 }
 0x214   : > { %v21961_v7 = vpop.permute.xlu0 %1222  ;;  %17320 = vmatmul.mubr.msk.f32.gmra.mrb[4].mxu1 %vm3408_vm8, %v27716_v50  ;;  %3681 = vmatprep.mubr.f32.mxu0 %v27678_v46  ;;  %v21967_v17 = vpop.permute.xlu1 %1220 }
 0x215   : > { %3592 = vmatprep.mubr.f32.mxu1 %v27678_v46  ;;  %v1787_v6 = vmul.f32 %v1748_v33, %v27723_v20  ;;  %v27728_v20 = vld [vmem:[#allocation76_spill] sm:$0xff] }
 0x216   : > { %1252 = vrot.lane.b32.xlu0 %v1175_v24, %s27488_s24  ;;  %v2054_v24 = vrot.slane %v27724_v14, %v27710_v56  ;;  %v2360_v2 = vrot.slane %v27728_v20, %v27710_v56 }
 0x217   : > { %1226 = vrot.lane.b32.xlu1 %v1162_v13, %s27488_s24  ;;  %17325 = vmatmul.mubr.msk.f32.gmra.mrb[14].mxu0 %vm3408_vm8, %v21790_v41  ;;  %v27725_v13 = vld [vmem:[#allocation16_spill] sm:$0xff] }
 0x218   : > { %v21977_v3 = vpop.permute.xlu0 %1246  ;;  %17321 = vmatmul.mubr.msk.f32.gmra.mrb[6].mxu1 %vm3408_vm8, %v21790_v41  ;;  %3841 = vmatprep.mubr.f32.mxu0 %v27678_v46  ;;  %v21983_v16 = vpop.permute.xlu1 %1224  ;;  %v1774_v32 = vmul.f32 %v1748_v33, %v27725_v13 }
 0x219   : > { %3752 = vmatprep.mubr.f32.mxu1 %v27678_v46  ;;  %v27742_v46 = vld [vmem:[#allocation6_spill] sm:$0xff] }
 0x21a   : > { %1558 = vrot.lane.b32.xlu0 %v1481_v9, %s20345_s25  ;;  %v2093_v9 = vmul.f32 %v2054_v24, %v27726_v35  ;;  %v27731_v35 = vld [vmem:[#allocation78_spill] sm:$0xff] }
 0x21b   : > { %1532 = vrot.lane.b32.xlu1 %v1468_v36, %s20345_s25  ;;  %v27727_v36 = vld [vmem:[#allocation18_spill] sm:$0xff]  ;;  %v2666_v48 = vrot.slane %v27731_v35, %v27710_v56 }
 0x21c   : > { %v21991_v59 = vpop.permute.xlu0 %1250  ;;  %v21996_v39 = vpop.permute.xlu1 %1248  ;;  %v2080_v45 = vmul.f32 %v2054_v24, %v27727_v36  ;;  %v2972_v36 = vrot.slane %v27700_v63, %v27710_v56 }
 0x21d   : > { %v2692_v20 = vmul.f32 %v2666_v48, %v27576_v19  ;;  %v27732_v19 = vld [vmem:[#allocation48_spill] sm:$0xff] }
 0x21e   : > { %1864 = vrot.lane.b32.xlu0 %v1787_v6, %s20346_s26  ;;  %v27729_v6 = vld [vmem:[#allocation21_spill] sm:$0xff] }
 0x21f   : > { %1838 = vrot.lane.b32.xlu1 %v1774_v32, %s20346_s26  ;;  %v2399_v14 = vmul.f32 %v2360_v2, %v27729_v6  ;;  %v27730_v32 = vld [vmem:[#allocation20_spill] sm:$0xff]  ;;  %v3011_v6 = vmul.f32 %v2972_v36, %v27689_v61 }
 0x220   : > { %v22001_v15 = vpop.permute.xlu0 %1244  ;;  %v22004_v49 = vpop.permute.xlu1 %1218  ;;  %v2386_v22 = vmul.f32 %v2360_v2, %v27730_v32 }
 0x222   : > { %2170 = vrot.lane.b32.xlu0 %v2093_v9, %s20347_s27  ;;  %v2705_v9 = vmul.f32 %v2666_v48, %v27575_v28  ;;  %v27733_v48 = vld [vmem:[#allocation49_spill] sm:$0xff] }
 0x223   : > { %2144 = vrot.lane.b32.xlu1 %v2080_v45, %s20347_s27 }
 0x224   : > { %v22011_v33 = vpop.permute.xlu0 %1528  ;;  %v22014_v13 = vpop.permute.xlu1 %1526 }
 0x226   : > { %2476 = vrot.lane.b32.xlu0 %v2399_v14, %s20348_s28  ;;  %v2998_v14 = vmul.f32 %v2972_v36, %v27682_v23  ;;  %v27734_v23 = vld [vmem:[#allocation45_spill] sm:$0xff] }
 0x227   : > { %2450 = vrot.lane.b32.xlu1 %v2386_v22, %s20348_s28 }
 0x228   : > { %v22021_v24 = vpop.permute.xlu0 %1552  ;;  %v22026_v45 = vpop.permute.xlu1 %1530 }
 0x22a   : > { %2782 = vrot.lane.b32.xlu0 %v2705_v9, %s20349_s29 }
 0x22b   : > { %2756 = vrot.lane.b32.xlu1 %v2692_v20, %s20349_s29 }
 0x22c   : > { %v22031_v2 = vpop.permute.xlu0 %1556  ;;  %v22034_v22 = vpop.permute.xlu1 %1554 }
 0x22e   : > { %3088 = vrot.lane.b32.xlu0 %v3011_v6, %s20350_s30 }
 0x22f   : > { %3062 = vrot.lane.b32.xlu1 %v2998_v14, %s20350_s30 }
 0x230   : > { %v22039_v28 = vpop.permute.xlu0 %1550  ;;  %v22041_v63 = vpop.permute.xlu1 %1524 }
 0x232   : > { %19755 = vrot.lane.b32.xlu0 %v27732_v19, %s27423_s23 }
 0x233   : > { %19750 = vrot.lane.b32.xlu1 %v27733_v48, %s27423_s23 }
 0x234   : > { %v22047_v56 = vpop.permute.xlu0 %1834  ;;  %v22049_v61 = vpop.permute.xlu1 %1832 }
 0x236   : > { %4131 = vrot.lane.b32.xlu0 %v27708_v58, %s27494_s0 }
 0x237   : > { %19760 = vrot.lane.b32.xlu1 %v27734_v23, %s27423_s23  ;;  %v27741_v23 = vld [vmem:[#allocation7_spill] sm:$0xff] }
 0x238   : > { %v22055_v32 = vpop.permute.xlu0 %1858  ;;  %v22057_v35 = vpop.permute.xlu1 %1836 }
 0x23a   : > { %4135 = vrot.lane.b32.xlu0 %v27716_v50, %s27494_s0 }
 0x23b   : > { %4133 = vrot.lane.b32.xlu1 %v27712_v5, %s27494_s0 }
 0x23c   : > { %v22063_v9 = vpop.permute.xlu0 %1862  ;;  %v22065_v36 = vpop.permute.xlu1 %1860 }
 0x23e   : > { %19770 = vrot.lane.b32.xlu0 %v21875_v47, %s27423_s23  ;;  %v22100_v47 = vld [vmem:[%s20495_s20 + $0x8] sm:$0xf]  ;;  %s27503_s20 = smov 96  }
 0x23f   : > { %19765 = vrot.lane.b32.xlu1 %v21858_v4, %s27423_s23  ;;  %27739 = vst [vmem:[#allocation74_spill] sm:$0xff] %v22100_v47  ;;  %v650_v19 = vrot.slane %v22100_v47, %v27742_v46  ;;  %v642_v10 = vrot.slane %v22100_v47, %v27699_v30 }
 0x240   : > { %v22071_v58 = vpop.permute.xlu0 %1856  ;;  %v22073_v20 = vpop.permute.xlu1 %1830 }
 0x241   : > { %v689_v46 = vmul.f32 %v650_v19, %v27749_v11  ;;  %v687_v40 = vmul.f32 %v642_v10, %v27749_v11  ;;  %v675_v30 = vmul.f32 %v642_v10, %v27748_v27  ;;  %v970_v10 = vsel %vm948_vm0, %v21913_v55, %v21935_v57 }
 0x242   : > { %4137 = vrot.lane.b32.xlu0 %v21790_v41, %s27494_s0  ;;  %s28137_s0 = smov 112  }
 0x243   : > { %19775 = vrot.lane.b32.xlu1 %v21911_v1, %s27423_s23 }
 0x244   : > { %v22079_v5 = vpop.permute.xlu0 %2140  ;;  %v22081_v50 = vpop.permute.xlu1 %2138 }
 0x247   : > { %19780 = vrot.lane.b32.xlu1 %v21907_v34, %s27423_s23  ;;  %v646_v34 = vrot.slane %v22100_v47, %v27741_v23  ;;  %v27752_v47 = vld [vmem:[#allocation29_spill] sm:$0xff] }
 0x248   : > { %v22085_v6 = vpop.permute.xlu0 %2164 }
 0x249   : > { %v22087_v14 = vpop.permute.xlu1 %2142  ;;  %v676_v21 = vmul.f32 %v646_v34, %v27748_v27  ;;  %v688_v23 = vmul.f32 %v646_v34, %v27749_v11  ;;  %v958_v34 = vsel %vm948_vm0, %v21889_v38, %v21887_v42 }
 0x24c   : > { %v22089_v18 = vpop.permute.xlu0 %2168 }
 0x24d   : > { %27735 = vst [vmem:[#allocation67_spill] sm:$0xff] %v22089_v18  ;;  %v22091_v43 = vpop.permute.xlu1 %2166 }
 0x250   : > { %v22093_v53 = vpop.permute.xlu0 %2162 }
 0x251   : > { %27736 = vst [vmem:[#allocation68_spill] sm:$0xff] %v22093_v53  ;;  %v22095_v4 = vpop.permute.xlu1 %2136 }
 0x252   : > { %27737 = vst [vmem:[#allocation73_spill] sm:$0xff] %v22095_v4  ;;  %v677_v4 = vmul.f32 %v650_v19, %v27748_v27 }
 0x254   : > { %v22097_v1 = vpop.permute.xlu0 %2446 }
 0x255   : > { %27738 = vst [vmem:[#allocation69_spill] sm:$0xff] %v22097_v1  ;;  %v22102_v41 = vpop.permute.xlu1 %2444 }
 0x256   : > { %27740 = vst [vmem:[#allocation41_spill] sm:$0xff] %v22102_v41  ;;  %v27753_v41 = vld [vmem:[#allocation28_spill] sm:$0xff] }
 0x257   : > { %v712_v19 = vadd.f32 %v688_v23, %v27753_v41  ;;  %v711_v23 = vadd.f32 %v687_v40, %v27753_v41  ;;  %v957_v40 = vsel %vm948_vm0, %v21953_v37, %v21889_v38 }
 0x258   : > { %v22108_v48 = vpop.permute.xlu0 %2470 }
 0x259   : > { %27743 = vst [vmem:[#allocation79_spill] sm:$0xff] %v22108_v48  ;;  %v22113_v26 = vpop.permute.xlu1 %2448  ;;  %v686_v48 = vmul.f32 %v638_v25, %v27749_v11  ;;  %v959_v11 = vsel %vm948_vm0, %v21887_v42, %v21921_v60  ;;  %v713_v25 = vadd.f32 %v689_v46, %v27753_v41  ;;  %v699_v42 = vadd.f32 %v675_v30, %v27752_v47  ;;  %v27756_v46 = vld [vmem:[#allocation53_spill] sm:$0xff] }
 0x25a   : > { %27747 = vst [vmem:[#allocation80_spill] sm:$0xff] %v22113_v26  ;;  %v700_v26 = vadd.f32 %v676_v21, %v27752_v47 }
 0x25b   : > { %v710_v21 = vadd.f32 %v686_v48, %v27753_v41  ;;  %v969_v48 = vsel %vm948_vm0, %v21945_v12, %v21913_v55  ;;  %v1265_v55 = vsel %vm1254_vm1, %v21961_v7, %v21983_v16 }
 0x25c   : > { %v22120_v53 = vpop.permute.xlu0 %2474  ;;  %v1006_v60 = vadd.f32 %v958_v34, %v700_v26  ;;  %v1264_v26 = vsel %vm1254_vm1, %v21967_v17, %v21961_v7  ;;  %v1274_v34 = vsel %vm1254_vm1, %v21332_v44, %v22001_v15  ;;  %v1275_v7 = vsel %vm1254_vm1, %v22001_v15, %v21977_v3 }
 0x25d   : > { %27750 = vst [vmem:[#allocation75_spill] sm:$0xff] %v22120_v53  ;;  %v22124_v31 = vpop.permute.xlu1 %2472  ;;  %v701_v53 = vadd.f32 %v677_v4, %v27752_v47  ;;  %v971_v4 = vsel %vm948_vm0, %v21935_v57, %v21929_v54  ;;  %v1018_v54 = vadd.f32 %v970_v10, %v712_v19  ;;  %v1005_v19 = vadd.f32 %v957_v40, %v699_v42 }
 0x25e   : > { %27751 = vst [vmem:[#allocation40_spill] sm:$0xff] %v22124_v31  ;;  %v968_v31 = vsel %vm948_vm0, %v27756_v46, %v21945_v12  ;;  %v1019_v30 = vadd.f32 %v971_v4, %v713_v25  ;;  %v1017_v12 = vadd.f32 %v969_v48, %v711_v23  ;;  %v1312_v25 = vadd.f32 %v1264_v26, %v1006_v60 }
 0x25f   : > { %v1007_v57 = vadd.f32 %v959_v11, %v701_v53  ;;  %v1277_v11 = vsel %vm1254_vm1, %v21996_v39, %v21991_v59  ;;  %v1016_v38 = vadd.f32 %v968_v31, %v710_v21  ;;  %v1262_v10 = vsel %vm1254_vm1, %v21321_v8, %v22004_v49 }
 0x260   : > { %v22135_v1 = vpop.permute.xlu0 %2468  ;;  %v1325_v46 = vadd.f32 %v1277_v11, %v1019_v30  ;;  %v1570_v60 = vsel %vm1560_vm2, %v22014_v13, %v22011_v33  ;;  %v1582_v8 = vsel %vm1560_vm2, %v22021_v24, %v22034_v22  ;;  %v1323_v15 = vadd.f32 %v1275_v7, %v1017_v12 }
 0x261   : > { %27754 = vst [vmem:[#allocation47_spill] sm:$0xff] %v22135_v1  ;;  %v22145_v27 = vpop.permute.xlu1 %2442  ;;  %v698_v1 = vadd.f32 %v674_v62, %v27752_v47  ;;  %v1322_v44 = vadd.f32 %v1274_v34, %v1016_v38  ;;  %v1568_v23 = vsel %vm1560_vm2, %v21364_v0, %v22041_v63  ;;  %v1569_v42 = vsel %vm1560_vm2, %v22041_v63, %v22014_v13 }
 0x262   : > { %27755 = vst [vmem:[#allocation46_spill] sm:$0xff] %v22145_v27  ;;  %v27757_v27 = vld [vmem:[#allocation50_spill] sm:$0xff]  ;;  %v1618_v48 = vadd.f32 %v1570_v60, %v1312_v25  ;;  %v1888_v0 = vsel %vm1866_vm3, %v22055_v32, %v22065_v36  ;;  %v1886_v38 = vsel %vm1866_vm3, %v27659_v52, %v22071_v58  ;;  %v1874_v12 = vsel %vm1866_vm3, %v27656_v51, %v22073_v20 }
 0x263   : > { %v956_v18 = vsel %vm948_vm0, %v27757_v27, %v21953_v37  ;;  %v1276_v27 = vsel %vm1254_vm1, %v21977_v3, %v21996_v39  ;;  %v1313_v39 = vadd.f32 %v1265_v55, %v1007_v57  ;;  %v1571_v3 = vsel %vm1560_vm2, %v22011_v33, %v22026_v45 }
 0x264   : > { %v22168_v62 = vpop.permute.xlu0 %2752  ;;  %v1004_v37 = vadd.f32 %v956_v18, %v698_v1  ;;  %v1324_v4 = vadd.f32 %v1276_v27, %v1018_v54  ;;  %v1263_v18 = vsel %vm1254_vm1, %v22004_v49, %v21967_v17  ;;  %v1583_v17 = vsel %vm1560_vm2, %v22034_v22, %v22031_v2 }
 0x265   : > { %v22179_v53 = vpop.permute.xlu1 %2750  ;;  %v1580_v49 = vsel %vm1560_vm2, %v27649_v29, %v22039_v28  ;;  %v1311_v21 = vadd.f32 %v1263_v18, %v1005_v19  ;;  %v1581_v33 = vsel %vm1560_vm2, %v22039_v28, %v22021_v24  ;;  %v1619_v57 = vadd.f32 %v1571_v3, %v1313_v39  ;;  %v27761_v3 = vld [vmem:[#allocation68_spill] sm:$0xff] }
 0x266   : > { %v1310_v31 = vadd.f32 %v1262_v10, %v1004_v37  ;;  %v1630_v22 = vadd.f32 %v1582_v8, %v1324_v4  ;;  %v1876_v29 = vsel %vm1866_vm3, %v22049_v61, %v22047_v56  ;;  %v1631_v26 = vadd.f32 %v1583_v17, %v1325_v46  ;;  %v27759_v4 = vld [vmem:[#allocation69_spill] sm:$0xff] }
 0x267   : > { %v1628_v30 = vadd.f32 %v1580_v49, %v1322_v44  ;;  %v1877_v24 = vsel %vm1866_vm3, %v22047_v56, %v22057_v35  ;;  %v1629_v28 = vadd.f32 %v1581_v33, %v1323_v15  ;;  %v1617_v55 = vadd.f32 %v1569_v42, %v1311_v21  ;;  %v27760_v46 = vld [vmem:[#allocation41_spill] sm:$0xff]  ;;  %v27763_v15 = vld [vmem:[#allocation80_spill] sm:$0xff] }
 0x268   : > { %v22193_v1 = vpop.permute.xlu0 %2776  ;;  %v1616_v63 = vadd.f32 %v1568_v23, %v1310_v31  ;;  %v1889_v27 = vsel %vm1866_vm3, %v22065_v36, %v22063_v9  ;;  %v1924_v11 = vadd.f32 %v1876_v29, %v1618_v48  ;;  %v1887_v56 = vsel %vm1866_vm3, %v22071_v58, %v22055_v32  ;;  %v27758_v58 = vld [vmem:[#allocation67_spill] sm:$0xff]  ;;  %v27764_v42 = vld [vmem:[#allocation73_spill] sm:$0xff]  ;;  %v27765_v48 = vld [vmem:[#allocation70_spill] sm:$0xff] }
 0x269   : > { %v22204_v54 = vpop.permute.xlu1 %2754  ;;  %v1925_v37 = vadd.f32 %v1877_v24, %v1619_v57  ;;  %v1936_v34 = vadd.f32 %v1888_v0, %v1630_v22  ;;  %v1875_v19 = vsel %vm1866_vm3, %v22073_v20, %v22049_v61  ;;  %v2182_v36 = vsel %vm2172_vm4, %v22081_v50, %v22079_v5 }
 0x26a   : > { %v1937_v52 = vadd.f32 %v1889_v27, %v1631_v26  ;;  %v2183_v32 = vsel %vm2172_vm4, %v22079_v5, %v22087_v14  ;;  %v2194_v51 = vsel %vm2172_vm4, %v22085_v6, %v22091_v43  ;;  %v2195_v7 = vsel %vm2172_vm4, %v22091_v43, %v27758_v58  ;;  %v27762_v5 = vld [vmem:[#allocation72_spill] sm:$0xff]  ;;  %v27768_v27 = vld [vmem:[#allocation75_spill] sm:$0xff] }
 0x26b   : > { %v1934_v61 = vadd.f32 %v1886_v38, %v1628_v30  ;;  %v1935_v20 = vadd.f32 %v1887_v56, %v1629_v28  ;;  %v1922_v39 = vadd.f32 %v1874_v12, %v1616_v63  ;;  %v2488_v18 = vsel %vm2478_vm5, %v27760_v46, %v27759_v4  ;;  %v27766_v63 = vld [vmem:[#allocation40_spill] sm:$0xff]  ;;  %v27769_v38 = vld [vmem:[#allocation47_spill] sm:$0xff] }
 0x26c   : > { %v22224_v40 = vpop.permute.xlu0 %2780  ;;  %v1923_v44 = vadd.f32 %v1875_v19, %v1617_v55  ;;  %v2230_v60 = vadd.f32 %v2182_v36, %v1924_v11  ;;  %v2192_v8 = vsel %vm2172_vm4, %v27762_v5, %v27761_v3  ;;  %v2489_v31 = vsel %vm2478_vm5, %v27759_v4, %v27763_v15 }
 0x26d   : > { %v2779_v13 = vpop.permute.xlu1 %2778  ;;  %v2231_v17 = vadd.f32 %v2183_v32, %v1925_v37  ;;  %v2242_v43 = vadd.f32 %v2194_v51, %v1936_v34  ;;  %v2243_v49 = vadd.f32 %v2195_v7, %v1937_v52  ;;  %v2794_v21 = vsel %vm2784_vm6, %v22179_v53, %v22168_v62 }
 0x26e   : > { %v2193_v23 = vsel %vm2172_vm4, %v27761_v3, %v22085_v6  ;;  %v2180_v57 = vsel %vm2172_vm4, %v27765_v48, %v27764_v42  ;;  %v2181_v22 = vsel %vm2172_vm4, %v27764_v42, %v22081_v50  ;;  %v2536_v29 = vadd.f32 %v2488_v18, %v2230_v60  ;;  %v27767_v6 = vld [vmem:[#allocation79_spill] sm:$0xff]  ;;  %v27770_v50 = vld [vmem:[#allocation86_spill] sm:$0xff] }
 0x26f   : > { %v2240_v30 = vadd.f32 %v2192_v8, %v1934_v61  ;;  %v2537_v24 = vadd.f32 %v2489_v31, %v2231_v17  ;;  %v2795_v0 = vsel %vm2784_vm6, %v22168_v62, %v22204_v54  ;;  %v2500_v55 = vsel %vm2478_vm5, %v27767_v6, %v27766_v63  ;;  %v27771_v60 = vld [vmem:[#allocation46_spill] sm:$0xff] }
 0x270   : > { %v2775_v25 = vpop.permute.xlu0 %2774  ;;  %v2501_v11 = vsel %vm2478_vm5, %v27766_v63, %v27768_v27  ;;  %v2498_v56 = vsel %vm2478_vm5, %v27770_v50, %v27769_v38  ;;  %v2842_v12 = vadd.f32 %v2794_v21, %v2536_v29  ;;  %v2241_v37 = vadd.f32 %v2193_v23, %v1935_v20  ;;  %v27772_v3 = vld [vmem:[#allocation82_spill] sm:$0xff]  ;;  %v27774_v23 = vld [vmem:[#allocation24_spill] sm:$0xff] }
 0x271   : > { %v2749_v10 = vpop.permute.xlu1 %2748  ;;  %v2228_v34 = vadd.f32 %v2180_v57, %v1922_v39  ;;  %v2229_v19 = vadd.f32 %v2181_v22, %v1923_v44  ;;  %v2499_v62 = vsel %vm2478_vm5, %v27769_v38, %v27767_v6  ;;  %v2843_v52 = vadd.f32 %v2795_v0, %v2537_v24  ;;  %v27773_v21 = vld [vmem:[#allocation30_spill] sm:$0xff]  ;;  %v27775_v50 = vld [vmem:[#allocation32_spill] sm:$0xff] }
 0x272   : > { %v2806_v32 = vsel %vm2784_vm6, %v22193_v1, %v2779_v13  ;;  %v2807_v51 = vsel %vm2784_vm6, %v2779_v13, %v22224_v40  ;;  %v2548_v4 = vadd.f32 %v2500_v55, %v2242_v43  ;;  %v2549_v18 = vadd.f32 %v2501_v11, %v2243_v49 }
 0x273   : > { %v2546_v20 = vadd.f32 %v2498_v56, %v2240_v30  ;;  %v2547_v44 = vadd.f32 %v2499_v62, %v2241_v37  ;;  %v2486_v5 = vsel %vm2478_vm5, %v27772_v3, %v27771_v60  ;;  %v2487_v8 = vsel %vm2478_vm5, %v27771_v60, %v27760_v46  ;;  %v27776_v62 = vld [vmem:[#allocation36_spill] sm:$0xff] }
 0x274   : > { %v3059_v33 = vpop.permute.xlu0 %3058  ;;  %v2854_v13 = vadd.f32 %v2806_v32, %v2548_v4  ;;  %v2855_v17 = vadd.f32 %v2807_v51, %v2549_v18  ;;  %v2804_v43 = vsel %vm2784_vm6, %v27773_v21, %v2775_v25  ;;  %v2805_v49 = vsel %vm2784_vm6, %v2775_v25, %v22193_v1 }
 0x275   : > { %v3057_v26 = vpop.permute.xlu1 %3056  ;;  %v2792_v42 = vsel %vm2784_vm6, %v27774_v23, %v2749_v10  ;;  %v2793_v48 = vsel %vm2784_vm6, %v2749_v10, %v22179_v53  ;;  %v2534_v29 = vadd.f32 %v2486_v5, %v2228_v34  ;;  %v2535_v30 = vadd.f32 %v2487_v8, %v2229_v19  ;;  %v27777_v23 = vld [vmem:[#allocation8_spill] sm:$0xff] }
 0x276   : > { %v3100_v28 = vsel %vm3090_vm7, %v3057_v26, %v3059_v33  ;;  %v2852_v63 = vadd.f32 %v2804_v43, %v2546_v20  ;;  %v2853_v53 = vadd.f32 %v2805_v49, %v2547_v44 }
 0x277   : > { %v3148_v7 = vadd.f32 %v3100_v28, %v2842_v12  ;;  %v2840_v10 = vadd.f32 %v2792_v42, %v2534_v29  ;;  %v2841_v6 = vadd.f32 %v2793_v48, %v2535_v30  ;;  %v27778_v42 = vld [vmem:[#allocation74_spill] sm:$0xff]  ;;  %v27780_v30 = vld [vmem:[#allocation49_spill] sm:$0xff] }
 0x278   : > { %v3083_v36 = vpop.permute.xlu0 %3082  ;;  %v654_v48 = vrot.slane %v27778_v42, %v27777_v23 }
 0x279   : > { %v22300_v61 = vpop.permute.xlu1 %3060  ;;  %v3220_v57 = vmax.f32 %v3148_v7, 0.0 }
 0x27a   : > { %v3101_v39 = vsel %vm3090_vm7, %v3059_v33, %v22300_v61 }
 0x27b   : > { %v22310_v31 = vadd.f32 %v3101_v39, %v2843_v52 }
 0x27c   : > { %v22316_v33 = vpop.permute.xlu0 %3086 }
 0x27d   : > { %v3221_v46 = vmax.f32 %v22310_v31, 0.0  ;;  %v3085_v22 = vpop.permute.xlu1 %3084 }
 0x27e   : > { %v3112_v24 = vsel %vm3090_vm7, %v3083_v36, %v3085_v22  ;;  %v3113_v0 = vsel %vm3090_vm7, %v3085_v22, %v22316_v33 }
 0x27f   : > { %v3160_v1 = vadd.f32 %v3112_v24, %v2854_v13  ;;  %v22326_v25 = vadd.f32 %v3113_v0, %v2855_v17  ;;  %v22330_v28 = vpack.i.bf16 %v3221_v46, %v3220_v57  ;;  %v22383_v24 = vld [vmem:[%s27224_s4] sm:$0xff]  ;;  %v27781_v0 = vld [vmem:[#allocation26_spill] sm:$0xff] }
 0x280   : > { %v3081_v55 = vpop.permute.xlu0 %3080 }
 0x281   : > { %v3232_v11 = vmax.f32 %v3160_v1, 0.0  ;;  %v3233_v38 = vmax.f32 %v22326_v25, 0.0  ;;  %v3110_v56 = vsel %vm3090_vm7, %v27775_v50, %v3081_v55  ;;  %v3111_v12 = vsel %vm3090_vm7, %v3081_v55, %v3083_v36  ;;  %v3055_v37 = vpop.permute.xlu1 %3054  ;;  %19785 = vrot.lane.b32.xlu0 %v22330_v28, %s27423_s23 }
 0x282   : > { %v3158_v34 = vadd.f32 %v3110_v56, %v2852_v63  ;;  %v3159_v19 = vadd.f32 %v3111_v12, %v2853_v53  ;;  %v3098_v52 = vsel %vm3090_vm7, %v27776_v62, %v3055_v37  ;;  %v3099_v32 = vsel %vm3090_vm7, %v3055_v37, %v3057_v26  ;;  %v27782_v63 = vld [vmem:[#allocation48_spill] sm:$0xff]  ;;  %v27783_v53 = vld [vmem:[#allocation27_spill] sm:$0xff]  ;;  %v27786_v12 = vld [vmem:[#allocation45_spill] sm:$0xff] }
 0x283   : > { %v3146_v51 = vadd.f32 %v3098_v52, %v2840_v10  ;;  %v3147_v7 = vadd.f32 %v3099_v32, %v2841_v6  ;;  %v22343_v4 = vpack.i.bf16 %v3233_v38, %v3232_v11  ;;  %v19018_v18 = vpack.c.bf16 %v3232_v11, %v3220_v57  ;;  %v27779_v57 = vld [vmem:[#allocation57_spill] sm:$0xff]  ;;  %v22402_v37 = vld [vmem:[%s27224_s4 + $0x10] sm:$0xff] }
 0x284   : > { %v22345_v20 = vmax.f32 %v3158_v34, 0.0  ;;  %v22347_v36 = vmax.f32 %v3159_v19, 0.0  ;;  %v947_v39 = vpop.permute.xlu0 %946  ;;  %v690_v1 = vmul.f32 %v654_v48, %v27781_v0  ;;  %v678_v10 = vmul.f32 %v654_v48, %v27783_v53  ;;  %v27785_v11 = vld [vmem:[#allocation37_spill] sm:$0xff]  ;;  %v27787_v19 = vld [vmem:[#allocation66_spill] sm:$0xff]  ;;  %v27788_v48 = vld [vmem:[#allocation31_spill] sm:$0xff] }
 0x285   : > { %v22349_v44 = vmax.f32 %v3146_v51, 0.0  ;;  %v22351_v60 = vmax.f32 %v3147_v7, 0.0  ;;  %v921_v3 = vpop.permute.xlu1 %920  ;;  %19790 = vrot.lane.b32.xlu1 %v22343_v4, %s27423_s23  ;;  %19019 = vmatprep.subr.bf16.mxu0 %v19018_v18  ;;  %v27784_v6 = vmov 0.0   ;;  %v972_v50 = vsel %vm948_vm0, %v27785_v11, %v947_v39 }
 0x286   : > { %v714_v34 = vadd.f32 %v690_v1, %v27753_v41  ;;  %v960_v62 = vsel %vm948_vm0, %v27787_v19, %v921_v3  ;;  %v702_v52 = vadd.f32 %v678_v10, %v27752_v47  ;;  %v22425_v47 = vld [vmem:[%s27224_s4 + $0x20] sm:$0xff]  ;;  %v27789_v10 = vld [vmem:[#allocation56_spill] sm:$0xff] }
 0x287   : > { %v19014_v5 = vpack.c.bf16 %v22345_v20, %v22349_v44  ;;  %v22361_v8 = vpack.i.bf16 %v22347_v36, %v22351_v60  ;;  %v22365_v13 = vpack.i.bf16 %v22345_v20, %v22349_v44  ;;  %v19020_v21 = vpack.c.bf16 %v22347_v36, %v22351_v60 }
 0x288   : > { %v1253_v17 = vpop.permute.xlu0 %1252  ;;  %v1020_v51 = vadd.f32 %v972_v50, %v714_v34  ;;  %v1008_v18 = vadd.f32 %v960_v62, %v702_v52 }
 0x289   : > { %v1227_v49 = vpop.permute.xlu1 %1226  ;;  %19015 = vmatprep.subr.bf16.mxu1 %v19014_v5  ;;  %19795 = vrot.lane.b32.xlu0 %v22361_v8, %s27423_s23  ;;  %v1278_v32 = vsel %vm1254_vm1, %v21991_v59, %v1253_v17 }
 0x28a   : > { %19800 = vrot.lane.b32.xlu1 %v22365_v13, %s27423_s23  ;;  %19021 = vmatpush1.bf16.msra.mxu0 %v19020_v21  ;;  %v1266_v7 = vsel %vm1254_vm1, %v21983_v16, %v1227_v49  ;;  %v1326_v59 = vadd.f32 %v1278_v32, %v1020_v51 }
 0x28b   : > { %19017 = vmatpush1.bf16.msra.mxu1 %v27779_v57 }
 0x28c   : > { %v1559_v22 = vpop.permute.xlu0 %1558 }
 0x28d   : > { %v1533_v29 = vpop.permute.xlu1 %1532  ;;  %19805 = vrot.lane.b32.xlu0 %v27780_v30, %s27488_s24  ;;  %17330 = vmatmul.mubr.msk.f32.vlgmr.msra.gmra.mrb[16].mxu0 %vm3408_vm8, %v22383_v24  ;;  %v1584_v39 = vsel %vm1560_vm2, %v22031_v2, %v1559_v22  ;;  %v1314_v2 = vadd.f32 %v1266_v7, %v1008_v18 }
 0x28e   : > { %19810 = vrot.lane.b32.xlu1 %v27782_v63, %s27488_s24  ;;  %17326 = vmatmul.mubr.msk.f32.vlgmr.msra.gmra.mrb[8].mxu1 %vm3408_vm8, %v22383_v24  ;;  %v1572_v16 = vsel %vm1560_vm2, %v22026_v45, %v1533_v29  ;;  %v1632_v17 = vadd.f32 %v1584_v39, %v1326_v59 }
 0x28f   : > { %3847 = vmatprep.mubr.f32.mxu0 %v27784_v6  ;;  %3758 = vmatprep.mubr.f32.mxu1 %v27784_v6  ;;  %v1620_v23 = vadd.f32 %v1572_v16, %v1314_v2  ;;  %v19024_v2 = vpack.c.bf16 %v3233_v38, %v3221_v46 }
 0x290   : > { %v1865_v55 = vpop.permute.xlu0 %1864 }
 0x291   : > { %v1839_v56 = vpop.permute.xlu1 %1838  ;;  %19815 = vrot.lane.b32.xlu0 %v27786_v12, %s27488_s24  ;;  %17331 = vmatmul.mubr.msk.f32.gmra.mrb[18].mxu0 %vm3408_vm8, %v22402_v37  ;;  %v1890_v5 = vsel %vm1866_vm3, %v22063_v9, %v1865_v55 }
 0x292   : > { %3853 = vmatprep.mubr.f32.mxu0 %v27784_v6  ;;  %17327 = vmatmul.mubr.msk.f32.gmra.mrb[10].mxu1 %vm3408_vm8, %v22402_v37  ;;  %v1878_v21 = vsel %vm1866_vm3, %v22057_v35, %v1839_v56  ;;  %v1938_v57 = vadd.f32 %v1890_v5, %v1632_v17 }
 0x293   : > { %3764 = vmatprep.mubr.f32.mxu1 %v27784_v6  ;;  %v1926_v35 = vadd.f32 %v1878_v21, %v1620_v23 }
 0x294   : > { %v2171_v41 = vpop.permute.xlu0 %2170 }
 0x295   : > { %v2145_v3 = vpop.permute.xlu1 %2144  ;;  %4975 = vrot.lane.b32.xlu0 %v22383_v24, %s27503_s20  ;;  %17332 = vmatmul.mubr.msk.f32.gmra.mrb[20].mxu0 %vm3408_vm8, %v22425_v47  ;;  %v2196_v45 = vsel %vm2172_vm4, %v27758_v58, %v2171_v41 }
 0x296   : > { %3859 = vmatprep.mubr.f32.mxu0 %v27784_v6  ;;  %17328 = vmatmul.mubr.msk.f32.gmra.mrb[12].mxu1 %vm3408_vm8, %v22425_v47  ;;  %v2184_v9 = vsel %vm2172_vm4, %v22087_v14, %v2145_v3  ;;  %v2244_v22 = vadd.f32 %v2196_v45, %v1938_v57 }
 0x297   : > { %3770 = vmatprep.mubr.f32.mxu1 %v27784_v6  ;;  %v2232_v1 = vadd.f32 %v2184_v9, %v1926_v35  ;;  %v27790_v35 = vld [vmem:[#allocation35_spill] sm:$0xff] }
 0x298   : > { %v2477_v49 = vpop.permute.xlu0 %2476 }
 0x299   : > { %v2451_v42 = vpop.permute.xlu1 %2450  ;;  %4979 = vrot.lane.b32.xlu0 %v22425_v47, %s27503_s20  ;;  %17333 = vmatmul.mubr.msk.f32.gmra.mrb[22].mxu0 %vm3408_vm8, %v27788_v48  ;;  %v2502_v58 = vsel %vm2478_vm5, %v27768_v27, %v2477_v49 }
 0x29a   : > { %4329 = vmatprep.mubr.f32.mxu0 %v27784_v6  ;;  %17329 = vmatmul.mubr.msk.f32.gmra.mrb[14].mxu1 %vm3408_vm8, %v27788_v48  ;;  %v2490_v29 = vsel %vm2478_vm5, %v27763_v15, %v2451_v42  ;;  %v2550_v55 = vadd.f32 %v2502_v58, %v2244_v22 }
 0x29b   : > { %3930 = vmatprep.mubr.f32.mxu1 %v27784_v6  ;;  %v2538_v27 = vadd.f32 %v2490_v29, %v2232_v1 }
 0x29c   : > { %v2783_v0 = vpop.permute.xlu0 %2782 }
 0x29d   : > { %v2808_v14 = vsel %vm2784_vm6, %v22224_v40, %v2783_v0  ;;  %v2757_v53 = vpop.permute.xlu1 %2756  ;;  %19830 = vrot.lane.b32.xlu0 %v27789_v10, %s27488_s24 }
 0x29e   : > { %v2796_v11 = vsel %vm2784_vm6, %v22204_v54, %v2757_v53  ;;  %v2856_v50 = vadd.f32 %v2808_v14, %v2550_v55  ;;  %v27791_v53 = vld [vmem:[#allocation38_spill] sm:$0xff] }
 0x29f   : > { %v2844_v34 = vadd.f32 %v2796_v11, %v2538_v27 }
 0x2a0   : > { %v3089_v56 = vpop.permute.xlu0 %3088 }
 0x2a1   : > { %v3114_v15 = vsel %vm3090_vm7, %v22316_v33, %v3089_v56  ;;  %v3063_v19 = vpop.permute.xlu1 %3062  ;;  %4981 = vrot.lane.b32.xlu0 %v27788_v48, %s27503_s20 }
 0x2a2   : > { %v3162_v40 = vadd.f32 %v3114_v15, %v2856_v50  ;;  %v3102_v62 = vsel %vm3090_vm7, %v22300_v61, %v3063_v19  ;;  %v27792_v15 = vld [vmem:[#allocation65_spill] sm:$0xff] }
 0x2a3   : > { %v3150_v52 = vadd.f32 %v3102_v62, %v2844_v34  ;;  %v22549_v34 = vld [vmem:[%s27224_s4 + $0x30] sm:$0xff] }
 0x2a4   : > { %v3234_v32 = vmax.f32 %v3162_v40, 0.0  ;;  %v22467_v51 = vpop.permute.xlu0 %19755 }
 0x2a5   : > { %v3222_v54 = vmax.f32 %v3150_v52, 0.0  ;;  %v19758_v7 = vunpack.i.h.bf16 %v22467_v51  ;;  %v19757_v41 = vunpack.i.l.bf16 %v22467_v51  ;;  %v22471_v18 = vpop.permute.xlu1 %19750  ;;  %19845 = vrot.lane.b32.xlu0 %v22330_v28, %s27488_s24  ;;  %v22623_v51 = vld [vmem:[%s27224_s4] sm:$0xff] }
 0x2a6   : > { %v19753_v33 = vunpack.i.h.bf16 %v22471_v18  ;;  %v19752_v39 = vunpack.i.l.bf16 %v22471_v18 }
 0x2a7   : > { %v19022_v3 = vpack.c.bf16 %v3234_v32, %v3222_v54  ;;  %v22477_v61 = vpack.i.bf16 %v3234_v32, %v3222_v54  ;;  %v4223_v59 = vsel %vm948_vm0, %v19757_v41, %v19758_v7 }
 0x2a8   : > { %v22482_v16 = vpop.permute.xlu0 %4131  ;;  %v4212_v5 = vsel %vm948_vm0, %v19752_v39, %v19753_v33 }
 0x2a9   : > { %19023 = vmatprep.subr.bf16.mxu1 %v19022_v3  ;;  %19855 = vrot.lane.b32.xlu0 %v22361_v8, %s27488_s24  ;;  %v19761_v17 = vpop.permute.xlu1 %19760  ;;  %v19026_v21 = vpack.c.bf16 %v4223_v59, %v4212_v5 }
 0x2aa   : > { %19820 = vrot.lane.b32.xlu1 %v22477_v61, %s27423_s23  ;;  %v19763_v49 = vunpack.i.h.bf16 %v19761_v17  ;;  %v19762_v23 = vunpack.i.l.bf16 %v19761_v17  ;;  %19025 = vmatpush1.bf16.msra.mxu1 %v19024_v2  ;;  %s27501_s23 = smov 64  }
 0x2ab   : > { %19027 = vmatprep.subr.bf16.mxu0 %v19026_v21 }
 0x2ac   : > { %v4222_v31 = vsel %vm948_vm0, %v19763_v49, %v19757_v41  ;;  %v4211_v46 = vsel %vm948_vm0, %v19762_v23, %v19752_v39  ;;  %v22497_v25 = vpop.permute.xlu0 %4135 }
 0x2ad   : > { %19865 = vrot.lane.b32.xlu0 %v27780_v30, %s20345_s25  ;;  %v22501_v38 = vpop.permute.xlu1 %4133  ;;  %v19028_v45 = vpack.c.bf16 %v4222_v31, %v4211_v46  ;;  %17334 = vmatmul.mubr.msk.f32.vlgmr.msra.gmra.mrb[16].mxu1 %vm3408_vm8, %v22383_v24 }
 0x2ae   : > { %4977 = vrot.lane.b32.xlu1 %v22402_v37, %s27503_s20  ;;  %3936 = vmatprep.mubr.f32.mxu1 %v27784_v6 }
 0x2af   : > { %19029 = vmatpush1.bf16.msra.mxu0 %v19028_v45 }
 0x2b0   : > { %v22508_v42 = vpop.permute.xlu0 %19770 }
 0x2b1   : > { %v19773_v48 = vunpack.i.h.bf16 %v22508_v42  ;;  %v19772_v57 = vunpack.i.l.bf16 %v22508_v42  ;;  %19875 = vrot.lane.b32.xlu0 %v27786_v12, %s20345_s25  ;;  %v22514_v9 = vpop.permute.xlu1 %19765  ;;  %17335 = vmatmul.mubr.msk.f32.gmra.mrb[18].mxu1 %vm3408_vm8, %v22402_v37 }
 0x2b2   : > { %19825 = vrot.lane.b32.xlu1 %v27790_v35, %s27488_s24  ;;  %v19768_v58 = vunpack.i.h.bf16 %v22514_v9  ;;  %v19767_v22 = vunpack.i.l.bf16 %v22514_v9  ;;  %17338 = vmatmul.mubr.msk.f32.vlgmr.msra.gmra.mrb[24].mxu0 %vm3408_vm8, %v22482_v16 }
 0x2b3   : > { %v4227_v29 = vsel %vm948_vm0, %v19772_v57, %v19773_v48  ;;  %4335 = vmatprep.mubr.f32.mxu0 %v27784_v6  ;;  %3942 = vmatprep.mubr.f32.mxu1 %v27784_v6 }
 0x2b4   : > { %v4216_v0 = vsel %vm948_vm0, %v19767_v22, %v19768_v58  ;;  %v22557_v62 = vpop.permute.xlu0 %4137 }
 0x2b5   : > { %5819 = vrot.lane.b32.xlu0 %v22383_v24, %s27490_s19  ;;  %v19776_v1 = vpop.permute.xlu1 %19775  ;;  %v19034_v14 = vpack.c.bf16 %v4227_v29, %v4216_v0  ;;  %17336 = vmatmul.mubr.msk.f32.gmra.mrb[20].mxu1 %vm3408_vm8, %v22425_v47 }
 0x2b6   : > { %19835 = vrot.lane.b32.xlu1 %v27791_v53, %s27488_s24  ;;  %v19778_v55 = vunpack.i.h.bf16 %v19776_v1  ;;  %v19777_v11 = vunpack.i.l.bf16 %v19776_v1  ;;  %17339 = vmatmul.mubr.msk.f32.gmra.mrb[26].mxu0 %vm3408_vm8, %v22501_v38 }
 0x2b7   : > { %19035 = vmatprep.subr.bf16.mxu0 %v19034_v14  ;;  %4341 = vmatprep.mubr.f32.mxu0 %v27784_v6 }
 0x2b8   : > { %v4226_v27 = vsel %vm948_vm0, %v19778_v55, %v19772_v57  ;;  %v4215_v24 = vsel %vm948_vm0, %v19777_v11, %v19767_v22  ;;  %3948 = vmatprep.mubr.f32.mxu1 %v27784_v6 }
 0x2b9   : > { %5823 = vrot.lane.b32.xlu0 %v22425_v47, %s27490_s19  ;;  %v19781_v50 = vpop.permute.xlu1 %19780  ;;  %v19036_v56 = vpack.c.bf16 %v4226_v27, %v4215_v24  ;;  %17337 = vmatmul.mubr.msk.f32.gmra.mrb[22].mxu1 %vm3408_vm8, %v22549_v34 }
 0x2ba   : > { %19840 = vrot.lane.b32.xlu1 %v27792_v15, %s27488_s24  ;;  %v19783_v19 = vunpack.i.h.bf16 %v19781_v50  ;;  %v19782_v40 = vunpack.i.l.bf16 %v19781_v50  ;;  %17340 = vmatmul.mubr.msk.f32.gmra.mrb[28].mxu0 %vm3408_vm8, %v22497_v25 }
 0x2bb   : > { %19037 = vmatpush1.bf16.msra.mxu0 %v19036_v56  ;;  %4347 = vmatprep.mubr.f32.mxu0 %v27784_v6 }
 0x2bc   : > { %v4224_v52 = vsel %vm948_vm0, %v19758_v7, %v19783_v19  ;;  %v4213_v32 = vsel %vm948_vm0, %v19753_v33, %v19782_v40  ;;  %v4214_v54 = vsel %vm948_vm0, %v19782_v40, %v19777_v11  ;;  %v4225_v41 = vsel %vm948_vm0, %v19783_v19, %v19778_v55  ;;  %4418 = vmatprep.mubr.f32.mxu1 %v27784_v6 }
 0x2bd   : > { %19890 = vrot.lane.b32.xlu0 %v27789_v10, %s20345_s25  ;;  %v19030_v39 = vpack.c.bf16 %v4225_v41, %v4214_v54  ;;  %v19032_v3 = vpack.c.bf16 %v4224_v52, %v4213_v32 }
 0x2be   : > { %19850 = vrot.lane.b32.xlu1 %v22343_v4, %s27488_s24  ;;  %17341 = vmatmul.mubr.msk.f32.gmra.mrb[30].mxu0 %vm3408_vm8, %v22557_v62 }
 0x2bf   : > { %19031 = vmatprep.subr.bf16.mxu1 %v19030_v39  ;;  %4507 = vmatprep.mubr.f32.mxu0 %v27784_v6 }
 0x2c0   : > { %19033 = vmatpush1.bf16.msra.mxu1 %v19032_v3 }
 0x2c1   : > { %5825 = vrot.lane.b32.xlu0 %v22549_v34, %s27490_s19 }
 0x2c2   : > { %19860 = vrot.lane.b32.xlu1 %v22365_v13, %s27488_s24  ;;  %17346 = vmatmul.mubr.msk.f32.vlgmr.msra.gmra.mrb[32].mxu0 %vm3408_vm8, %v22482_v16 }
 0x2c3   : > { %17342 = vmatmul.mubr.msk.f32.vlgmr.msra.gmra.mrb[24].mxu1 %vm3408_vm8, %v22482_v16  ;;  %4513 = vmatprep.mubr.f32.mxu0 %v27784_v6 }
 0x2c4   : > { %4424 = vmatprep.mubr.f32.mxu1 %v27784_v6 }
 0x2c5   : > { %19905 = vrot.lane.b32.xlu0 %v22330_v28, %s20345_s25 }
 0x2c6   : > { %19870 = vrot.lane.b32.xlu1 %v27782_v63, %s20345_s25  ;;  %17347 = vmatmul.mubr.msk.f32.gmra.mrb[34].mxu0 %vm3408_vm8, %v22501_v38 }
 0x2c7   : > { %17343 = vmatmul.mubr.msk.f32.gmra.mrb[26].mxu1 %vm3408_vm8, %v22501_v38  ;;  %4519 = vmatprep.mubr.f32.mxu0 %v27784_v6 }
 0x2c8   : > { %4430 = vmatprep.mubr.f32.mxu1 %v27784_v6 }
 0x2c9   : > { %19915 = vrot.lane.b32.xlu0 %v22361_v8, %s20345_s25 }
 0x2ca   : > { %19880 = vrot.lane.b32.xlu1 %v22477_v61, %s27488_s24  ;;  %17348 = vmatmul.mubr.msk.f32.gmra.mrb[36].mxu0 %vm3408_vm8, %v22497_v25  ;;  %s28138_s24 = smov 32  }
 0x2cb   : > { %17344 = vmatmul.mubr.msk.f32.gmra.mrb[28].mxu1 %vm3408_vm8, %v22497_v25  ;;  %4525 = vmatprep.mubr.f32.mxu0 %v27784_v6 }
 0x2cc   : > { %4436 = vmatprep.mubr.f32.mxu1 %v27784_v6 }
 0x2cd   : > { %19925 = vrot.lane.b32.xlu0 %v27780_v30, %s20346_s26 }
 0x2ce   : > { %5821 = vrot.lane.b32.xlu1 %v22402_v37, %s27490_s19  ;;  %17349 = vmatmul.mubr.msk.f32.gmra.mrb[38].mxu0 %vm3408_vm8, %v22557_v62  ;;  %s28139_s19 = smov 80  }
 0x2cf   : > { %17345 = vmatmul.mubr.msk.f32.gmra.mrb[30].mxu1 %vm3408_vm8, %v22557_v62  ;;  %4685 = vmatprep.mubr.f32.mxu0 %v27784_v6 }
 0x2d0   : > { %4596 = vmatprep.mubr.f32.mxu1 %v27784_v6 }
 0x2d1   : > { %19935 = vrot.lane.b32.xlu0 %v27786_v12, %s20346_s26 }
 0x2d2   : > { %19885 = vrot.lane.b32.xlu1 %v27790_v35, %s20345_s25 }
 0x2d5   : > { %6663 = vrot.lane.b32.xlu0 %v22623_v51, %s27501_s23 }
 0x2d6   : > { %19895 = vrot.lane.b32.xlu1 %v27791_v53, %s20345_s25 }
 0x2d9   : > { %6667 = vrot.lane.b32.xlu0 %v22425_v47, %s27501_s23 }
 0x2da   : > { %19900 = vrot.lane.b32.xlu1 %v27792_v15, %s20345_s25 }
 0x2dd   : > { %19950 = vrot.lane.b32.xlu0 %v27789_v10, %s20346_s26 }
 0x2de   : > { %19910 = vrot.lane.b32.xlu1 %v22343_v4, %s20345_s25 }
 0x2e1   : > { %6669 = vrot.lane.b32.xlu0 %v22549_v34, %s27501_s23 }
 0x2e2   : > { %19920 = vrot.lane.b32.xlu1 %v22365_v13, %s20345_s25 }
 0x2e5   : > { %19965 = vrot.lane.b32.xlu0 %v22330_v28, %s20346_s26 }
 0x2e6   : > { %19930 = vrot.lane.b32.xlu1 %v27782_v63, %s20346_s26 }
 0x2e9   : > { %19975 = vrot.lane.b32.xlu0 %v22361_v8, %s20346_s26 }
 0x2ea   : > { %19940 = vrot.lane.b32.xlu1 %v22477_v61, %s20345_s25 }
 0x2ed   : > { %19985 = vrot.lane.b32.xlu0 %v27780_v30, %s20347_s27 }
 0x2ee   : > { %6665 = vrot.lane.b32.xlu1 %v22402_v37, %s27501_s23 }
 0x2f1   : > { %19995 = vrot.lane.b32.xlu0 %v27786_v12, %s20347_s27 }
 0x2f2   : > { %19945 = vrot.lane.b32.xlu1 %v27790_v35, %s20346_s26 }
 0x2f3   : > { %v22657_v7 = vpop.permute.xlu0 %19785 }
 0x2f4   : > { %v19788_v18 = vunpack.i.h.bf16 %v22657_v7  ;;  %v19787_v33 = vunpack.i.l.bf16 %v22657_v7 }
 0x2f5   : > { %7507 = vrot.lane.b32.xlu0 %v22623_v51, %s20348_s28 }
 0x2f6   : > { %19955 = vrot.lane.b32.xlu1 %v27791_v53, %s20346_s26  ;;  %v4220_v17 = vsel %vm948_vm0, %v19787_v33, %v19788_v18 }
 0x2f7   : > { %v22665_v59 = vpop.permute.xlu1 %19790 }
 0x2f8   : > { %v19793_v2 = vunpack.i.h.bf16 %v22665_v59  ;;  %v19792_v5 = vunpack.i.l.bf16 %v22665_v59 }
 0x2f9   : > { %7511 = vrot.lane.b32.xlu0 %v22425_v47, %s20348_s28 }
 0x2fa   : > { %19960 = vrot.lane.b32.xlu1 %v27792_v15, %s20346_s26  ;;  %v4231_v21 = vsel %vm948_vm0, %v19792_v5, %v19793_v2 }
 0x2fb   : > { %v19796_v49 = vpop.permute.xlu0 %19795  ;;  %v19042_v23 = vpack.c.bf16 %v4231_v21, %v4220_v17 }
 0x2fc   : > { %v19798_v31 = vunpack.i.h.bf16 %v19796_v49  ;;  %v19797_v46 = vunpack.i.l.bf16 %v19796_v49  ;;  %v19801_v45 = vpop.permute.xlu1 %19800  ;;  %v22768_v49 = vld [vmem:[%s27224_s4 + $0x20] sm:$0xff] }
 0x2fd   : > { %v19803_v57 = vunpack.i.h.bf16 %v19801_v45  ;;  %v19802_v22 = vunpack.i.l.bf16 %v19801_v45  ;;  %20010 = vrot.lane.b32.xlu0 %v27789_v10, %s20347_s27  ;;  %19043 = vmatprep.subr.bf16.mxu0 %v19042_v23 }
 0x2fe   : > { %v4219_v47 = vsel %vm948_vm0, %v19797_v46, %v19787_v33  ;;  %v4230_v29 = vsel %vm948_vm0, %v19798_v31, %v19792_v5  ;;  %19970 = vrot.lane.b32.xlu1 %v22343_v4, %s20346_s26 }
 0x2ff   : > { %v4228_v0 = vsel %vm948_vm0, %v19773_v48, %v19803_v57  ;;  %v4217_v1 = vsel %vm948_vm0, %v19768_v58, %v19802_v22  ;;  %v22691_v14 = vpop.permute.xlu0 %19805  ;;  %v4218_v55 = vsel %vm948_vm0, %v19802_v22, %v19797_v46  ;;  %v4229_v11 = vsel %vm948_vm0, %v19803_v57, %v19798_v31 }
 0x300   : > { %v19808_v27 = vunpack.i.h.bf16 %v22691_v14  ;;  %v19807_v24 = vunpack.i.l.bf16 %v22691_v14  ;;  %v22697_v50 = vpop.permute.xlu1 %19810  ;;  %v19038_v56 = vpack.c.bf16 %v4229_v11, %v4218_v55  ;;  %v19044_v42 = vpack.c.bf16 %v4230_v29, %v4219_v47  ;;  %v22797_v11 = vpop.f32.mrb[0].mxu0 }
 0x301   : > { %v19813_v48 = vunpack.i.h.bf16 %v22697_v50  ;;  %v19812_v9 = vunpack.i.l.bf16 %v22697_v50  ;;  %7513 = vrot.lane.b32.xlu0 %v22549_v34, %s20348_s28  ;;  %v19040_v58 = vpack.c.bf16 %v4228_v0, %v4217_v1 }
 0x302   : > { %19980 = vrot.lane.b32.xlu1 %v22365_v13, %s20346_s26  ;;  %19039 = vmatprep.subr.bf16.mxu1 %v19038_v56  ;;  %v5056_v19 = vsel %vm1254_vm1, %v19807_v24, %v19808_v27 }
 0x303   : > { %19045 = vmatpush1.bf16.msra.mxu0 %v19044_v42  ;;  %19041 = vmatpush1.bf16.msra.mxu1 %v19040_v58  ;;  %v19816_v40 = vpop.permute.xlu0 %19815  ;;  %v5067_v52 = vsel %vm1254_vm1, %v19812_v9, %v19813_v48 }
 0x304   : > { %v19818_v32 = vunpack.i.h.bf16 %v19816_v40  ;;  %v19817_v54 = vunpack.i.l.bf16 %v19816_v40  ;;  %v19050_v41 = vpack.c.bf16 %v5067_v52, %v5056_v19 }
 0x305   : > { %20025 = vrot.lane.b32.xlu0 %v22330_v28, %s20347_s27 }
 0x306   : > { %v5055_v39 = vsel %vm1254_vm1, %v19817_v54, %v19807_v24  ;;  %v5066_v3 = vsel %vm1254_vm1, %v19818_v32, %v19812_v9  ;;  %17354 = vmatmul.mubr.msk.f32.vlgmr.msra.gmra.mrb[40].mxu0 %vm3408_vm8, %v22482_v16  ;;  %19990 = vrot.lane.b32.xlu1 %v27782_v63, %s20347_s27 }
 0x307   : > { %17350 = vmatmul.mubr.msk.f32.vlgmr.msra.gmra.mrb[32].mxu1 %vm3408_vm8, %v22482_v16  ;;  %19051 = vmatprep.subr.bf16.mxu0 %v19050_v41  ;;  %v22721_v33 = vpop.permute.xlu0 %4975  ;;  %v19052_v5 = vpack.c.bf16 %v5066_v3, %v5055_v39 }
 0x308   : > { %4691 = vmatprep.mubr.f32.mxu0 %v27784_v6  ;;  %4602 = vmatprep.mubr.f32.mxu1 %v27784_v6 }
 0x309   : > { %20035 = vrot.lane.b32.xlu0 %v22361_v8, %s20347_s27  ;;  %19053 = vmatpush1.bf16.msra.mxu0 %v19052_v5 }
 0x30a   : > { %17355 = vmatmul.mubr.msk.f32.gmra.mrb[42].mxu0 %vm3408_vm8, %v22501_v38  ;;  %20000 = vrot.lane.b32.xlu1 %v22477_v61, %s20346_s26  ;;  %s27492_s26 = smov 32  }
 0x30b   : > { %17351 = vmatmul.mubr.msk.f32.gmra.mrb[34].mxu1 %vm3408_vm8, %v22501_v38  ;;  %v22733_v17 = vpop.permute.xlu0 %4979  ;;  %4697 = vmatprep.mubr.f32.mxu0 %v27784_v6 }
 0x30c   : > { %4608 = vmatprep.mubr.f32.mxu1 %v27784_v6 }
 0x30d   : > { %20045 = vrot.lane.b32.xlu0 %v27780_v30, %s20348_s28 }
 0x30e   : > { %17356 = vmatmul.mubr.msk.f32.gmra.mrb[44].mxu0 %vm3408_vm8, %v22497_v25  ;;  %7509 = vrot.lane.b32.xlu1 %v22402_v37, %s20348_s28 }
 0x30f   : > { %17352 = vmatmul.mubr.msk.f32.gmra.mrb[36].mxu1 %vm3408_vm8, %v22497_v25  ;;  %v22745_v21 = vpop.permute.xlu0 %19830  ;;  %4703 = vmatprep.mubr.f32.mxu0 %v27784_v6 }
 0x310   : > { %4614 = vmatprep.mubr.f32.mxu1 %v27784_v6  ;;  %v27426_v7 = vunpack.i.h.bf16 %v22745_v21 }
 0x311   : > { %20055 = vrot.lane.b32.xlu0 %v27786_v12, %s20348_s28 }
 0x312   : > { %17357 = vmatmul.mubr.msk.f32.gmra.mrb[46].mxu0 %vm3408_vm8, %v22557_v62  ;;  %20005 = vrot.lane.b32.xlu1 %v27790_v35, %s20347_s27 }
 0x313   : > { %17353 = vmatmul.mubr.msk.f32.gmra.mrb[38].mxu1 %vm3408_vm8, %v22557_v62  ;;  %v22757_v37 = vpop.permute.xlu0 %4981  ;;  %5173 = vmatprep.mubr.f32.mxu0 %v27784_v6 }
 0x314   : > { %4774 = vmatprep.mubr.f32.mxu1 %v27784_v6 }
 0x315   : > { %8351 = vrot.lane.b32.xlu0 %v22623_v51, %s27492_s26 }
 0x316   : > { %20015 = vrot.lane.b32.xlu1 %v27791_v53, %s20347_s27  ;;  %17362 = vmatmul.mubr.msk.f32.vlgmr.msra.gmra.mrb[48].mxu0 %vm3408_vm8, %v22721_v33 }
 0x317   : > { %v22772_v23 = vpop.permute.xlu0 %19845  ;;  %5179 = vmatprep.mubr.f32.mxu0 %v27784_v6 }
 0x319   : > { %8355 = vrot.lane.b32.xlu0 %v22768_v49, %s27492_s26 }
 0x31a   : > { %20020 = vrot.lane.b32.xlu1 %v27792_v15, %s20347_s27 }
 0x31b   : > { %v22779_v31 = vpop.permute.xlu0 %19855 }
 0x31c   : > { %v19821_v46 = vpop.permute.xlu1 %19820 }
 0x31d   : > { %v19823_v45 = vunpack.i.h.bf16 %v19821_v46  ;;  %v19822_v57 = vunpack.i.l.bf16 %v19821_v46  ;;  %20070 = vrot.lane.b32.xlu0 %v27789_v10, %s20348_s28 }
 0x31e   : > { %20030 = vrot.lane.b32.xlu1 %v22343_v4, %s20347_s27 }
 0x31f   : > { %v4221_v22 = vsel %vm948_vm0, %v19788_v18, %v19822_v57  ;;  %v4232_v47 = vsel %vm948_vm0, %v19793_v2, %v19823_v45  ;;  %v22791_v29 = vpop.permute.xlu0 %19865  ;;  %v19046_v0 = vpack.c.bf16 %v19823_v45, %v19822_v57  ;;  %v19832_v18 = vunpack.i.l.bf16 %v22745_v21  ;;  %v22808_v2 = vpop.f32.mrb[1].mxu0 }
 0x320   : > { %v22793_v1 = vpop.permute.xlu1 %4977  ;;  %v19048_v55 = vpack.c.bf16 %v4232_v47, %v4221_v22  ;;  %v22812_v56 = vpop.f32.mrb[2].mxu0  ;;  %vm12251_vm0 = vcmask 736832  }
 0x321   : > { %19047 = vmatprep.subr.bf16.mxu1 %v19046_v0  ;;  %17363 = vmatmul.mubr.msk.f32.gmra.mrb[50].mxu0 %vm3408_vm8, %v22793_v1  ;;  %27793 = vst [vmem:[#allocation23_spill] sm:$0xff] %v22812_v56  ;;  %v5071_v19 = vsel %vm1254_vm1, %v19832_v18, %v27426_v7  ;;  %v22834_v52 = vpop.f32.mrb[3].mxu0 }
 0x322   : > { %8357 = vrot.lane.b32.xlu0 %v22549_v34, %s27492_s26  ;;  %20040 = vrot.lane.b32.xlu1 %v22365_v13, %s20347_s27  ;;  %27794 = vst [vmem:[#allocation83_spill] sm:$0xff] %v22834_v52  ;;  %v22838_v41 = vpop.f32.mrb[4].mxu0 }
 0x323   : > { %19049 = vmatpush1.bf16.msra.mxu1 %v19048_v55  ;;  %v22805_v59 = vpop.permute.xlu0 %19875  ;;  %5185 = vmatprep.mubr.f32.mxu0 %v27784_v6  ;;  %v22844_v39 = vpop.f32.mrb[5].mxu0 }
 0x324   : > { %v22810_v24 = vpop.permute.xlu1 %19825  ;;  %v22852_v45 = vpop.f32.mrb[6].mxu0 }
 0x325   : > { %v27425_v34 = vunpack.i.h.bf16 %v22810_v24  ;;  %v19827_v42 = vunpack.i.l.bf16 %v22810_v24  ;;  %17364 = vmatmul.mubr.msk.f32.gmra.mrb[52].mxu0 %vm3408_vm8, %v22733_v17  ;;  %27795 = vst [vmem:[#allocation55_spill] sm:$0xff] %v22852_v45  ;;  %v22861_v47 = vpop.f32.mrb[7].mxu0 }
 0x326   : > { %17358 = vmatmul.mubr.msk.f32.vlgmr.msra.gmra.mrb[40].mxu1 %vm3408_vm8, %v22482_v16  ;;  %20085 = vrot.lane.b32.xlu0 %v22330_v28, %s20348_s28  ;;  %27796 = vst [vmem:[#allocation54_spill] sm:$0xff] %v22861_v47 }
 0x327   : > { %20050 = vrot.lane.b32.xlu1 %v27782_v63, %s20348_s28  ;;  %v22824_v9 = vpop.permute.xlu0 %5819  ;;  %4780 = vmatprep.mubr.f32.mxu1 %v27784_v6  ;;  %v5060_v58 = vsel %vm1254_vm1, %v19827_v42, %v27425_v34  ;;  %v19858_v34 = vunpack.i.h.bf16 %v22779_v31 }
 0x328   : > { %v19836_v40 = vpop.permute.xlu1 %19835  ;;  %v19058_v16 = vpack.c.bf16 %v5071_v19, %v5060_v58  ;;  %5191 = vmatprep.mubr.f32.mxu0 %v27784_v6  ;;  %v19847_v19 = vunpack.i.l.bf16 %v22772_v23 }
 0x329   : > { %v19838_v32 = vunpack.i.h.bf16 %v19836_v40  ;;  %v19837_v54 = vunpack.i.l.bf16 %v19836_v40  ;;  %17365 = vmatmul.mubr.msk.f32.gmra.mrb[54].mxu0 %vm3408_vm8, %v22757_v37 }
 0x32a   : > { %17359 = vmatmul.mubr.msk.f32.gmra.mrb[42].mxu1 %vm3408_vm8, %v22501_v38  ;;  %20095 = vrot.lane.b32.xlu0 %v22361_v8, %s20348_s28  ;;  %v22858_v38 = vld [vmem:[%s27224_s4 + $0x10] sm:$0xff] }
 0x32b   : > { %v5070_v3 = vsel %vm1254_vm1, %v19838_v32, %v19832_v18  ;;  %v5059_v5 = vsel %vm1254_vm1, %v19837_v54, %v19827_v42  ;;  %20060 = vrot.lane.b32.xlu1 %v22477_v61, %s20347_s27  ;;  %19059 = vmatprep.subr.bf16.mxu0 %v19058_v16  ;;  %v22850_v46 = vpop.permute.xlu0 %5823  ;;  %v22863_v18 = vpop.f32.mrb[0].mxu1  ;;  %s20357_s27 = smov 16  }
 0x32c   : > { %v19841_v57 = vpop.permute.xlu1 %19840  ;;  %4786 = vmatprep.mubr.f32.mxu1 %v27784_v6  ;;  %v19060_v22 = vpack.c.bf16 %v5070_v3, %v5059_v5  ;;  %5351 = vmatprep.mubr.f32.mxu0 %v27784_v6  ;;  %v22865_v42 = vpop.f32.mrb[8].mxu0  ;;  %v19857_v3 = vunpack.i.l.bf16 %v22779_v31  ;;  %v27801_v31 = vunpack.i.h.bf16 %v22772_v23 }
 0x32d   : > { %v19843_v0 = vunpack.i.h.bf16 %v19841_v57  ;;  %v19842_v55 = vunpack.i.l.bf16 %v19841_v57  ;;  %v22873_v40 = vpop.f32.mrb[1].mxu1  ;;  %v22875_v16 = vpop.f32.mrb[9].mxu0 }
 0x32e   : > { %17360 = vmatmul.mubr.msk.f32.gmra.mrb[44].mxu1 %vm3408_vm8, %v22497_v25  ;;  %20105 = vrot.lane.b32.xlu0 %v27780_v30, %s20349_s29  ;;  %v22889_v43 = vpop.f32.mrb[2].mxu1 }
 0x32f   : > { %v5057_v5 = vsel %vm1254_vm1, %v19808_v27, %v19842_v55  ;;  %v5068_v57 = vsel %vm1254_vm1, %v19813_v48, %v19843_v0  ;;  %8353 = vrot.lane.b32.xlu1 %v22858_v38, %s27492_s26  ;;  %19061 = vmatpush1.bf16.msra.mxu0 %v19060_v22  ;;  %v22886_v25 = vpop.permute.xlu0 %19890  ;;  %v5058_v26 = vsel %vm1254_vm1, %v19842_v55, %v19837_v54  ;;  %v22896_v27 = vpop.f32.mrb[10].mxu0  ;;  %s20363_s26 = smov 108  }
 0x330   : > { %27797 = vst [vmem:[#allocation84_spill] sm:$0xff] %v22889_v43  ;;  %v22892_v7 = vpop.permute.xlu1 %19850  ;;  %4792 = vmatprep.mubr.f32.mxu1 %v27784_v6  ;;  %v5069_v14 = vsel %vm1254_vm1, %v19843_v0, %v19838_v32  ;;  %27798 = vst [vmem:[#allocation25_spill] sm:$0xff] %v22896_v27  ;;  %v19056_v58 = vpack.c.bf16 %v5068_v57, %v5057_v5  ;;  %v22900_v52 = vpop.f32.mrb[3].mxu1  ;;  %v5064_v32 = vsel %vm1254_vm1, %v19847_v19, %v27801_v31 }
 0x331   : > { %v27427_v50 = vunpack.i.h.bf16 %v22892_v7  ;;  %v19852_v48 = vunpack.i.l.bf16 %v22892_v7  ;;  %v19054_v22 = vpack.c.bf16 %v5069_v14, %v5058_v26  ;;  %27799 = vst [vmem:[#allocation43_spill] sm:$0xff] %v22900_v52  ;;  %v22902_v54 = vpop.f32.mrb[11].mxu0  ;;  %v22911_v0 = vpop.f32.mrb[4].mxu1  ;;  %v5063_v26 = vsel %vm1254_vm1, %v19857_v3, %v19847_v19 }
 0x332   : > { %27800 = vst [vmem:[#allocation42_spill] sm:$0xff] %v22902_v54  ;;  %17361 = vmatmul.mubr.msk.f32.gmra.mrb[46].mxu1 %vm3408_vm8, %v22557_v62  ;;  %17370 = vmatmul.mubr.msk.f32.vlgmr.msra.gmra.mrb[56].mxu0 %vm3408_vm8, %v22721_v33  ;;  %27802 = vst [vmem:[#allocation85_spill] sm:$0xff] %v22911_v0  ;;  %v22913_v55 = vpop.f32.mrb[12].mxu0  ;;  %v22926_v14 = vpop.f32.mrb[5].mxu1 }
 0x333   : > { %v5074_v5 = vsel %vm1254_vm1, %v19858_v34, %v19852_v48  ;;  %20115 = vrot.lane.b32.xlu0 %v27786_v12, %s20349_s29  ;;  %20065 = vrot.lane.b32.xlu1 %v27790_v35, %s20348_s28  ;;  %v22921_v62 = vpop.permute.xlu0 %5825  ;;  %v5075_v57 = vsel %vm1254_vm1, %v19852_v48, %v27427_v50  ;;  %27803 = vst [vmem:[#allocation11_spill] sm:$0xff] %v22926_v14  ;;  %v22929_v47 = vpop.f32.mrb[13].mxu0 }
 0x334   : > { %19055 = vmatprep.subr.bf16.mxu1 %v19054_v22  ;;  %v19861_v31 = vpop.permute.xlu1 %19860  ;;  %5357 = vmatprep.mubr.f32.mxu0 %v27784_v6  ;;  %v19066_v19 = vpack.c.bf16 %v5075_v57, %v5064_v32  ;;  %v19068_v56 = vpack.c.bf16 %v5074_v5, %v5063_v26  ;;  %v22932_v43 = vpop.f32.mrb[6].mxu1  ;;  %v27808_v26 = vunpack.i.h.bf16 %v22745_v21  ;;  %v27809_v57 = vunpack.i.h.bf16 %v22810_v24 }
 0x335   : > { %19057 = vmatpush1.bf16.msra.mxu1 %v19056_v58  ;;  %v19863_v45 = vunpack.i.h.bf16 %v19861_v31  ;;  %v19862_v52 = vunpack.i.l.bf16 %v19861_v31  ;;  %5262 = vmatprep.mubr.f32.mxu1 %v27784_v6  ;;  %27804 = vst [vmem:[#allocation81_spill] sm:$0xff] %v22932_v43  ;;  %v22934_v54 = vpop.f32.mrb[14].mxu0  ;;  %v22939_v22 = vpop.f32.mrb[7].mxu1  ;;  %v19867_v58 = vunpack.i.l.bf16 %v22791_v29 }
 0x336   : > { %27805 = vst [vmem:[#allocation39_spill] sm:$0xff] %v22934_v54  ;;  %17371 = vmatmul.mubr.msk.f32.gmra.mrb[58].mxu0 %vm3408_vm8, %v22793_v1  ;;  %19067 = vmatprep.subr.bf16.mxu0 %v19066_v19  ;;  %27806 = vst [vmem:[#allocation44_spill] sm:$0xff] %v22939_v22  ;;  %v22941_v32 = vpop.f32.mrb[15].mxu0 }
 0x337   : > { %27807 = vst [vmem:[#allocation52_spill] sm:$0xff] %v22941_v32  ;;  %v5072_v5 = vsel %vm1254_vm1, %v27808_v26, %v19863_v45  ;;  %v5061_v31 = vsel %vm1254_vm1, %v27809_v57, %v19862_v52  ;;  %9195 = vrot.lane.b32.xlu0 %v22623_v51, %s20357_s27  ;;  %20075 = vrot.lane.b32.xlu1 %v27791_v53, %s20348_s28  ;;  %v22954_v19 = vpop.permute.xlu0 %19905 }
 0x338   : > { %v5062_v50 = vsel %vm1254_vm1, %v19862_v52, %v19857_v3  ;;  %17366 = vmatmul.mubr.msk.f32.vlgmr.msra.gmra.mrb[48].mxu1 %vm3408_vm8, %v22721_v33  ;;  %19069 = vmatpush1.bf16.msra.mxu0 %v19068_v56  ;;  %v22959_v21 = vpop.permute.xlu1 %19870  ;;  %v5073_v24 = vsel %vm1254_vm1, %v19863_v45, %v19858_v34  ;;  %v19064_v48 = vpack.c.bf16 %v5072_v5, %v5061_v31  ;;  %v27810_v34 = vunpack.i.h.bf16 %v22791_v29 }
 0x339   : > { %v27428_v26 = vunpack.i.h.bf16 %v22959_v21  ;;  %v19872_v57 = vunpack.i.l.bf16 %v22959_v21  ;;  %5363 = vmatprep.mubr.f32.mxu0 %v27784_v6  ;;  %5268 = vmatprep.mubr.f32.mxu1 %v27784_v6  ;;  %v19062_v51 = vpack.c.bf16 %v5073_v24, %v5062_v50  ;;  %v19878_v3 = vunpack.i.h.bf16 %v22805_v59 }
 0x33a   : > { %17372 = vmatmul.mubr.msk.f32.gmra.mrb[60].mxu0 %vm3408_vm8, %v22733_v17  ;;  %v5900_v52 = vsel %vm1560_vm2, %v19867_v58, %v27810_v34  ;;  %v19877_v50 = vunpack.i.l.bf16 %v22805_v59 }
 0x33b   : > { %9199 = vrot.lane.b32.xlu0 %v22768_v49, %s20357_s27  ;;  %20080 = vrot.lane.b32.xlu1 %v27792_v15, %s20348_s28  ;;  %v22972_v56 = vpop.permute.xlu0 %19915  ;;  %v5911_v45 = vsel %vm1560_vm2, %v19872_v57, %v27428_v26  ;;  %v5910_v34 = vsel %vm1560_vm2, %v19878_v3, %v19872_v57  ;;  %v19892_v3 = vunpack.i.l.bf16 %v22886_v25  ;;  %v27812_v26 = vunpack.i.h.bf16 %v22892_v7 }
 0x33c   : > { %17367 = vmatmul.mubr.msk.f32.gmra.mrb[50].mxu1 %vm3408_vm8, %v22793_v1  ;;  %19063 = vmatprep.subr.bf16.mxu1 %v19062_v51  ;;  %v19881_v49 = vpop.permute.xlu1 %19880  ;;  %v19074_v5 = vpack.c.bf16 %v5911_v45, %v5900_v52  ;;  %v5899_v51 = vsel %vm1560_vm2, %v19877_v50, %v19867_v58  ;;  %v9166_v52 = vld [vmem:[%s27224_s4 + $0x30] sm:$0xff]  ;;  %v27430_v58 = vunpack.i.h.bf16 %v22886_v25 }
 0x33d   : > { %19065 = vmatpush1.bf16.msra.mxu1 %v19064_v48  ;;  %v19883_v31 = vunpack.i.h.bf16 %v19881_v49  ;;  %v19882_v24 = vunpack.i.l.bf16 %v19881_v49  ;;  %5369 = vmatprep.mubr.f32.mxu0 %v27784_v6  ;;  %v19076_v45 = vpack.c.bf16 %v5910_v34, %v5899_v51  ;;  %v27811_v49 = vunpack.i.h.bf16 %v22772_v23 }
 0x33e   : > { %5274 = vmatprep.mubr.f32.mxu1 %v27784_v6  ;;  %17373 = vmatmul.mubr.msk.f32.gmra.mrb[62].mxu0 %vm3408_vm8, %v22757_v37 }
 0x33f   : > { %20130 = vrot.lane.b32.xlu0 %v27789_v10, %s20349_s29  ;;  %20090 = vrot.lane.b32.xlu1 %v22343_v4, %s20348_s28  ;;  %v22993_v59 = vpop.permute.xlu0 %19925  ;;  %v19070_v48 = vpack.c.bf16 %v19883_v31, %v19882_v24  ;;  %v5076_v34 = vsel %vm1254_vm1, %v27812_v26, %v19883_v31  ;;  %v5915_v31 = vsel %vm1560_vm2, %v19892_v3, %v27430_v58 }
 0x340   : > { %17368 = vmatmul.mubr.msk.f32.gmra.mrb[52].mxu1 %vm3408_vm8, %v22733_v17  ;;  %19075 = vmatprep.subr.bf16.mxu0 %v19074_v5  ;;  %v22998_v57 = vpop.permute.xlu1 %5821  ;;  %v5065_v5 = vsel %vm1254_vm1, %v27811_v49, %v19882_v24  ;;  %vm12506_vm1 = vcmask 884432  }
 0x341   : > { %5529 = vmatprep.mubr.f32.mxu0 %v27784_v6  ;;  %5280 = vmatprep.mubr.f32.mxu1 %v27784_v6  ;;  %v19072_v23 = vpack.c.bf16 %v5076_v34, %v5065_v5 }
 0x342   : > { %17378 = vmatmul.mubr.msk.f32.vlgmr.msra.gmra.mrb[64].mxu0 %vm3408_vm8, %v22721_v33  ;;  %19071 = vmatprep.subr.bf16.mxu1 %v19070_v48 }
 0x343   : > { %19077 = vmatpush1.bf16.msra.mxu0 %v19076_v45  ;;  %9201 = vrot.lane.b32.xlu0 %v9166_v52, %s20357_s27  ;;  %v23010_v50 = vpop.permute.xlu0 %19935 }
 0x344   : > { %20100 = vrot.lane.b32.xlu1 %v22365_v13, %s20348_s28  ;;  %17369 = vmatmul.mubr.msk.f32.gmra.mrb[54].mxu1 %vm3408_vm8, %v22757_v37  ;;  %v23022_v48 = vpop.permute.xlu1 %19885 }
 0x345   : > { %v27429_v51 = vunpack.i.h.bf16 %v23022_v48  ;;  %v19887_v52 = vunpack.i.l.bf16 %v23022_v48  ;;  %5535 = vmatprep.mubr.f32.mxu0 %v27784_v6  ;;  %5440 = vmatprep.mubr.f32.mxu1 %v27784_v6 }
 0x346   : > { %17379 = vmatmul.mubr.msk.f32.gmra.mrb[66].mxu0 %vm3408_vm8, %v22793_v1 }
 0x347   : > { %20145 = vrot.lane.b32.xlu0 %v22330_v28, %s20349_s29  ;;  %v23032_v7 = vpop.permute.xlu0 %6663  ;;  %5541 = vmatprep.mubr.f32.mxu0 %v27784_v6  ;;  %v5904_v26 = vsel %vm1560_vm2, %v19887_v52, %v27429_v51 }
 0x348   : > { %20110 = vrot.lane.b32.xlu1 %v27782_v63, %s20349_s29  ;;  %17374 = vmatmul.mubr.msk.f32.vlgmr.msra.gmra.mrb[56].mxu1 %vm3408_vm8, %v22721_v33  ;;  %v19896_v24 = vpop.permute.xlu1 %19895  ;;  %v19082_v45 = vpack.c.bf16 %v5915_v31, %v5904_v26 }
 0x349   : > { %19073 = vmatpush1.bf16.msra.mxu1 %v19072_v23  ;;  %5446 = vmatprep.mubr.f32.mxu1 %v27784_v6  ;;  %v19898_v49 = vunpack.i.h.bf16 %v19896_v24  ;;  %v19897_v5 = vunpack.i.l.bf16 %v19896_v24 }
 0x34a   : > { %17380 = vmatmul.mubr.msk.f32.gmra.mrb[68].mxu0 %vm3408_vm8, %v22733_v17  ;;  %19083 = vmatprep.subr.bf16.mxu0 %v19082_v45 }
 0x34b   : > { %20155 = vrot.lane.b32.xlu0 %v22361_v8, %s20349_s29  ;;  %v23050_v34 = vpop.permute.xlu0 %6667  ;;  %5547 = vmatprep.mubr.f32.mxu0 %v27784_v6  ;;  %v5914_v24 = vsel %vm1560_vm2, %v19898_v49, %v19892_v3  ;;  %v5903_v45 = vsel %vm1560_vm2, %v19897_v5, %v19887_v52 }
 0x34c   : > { %20120 = vrot.lane.b32.xlu1 %v22477_v61, %s20348_s28  ;;  %17375 = vmatmul.mubr.msk.f32.gmra.mrb[58].mxu1 %vm3408_vm8, %v22793_v1  ;;  %v19901_v23 = vpop.permute.xlu1 %19900  ;;  %v19084_v8 = vpack.c.bf16 %v5914_v24, %v5903_v45  ;;  %v27816_v45 = vunpack.i.h.bf16 %v22791_v29  ;;  %v19918_v29 = vunpack.i.h.bf16 %v22972_v56 }
 0x34d   : > { %v19903_v26 = vunpack.i.h.bf16 %v19901_v23  ;;  %v19902_v31 = vunpack.i.l.bf16 %v19901_v23  ;;  %5452 = vmatprep.mubr.f32.mxu1 %v27784_v6 }
 0x34e   : > { %17381 = vmatmul.mubr.msk.f32.gmra.mrb[70].mxu0 %vm3408_vm8, %v22757_v37 }
 0x34f   : > { %20165 = vrot.lane.b32.xlu0 %v27780_v30, %s20350_s30  ;;  %v23066_v58 = vpop.permute.xlu0 %19950  ;;  %6017 = vmatprep.mubr.f32.mxu0 %v27784_v6  ;;  %v5902_v23 = vsel %vm1560_vm2, %v19902_v31, %v19897_v5  ;;  %v5913_v52 = vsel %vm1560_vm2, %v19903_v26, %v19898_v49  ;;  %v27813_v5 = vunpack.i.h.bf16 %v22954_v19  ;;  %v27814_v49 = vunpack.i.l.bf16 %v22954_v19 }
 0x350   : > { %9197 = vrot.lane.b32.xlu1 %v22858_v38, %s20357_s27  ;;  %17376 = vmatmul.mubr.msk.f32.gmra.mrb[60].mxu1 %vm3408_vm8, %v22733_v17  ;;  %v23074_v3 = vpop.permute.xlu1 %19910  ;;  %v19078_v22 = vpack.c.bf16 %v5913_v52, %v5902_v23  ;;  %v5901_v23 = vsel %vm1560_vm2, %v27816_v45, %v19902_v31 }
 0x351   : > { %v19912_v30 = vunpack.i.l.bf16 %v23074_v3  ;;  %5458 = vmatprep.mubr.f32.mxu1 %v27784_v6  ;;  %v5908_v51 = vsel %vm1560_vm2, %v27814_v49, %v27813_v5  ;;  %v27815_v43 = vunpack.i.h.bf16 %v23074_v3  ;;  %v19917_v49 = vunpack.i.l.bf16 %v22972_v56 }
 0x352   : > { %17386 = vmatmul.mubr.msk.f32.vlgmr.msra.gmra.mrb[72].mxu0 %vm3408_vm8, %v22824_v9  ;;  %19079 = vmatprep.subr.bf16.mxu1 %v19078_v22 }
 0x353   : > { %19085 = vmatpush1.bf16.msra.mxu0 %v19084_v8  ;;  %20175 = vrot.lane.b32.xlu0 %v27786_v12, %s20350_s30  ;;  %v23084_v38 = vpop.permute.xlu0 %6669  ;;  %v5919_v24 = vsel %vm1560_vm2, %v19912_v30, %v27815_v43  ;;  %v27817_v8 = vunpack.i.h.bf16 %v22959_v21  ;;  %v27818_v21 = vld [vmem:[#allocation62_spill] sm:$0xff] }
 0x354   : > { %20125 = vrot.lane.b32.xlu1 %v27790_v35, %s20349_s29  ;;  %17377 = vmatmul.mubr.msk.f32.gmra.mrb[62].mxu1 %vm3408_vm8, %v22757_v37  ;;  %v19921_v52 = vpop.permute.xlu1 %19920  ;;  %v19090_v5 = vpack.c.bf16 %v5919_v24, %v5908_v51 }
 0x355   : > { %v5912_v12 = vsel %vm1560_vm2, %v27817_v8, %v19903_v26  ;;  %v19923_v43 = vunpack.i.h.bf16 %v19921_v52  ;;  %v19922_v32 = vunpack.i.l.bf16 %v19921_v52  ;;  %6023 = vmatprep.mubr.f32.mxu0 %v27784_v6  ;;  %5618 = vmatprep.mubr.f32.mxu1 %v27784_v6  ;;  %v27819_v26 = vld [vmem:[#allocation58_spill] sm:$0xff]  ;;  %v27435_v52 = vunpack.i.l.bf16 %v22993_v59 }
 0x356   : > { %17387 = vmatmul.mubr.msk.f32.gmra.mrb[74].mxu0 %vm3408_vm8, %v22998_v57  ;;  %v27820_v31 = vpack.i.bf16 %v27818_v21, %v27819_v26  ;;  %v19080_v51 = vpack.c.bf16 %v5912_v12, %v5901_v23  ;;  %19091 = vmatprep.subr.bf16.mxu0 %v19090_v5  ;;  %v5918_v5 = vsel %vm1560_vm2, %v19918_v29, %v19912_v30  ;;  %v27822_v21 = vunpack.i.l.bf16 %v22954_v19 }
 0x357   : > { %v23114_v24 = vpop.permute.xlu0 %19965  ;;  %v5906_v22 = vsel %vm1560_vm2, %v19922_v32, %v19917_v49  ;;  %v5917_v45 = vsel %vm1560_vm2, %v19923_v43, %v19918_v29  ;;  %6029 = vmatprep.mubr.f32.mxu0 %v27784_v6 }
 0x358   : > { %20185 = vrot.lane.b32.xlu0 %v27820_v31, %s20350_s30  ;;  %20135 = vrot.lane.b32.xlu1 %v27791_v53, %s20349_s29  ;;  %v23121_v56 = vpop.permute.xlu1 %19930  ;;  %v19086_v8 = vpack.c.bf16 %v5917_v45, %v5906_v22  ;;  %v5907_v26 = vsel %vm1560_vm2, %v19917_v49, %v27822_v21 }
 0x359   : > { %17382 = vmatmul.mubr.msk.f32.vlgmr.msra.gmra.mrb[64].mxu1 %vm3408_vm8, %v22721_v33  ;;  %v27431_v33 = vunpack.i.h.bf16 %v23121_v56  ;;  %v19932_v23 = vunpack.i.l.bf16 %v23121_v56  ;;  %v19092_v29 = vpack.c.bf16 %v5918_v5, %v5907_v26 }
 0x35a   : > { %19081 = vmatpush1.bf16.msra.mxu1 %v19080_v51  ;;  %5624 = vmatprep.mubr.f32.mxu1 %v27784_v6 }
 0x35b   : > { %17388 = vmatmul.mubr.msk.f32.gmra.mrb[76].mxu0 %vm3408_vm8, %v22850_v46  ;;  %19087 = vmatprep.subr.bf16.mxu1 %v19086_v8  ;;  %v23130_v53 = vpop.permute.xlu0 %19975  ;;  %v27827_v8 = vunpack.i.h.bf16 %v22886_v25  ;;  %v3259_v25 = vld [vmem:[%s27225_s5] sm:$0xff] }
 0x35c   : > { %20195 = vrot.lane.b32.xlu0 %v27790_v35, %s20350_s30  ;;  %20140 = vrot.lane.b32.xlu1 %v27792_v15, %s20349_s29  ;;  %v23138_v12 = vpop.permute.xlu1 %19940  ;;  %v27432_v35 = vunpack.i.h.bf16 %v22993_v59  ;;  %v27821_v15 = vpack.i.bf16 %v22351_v60, %v22349_v44  ;;  %v6755_v44 = vsel %vm1866_vm3, %v19932_v23, %v27431_v33 }
 0x35d   : > { %17383 = vmatmul.mubr.msk.f32.gmra.mrb[66].mxu1 %vm3408_vm8, %v22793_v1  ;;  %6035 = vmatprep.mubr.f32.mxu0 %v27784_v6  ;;  %v5916_v5 = vsel %vm1560_vm2, %v27827_v8, %v19923_v43  ;;  %v27433_v26 = vunpack.i.h.bf16 %v23138_v12  ;;  %v27434_v33 = vunpack.i.l.bf16 %v23138_v12 }
 0x35e   : > { %5630 = vmatprep.mubr.f32.mxu1 %v27784_v6 }
 0x35f   : > { %17389 = vmatmul.mubr.msk.f32.gmra.mrb[78].mxu0 %vm3408_vm8, %v22921_v62  ;;  %v23151_v1 = vpop.permute.xlu0 %19985 }
 0x360   : > { %20205 = vrot.lane.b32.xlu0 %v27821_v15, %s20350_s30  ;;  %6195 = vmatprep.mubr.f32.mxu0 %v27784_v6  ;;  %v23161_v30 = vpop.permute.xlu1 %6665  ;;  %v23168_v60 = vpop.f32.mrb[16].mxu0  ;;  %v27828_v15 = vunpack.i.h.bf16 %v23022_v48 }
 0x361   : > { %20150 = vrot.lane.b32.xlu1 %v22343_v4, %s20349_s29  ;;  %17384 = vmatmul.mubr.msk.f32.gmra.mrb[68].mxu1 %vm3408_vm8, %v22733_v17  ;;  %27823 = vst [vmem:[#allocation33_spill] sm:$0xff] %v23168_v60  ;;  %v23171_v49 = vpop.f32.mrb[8].mxu1  ;;  %v23173_v31 = vpop.f32.mrb[17].mxu0  ;;  %v6744_v17 = vsel %vm1866_vm3, %v27435_v52, %v27432_v35 }
 0x362   : > { %5636 = vmatprep.mubr.f32.mxu1 %v27784_v6  ;;  %27824 = vst [vmem:[#allocation51_spill] sm:$0xff] %v23171_v49  ;;  %27825 = vst [vmem:[#allocation61_spill] sm:$0xff] %v23173_v31  ;;  %v23182_v51 = vpop.f32.mrb[9].mxu1  ;;  %v19098_v22 = vpack.c.bf16 %v6755_v44, %v6744_v17  ;;  %v5905_v21 = vsel %vm1560_vm2, %v27828_v15, %v19922_v32 }
 0x363   : > { %17394 = vmatmul.mubr.msk.f32.vlgmr.msra.gmra.mrb[80].mxu0 %vm3408_vm8, %v22824_v9  ;;  %27826 = vst [vmem:[#allocation10_spill] sm:$0xff] %v23182_v51  ;;  %v23186_v45 = vpop.permute.xlu0 %19995 }
 0x364   : > { %19093 = vmatpush1.bf16.msra.mxu0 %v19092_v29  ;;  %20215 = vrot.lane.b32.xlu0 %v22330_v28, %s20350_s30  ;;  %v23200_v28 = vpop.permute.xlu1 %19945  ;;  %v23205_v43 = vpop.f32.mrb[18].mxu0  ;;  %v19094_v29 = vpack.c.bf16 %v27433_v26, %v27434_v33  ;;  %v19952_v26 = vunpack.i.l.bf16 %v23066_v58 }
 0x365   : > { %20160 = vrot.lane.b32.xlu1 %v22365_v13, %s20349_s29  ;;  %17385 = vmatmul.mubr.msk.f32.gmra.mrb[70].mxu1 %vm3408_vm8, %v22757_v37  ;;  %27829 = vst [vmem:[#allocation34_spill] sm:$0xff] %v23205_v43  ;;  %v23208_v32 = vpop.f32.mrb[10].mxu1  ;;  %v23210_v48 = vpop.f32.mrb[19].mxu0  ;;  %v19088_v37 = vpack.c.bf16 %v5916_v5, %v5905_v21 }
 0x366   : > { %19099 = vmatprep.subr.bf16.mxu0 %v19098_v22  ;;  %6201 = vmatprep.mubr.f32.mxu0 %v27784_v6  ;;  %27830 = vst [vmem:[#allocation9_spill] sm:$0xff] %v23208_v32  ;;  %27831 = vst [vmem:[#allocation64_spill] sm:$0xff] %v23210_v48  ;;  %v23215_v13 = vpop.f32.mrb[11].mxu1  ;;  %v3261_v22 = vld [vmem:[%s27225_s5 + $0x10] sm:$0xff]  ;;  %v27848_v48 = vunpack.i.l.bf16 %v23138_v12 }
 0x367   : > { %6106 = vmatprep.mubr.f32.mxu1 %v27784_v6  ;;  %17395 = vmatmul.mubr.msk.f32.gmra.mrb[82].mxu0 %vm3408_vm8, %v22998_v57  ;;  %27832 = vst [vmem:[#allocation13_spill] sm:$0xff] %v23215_v13  ;;  %v23217_v44 = vpop.permute.xlu0 %7507  ;;  %v27843_v13 = vld [vmem:[#allocation59_spill] sm:$0xff] }
 0x368   : > { %3265 = vperm.xlu0 %19747, %v3259_v25   ;;  %6207 = vmatprep.mubr.f32.mxu0 %v27784_v6  ;;  %v23228_v17 = vpop.permute.xlu1 %19955  ;;  %v23233_v8 = vpop.f32.mrb[20].mxu0  ;;  %v19938_v25 = vunpack.i.h.bf16 %v23010_v50 }
 0x369   : > { %20170 = vrot.lane.b32.xlu1 %v27782_v63, %s20350_s30  ;;  %17390 = vmatmul.mubr.msk.f32.vlgmr.msra.gmra.mrb[72].mxu1 %vm3408_vm8, %v22824_v9  ;;  %27833 = vst [vmem:[#allocation12_spill] sm:$0xff] %v23233_v8  ;;  %v23236_v63 = vpop.f32.mrb[12].mxu1  ;;  %v23238_v5 = vpop.f32.mrb[21].mxu0  ;;  %v19957_v43 = vunpack.i.l.bf16 %v23228_v17  ;;  %v27878_v8 = vunpack.i.l.bf16 %v23151_v1 }
 0x36a   : > { %19089 = vmatpush1.bf16.msra.mxu1 %v19088_v37  ;;  %6112 = vmatprep.mubr.f32.mxu1 %v27784_v6  ;;  %27834 = vst [vmem:[#allocation22_spill] sm:$0xff] %v23236_v63  ;;  %27835 = vst [vmem:[#allocation15_spill] sm:$0xff] %v23238_v5  ;;  %v23242_v15 = vpop.f32.mrb[13].mxu1  ;;  %v19937_v37 = vunpack.i.l.bf16 %v23010_v50  ;;  %v6754_v35 = vsel %vm1866_vm3, %v19938_v25, %v19932_v23  ;;  %v27841_v50 = vunpack.i.l.bf16 %v22993_v59  ;;  %v27877_v5 = vunpack.i.h.bf16 %v23151_v1 }
 0x36b   : > { %19095 = vmatprep.subr.bf16.mxu1 %v19094_v29  ;;  %17396 = vmatmul.mubr.msk.f32.gmra.mrb[84].mxu0 %vm3408_vm8, %v22850_v46  ;;  %27836 = vst [vmem:[#allocation14_spill] sm:$0xff] %v23242_v15  ;;  %v23244_v21 = vpop.permute.xlu0 %7511 }
 0x36c   : > { %3275 = vperm.xlu0 %19747, %v3261_v22   ;;  %6213 = vmatprep.mubr.f32.mxu0 %v27784_v6  ;;  %v23255_v29 = vpop.permute.xlu1 %19960  ;;  %v23257_v22 = vpop.f32.mrb[22].mxu0 }
 0x36d   : > { %20180 = vrot.lane.b32.xlu1 %v22477_v61, %s20349_s29  ;;  %17391 = vmatmul.mubr.msk.f32.gmra.mrb[74].mxu1 %vm3408_vm8, %v22998_v57  ;;  %27837 = vst [vmem:[#allocation60_spill] sm:$0xff] %v23257_v22  ;;  %v23260_v33 = vpop.f32.mrb[14].mxu1  ;;  %v23262_v52 = vpop.f32.mrb[23].mxu0  ;;  %v27860_v15 = vunpack.i.h.bf16 %v23255_v29  ;;  %s20361_s29 = smov 72  }
 0x36e   : > { %6118 = vmatprep.mubr.f32.mxu1 %v27784_v6  ;;  %27838 = vst [vmem:[#allocation17_spill] sm:$0xff] %v23260_v33  ;;  %27839 = vst [vmem:[#allocation71_spill] sm:$0xff] %v23262_v52  ;;  %v23271_v54 = vpop.f32.mrb[15].mxu1  ;;  %v6743_v33 = vsel %vm1866_vm3, %v19937_v37, %v27841_v50  ;;  %v27842_v52 = vld [vmem:[#allocation63_spill] sm:$0xff]  ;;  %v27850_v37 = vunpack.i.h.bf16 %v23138_v12  ;;  %v27853_v12 = vunpack.i.h.bf16 %v23255_v29 }
 0x36f   : > { %17397 = vmatmul.mubr.msk.f32.gmra.mrb[86].mxu0 %vm3408_vm8, %v22921_v62  ;;  %27840 = vst [vmem:[#allocation16_spill] sm:$0xff] %v23271_v54  ;;  %v23275_v22 = vpop.permute.xlu0 %20010  ;;  %v27844_v23 = vpack.i.bf16 %v27842_v52, %v27843_v13  ;;  %v27846_v54 = vunpack.i.l.bf16 %v23200_v28  ;;  %v19100_v50 = vpack.c.bf16 %v6754_v35, %v6743_v33  ;;  %v27847_v52 = vunpack.i.h.bf16 %v23066_v58 }
 0x370   : > { %20225 = vrot.lane.b32.xlu0 %v22477_v61, %s20350_s30  ;;  %6373 = vmatprep.mubr.f32.mxu0 %v27784_v6  ;;  %v23287_v25 = vpop.permute.xlu1 %19970  ;;  %v27845_v61 = vunpack.i.h.bf16 %v23200_v28  ;;  %v27849_v33 = vunpack.i.h.bf16 %v22954_v19  ;;  %v27852_v19 = vunpack.i.l.bf16 %v23255_v29 }
 0x371   : > { %20190 = vrot.lane.b32.xlu1 %v27844_v23, %s20350_s30  ;;  %17392 = vmatmul.mubr.msk.f32.gmra.mrb[76].mxu1 %vm3408_vm8, %v22850_v46  ;;  %v6759_v13 = vsel %vm1866_vm3, %v19952_v26, %v27847_v52  ;;  %v19958_v23 = vunpack.i.h.bf16 %v23228_v17  ;;  %v27851_v52 = vunpack.i.h.bf16 %v23074_v3 }
 0x372   : > { %v6748_v32 = vsel %vm1866_vm3, %v27846_v54, %v27845_v61  ;;  %6124 = vmatprep.mubr.f32.mxu1 %v27784_v6  ;;  %v5909_v35 = vsel %vm1560_vm2, %v27849_v33, %v27848_v48  ;;  %v6746_v48 = vsel %vm1866_vm3, %v27852_v19, %v19957_v43  ;;  %v3260_v33 = vld [vmem:[%s27225_s5 + $0x8] sm:$0xff] }
 0x373   : > { %17402 = vmatmul.mubr.msk.f32.vlgmr.msra.gmra.mrb[88].mxu0 %vm3408_vm8, %v22824_v9  ;;  %v19106_v54 = vpack.c.bf16 %v6759_v13, %v6748_v32  ;;  %v23304_v61 = vpop.permute.xlu0 %7513  ;;  %v5920_v27 = vsel %vm1560_vm2, %v27851_v52, %v27850_v37  ;;  %v6757_v3 = vsel %vm1866_vm3, %v27853_v12, %v19958_v23  ;;  %v27854_v37 = vpack.i.bf16 %v22347_v36, %v22345_v20 }
 0x374   : > { %19101 = vmatpush1.bf16.msra.mxu0 %v19100_v50  ;;  %6379 = vmatprep.mubr.f32.mxu0 %v27784_v6  ;;  %v23321_v32 = vpop.permute.xlu1 %19980  ;;  %v19102_v50 = vpack.c.bf16 %v6757_v3, %v6746_v48  ;;  %v27436_v20 = vunpack.i.h.bf16 %v23287_v25  ;;  %v27437_v36 = vunpack.i.l.bf16 %v23287_v25  ;;  %v27439_v52 = vunpack.i.l.bf16 %v23114_v24 }
 0x375   : > { %20200 = vrot.lane.b32.xlu1 %v27789_v10, %s20350_s30  ;;  %17393 = vmatmul.mubr.msk.f32.gmra.mrb[78].mxu1 %vm3408_vm8, %v22921_v62  ;;  %v19096_v10 = vpack.c.bf16 %v5920_v27, %v5909_v35  ;;  %v27438_v35 = vunpack.i.h.bf16 %v23114_v24  ;;  %v6758_v19 = vsel %vm1866_vm3, %v19958_v23, %v19952_v26  ;;  %v27855_v48 = vunpack.i.l.bf16 %v23200_v28 }
 0x376   : > { %19107 = vmatprep.subr.bf16.mxu0 %v19106_v54  ;;  %6284 = vmatprep.mubr.f32.mxu1 %v27784_v6  ;;  %v6763_v26 = vsel %vm1866_vm3, %v27437_v36, %v27436_v20  ;;  %v19978_v20 = vunpack.i.h.bf16 %v23130_v53  ;;  %v19977_v36 = vunpack.i.l.bf16 %v23130_v53  ;;  %v27858_v23 = vunpack.i.l.bf16 %v23255_v29 }
 0x377   : > { %17403 = vmatmul.mubr.msk.f32.gmra.mrb[90].mxu0 %vm3408_vm8, %v22998_v57  ;;  %v23332_v17 = vpop.permute.xlu0 %20025  ;;  %v27864_v29 = vunpack.i.h.bf16 %v23321_v32 }
 0x378   : > { %6385 = vmatprep.mubr.f32.mxu0 %v27784_v6  ;;  %v23341_v13 = vpop.permute.xlu1 %19990 }
 0x379   : > { %20210 = vrot.lane.b32.xlu1 %v27854_v37, %s20350_s30  ;;  %17398 = vmatmul.mubr.msk.f32.vlgmr.msra.gmra.mrb[80].mxu1 %vm3408_vm8, %v22824_v9 }
 0x37a   : > { %19097 = vmatpush1.bf16.msra.mxu1 %v19096_v10  ;;  %6290 = vmatprep.mubr.f32.mxu1 %v27784_v6  ;;  %v27859_v10 = vunpack.i.h.bf16 %v22993_v59  ;;  %v27863_v59 = vunpack.i.l.bf16 %v23321_v32 }
 0x37b   : > { %19103 = vmatprep.subr.bf16.mxu1 %v19102_v50  ;;  %17404 = vmatmul.mubr.msk.f32.gmra.mrb[92].mxu0 %vm3408_vm8, %v22850_v46  ;;  %v23346_v27 = vpop.permute.xlu0 %20035  ;;  %v3262_v50 = vld [vmem:[%s27225_s5 + $0x18] sm:$0xff] }
 0x37c   : > { %6391 = vmatprep.mubr.f32.mxu0 %v27784_v6  ;;  %v23355_v54 = vpop.permute.xlu1 %20000 }
 0x37d   : > { %20220 = vrot.lane.b32.xlu1 %v22343_v4, %s20350_s30  ;;  %17399 = vmatmul.mubr.msk.f32.gmra.mrb[82].mxu1 %vm3408_vm8, %v22998_v57  ;;  %v6747_v4 = vsel %vm1866_vm3, %v19957_v43, %v27855_v48  ;;  %v6752_v48 = vsel %vm1866_vm3, %v27439_v52, %v27438_v35  ;;  %v27861_v35 = vunpack.i.h.bf16 %v23121_v56  ;;  %v6761_v56 = vsel %vm1866_vm3, %v27864_v29, %v19978_v20  ;;  %s20364_s30 = smov 34  }
 0x37e   : > { %6296 = vmatprep.mubr.f32.mxu1 %v27784_v6  ;;  %v19108_v37 = vpack.c.bf16 %v6758_v19, %v6747_v4  ;;  %v19114_v19 = vpack.c.bf16 %v6763_v26, %v6752_v48 }
 0x37f   : > { %17405 = vmatmul.mubr.msk.f32.gmra.mrb[94].mxu0 %vm3408_vm8, %v22921_v62  ;;  %v23369_v12 = vpop.permute.xlu0 %20045  ;;  %v6756_v52 = vsel %vm1866_vm3, %v27861_v35, %v27860_v15 }
 0x380   : > { %6861 = vmatprep.mubr.f32.mxu0 %v27784_v6  ;;  %v23374_v3 = vpop.permute.xlu1 %7509  ;;  %v23381_v43 = vpop.f32.mrb[16].mxu1 }
 0x381   : > { %3270 = vperm.xlu1 %19748, %v3260_v33   ;;  %17400 = vmatmul.mubr.msk.f32.gmra.mrb[84].mxu1 %vm3408_vm8, %v22850_v46  ;;  %27856 = vst [vmem:[#allocation19_spill] sm:$0xff] %v23381_v43  ;;  %v23389_v33 = vpop.f32.mrb[17].mxu1  ;;  %v6745_v43 = vsel %vm1866_vm3, %v27859_v10, %v27858_v23  ;;  %v6750_v23 = vsel %vm1866_vm3, %v27863_v59, %v19977_v36 }
 0x382   : > { %6302 = vmatprep.mubr.f32.mxu1 %v27784_v6  ;;  %27857 = vst [vmem:[#allocation18_spill] sm:$0xff] %v23389_v33  ;;  %v19110_v48 = vpack.c.bf16 %v6761_v56, %v6750_v23  ;;  %v27898_v33 = vunpack.i.l.bf16 %v23151_v1 }
 0x383   : > { %17410 = vmatmul.mubr.msk.f32.vlgmr.msra.gmra.mrb[96].mxu0 %vm3408_vm8, %v23032_v7  ;;  %v23400_v4 = vpop.permute.xlu0 %20055 }
 0x384   : > { %19109 = vmatpush1.bf16.msra.mxu0 %v19108_v37  ;;  %6867 = vmatprep.mubr.f32.mxu0 %v27784_v6  ;;  %v23415_v53 = vpop.permute.xlu1 %20005  ;;  %v23417_v26 = vpop.f32.mrb[18].mxu1  ;;  %v19104_v37 = vpack.c.bf16 %v6756_v52, %v6745_v43 }
 0x385   : > { %3280 = vperm.xlu1 %19748, %v3262_v50   ;;  %17401 = vmatmul.mubr.msk.f32.gmra.mrb[86].mxu1 %vm3408_vm8, %v22921_v62  ;;  %27862 = vst [vmem:[#allocation76_spill] sm:$0xff] %v23417_v26  ;;  %v23426_v15 = vpop.f32.mrb[24].mxu0  ;;  %v23428_v35 = vpop.f32.mrb[19].mxu1  ;;  %v27896_v31 = vunpack.i.l.bf16 %v23415_v53 }
 0x386   : > { %19115 = vmatprep.subr.bf16.mxu0 %v19114_v19  ;;  %6462 = vmatprep.mubr.f32.mxu1 %v27784_v6  ;;  %27865 = vst [vmem:[#allocation21_spill] sm:$0xff] %v23428_v35  ;;  %v23432_v10 = vpop.f32.mrb[25].mxu0 }
 0x387   : > { %17411 = vmatmul.mubr.msk.f32.gmra.mrb[98].mxu0 %vm3408_vm8, %v23161_v30  ;;  %v23434_v50 = vpop.permute.xlu0 %8351 }
 0x388   : > { %6873 = vmatprep.mubr.f32.mxu0 %v27784_v6  ;;  %v23439_v19 = vpop.permute.xlu1 %20015  ;;  %v23441_v59 = vpop.f32.mrb[20].mxu1 }
 0x389   : > { %17406 = vmatmul.mubr.msk.f32.vlgmr.msra.gmra.mrb[88].mxu1 %vm3408_vm8, %v22824_v9  ;;  %27866 = vst [vmem:[#allocation20_spill] sm:$0xff] %v23441_v59  ;;  %v23444_v29 = vpop.f32.mrb[26].mxu0  ;;  %v23446_v26 = vpop.f32.mrb[21].mxu1 }
 0x38a   : > { %19105 = vmatpush1.bf16.msra.mxu1 %v19104_v37  ;;  %6468 = vmatprep.mubr.f32.mxu1 %v27784_v6  ;;  %27867 = vst [vmem:[#allocation78_spill] sm:$0xff] %v23444_v29  ;;  %27868 = vst [vmem:[#allocation7_spill] sm:$0xff] %v23446_v26  ;;  %v23450_v52 = vpop.f32.mrb[27].mxu0  ;;  %v27874_v29 = vunpack.i.h.bf16 %v23341_v13  ;;  %v7588_v26 = vsel %vm2172_vm4, %v27878_v8, %v27877_v5  ;;  %v27884_v8 = vunpack.i.h.bf16 %v23200_v28 }
 0x38b   : > { %19111 = vmatprep.subr.bf16.mxu1 %v19110_v48  ;;  %17412 = vmatmul.mubr.msk.f32.gmra.mrb[100].mxu0 %vm3408_vm8, %v23050_v34  ;;  %27869 = vst [vmem:[#allocation6_spill] sm:$0xff] %v23450_v52  ;;  %v23454_v23 = vpop.permute.xlu0 %8355  ;;  %v27872_v52 = vunpack.i.l.bf16 %v23287_v25  ;;  %v27875_v48 = vunpack.i.l.bf16 %v23341_v13 }
 0x38c   : > { %6879 = vmatprep.mubr.f32.mxu0 %v27784_v6  ;;  %v23459_v56 = vpop.permute.xlu1 %20020  ;;  %v23461_v37 = vpop.f32.mrb[22].mxu1 }
 0x38d   : > { %17407 = vmatmul.mubr.msk.f32.gmra.mrb[90].mxu1 %vm3408_vm8, %v22998_v57  ;;  %27870 = vst [vmem:[#allocation5_spill] sm:$0xff] %v23461_v37  ;;  %v23466_v9 = vpop.f32.mrb[28].mxu0  ;;  %v23468_v43 = vpop.f32.mrb[23].mxu1  ;;  %v6762_v35 = vsel %vm1866_vm3, %v19978_v20, %v27872_v52  ;;  %v7599_v59 = vsel %vm2172_vm4, %v27875_v48, %v27874_v29  ;;  %v27440_v48 = vunpack.i.h.bf16 %v23355_v54 }
 0x38e   : > { %6474 = vmatprep.mubr.f32.mxu1 %v27784_v6  ;;  %27871 = vst [vmem:[#allocation77_spill] sm:$0xff] %v23468_v43  ;;  %v23475_v57 = vpop.f32.mrb[29].mxu0  ;;  %v27876_v43 = vunpack.i.l.bf16 %v23114_v24 }
 0x38f   : > { %17413 = vmatmul.mubr.msk.f32.gmra.mrb[102].mxu0 %vm3408_vm8, %v23084_v38  ;;  %27873 = vst [vmem:[#allocation29_spill] sm:$0xff] %v23475_v57  ;;  %v23477_v37 = vpop.permute.xlu0 %20070  ;;  %v20037_v57 = vunpack.i.l.bf16 %v23346_v27 }
 0x390   : > { %7039 = vmatprep.mubr.f32.mxu0 %v27784_v6  ;;  %v6751_v63 = vsel %vm1866_vm3, %v19977_v36, %v27876_v43  ;;  %v23490_v20 = vpop.permute.xlu1 %20030  ;;  %v19122_v36 = vpack.c.bf16 %v7599_v59, %v7588_v26  ;;  %v27883_v43 = vunpack.i.l.bf16 %v23321_v32  ;;  %v27441_v26 = vunpack.i.l.bf16 %v23355_v54 }
 0x391   : > { %17408 = vmatmul.mubr.msk.f32.gmra.mrb[92].mxu1 %vm3408_vm8, %v22850_v46  ;;  %v19116_v52 = vpack.c.bf16 %v6762_v35, %v6751_v63  ;;  %v23498_v51 = vpop.f32.mrb[30].mxu0  ;;  %v27881_v46 = vunpack.i.h.bf16 %v23321_v32  ;;  %v27882_v63 = vunpack.i.h.bf16 %v23066_v58 }
 0x392   : > { %6480 = vmatprep.mubr.f32.mxu1 %v27784_v6  ;;  %27879 = vst [vmem:[#allocation28_spill] sm:$0xff] %v23498_v51  ;;  %v23502_v29 = vpop.f32.mrb[31].mxu0  ;;  %v6749_v5 = vsel %vm1866_vm3, %v27884_v8, %v27883_v43  ;;  %v19997_v51 = vunpack.i.l.bf16 %v23186_v45 }
 0x393   : > { %17418 = vmatmul.mubr.msk.f32.vlgmr.msra.gmra.mrb[104].mxu0 %vm3408_vm8, %v23032_v7  ;;  %27880 = vst [vmem:[#allocation53_spill] sm:$0xff] %v23502_v29  ;;  %v6760_v35 = vsel %vm1866_vm3, %v27882_v63, %v27881_v46 }
 0x394   : > { %19117 = vmatpush1.bf16.msra.mxu0 %v19116_v52  ;;  %7045 = vmatprep.mubr.f32.mxu0 %v27784_v6  ;;  %v23519_v59 = vpop.permute.xlu0 %8357  ;;  %v23521_v52 = vpop.permute.xlu1 %20040  ;;  %v19112_v46 = vpack.c.bf16 %v6760_v35, %v6749_v5 }
 0x395   : > { %17409 = vmatmul.mubr.msk.f32.gmra.mrb[94].mxu1 %vm3408_vm8, %v22921_v62  ;;  %19123 = vmatprep.subr.bf16.mxu0 %v19122_v36  ;;  %27885 = vst [vmem:[#allocation50_spill] sm:$0xff] %v23519_v59  ;;  %v23524_v58 = vpop.f32.mrb[32].mxu0  ;;  %v19118_v36 = vpack.c.bf16 %v27440_v48, %v27441_v26  ;;  %v19998_v26 = vunpack.i.h.bf16 %v23186_v45 }
 0x396   : > { %6950 = vmatprep.mubr.f32.mxu1 %v27784_v6  ;;  %v23528_v28 = vpop.f32.mrb[24].mxu1  ;;  %v23530_v32 = vpop.f32.mrb[33].mxu0 }
 0x397   : > { %17419 = vmatmul.mubr.msk.f32.gmra.mrb[106].mxu0 %vm3408_vm8, %v23161_v30  ;;  %v23533_v62 = vpop.f32.mrb[25].mxu1 }
 0x398   : > { %7051 = vmatprep.mubr.f32.mxu0 %v27784_v6  ;;  %27886 = vst [vmem:[#allocation67_spill] sm:$0xff] %v23533_v62  ;;  %v23541_v63 = vpop.permute.xlu0 %20085  ;;  %v20017_v62 = vunpack.i.l.bf16 %v23439_v19 }
 0x399   : > { %17414 = vmatmul.mubr.msk.f32.vlgmr.msra.gmra.mrb[96].mxu1 %vm3408_vm8, %v23032_v7  ;;  %v23543_v43 = vpop.permute.xlu1 %20050  ;;  %v23546_v35 = vpop.f32.mrb[34].mxu0 }
 0x39a   : > { %19113 = vmatpush1.bf16.msra.mxu1 %v19112_v46  ;;  %6956 = vmatprep.mubr.f32.mxu1 %v27784_v6  ;;  %27887 = vst [vmem:[#allocation69_spill] sm:$0xff] %v23546_v35  ;;  %v23550_v8 = vpop.f32.mrb[26].mxu1  ;;  %v23552_v5 = vpop.f32.mrb[35].mxu0 }
 0x39b   : > { %19119 = vmatprep.subr.bf16.mxu1 %v19118_v36  ;;  %17420 = vmatmul.mubr.msk.f32.gmra.mrb[108].mxu0 %vm3408_vm8, %v23050_v34  ;;  %27888 = vst [vmem:[#allocation41_spill] sm:$0xff] %v23550_v8  ;;  %27889 = vst [vmem:[#allocation68_spill] sm:$0xff] %v23552_v5  ;;  %v23557_v46 = vpop.f32.mrb[27].mxu1  ;;  %v20012_v5 = vunpack.i.l.bf16 %v23275_v22  ;;  %v27895_v8 = vunpack.i.h.bf16 %v23415_v53 }
 0x39c   : > { %7057 = vmatprep.mubr.f32.mxu0 %v27784_v6  ;;  %27890 = vst [vmem:[#allocation72_spill] sm:$0xff] %v23557_v46  ;;  %v23563_v36 = vpop.permute.xlu0 %20095  ;;  %v27892_v46 = vunpack.i.l.bf16 %v23341_v13 }
 0x39d   : > { %17415 = vmatmul.mubr.msk.f32.gmra.mrb[98].mxu1 %vm3408_vm8, %v23161_v30  ;;  %v23567_v29 = vpop.permute.xlu1 %20060  ;;  %v23570_v48 = vpop.f32.mrb[36].mxu0  ;;  %v7592_v60 = vsel %vm2172_vm4, %v27896_v31, %v27895_v8  ;;  %v27899_v8 = vunpack.i.h.bf16 %v23275_v22 }
 0x39e   : > { %6962 = vmatprep.mubr.f32.mxu1 %v27784_v6  ;;  %27891 = vst [vmem:[#allocation80_spill] sm:$0xff] %v23570_v48  ;;  %v7598_v35 = vsel %vm2172_vm4, %v19998_v26, %v27892_v46  ;;  %v23577_v45 = vpop.f32.mrb[28].mxu1  ;;  %v23579_v49 = vpop.f32.mrb[37].mxu0  ;;  %v7587_v26 = vsel %vm2172_vm4, %v19997_v51, %v27898_v33 }
 0x39f   : > { %17421 = vmatmul.mubr.msk.f32.gmra.mrb[110].mxu0 %vm3408_vm8, %v23084_v38  ;;  %27893 = vst [vmem:[#allocation73_spill] sm:$0xff] %v23577_v45  ;;  %27894 = vst [vmem:[#allocation70_spill] sm:$0xff] %v23579_v49  ;;  %v23587_v48 = vpop.f32.mrb[29].mxu1  ;;  %v19124_v31 = vpack.c.bf16 %v7598_v35, %v7587_v26  ;;  %v20018_v49 = vunpack.i.h.bf16 %v23439_v19  ;;  %v27904_v26 = vunpack.i.l.bf16 %v23355_v54 }
 0x3a0   : > { %7217 = vmatprep.mubr.f32.mxu0 %v27784_v6  ;;  %27897 = vst [vmem:[#allocation40_spill] sm:$0xff] %v23587_v48  ;;  %v23594_v46 = vpop.permute.xlu0 %20105  ;;  %v7603_v48 = vsel %vm2172_vm4, %v20012_v5, %v27899_v8  ;;  %v27905_v8 = vunpack.i.h.bf16 %v23114_v24  ;;  %v27909_v24 = vunpack.i.l.bf16 %v23459_v56 }
 0x3a1   : > { %17416 = vmatmul.mubr.msk.f32.gmra.mrb[100].mxu1 %vm3408_vm8, %v23050_v34  ;;  %v23598_v14 = vpop.permute.xlu1 %8353  ;;  %v23604_v0 = vpop.f32.mrb[38].mxu0  ;;  %v19130_v51 = vpack.c.bf16 %v7603_v48, %v7592_v60  ;;  %v27906_v60 = vunpack.i.h.bf16 %v23355_v54  ;;  %v27907_v48 = vunpack.i.h.bf16 %v23287_v25  ;;  %v27910_v54 = vunpack.i.h.bf16 %v23459_v56 }
 0x3a2   : > { %6968 = vmatprep.mubr.f32.mxu1 %v27784_v6  ;;  %27900 = vst [vmem:[#allocation79_spill] sm:$0xff] %v23604_v0  ;;  %v23608_v33 = vpop.f32.mrb[30].mxu1  ;;  %v23610_v45 = vpop.f32.mrb[39].mxu0  ;;  %v6753_v0 = vsel %vm1866_vm3, %v27905_v8, %v27904_v26  ;;  %v7590_v26 = vsel %vm2172_vm4, %v27909_v24, %v20017_v62 }
 0x3a3   : > { %17426 = vmatmul.mubr.msk.f32.vlgmr.msra.gmra.mrb[112].mxu0 %vm3408_vm8, %v23032_v7  ;;  %27901 = vst [vmem:[#allocation75_spill] sm:$0xff] %v23608_v33  ;;  %27902 = vst [vmem:[#allocation47_spill] sm:$0xff] %v23610_v45  ;;  %v23615_v35 = vpop.f32.mrb[31].mxu1  ;;  %v6764_v33 = vsel %vm1866_vm3, %v27907_v48, %v27906_v60  ;;  %v7601_v25 = vsel %vm2172_vm4, %v27910_v54, %v20018_v49  ;;  %vm13040_vm3 = vcmask 1048560  }
 0x3a4   : > { %19125 = vmatpush1.bf16.msra.mxu0 %v19124_v31  ;;  %7223 = vmatprep.mubr.f32.mxu0 %v27784_v6  ;;  %27903 = vst [vmem:[#allocation86_spill] sm:$0xff] %v23615_v35  ;;  %v19120_v8 = vpack.c.bf16 %v6764_v33, %v6753_v0  ;;  %v20032_v0 = vunpack.i.l.bf16 %v23490_v20  ;;  %v27914_v33 = vunpack.i.h.bf16 %v23490_v20 }
 0x3a5   : > { %17417 = vmatmul.mubr.msk.f32.gmra.mrb[102].mxu1 %vm3408_vm8, %v23084_v38  ;;  %19131 = vmatprep.subr.bf16.mxu0 %v19130_v51  ;;  %v23629_v19 = vpop.permute.xlu0 %20115  ;;  %v23631_v31 = vpop.permute.xlu1 %20065  ;;  %v19126_v51 = vpack.c.bf16 %v7601_v25, %v7590_v26  ;;  %v20027_v26 = vunpack.i.l.bf16 %v23332_v17 }
 0x3a6   : > { %27908 = vst [vmem:[#allocation46_spill] sm:$0xff] %v23629_v19  ;;  %7128 = vmatprep.mubr.f32.mxu1 %v27784_v6  ;;  %v20038_v19 = vunpack.i.h.bf16 %v23346_v27 }
 0x3a7   : > { %17427 = vmatmul.mubr.msk.f32.gmra.mrb[114].mxu0 %vm3408_vm8, %v23161_v30 }
 0x3a8   : > { %7229 = vmatprep.mubr.f32.mxu0 %v27784_v6 }
 0x3a9   : > { %17422 = vmatmul.mubr.msk.f32.vlgmr.msra.gmra.mrb[104].mxu1 %vm3408_vm8, %v23032_v7  ;;  %v23645_v60 = vpop.permute.xlu0 %9195  ;;  %v23647_v48 = vpop.permute.xlu1 %20075 }
 0x3aa   : > { %19121 = vmatpush1.bf16.msra.mxu1 %v19120_v8  ;;  %27911 = vst [vmem:[#allocation82_spill] sm:$0xff] %v23645_v60  ;;  %7134 = vmatprep.mubr.f32.mxu1 %v27784_v6  ;;  %v7602_v8 = vsel %vm2172_vm4, %v20018_v49, %v20012_v5  ;;  %v7607_v60 = vsel %vm2172_vm4, %v20032_v0, %v27914_v33  ;;  %v20042_v49 = vunpack.i.l.bf16 %v23521_v52 }
 0x3ab   : > { %19127 = vmatprep.subr.bf16.mxu1 %v19126_v51  ;;  %17428 = vmatmul.mubr.msk.f32.gmra.mrb[116].mxu0 %vm3408_vm8, %v23050_v34  ;;  %v27913_v51 = vunpack.i.l.bf16 %v23415_v53 }
 0x3ac   : > { %7235 = vmatprep.mubr.f32.mxu0 %v27784_v6 }
 0x3ad   : > { %17423 = vmatmul.mubr.msk.f32.gmra.mrb[106].mxu1 %vm3408_vm8, %v23161_v30  ;;  %v23659_v54 = vpop.permute.xlu0 %9199  ;;  %v23661_v25 = vpop.permute.xlu1 %20080  ;;  %v7591_v24 = vsel %vm2172_vm4, %v20017_v62, %v27913_v51  ;;  %v27916_v51 = vunpack.i.h.bf16 %v23332_v17 }
 0x3ae   : > { %27912 = vst [vmem:[#allocation30_spill] sm:$0xff] %v23659_v54  ;;  %7140 = vmatprep.mubr.f32.mxu1 %v27784_v6  ;;  %v20043_v54 = vunpack.i.h.bf16 %v23521_v52  ;;  %v19132_v62 = vpack.c.bf16 %v7602_v8, %v7591_v24  ;;  %v27917_v52 = vunpack.i.l.bf16 %v23459_v56  ;;  %v27919_v8 = vunpack.i.h.bf16 %v23459_v56 }
 0x3af   : > { %17429 = vmatmul.mubr.msk.f32.gmra.mrb[118].mxu0 %vm3408_vm8, %v23084_v38  ;;  %v7596_v45 = vsel %vm2172_vm4, %v20027_v26, %v27916_v51  ;;  %v27920_v51 = vunpack.i.h.bf16 %v23341_v13 }
 0x3b0   : > { %7705 = vmatprep.mubr.f32.mxu0 %v27784_v6  ;;  %v19138_v33 = vpack.c.bf16 %v7607_v60, %v7596_v45  ;;  %v7594_v45 = vsel %vm2172_vm4, %v20042_v49, %v20037_v57 }
 0x3b1   : > { %17424 = vmatmul.mubr.msk.f32.gmra.mrb[108].mxu1 %vm3408_vm8, %v23050_v34  ;;  %v23678_v5 = vpop.permute.xlu0 %20130  ;;  %v23680_v35 = vpop.permute.xlu1 %20090  ;;  %v7600_v59 = vsel %vm2172_vm4, %v27920_v51, %v27919_v8  ;;  %v7606_v8 = vsel %vm2172_vm4, %v20038_v19, %v20032_v0 }
 0x3b2   : > { %27915 = vst [vmem:[#allocation24_spill] sm:$0xff] %v23678_v5  ;;  %7146 = vmatprep.mubr.f32.mxu1 %v27784_v6  ;;  %v27918_v5 = vunpack.i.h.bf16 %v23151_v1  ;;  %v7605_v1 = vsel %vm2172_vm4, %v20043_v54, %v20038_v19 }
 0x3b3   : > { %17434 = vmatmul.mubr.msk.f32.vlgmr.msra.gmra.mrb[120].mxu0 %vm3408_vm8, %v23217_v44  ;;  %v19134_v56 = vpack.c.bf16 %v7605_v1, %v7594_v45  ;;  %v7595_v45 = vsel %vm2172_vm4, %v20037_v57, %v20027_v26  ;;  %v27926_v26 = vunpack.i.h.bf16 %v23415_v53 }
 0x3b4   : > { %19133 = vmatpush1.bf16.msra.mxu0 %v19132_v62  ;;  %7711 = vmatprep.mubr.f32.mxu0 %v27784_v6  ;;  %v7589_v24 = vsel %vm2172_vm4, %v27918_v5, %v27917_v52  ;;  %v20047_v52 = vunpack.i.l.bf16 %v23369_v12  ;;  %v19140_v1 = vpack.c.bf16 %v7606_v8, %v7595_v45  ;;  %v20063_v45 = vunpack.i.h.bf16 %v23567_v29 }
 0x3b5   : > { %17425 = vmatmul.mubr.msk.f32.gmra.mrb[110].mxu1 %vm3408_vm8, %v23084_v38  ;;  %19139 = vmatprep.subr.bf16.mxu0 %v19138_v33  ;;  %v23703_v27 = vpop.permute.xlu0 %9201  ;;  %v19128_v13 = vpack.c.bf16 %v7600_v59, %v7589_v24  ;;  %v27447_v33 = vunpack.i.h.bf16 %v23543_v43  ;;  %v20052_v59 = vunpack.i.l.bf16 %v23543_v43  ;;  %v7593_v8 = vsel %vm2172_vm4, %v27926_v26, %v20042_v49 }
 0x3b6   : > { %27921 = vst [vmem:[#allocation32_spill] sm:$0xff] %v23703_v27  ;;  %7306 = vmatprep.mubr.f32.mxu1 %v27784_v6  ;;  %v23708_v60 = vpop.permute.xlu1 %20100  ;;  %v20067_v49 = vunpack.i.l.bf16 %v23631_v31 }
 0x3b7   : > { %17435 = vmatmul.mubr.msk.f32.gmra.mrb[122].mxu0 %vm3408_vm8, %v23374_v3 }
 0x3b8   : > { %7717 = vmatprep.mubr.f32.mxu0 %v27784_v6 }
 0x3b9   : > { %17430 = vmatmul.mubr.msk.f32.vlgmr.msra.gmra.mrb[112].mxu1 %vm3408_vm8, %v23032_v7  ;;  %v23715_v5 = vpop.permute.xlu0 %20145  ;;  %v27448_v7 = vunpack.i.h.bf16 %v23369_v12 }
 0x3ba   : > { %19129 = vmatpush1.bf16.msra.mxu1 %v19128_v13  ;;  %7312 = vmatprep.mubr.f32.mxu1 %v27784_v6  ;;  %v23718_v62 = vpop.permute.xlu1 %20110 }
 0x3bb   : > { %19135 = vmatprep.subr.bf16.mxu1 %v19134_v56  ;;  %17436 = vmatmul.mubr.msk.f32.gmra.mrb[124].mxu0 %vm3408_vm8, %v23244_v21  ;;  %v8432_v19 = vsel %vm2478_vm5, %v20047_v52, %v27448_v7 }
 0x3bc   : > { %7723 = vmatprep.mubr.f32.mxu0 %v27784_v6 }
 0x3bd   : > { %17431 = vmatmul.mubr.msk.f32.gmra.mrb[114].mxu1 %vm3408_vm8, %v23161_v30  ;;  %v23729_v24 = vpop.permute.xlu0 %20155  ;;  %v8443_v30 = vsel %vm2478_vm5, %v20052_v59, %v27447_v33  ;;  %v20062_v33 = vunpack.i.l.bf16 %v23567_v29 }
 0x3be   : > { %27922 = vst [vmem:[#allocation36_spill] sm:$0xff] %v23729_v24  ;;  %7318 = vmatprep.mubr.f32.mxu1 %v27784_v6  ;;  %v23733_v51 = vpop.permute.xlu1 %20120  ;;  %v19146_v56 = vpack.c.bf16 %v8443_v30, %v8432_v19  ;;  %v20057_v19 = vunpack.i.l.bf16 %v23400_v4 }
 0x3bf   : > { %17437 = vmatmul.mubr.msk.f32.gmra.mrb[126].mxu0 %vm3408_vm8, %v23304_v61  ;;  %v19142_v29 = vpack.c.bf16 %v20063_v45, %v20062_v33 }
 0x3c0   : > { %7883 = vmatprep.mubr.f32.mxu0 %v27784_v6 }
 0x3c1   : > { %17432 = vmatmul.mubr.msk.f32.gmra.mrb[116].mxu1 %vm3408_vm8, %v23050_v34  ;;  %v23748_v0 = vpop.permute.xlu0 %20165  ;;  %v27925_v34 = vunpack.i.h.bf16 %v23275_v22 }
 0x3c2   : > { %7324 = vmatprep.mubr.f32.mxu1 %v27784_v6  ;;  %27923 = vst [vmem:[#allocation8_spill] sm:$0xff] %v23748_v0  ;;  %v23750_v13 = vpop.permute.xlu1 %9197 }
 0x3c3   : > { %27924 = vst [vmem:[#allocation74_spill] sm:$0xff] %v23750_v13  ;;  %17442 = vmatmul.mubr.msk.f32.vlgmr.msra.gmra.mrb[128].mxu0 %vm3408_vm8, %v23217_v44  ;;  %v7604_v57 = vsel %vm2172_vm4, %v27925_v34, %v20043_v54  ;;  %v27450_v54 = vunpack.i.h.bf16 %v23631_v31  ;;  %v20072_v34 = vunpack.i.l.bf16 %v23477_v37 }
 0x3c4   : > { %19141 = vmatpush1.bf16.msra.mxu0 %v19140_v1  ;;  %7889 = vmatprep.mubr.f32.mxu0 %v27784_v6  ;;  %v19136_v22 = vpack.c.bf16 %v7604_v57, %v7593_v8  ;;  %v20058_v1 = vunpack.i.h.bf16 %v23400_v4 }
 0x3c5   : > { %17433 = vmatmul.mubr.msk.f32.gmra.mrb[118].mxu1 %vm3408_vm8, %v23084_v38  ;;  %19147 = vmatprep.subr.bf16.mxu0 %v19146_v56  ;;  %v23771_v53 = vpop.permute.xlu0 %20175  ;;  %v27451_v56 = vunpack.i.h.bf16 %v23477_v37  ;;  %v8436_v4 = vsel %vm2478_vm5, %v20067_v49, %v27450_v54  ;;  %v20077_v54 = vunpack.i.l.bf16 %v23647_v48 }
 0x3c6   : > { %7794 = vmatprep.mubr.f32.mxu1 %v27784_v6  ;;  %v23766_v30 = vpop.permute.xlu1 %20125  ;;  %27927 = vst [vmem:[#allocation57_spill] sm:$0xff] %v23771_v53  ;;  %v8442_v57 = vsel %vm2478_vm5, %v20058_v1, %v20052_v59  ;;  %v27929_v59 = vunpack.i.h.bf16 %v23332_v17  ;;  %v27933_v17 = vunpack.i.h.bf16 %v23661_v25  ;;  %v27938_v53 = vunpack.i.l.bf16 %v23680_v35 }
 0x3c7   : > { %17443 = vmatmul.mubr.msk.f32.gmra.mrb[130].mxu0 %vm3408_vm8, %v23374_v3  ;;  %v8447_v7 = vsel %vm2478_vm5, %v20072_v34, %v27451_v56 }
 0x3c8   : > { %7895 = vmatprep.mubr.f32.mxu0 %v27784_v6 }
 0x3c9   : > { %17438 = vmatmul.mubr.msk.f32.vlgmr.msra.gmra.mrb[120].mxu1 %vm3408_vm8, %v23217_v44 }
 0x3ca   : > { %19137 = vmatpush1.bf16.msra.mxu1 %v19136_v22  ;;  %7800 = vmatprep.mubr.f32.mxu1 %v27784_v6  ;;  %v23776_v38 = vpop.permute.xlu1 %20135  ;;  %v23791_v26 = vpop.permute.xlu0 %20185  ;;  %v8431_v22 = vsel %vm2478_vm5, %v20057_v19, %v20047_v52  ;;  %v19154_v52 = vpack.c.bf16 %v8447_v7, %v8436_v4  ;;  %v20078_v19 = vunpack.i.h.bf16 %v23647_v48  ;;  %v27932_v48 = vunpack.i.l.bf16 %v23661_v25 }
 0x3cb   : > { %19143 = vmatprep.subr.bf16.mxu1 %v19142_v29  ;;  %17444 = vmatmul.mubr.msk.f32.gmra.mrb[132].mxu0 %vm3408_vm8, %v23244_v21  ;;  %27928 = vst [vmem:[#allocation49_spill] sm:$0xff] %v23791_v26  ;;  %v19148_v1 = vpack.c.bf16 %v8442_v57, %v8431_v22  ;;  %v7597_v57 = vsel %vm2172_vm4, %v27929_v59, %v20062_v33  ;;  %v27930_v22 = vunpack.i.h.bf16 %v23490_v20 }
 0x3cc   : > { %7901 = vmatprep.mubr.f32.mxu0 %v27784_v6  ;;  %v8434_v7 = vsel %vm2478_vm5, %v27932_v48, %v20077_v54  ;;  %v8445_v33 = vsel %vm2478_vm5, %v27933_v17, %v20078_v19  ;;  %v27937_v17 = vunpack.i.h.bf16 %v23680_v35 }
 0x3cd   : > { %17439 = vmatmul.mubr.msk.f32.gmra.mrb[122].mxu1 %vm3408_vm8, %v23374_v3  ;;  %v7608_v56 = vsel %vm2172_vm4, %v27930_v22, %v20063_v45  ;;  %v19150_v45 = vpack.c.bf16 %v8445_v33, %v8434_v7  ;;  %v20087_v33 = vunpack.i.l.bf16 %v23541_v63  ;;  %vm13291_vm4 = vcmask 277632  }
 0x3ce   : > { %7806 = vmatprep.mubr.f32.mxu1 %v27784_v6  ;;  %v23793_v8 = vpop.permute.xlu1 %20140  ;;  %v23823_v29 = vpop.permute.xlu0 %20195  ;;  %v19144_v20 = vpack.c.bf16 %v7608_v56, %v7597_v57  ;;  %v8435_v57 = vsel %vm2478_vm5, %v20077_v54, %v20067_v49  ;;  %v8451_v27 = vsel %vm2478_vm5, %v27938_v53, %v27937_v17  ;;  %v20098_v54 = vunpack.i.h.bf16 %v23563_v36 }
 0x3cf   : > { %17445 = vmatmul.mubr.msk.f32.gmra.mrb[134].mxu0 %vm3408_vm8, %v23304_v61  ;;  %27931 = vst [vmem:[#allocation26_spill] sm:$0xff] %v23823_v29  ;;  %v20097_v49 = vunpack.i.l.bf16 %v23563_v36 }
 0x3d0   : > { %8061 = vmatprep.mubr.f32.mxu0 %v27784_v6 }
 0x3d1   : > { %17440 = vmatmul.mubr.msk.f32.gmra.mrb[124].mxu1 %vm3408_vm8, %v23244_v21 }
 0x3d2   : > { %7812 = vmatprep.mubr.f32.mxu1 %v27784_v6 }
 0x3d3   : > { %v23810_v26 = vpop.permute.xlu1 %20150  ;;  %17450 = vmatmul.mubr.msk.f32.vlgmr.msra.gmra.mrb[136].mxu0 %vm3408_vm8, %v23217_v44 }
 0x3d4   : > { %19149 = vmatpush1.bf16.msra.mxu0 %v19148_v1  ;;  %8067 = vmatprep.mubr.f32.mxu0 %v27784_v6  ;;  %v23844_v1 = vpop.permute.xlu0 %20205 }
 0x3d5   : > { %17441 = vmatmul.mubr.msk.f32.gmra.mrb[126].mxu1 %vm3408_vm8, %v23304_v61  ;;  %19155 = vmatprep.subr.bf16.mxu0 %v19154_v52  ;;  %27935 = vst [vmem:[#allocation27_spill] sm:$0xff] %v23844_v1 }
 0x3d6   : > { %7972 = vmatprep.mubr.f32.mxu1 %v27784_v6 }
 0x3d7   : > { %v23834_v4 = vpop.permute.xlu1 %20160  ;;  %17451 = vmatmul.mubr.msk.f32.gmra.mrb[138].mxu0 %vm3408_vm8, %v23374_v3 }
 0x3d8   : > { %27934 = vst [vmem:[#allocation48_spill] sm:$0xff] %v23834_v4  ;;  %8073 = vmatprep.mubr.f32.mxu0 %v27784_v6  ;;  %v27944_v4 = vunpack.i.h.bf16 %v23661_v25 }
 0x3d9   : > { %17446 = vmatmul.mubr.msk.f32.vlgmr.msra.gmra.mrb[128].mxu1 %vm3408_vm8, %v23217_v44  ;;  %v23841_v59 = vpop.f32.mrb[40].mxu0 }
 0x3da   : > { %19145 = vmatpush1.bf16.msra.mxu1 %v19144_v20  ;;  %7978 = vmatprep.mubr.f32.mxu1 %v27784_v6  ;;  %v23846_v52 = vpop.f32.mrb[32].mxu1  ;;  %v23852_v22 = vpop.f32.mrb[41].mxu0 }
 0x3db   : > { %19151 = vmatprep.subr.bf16.mxu1 %v19150_v45  ;;  %17452 = vmatmul.mubr.msk.f32.gmra.mrb[140].mxu0 %vm3408_vm8, %v23244_v21  ;;  %v23854_v48 = vpop.f32.mrb[33].mxu1  ;;  %v23857_v7 = vpop.permute.xlu1 %20170  ;;  %v8446_v45 = vsel %vm2478_vm5, %v20078_v19, %v20072_v34 }
 0x3dc   : > { %8079 = vmatprep.mubr.f32.mxu0 %v27784_v6  ;;  %27936 = vst [vmem:[#allocation37_spill] sm:$0xff] %v23857_v7  ;;  %v23886_v34 = vpop.permute.xlu0 %20215  ;;  %v19156_v0 = vpack.c.bf16 %v8446_v45, %v8435_v57  ;;  %v27940_v7 = vunpack.i.h.bf16 %v23541_v63  ;;  %v27943_v45 = vunpack.i.h.bf16 %v23369_v12 }
 0x3dd   : > { %17447 = vmatmul.mubr.msk.f32.gmra.mrb[130].mxu1 %vm3408_vm8, %v23374_v3  ;;  %v23863_v20 = vpop.f32.mrb[42].mxu0  ;;  %27939 = vst [vmem:[#allocation45_spill] sm:$0xff] %v23886_v34 }
 0x3de   : > { %7984 = vmatprep.mubr.f32.mxu1 %v27784_v6  ;;  %v23868_v56 = vpop.f32.mrb[34].mxu1  ;;  %v23872_v1 = vpop.f32.mrb[43].mxu0  ;;  %v8440_v13 = vsel %vm2478_vm5, %v20087_v33, %v27940_v7  ;;  %v27942_v7 = vunpack.i.l.bf16 %v23661_v25 }
 0x3df   : > { %17453 = vmatmul.mubr.msk.f32.gmra.mrb[142].mxu0 %vm3408_vm8, %v23304_v61  ;;  %v23874_v29 = vpop.f32.mrb[35].mxu1  ;;  %v23894_v24 = vpop.permute.xlu1 %20180  ;;  %v19162_v17 = vpack.c.bf16 %v8451_v27, %v8440_v13  ;;  %v27945_v27 = vunpack.i.h.bf16 %v23543_v43 }
 0x3e0   : > { %8549 = vmatprep.mubr.f32.mxu0 %v27784_v6  ;;  %27941 = vst [vmem:[#allocation66_spill] sm:$0xff] %v23894_v24  ;;  %v8433_v24 = vsel %vm2478_vm5, %v27943_v45, %v27942_v7  ;;  %v27948_v7 = vunpack.i.h.bf16 %v23708_v60 }
 0x3e1   : > { %17448 = vmatmul.mubr.msk.f32.gmra.mrb[132].mxu1 %vm3408_vm8, %v23244_v21  ;;  %v23888_v19 = vpop.f32.mrb[44].mxu0  ;;  %v8444_v13 = vsel %vm2478_vm5, %v27945_v27, %v27944_v4  ;;  %v23933_v4 = vsel %vm2478_vm5, %v20097_v49, %v20087_v33 }
 0x3e2   : > { %7990 = vmatprep.mubr.f32.mxu1 %v27784_v6  ;;  %v23896_v53 = vpop.f32.mrb[36].mxu1  ;;  %v23902_v34 = vpop.f32.mrb[45].mxu0  ;;  %v8449_v25 = vsel %vm2478_vm5, %v27948_v7, %v20098_v54  ;;  %v19152_v27 = vpack.c.bf16 %v8444_v13, %v8433_v24  ;;  %v27464_v13 = vunpack.i.l.bf16 %v23718_v62 }
 0x3e3   : > { %17458 = vmatmul.mubr.msk.f32.vlgmr.msra.gmra.mrb[144].mxu0 %vm3408_vm8, %v23434_v50  ;;  %v23904_v57 = vpop.f32.mrb[37].mxu1 }
 0x3e4   : > { %19157 = vmatpush1.bf16.msra.mxu0 %v19156_v0  ;;  %8555 = vmatprep.mubr.f32.mxu0 %v27784_v6  ;;  %v27947_v0 = vunpack.i.l.bf16 %v23708_v60 }
 0x3e5   : > { %17449 = vmatmul.mubr.msk.f32.gmra.mrb[134].mxu1 %vm3408_vm8, %v23304_v61  ;;  %19163 = vmatprep.subr.bf16.mxu0 %v19162_v17  ;;  %v23919_v36 = vpop.f32.mrb[46].mxu0 }
 0x3e6   : > { %27946 = vst [vmem:[#allocation31_spill] sm:$0xff] %v23919_v36  ;;  %8150 = vmatprep.mubr.f32.mxu1 %v27784_v6  ;;  %v8438_v12 = vsel %vm2478_vm5, %v27947_v0, %v20097_v49  ;;  %v23935_v17 = vpop.f32.mrb[38].mxu1  ;;  %v23937_v45 = vpop.f32.mrb[47].mxu0 }
 0x3e7   : > { %v23928_v43 = vpop.permute.xlu0 %3265  ;;  %17459 = vmatmul.mubr.msk.f32.gmra.mrb[146].mxu0 %vm3408_vm8, %v23598_v14  ;;  %27949 = vst [vmem:[#allocation56_spill] sm:$0xff] %v23935_v17  ;;  %v23946_v36 = vpop.f32.mrb[39].mxu1  ;;  %v19158_v33 = vpack.c.bf16 %v8449_v25, %v8438_v12 }
 0x3e8   : > { %8561 = vmatprep.mubr.f32.mxu0 %v27784_v6  ;;  %v3955_v0 = vadd.f32 %v22797_v11, %v23928_v43  ;;  %v3956_v7 = vadd.f32 %v22808_v2, %v23928_v43  ;;  %3295 = vst.msk [vmem:[#allocation3 + $0x58] sm:$0xff] %vm3294_vm9, %v23928_v43  ;;  %v3959_v24 = vadd.f32 %v22865_v42, %v23928_v43  ;;  %v27463_v2 = vunpack.i.h.bf16 %v23718_v62  ;;  %v23958_v17 = vpop.permute.xlu1 %20190 }
 0x3e9   : > { %17454 = vmatmul.mubr.msk.f32.vlgmr.msra.gmra.mrb[136].mxu1 %vm3408_vm8, %v23217_v44  ;;  %v3960_v49 = vadd.f32 %v22875_v16, %v23928_v43  ;;  %v3957_v11 = vadd.f32 %v22863_v18, %v23928_v43  ;;  %27950 = vst [vmem:[#allocation35_spill] sm:$0xff] %v23958_v17  ;;  %v5175_v12 = vpop.f32.mrb[48].mxu0 }
 0x3ea   : > { %19153 = vmatpush1.bf16.msra.mxu1 %v19152_v27  ;;  %8156 = vmatprep.mubr.f32.mxu1 %v27784_v6  ;;  %v4799_v44 = vadd.f32 %v23426_v15, %v3955_v0  ;;  %v4800_v42 = vadd.f32 %v23432_v10, %v3956_v7  ;;  %v23968_v18 = vadd.f32 %v23524_v58, %v3959_v24  ;;  %v27465_v15 = vunpack.i.h.bf16 %v23594_v46  ;;  %v5177_v7 = vpop.f32.mrb[49].mxu0 }
 0x3eb   : > { %19159 = vmatprep.subr.bf16.mxu1 %v19158_v33  ;;  %v23963_v25 = vpop.permute.xlu0 %3275  ;;  %17460 = vmatmul.mubr.msk.f32.gmra.mrb[148].mxu0 %vm3408_vm8, %v23454_v23  ;;  %v23971_v16 = vadd.f32 %v23530_v32, %v3960_v49  ;;  %v23974_v27 = vadd.f32 %v23528_v28, %v3957_v11  ;;  %v27466_v0 = vunpack.i.l.bf16 %v23594_v46  ;;  %v27951_v28 = vunpack.i.l.bf16 %v23680_v35  ;;  %v27952_v11 = vld [vmem:[#allocation50_spill] sm:$0xff] }
 0x3ec   : > { %3314 = vst [vmem:[#allocation3 + $0xf0] sm:$0xff] %v23963_v25  ;;  %3315 = vst [vmem:[#allocation3 + $0xf8] sm:$0xff] %v23963_v25  ;;  %8567 = vmatprep.mubr.f32.mxu0 %v27784_v6  ;;  %v5643_v10 = vadd.f32 %v5175_v12, %v4799_v44  ;;  %v3979_v58 = vadd.f32 %v22838_v41, %v23963_v25  ;;  %v5644_v33 = vadd.f32 %v5177_v7, %v4800_v42  ;;  %v27953_v44 = vld [vmem:[#allocation29_spill] sm:$0xff]  ;;  %v27954_v42 = vld [vmem:[#allocation67_spill] sm:$0xff] }
 0x3ed   : > { %3319 = vst.msk [vmem:[#allocation3 + $0x118] sm:$0xff] %vm3294_vm9, %v23963_v25  ;;  %v8450_v32 = vsel %vm2478_vm5, %v20098_v54, %v27951_v28  ;;  %17455 = vmatmul.mubr.msk.f32.gmra.mrb[138].mxu1 %vm3408_vm8, %v23374_v3  ;;  %v3980_v24 = vadd.f32 %v22844_v39, %v23963_v25  ;;  %v3958_v49 = vadd.f32 %v22873_v40, %v23928_v43  ;;  %v27957_v28 = vunpack.i.h.bf16 %v23708_v60 }
 0x3ee   : > { %8162 = vmatprep.mubr.f32.mxu1 %v27784_v6  ;;  %5691 = vst [vmem:[#allocation3] sm:$0xff] %v5643_v10  ;;  %v9287_v41 = vsel %vm2784_vm6, %v27464_v13, %v27463_v2  ;;  %v24001_v54 = vadd.f32 %v23466_v9, %v3979_v58  ;;  %v3983_v3 = vadd.f32 %v22913_v55, %v23963_v25  ;;  %5692 = vst [vmem:[#allocation3 + $0x8] sm:$0xff] %v5644_v33  ;;  %v27955_v9 = vld [vmem:[#allocation85_spill] sm:$0xff]  ;;  %v27956_v58 = vld [vmem:[#allocation11_spill] sm:$0xff]  ;;  %v24024_v33 = vpop.permute.xlu1 %20200 }
 0x3ef   : > { %v3984_v39 = vadd.f32 %v22929_v47, %v23963_v25  ;;  %17461 = vmatmul.mubr.msk.f32.gmra.mrb[150].mxu0 %vm3408_vm8, %v27952_v11  ;;  %v3343_v40 = vld [vmem:[#allocation3 + $0x58] sm:$0xff]  ;;  %v24010_v12 = vadd.f32 %v27953_v44, %v3980_v24  ;;  %v24013_v10 = vadd.f32 %v27954_v42, %v3958_v49  ;;  %v3981_v7 = vadd.f32 %v27955_v9, %v23963_v25  ;;  %v27960_v44 = vld [vmem:[#allocation18_spill] sm:$0xff] }
 0x3f0   : > { %v3982_v55 = vadd.f32 %v27956_v58, %v23963_v25  ;;  %v27958_v47 = vunpack.i.h.bf16 %v23477_v37  ;;  %27959 = vst [vmem:[#allocation38_spill] sm:$0xff] %v24024_v33  ;;  %8727 = vmatprep.mubr.f32.mxu0 %v27784_v6  ;;  %v19164_v24 = vpack.c.bf16 %v8450_v32, %v23933_v4  ;;  %v9276_v49 = vsel %vm2784_vm6, %v27466_v0, %v27465_v15  ;;  %v27961_v37 = vld [vmem:[#allocation80_spill] sm:$0xff]  ;;  %v27962_v58 = vld [vmem:[#allocation70_spill] sm:$0xff] }
 0x3f1   : > { %17456 = vmatmul.mubr.msk.f32.gmra.mrb[140].mxu1 %vm3408_vm8, %v23244_v21  ;;  %v3966_v42 = vadd.f32 %v27960_v44, %v3343_v40  ;;  %v24037_v9 = vadd.f32 %v27961_v37, %v3983_v3  ;;  %v27965_v4 = vunpack.i.l.bf16 %v23708_v60  ;;  %v27966_v32 = vunpack.i.h.bf16 %v23631_v31  ;;  %v27967_v40 = vld [vmem:[#allocation40_spill] sm:$0xff]  ;;  %v27969_v60 = vld [vmem:[#allocation33_spill] sm:$0xff]  ;;  %v27971_v37 = vld [vmem:[#allocation51_spill] sm:$0xff] }
 0x3f2   : > { %v8448_v2 = vsel %vm2478_vm5, %v27958_v47, %v27957_v28  ;;  %v24040_v28 = vadd.f32 %v27962_v58, %v3984_v39  ;;  %v27963_v47 = vld [vmem:[#allocation73_spill] sm:$0xff]  ;;  %8168 = vmatprep.mubr.f32.mxu1 %v27784_v6  ;;  %v19170_v21 = vpack.c.bf16 %v9287_v41, %v9276_v49  ;;  %v24053_v3 = vadd.f32 %v27967_v40, %v3982_v55  ;;  %v27972_v41 = vld [vmem:[#allocation10_spill] sm:$0xff] }
 0x3f3   : > { %v24043_v13 = vadd.f32 %v27963_v47, %v3981_v7  ;;  %v8437_v15 = vsel %vm2478_vm5, %v27966_v32, %v27965_v4  ;;  %17466 = vmatmul.mubr.msk.f32.vlgmr.msra.gmra.mrb[152].mxu0 %vm3408_vm8, %v23434_v50  ;;  %4014 = vst.msk [vmem:[#allocation3 + $0x58] sm:$0xff] %vm3294_vm9, %v3966_v42  ;;  %v3963_v7 = vadd.f32 %v27969_v60, %v23928_v43  ;;  %v27970_v31 = vld [vmem:[#allocation61_spill] sm:$0xff]  ;;  %v3362_v55 = vld [vmem:[#allocation3 + $0xf0] sm:$0xff]  ;;  %v20122_v47 = vunpack.i.l.bf16 %v23733_v51  ;;  %v27974_v32 = vld [vmem:[#allocation12_spill] sm:$0xff] }
 0x3f4   : > { %27968 = vst [vmem:[#allocation62_spill] sm:$0xff] %v24053_v3  ;;  %v3367_v39 = vld [vmem:[#allocation3 + $0x118] sm:$0xff]  ;;  %v3964_v44 = vadd.f32 %v27970_v31, %v23928_v43  ;;  %v3961_v58 = vadd.f32 %v27971_v37, %v23928_v43  ;;  %v3962_v49 = vadd.f32 %v27972_v41, %v23928_v43  ;;  %19165 = vmatpush1.bf16.msra.mxu0 %v19164_v24  ;;  %v27973_v42 = vld [vmem:[#allocation7_spill] sm:$0xff]  ;;  %v24075_v37 = vpop.f32.mrb[50].mxu0 }
 0x3f5   : > { %27964 = vst [vmem:[#allocation65_spill] sm:$0xff] %v24043_v13  ;;  %8733 = vmatprep.mubr.f32.mxu0 %v27784_v6  ;;  %v3990_v4 = vadd.f32 %v27973_v42, %v3367_v39  ;;  %v3987_v40 = vadd.f32 %v27974_v32, %v23963_v25  ;;  %v27975_v60 = vld [vmem:[#allocation15_spill] sm:$0xff]  ;;  %v3363_v0 = vld [vmem:[#allocation3 + $0xf8] sm:$0xff]  ;;  %17457 = vmatmul.mubr.msk.f32.gmra.mrb[142].mxu1 %vm3408_vm8, %v23304_v61  ;;  %v24086_v42 = vpop.permute.xlu1 %20210  ;;  %v24088_v32 = vpop.f32.mrb[51].mxu0 }
 0x3f6   : > { %v3988_v31 = vadd.f32 %v27975_v60, %v23963_v25  ;;  %19171 = vmatprep.subr.bf16.mxu0 %v19170_v21  ;;  %v24078_v41 = vadd.f32 %v23841_v59, %v3963_v7  ;;  %v24081_v24 = vadd.f32 %v23852_v22, %v3964_v44  ;;  %v24084_v39 = vadd.f32 %v23846_v52, %v3961_v58  ;;  %v27983_v21 = vld [vmem:[#allocation22_spill] sm:$0xff] }
 0x3f7   : > { %27979 = vst [vmem:[#allocation50_spill] sm:$0xff] %v24086_v42  ;;  %8638 = vmatprep.mubr.f32.mxu1 %v27784_v6  ;;  %4038 = vst.msk [vmem:[#allocation3 + $0x118] sm:$0xff] %vm3294_vm9, %v3990_v4  ;;  %v24093_v61 = vadd.f32 %v23854_v48, %v3962_v49  ;;  %v24096_v59 = vadd.f32 %v23888_v19, %v3987_v40  ;;  %v3985_v52 = vadd.f32 %v27983_v21, %v3362_v55  ;;  %v27984_v7 = vld [vmem:[#allocation46_spill] sm:$0xff] }
 0x3f8   : > { %27976 = vst [vmem:[#allocation58_spill] sm:$0xff] %v24078_v41  ;;  %27977 = vst [vmem:[#allocation63_spill] sm:$0xff] %v24081_v24  ;;  %v24099_v22 = vadd.f32 %v23902_v34, %v3988_v31  ;;  %v20118_v44 = vunpack.i.h.bf16 %v27984_v7  ;;  %17467 = vmatmul.mubr.msk.f32.gmra.mrb[154].mxu0 %vm3408_vm8, %v23598_v14  ;;  %v19160_v58 = vpack.c.bf16 %v8448_v2, %v8437_v15  ;;  %v27985_v60 = vld [vmem:[#allocation14_spill] sm:$0xff]  ;;  %v27468_v4 = vunpack.i.h.bf16 %v23766_v30  ;;  %v27988_v2 = vld [vmem:[#allocation19_spill] sm:$0xff] }
 0x3f9   : > { %27978 = vst [vmem:[#allocation59_spill] sm:$0xff] %v24084_v39  ;;  %27980 = vst [vmem:[#allocation29_spill] sm:$0xff] %v24093_v61  ;;  %v3986_v42 = vadd.f32 %v27985_v60, %v3363_v0  ;;  %v27986_v19 = vunpack.i.h.bf16 %v23733_v51  ;;  %8739 = vmatprep.mubr.f32.mxu0 %v27784_v6  ;;  %v24112_v34 = vadd.f32 %v23896_v53, %v3985_v52  ;;  %17462 = vmatmul.mubr.msk.f32.vlgmr.msra.gmra.mrb[144].mxu1 %vm3408_vm8, %v23434_v50  ;;  %v5187_v0 = vpop.f32.mrb[52].mxu0  ;;  %v27990_v60 = vld [vmem:[#allocation24_spill] sm:$0xff]  ;;  %v4776_v52 = vpop.f32.mrb[40].mxu1  ;;  %v28026_v41 = vld [vmem:[#allocation53_spill] sm:$0xff] }
 0x3fa   : > { %27981 = vst [vmem:[#allocation67_spill] sm:$0xff] %v24096_v59  ;;  %27982 = vst [vmem:[#allocation85_spill] sm:$0xff] %v24099_v22  ;;  %v3965_v15 = vadd.f32 %v27988_v2, %v23928_v43  ;;  %v20117_v21 = vunpack.i.l.bf16 %v27984_v7  ;;  %v20132_v53 = vunpack.i.l.bf16 %v27990_v60  ;;  %19161 = vmatpush1.bf16.msra.mxu1 %v19160_v58  ;;  %8644 = vmatprep.mubr.f32.mxu1 %v27784_v6  ;;  %v5189_v40 = vpop.f32.mrb[53].mxu0  ;;  %v20138_v43 = vunpack.i.h.bf16 %v23776_v38  ;;  %v4778_v7 = vpop.f32.mrb[41].mxu1  ;;  %v28014_v59 = vld [vmem:[#allocation68_spill] sm:$0xff] }
 0x3fb   : > { %v19166_v49 = vpack.c.bf16 %v27986_v19, %v20122_v47  ;;  %27987 = vst [vmem:[#allocation11_spill] sm:$0xff] %v24112_v34  ;;  %v24121_v31 = vadd.f32 %v23904_v57, %v3986_v42  ;;  %v24128_v55 = vadd.f32 %v5187_v0, %v24001_v54  ;;  %v4062_v42 = vld [vmem:[#allocation3 + $0x58] sm:$0xff]  ;;  %v24135_v58 = vadd.f32 %v5189_v40, %v24010_v12  ;;  %v24152_v2 = vpop.permute.xlu1 %20220 }
 0x3fc   : > { %v4809_v57 = vadd.f32 %v4776_v52, %v3965_v15  ;;  %17468 = vmatmul.mubr.msk.f32.gmra.mrb[156].mxu0 %vm3408_vm8, %v23454_v23  ;;  %v27993_v19 = vunpack.i.l.bf16 %v23718_v62  ;;  %v27994_v0 = vunpack.i.h.bf16 %v23541_v63  ;;  %v27996_v15 = vunpack.i.h.bf16 %v23680_v35  ;;  %27997 = vst [vmem:[#allocation73_spill] sm:$0xff] %v24152_v2  ;;  %v24157_v63 = vpop.f32.mrb[54].mxu0 }
 0x3fd   : > { %27989 = vst [vmem:[#allocation18_spill] sm:$0xff] %v24121_v31  ;;  %27991 = vst [vmem:[#allocation80_spill] sm:$0xff] %v24128_v55  ;;  %19167 = vmatprep.subr.bf16.mxu1 %v19166_v49  ;;  %v27995_v49 = vunpack.i.h.bf16 %v23733_v51  ;;  %v4810_v12 = vadd.f32 %v4778_v7, %v4062_v42  ;;  %8745 = vmatprep.mubr.f32.mxu0 %v27784_v6  ;;  %v27998_v51 = vunpack.i.l.bf16 %v23766_v30  ;;  %v28002_v42 = vunpack.i.l.bf16 %v23594_v46 }
 0x3fe   : > { %27992 = vst [vmem:[#allocation70_spill] sm:$0xff] %v24135_v58  ;;  %v9286_v54 = vsel %vm2784_vm6, %v20118_v44, %v27993_v19  ;;  %v24143_v48 = vsel %vm2478_vm5, %v27994_v0, %v20122_v47  ;;  %4857 = vst [vmem:[#allocation3 + $0x50] sm:$0xff] %v4809_v57  ;;  %17463 = vmatmul.mubr.msk.f32.gmra.mrb[146].mxu1 %vm3408_vm8, %v23598_v14  ;;  %v27999_v47 = vunpack.i.l.bf16 %v23776_v38  ;;  %v28000_v44 = vunpack.i.l.bf16 %v23793_v8  ;;  %v24180_v0 = vpop.f32.mrb[42].mxu1  ;;  %v28010_v58 = vld [vmem:[#allocation64_spill] sm:$0xff] }
 0x3ff   : > { %v24150_v52 = vsel %vm2478_vm5, %v27996_v15, %v27995_v49  ;;  %v9280_v35 = vsel %vm2784_vm6, %v27998_v51, %v27468_v4  ;;  %v28001_v19 = vunpack.i.h.bf16 %v23793_v8  ;;  %v9275_v7 = vsel %vm2784_vm6, %v20117_v21, %v28002_v42  ;;  %4858 = vst.msk [vmem:[#allocation3 + $0x58] sm:$0xff] %vm3294_vm9, %v4810_v12  ;;  %8650 = vmatprep.mubr.f32.mxu1 %v27784_v6  ;;  %v24183_v49 = vpop.f32.mrb[55].mxu0  ;;  %v24185_v15 = vpop.f32.mrb[43].mxu1  ;;  %v28004_v42 = vld [vmem:[#allocation20_spill] sm:$0xff]  ;;  %v28009_v21 = vld [vmem:[#allocation34_spill] sm:$0xff] }
 0x400   : > { %v24169_v40 = vsel %vm2784_vm6, %v28000_v44, %v27999_v47  ;;  %17469 = vmatmul.mubr.msk.f32.gmra.mrb[158].mxu0 %vm3408_vm8, %v27952_v11  ;;  %v19172_v51 = vpack.c.bf16 %v9286_v54, %v9275_v7  ;;  %v28003_v47 = vunpack.i.h.bf16 %v27990_v60  ;;  %v24195_v12 = vsel %vm2784_vm6, %v20138_v43, %v20132_v53 }
 0x401   : > { %v24174_v57 = vsel %vm2784_vm6, %v28001_v19, %v20138_v43  ;;  %v24197_v19 = vpop.permute.xlu1 %3270  ;;  %v3989_v4 = vadd.f32 %v28004_v42, %v23963_v25  ;;  %8905 = vmatprep.mubr.f32.mxu0 %v27784_v6  ;;  %v28006_v25 = vld [vmem:[#allocation42_spill] sm:$0xff]  ;;  %v4788_v54 = vpop.f32.mrb[44].mxu1  ;;  %vm13566_vm5 = vcmask 425232  }
 0x402   : > { %v9291_v44 = vsel %vm2784_vm6, %v20132_v53, %v28003_v47  ;;  %3297 = vst [vmem:[#allocation3 + $0x68] sm:$0xff] %v24197_v19  ;;  %3306 = vst [vmem:[#allocation3 + $0xb0] sm:$0xff] %v24197_v19  ;;  %17464 = vmatmul.mubr.msk.f32.gmra.mrb[148].mxu1 %vm3408_vm8, %v23454_v23  ;;  %v28005_v53 = vld [vmem:[#allocation25_spill] sm:$0xff]  ;;  %v3972_v7 = vadd.f32 %v28006_v25, %v24197_v19  ;;  %v3975_v17 = vadd.f32 %v28009_v21, %v24197_v19  ;;  %v4790_v60 = vpop.f32.mrb[45].mxu1 }
 0x403   : > { %v19178_v2 = vpack.c.bf16 %v9291_v44, %v9280_v35  ;;  %3307 = vst.msk [vmem:[#allocation3 + $0xb8] sm:$0xff] %vm3294_vm9, %v24197_v19  ;;  %v3971_v43 = vadd.f32 %v28005_v53, %v24197_v19  ;;  %v28007_v35 = vld [vmem:[#allocation84_spill] sm:$0xff]  ;;  %v28008_v44 = vld [vmem:[#allocation43_spill] sm:$0xff]  ;;  %8656 = vmatprep.mubr.f32.mxu1 %v27784_v6  ;;  %v3976_v55 = vadd.f32 %v28010_v58, %v24197_v19  ;;  %v28011_v53 = vld [vmem:[#allocation9_spill] sm:$0xff] }
 0x404   : > { %v3969_v47 = vadd.f32 %v28007_v35, %v24197_v19  ;;  %v3970_v42 = vadd.f32 %v28008_v44, %v24197_v19  ;;  %v3973_v33 = vadd.f32 %v28011_v53, %v24197_v19  ;;  %v28012_v25 = vld [vmem:[#allocation13_spill] sm:$0xff]  ;;  %v4833_v34 = vadd.f32 %v4788_v54, %v3989_v4  ;;  %v4086_v35 = vld [vmem:[#allocation3 + $0x118] sm:$0xff]  ;;  %17474 = vmatmul.mubr.msk.f32.vlgmr.msra.gmra.mrb[160].mxu0 %vm3408_vm8, %v23434_v50 }
 0x405   : > { %v3974_v31 = vadd.f32 %v28012_v25, %v24197_v19  ;;  %v28013_v44 = vld [vmem:[#allocation69_spill] sm:$0xff]  ;;  %v4816_v61 = vadd.f32 %v28014_v59, %v3972_v7  ;;  %v3281_v24 = vpop.permute.xlu1 %3280  ;;  %v4834_v53 = vadd.f32 %v4790_v60, %v4086_v35  ;;  %19173 = vmatpush1.bf16.msra.mxu0 %v19172_v51  ;;  %8911 = vmatprep.mubr.f32.mxu0 %v27784_v6  ;;  %v28016_v4 = vld [vmem:[#allocation72_spill] sm:$0xff]  ;;  %v28018_v59 = vld [vmem:[#allocation55_spill] sm:$0xff] }
 0x406   : > { %v4815_v22 = vadd.f32 %v28013_v44, %v3971_v43  ;;  %v28015_v21 = vld [vmem:[#allocation41_spill] sm:$0xff]  ;;  %v24237_v54 = vadd.f32 %v28016_v4, %v3970_v42  ;;  %v24240_v25 = vadd.f32 %v23863_v20, %v3975_v17  ;;  %4881 = vst [vmem:[#allocation3 + $0x110] sm:$0xff] %v4833_v34  ;;  %3331 = vst.msk [vmem:[#allocation3 + $0x178] sm:$0xff] %vm3294_vm9, %v3281_v24  ;;  %17465 = vmatmul.mubr.msk.f32.gmra.mrb[150].mxu1 %vm3408_vm8, %v27952_v11  ;;  %v28019_v60 = vld [vmem:[#allocation54_spill] sm:$0xff]  ;;  %v4794_v42 = vpop.f32.mrb[46].mxu1  ;;  %v5353_v20 = vpop.f32.mrb[56].mxu0 }
 0x407   : > { %v24232_v39 = vadd.f32 %v28015_v21, %v3969_v47  ;;  %v3991_v7 = vadd.f32 %v28018_v59, %v3281_v24  ;;  %19179 = vmatprep.subr.bf16.mxu0 %v19178_v2  ;;  %v3992_v51 = vadd.f32 %v28019_v60, %v3281_v24  ;;  %v28020_v47 = vld [vmem:[#allocation5_spill] sm:$0xff]  ;;  %4882 = vst.msk [vmem:[#allocation3 + $0x118] sm:$0xff] %vm3294_vm9, %v4834_v53  ;;  %v28021_v17 = vld [vmem:[#allocation39_spill] sm:$0xff]  ;;  %v28022_v44 = vld [vmem:[#allocation52_spill] sm:$0xff]  ;;  %v5355_v13 = vpop.f32.mrb[57].mxu0 }
 0x408   : > { %28017 = vst [vmem:[#allocation40_spill] sm:$0xff] %v24240_v25  ;;  %v4001_v35 = vadd.f32 %v28020_v47, %v3281_v24  ;;  %8816 = vmatprep.mubr.f32.mxu1 %v27784_v6  ;;  %v3995_v34 = vadd.f32 %v28021_v17, %v3281_v24  ;;  %v3996_v21 = vadd.f32 %v28022_v44, %v3281_v24  ;;  %v28023_v4 = vld [vmem:[#allocation81_spill] sm:$0xff]  ;;  %v28024_v43 = vld [vmem:[#allocation44_spill] sm:$0xff]  ;;  %v24262_v47 = vpop.f32.mrb[47].mxu1 }
 0x409   : > { %v3993_v59 = vadd.f32 %v28023_v4, %v3281_v24  ;;  %v3994_v58 = vadd.f32 %v28024_v43, %v3281_v24  ;;  %v28025_v25 = vld [vmem:[#allocation28_spill] sm:$0xff]  ;;  %v4836_v60 = vadd.f32 %v28026_v41, %v3992_v51  ;;  %v24260_v53 = vadd.f32 %v5353_v20, %v23968_v18  ;;  %17475 = vmatmul.mubr.msk.f32.gmra.mrb[162].mxu0 %vm3408_vm8, %v23598_v14  ;;  %v28028_v41 = vld [vmem:[#allocation47_spill] sm:$0xff] }
 0x40a   : > { %v4835_v2 = vadd.f32 %v28025_v25, %v3991_v7  ;;  %v24257_v3 = vadd.f32 %v4794_v42, %v4001_v35  ;;  %v3355_v17 = vld [vmem:[#allocation3 + $0xb8] sm:$0xff]  ;;  %v24267_v44 = vadd.f32 %v5355_v13, %v23971_v16  ;;  %8917 = vmatprep.mubr.f32.mxu0 %v27784_v6  ;;  %v28027_v25 = vld [vmem:[#allocation79_spill] sm:$0xff]  ;;  %v24274_v7 = vadd.f32 %v28028_v41, %v3996_v21  ;;  %v28030_v35 = vld [vmem:[#allocation21_spill] sm:$0xff] }
 0x40b   : > { %v24271_v43 = vadd.f32 %v28027_v25, %v3995_v34  ;;  %v28029_v18 = vld [vmem:[#allocation75_spill] sm:$0xff]  ;;  %v3978_v42 = vadd.f32 %v28030_v35, %v3355_v17  ;;  %v24284_v4 = vadd.f32 %v24183_v49, %v4836_v60  ;;  %17470 = vmatmul.mubr.msk.f32.vlgmr.msra.gmra.mrb[152].mxu1 %vm3408_vm8, %v23434_v50  ;;  %v28031_v13 = vld [vmem:[#allocation86_spill] sm:$0xff]  ;;  %v27473_v34 = vunpack.i.h.bf16 %v23810_v26  ;;  %v28036_v25 = vld [vmem:[#allocation17_spill] sm:$0xff] }
 0x40c   : > { %v24277_v51 = vadd.f32 %v28029_v18, %v3993_v59  ;;  %v24281_v20 = vadd.f32 %v24157_v63, %v4835_v2  ;;  %v24289_v16 = vadd.f32 %v28031_v13, %v3994_v58  ;;  %v28032_v21 = vpack.c.bf16 %v24150_v52, %v24143_v48  ;;  %v5359_v59 = vpop.f32.mrb[58].mxu0  ;;  %8822 = vmatprep.mubr.f32.mxu1 %v27784_v6  ;;  %v3345_v35 = vld [vmem:[#allocation3 + $0x68] sm:$0xff]  ;;  %v28039_v13 = vld [vmem:[#allocation77_spill] sm:$0xff] }
 0x40d   : > { %v24297_v63 = vadd.f32 %v23872_v1, %v3976_v55  ;;  %v24300_v49 = vadd.f32 %v23868_v56, %v3973_v33  ;;  %v24303_v2 = vadd.f32 %v23874_v29, %v3974_v31  ;;  %v20152_v58 = vunpack.i.l.bf16 %v23810_v26  ;;  %4026 = vst.msk [vmem:[#allocation3 + $0xb8] sm:$0xff] %vm3294_vm9, %v3978_v42  ;;  %v5361_v60 = vpop.f32.mrb[59].mxu0  ;;  %17476 = vmatmul.mubr.msk.f32.gmra.mrb[164].mxu0 %vm3408_vm8, %v23454_v23  ;;  %v28034_v1 = vld [vmem:[#allocation60_spill] sm:$0xff]  ;;  %v28035_v33 = vld [vmem:[#allocation71_spill] sm:$0xff]  ;;  %v5264_v31 = vpop.f32.mrb[48].mxu1 }
 0x40e   : > { %19169 = vmatpush1.bf16.msra.mxu1 %v28032_v21  ;;  %v28033_v48 = vpack.c.bf16 %v24174_v57, %v24169_v40  ;;  %v24310_v52 = vadd.f32 %v5359_v59, %v4815_v22  ;;  %v3999_v56 = vadd.f32 %v28034_v1, %v3281_v24  ;;  %v4000_v55 = vadd.f32 %v28035_v33, %v3281_v24  ;;  %v3379_v29 = vld [vmem:[#allocation3 + $0x178] sm:$0xff]  ;;  %v28038_v22 = vld [vmem:[#allocation23_spill] sm:$0xff] }
 0x40f   : > { %v24316_v17 = vadd.f32 %v5361_v60, %v4816_v61  ;;  %8923 = vmatprep.mubr.f32.mxu0 %v27784_v6  ;;  %v3997_v41 = vadd.f32 %v28036_v25, %v3281_v24  ;;  %v28037_v40 = vld [vmem:[#allocation16_spill] sm:$0xff]  ;;  %v3967_v18 = vadd.f32 %v28038_v22, %v24197_v19  ;;  %v3354_v42 = vld [vmem:[#allocation3 + $0xb0] sm:$0xff]  ;;  %v4002_v21 = vadd.f32 %v28039_v13, %v3379_v29  ;;  %v5365_v19 = vpop.f32.mrb[60].mxu0 }
 0x410   : > { %19175 = vmatprep.subr.bf16.mxu1 %v28033_v48  ;;  %v3998_v57 = vadd.f32 %v28037_v40, %v3281_v24  ;;  %v24325_v59 = vadd.f32 %v5264_v31, %v23974_v27  ;;  %v5266_v48 = vpop.f32.mrb[49].mxu1  ;;  %17471 = vmatmul.mubr.msk.f32.gmra.mrb[154].mxu1 %vm3408_vm8, %v23598_v14  ;;  %v28040_v61 = vld [vmem:[#allocation31_spill] sm:$0xff]  ;;  %v24333_v1 = vadd.f32 %v23937_v45, %v4000_v55  ;;  %v28041_v33 = vld [vmem:[#allocation56_spill] sm:$0xff]  ;;  %v28042_v31 = vld [vmem:[#allocation78_spill] sm:$0xff]  ;;  %v28044_v40 = vunpack.i.l.bf16 %v23776_v38  ;;  %v5367_v55 = vpop.f32.mrb[61].mxu0 }
 0x411   : > { %v24330_v60 = vadd.f32 %v28040_v61, %v3999_v56  ;;  %v24336_v24 = vadd.f32 %v5266_v48, %v24013_v10  ;;  %8828 = vmatprep.mubr.f32.mxu1 %v27784_v6  ;;  %v24340_v29 = vadd.f32 %v28041_v33, %v3997_v41  ;;  %v4811_v25 = vadd.f32 %v28042_v31, %v3967_v18  ;;  %v28045_v41 = vld [vmem:[#allocation83_spill] sm:$0xff]  ;;  %v5270_v18 = vpop.f32.mrb[50].mxu1  ;;  %v28049_v61 = vld [vmem:[#allocation6_spill] sm:$0xff] }
 0x412   : > { %v24343_v27 = vadd.f32 %v23946_v36, %v3998_v57  ;;  %v28043_v56 = vunpack.i.l.bf16 %v23766_v30  ;;  %4050 = vst.msk [vmem:[#allocation3 + $0x178] sm:$0xff] %vm3294_vm9, %v4002_v21  ;;  %v24353_v10 = vadd.f32 %v5365_v19, %v24037_v9  ;;  %17477 = vmatmul.mubr.msk.f32.gmra.mrb[166].mxu0 %vm3408_vm8, %v27952_v11  ;;  %v3968_v36 = vadd.f32 %v28045_v41, %v3345_v35  ;;  %v28046_v57 = vld [vmem:[#allocation76_spill] sm:$0xff]  ;;  %v5272_v35 = vpop.f32.mrb[51].mxu1 }
 0x413   : > { %v3977_v22 = vadd.f32 %v28046_v57, %v3354_v42  ;;  %v24360_v13 = vadd.f32 %v5367_v55, %v24040_v28  ;;  %9393 = vmatprep.mubr.f32.mxu0 %v27784_v6  ;;  %v9295_v38 = vsel %vm2784_vm6, %v20152_v58, %v27473_v34  ;;  %v24369_v9 = vadd.f32 %v24075_v37, %v4811_v25  ;;  %v28050_v37 = vld [vmem:[#allocation48_spill] sm:$0xff]  ;;  %v28051_v57 = vld [vmem:[#allocation82_spill] sm:$0xff] }
 0x414   : > { %v9279_v45 = vsel %vm2784_vm6, %v28044_v40, %v28043_v56  ;;  %v24372_v21 = vadd.f32 %v5270_v18, %v24232_v39  ;;  %17472 = vmatmul.mubr.msk.f32.gmra.mrb[156].mxu1 %vm3408_vm8, %v23454_v23  ;;  %v28047_v28 = vunpack.i.h.bf16 %v23715_v5  ;;  %v28048_v42 = vunpack.i.l.bf16 %v23715_v5  ;;  %v4074_v25 = vld [vmem:[#allocation3 + $0xb8] sm:$0xff]  ;;  %v5371_v40 = vpop.f32.mrb[62].mxu0 }
 0x415   : > { %v4812_v19 = vadd.f32 %v28049_v61, %v3968_v36  ;;  %v24383_v33 = vadd.f32 %v24180_v0, %v3977_v22  ;;  %v27475_v31 = vunpack.i.h.bf16 %v28050_v37  ;;  %v27474_v39 = vunpack.i.l.bf16 %v28050_v37  ;;  %8834 = vmatprep.mubr.f32.mxu1 %v27784_v6  ;;  %v5373_v0 = vpop.f32.mrb[63].mxu0  ;;  %v28057_v61 = vld [vmem:[#allocation65_spill] sm:$0xff]  ;;  %v28069_v34 = vld [vmem:[#allocation32_spill] sm:$0xff] }
 0x416   : > { %v9284_v48 = vsel %vm2784_vm6, %v28048_v42, %v28047_v28  ;;  %v24388_v56 = vadd.f32 %v5272_v35, %v24237_v54  ;;  %v19180_v55 = vpack.c.bf16 %v24195_v12, %v9279_v45  ;;  %v4822_v41 = vadd.f32 %v24185_v15, %v4074_v25  ;;  %17482 = vmatmul.mubr.msk.f32.vlgmr.msra.gmra.mrb[168].mxu0 %vm3408_vm8, %v28051_v57  ;;  %v28052_v54 = vld [vmem:[#allocation36_spill] sm:$0xff]  ;;  %v5276_v42 = vpop.f32.mrb[52].mxu1 }
 0x417   : > { %v24394_v36 = vadd.f32 %v5371_v40, %v24271_v43  ;;  %v19186_v22 = vpack.c.bf16 %v9295_v38, %v9284_v48  ;;  %v24399_v18 = vadd.f32 %v24088_v32, %v4812_v19  ;;  %v20158_v35 = vunpack.i.h.bf16 %v28052_v54  ;;  %9399 = vmatprep.mubr.f32.mxu0 %v27784_v6  ;;  %v5278_v19 = vpop.f32.mrb[53].mxu1 }
 0x418   : > { %v20157_v28 = vunpack.i.l.bf16 %v28052_v54  ;;  %v24404_v12 = vadd.f32 %v5373_v0, %v24274_v7  ;;  %19181 = vmatpush1.bf16.msra.mxu0 %v19180_v55  ;;  %v28053_v15 = vunpack.i.l.bf16 %v23793_v8  ;;  %v28054_v43 = vunpack.i.h.bf16 %v23594_v46  ;;  %4870 = vst.msk [vmem:[#allocation3 + $0xb8] sm:$0xff] %vm3294_vm9, %v4822_v41  ;;  %17473 = vmatmul.mubr.msk.f32.gmra.mrb[158].mxu1 %vm3408_vm8, %v27952_v11  ;;  %v28058_v46 = vld [vmem:[#allocation62_spill] sm:$0xff]  ;;  %v5531_v55 = vpop.f32.mrb[64].mxu0 }
 0x419   : > { %v28055_v32 = vunpack.i.h.bf16 %v23793_v8  ;;  %v28056_v38 = vunpack.i.h.bf16 %v23718_v62  ;;  %v24419_v7 = vadd.f32 %v5276_v42, %v28057_v61  ;;  %19187 = vmatprep.subr.bf16.mxu0 %v19186_v22  ;;  %v4098_v25 = vld [vmem:[#allocation3 + $0x178] sm:$0xff]  ;;  %v24424_v40 = vadd.f32 %v5278_v19, %v28058_v46  ;;  %8994 = vmatprep.mubr.f32.mxu1 %v27784_v6  ;;  %v28059_v0 = vld [vmem:[#allocation58_spill] sm:$0xff]  ;;  %v5533_v22 = vpop.f32.mrb[65].mxu0 }
 0x41a   : > { %v9277_v45 = vsel %vm2784_vm6, %v28054_v43, %v28053_v15  ;;  %v9282_v62 = vsel %vm2784_vm6, %v27474_v39, %v20157_v28  ;;  %v9293_v8 = vsel %vm2784_vm6, %v27475_v31, %v20158_v35  ;;  %v4846_v41 = vadd.f32 %v24262_v47, %v4098_v25  ;;  %v28060_v42 = vld [vmem:[#allocation74_spill] sm:$0xff]  ;;  %v5282_v15 = vpop.f32.mrb[54].mxu1  ;;  %v28061_v43 = vld [vmem:[#allocation63_spill] sm:$0xff]  ;;  %v5537_v46 = vpop.f32.mrb[66].mxu0  ;;  %v28070_v39 = vld [vmem:[#allocation85_spill] sm:$0xff] }
 0x41b   : > { %v9288_v48 = vsel %vm2784_vm6, %v28056_v38, %v28055_v32  ;;  %v24435_v54 = vadd.f32 %v5531_v55, %v28059_v0  ;;  %17483 = vmatmul.mubr.msk.f32.gmra.mrb[170].mxu0 %vm3408_vm8, %v28060_v42  ;;  %v24440_v32 = vadd.f32 %v5533_v22, %v28061_v43  ;;  %v24445_v61 = vadd.f32 %v5282_v15, %v24277_v51  ;;  %v5284_v47 = vpop.f32.mrb[55].mxu1  ;;  %v5539_v55 = vpop.f32.mrb[67].mxu0  ;;  %v28064_v51 = vld [vmem:[#allocation37_spill] sm:$0xff]  ;;  %v28066_v43 = vld [vmem:[#allocation8_spill] sm:$0xff] }
 0x41c   : > { %v19176_v38 = vpack.c.bf16 %v9288_v48, %v9277_v45  ;;  %9405 = vmatprep.mubr.f32.mxu0 %v27784_v6  ;;  %4894 = vst.msk [vmem:[#allocation3 + $0x178] sm:$0xff] %vm3294_vm9, %v4846_v41  ;;  %17478 = vmatmul.mubr.msk.f32.vlgmr.msra.gmra.mrb[160].mxu1 %vm3408_vm8, %v23434_v50  ;;  %v19182_v19 = vpack.c.bf16 %v9293_v8, %v9282_v62  ;;  %v28062_v45 = vld [vmem:[#allocation40_spill] sm:$0xff]  ;;  %v28063_v41 = vld [vmem:[#allocation30_spill] sm:$0xff]  ;;  %v27476_v0 = vunpack.i.h.bf16 %v28064_v51  ;;  %v27479_v50 = vunpack.i.l.bf16 %v28064_v51  ;;  %v5442_v62 = vpop.f32.mrb[56].mxu1  ;;  %v28065_v8 = vld [vmem:[#allocation59_spill] sm:$0xff] }
 0x41d   : > { %v24450_v25 = vadd.f32 %v5284_v47, %v24289_v16  ;;  %9000 = vmatprep.mubr.f32.mxu1 %v27784_v6  ;;  %v24454_v48 = vadd.f32 %v5537_v46, %v28062_v45  ;;  %v24461_v16 = vadd.f32 %v5539_v55, %v24297_v63  ;;  %v24465_v22 = vadd.f32 %v5442_v62, %v28065_v8  ;;  %v5444_v15 = vpop.f32.mrb[57].mxu1  ;;  %v5543_v45 = vpop.f32.mrb[68].mxu0  ;;  %v28068_v55 = vld [vmem:[#allocation67_spill] sm:$0xff] }
 0x41e   : > { %19177 = vmatpush1.bf16.msra.mxu1 %v19176_v38  ;;  %v27477_v38 = vunpack.i.h.bf16 %v28066_v43  ;;  %v27478_v47 = vunpack.i.l.bf16 %v28066_v43  ;;  %v9294_v63 = vsel %vm2784_vm6, %v20158_v35, %v20152_v58  ;;  %v24479_v62 = vadd.f32 %v5543_v45, %v28068_v55  ;;  %v5545_v8 = vpop.f32.mrb[69].mxu0 }
 0x41f   : > { %19183 = vmatprep.subr.bf16.mxu1 %v19182_v19  ;;  %17484 = vmatmul.mubr.msk.f32.gmra.mrb[172].mxu0 %vm3408_vm8, %v28063_v41  ;;  %v28067_v19 = vld [vmem:[#allocation29_spill] sm:$0xff]  ;;  %v24484_v31 = vadd.f32 %v5545_v8, %v28070_v39  ;;  %v28071_v58 = vunpack.i.l.bf16 %v23715_v5 }
 0x420   : > { %9411 = vmatprep.mubr.f32.mxu0 %v27784_v6  ;;  %17479 = vmatmul.mubr.msk.f32.gmra.mrb[162].mxu1 %vm3408_vm8, %v23598_v14  ;;  %v24472_v46 = vadd.f32 %v5444_v15, %v28067_v19  ;;  %v5448_v14 = vpop.f32.mrb[58].mxu1  ;;  %v10119_v15 = vsel %vm3090_vm7, %v27479_v50, %v27476_v0 }
 0x421   : > { %9006 = vmatprep.mubr.f32.mxu1 %v27784_v6  ;;  %v9283_v35 = vsel %vm2784_vm6, %v20157_v28, %v28071_v58  ;;  %v24496_v19 = vadd.f32 %v5448_v14, %v24300_v49  ;;  %v5450_v45 = vpop.f32.mrb[59].mxu1  ;;  %v5549_v55 = vpop.f32.mrb[70].mxu0  ;;  %v10108_v28 = vsel %vm3090_vm7, %v27478_v47, %v27477_v38  ;;  %v28073_v58 = vld [vmem:[#allocation24_spill] sm:$0xff] }
 0x422   : > { %v24501_v39 = vadd.f32 %v5450_v45, %v24303_v2  ;;  %v19188_v8 = vpack.c.bf16 %v9294_v63, %v9283_v35  ;;  %v24510_v49 = vadd.f32 %v5549_v55, %v24330_v60  ;;  %v5551_v14 = vpop.f32.mrb[71].mxu0  ;;  %v28072_v2 = vunpack.i.h.bf16 %v28050_v37 }
 0x423   : > { %17485 = vmatmul.mubr.msk.f32.gmra.mrb[174].mxu0 %vm3408_vm8, %v28069_v34  ;;  %v28074_v45 = vunpack.i.h.bf16 %v28073_v58  ;;  %v5454_v35 = vpop.f32.mrb[60].mxu1  ;;  %v24520_v0 = vadd.f32 %v5551_v14, %v24333_v1  ;;  %v28075_v60 = vunpack.i.l.bf16 %v28050_v37  ;;  %v28076_v55 = vunpack.i.h.bf16 %v23766_v30  ;;  %v28078_v58 = vld [vmem:[#allocation11_spill] sm:$0xff]  ;;  %v28079_v1 = vld [vmem:[#allocation18_spill] sm:$0xff] }
 0x424   : > { %9571 = vmatprep.mubr.f32.mxu0 %v27784_v6  ;;  %17480 = vmatmul.mubr.msk.f32.gmra.mrb[164].mxu1 %vm3408_vm8, %v23454_v23  ;;  %v19194_v23 = vpack.c.bf16 %v10119_v15, %v10108_v28  ;;  %v28077_v15 = vld [vmem:[#allocation66_spill] sm:$0xff]  ;;  %v24531_v50 = vadd.f32 %v5454_v35, %v28078_v58 }
 0x425   : > { %9012 = vmatprep.mubr.f32.mxu1 %v27784_v6  ;;  %v9292_v63 = vsel %vm2784_vm6, %v28074_v45, %v28072_v2  ;;  %v9281_v38 = vsel %vm2784_vm6, %v28076_v55, %v28075_v60  ;;  %v27480_v28 = vunpack.i.h.bf16 %v28077_v15  ;;  %v27481_v47 = vunpack.i.l.bf16 %v28077_v15  ;;  %v5456_v2 = vpop.f32.mrb[61].mxu1  ;;  %v24538_v37 = vpop.f32.mrb[72].mxu0 }
 0x426   : > { %v24541_v30 = vpop.f32.mrb[73].mxu0  ;;  %v19184_v45 = vpack.c.bf16 %v9292_v63, %v9281_v38  ;;  %v28085_v63 = vld [vmem:[#allocation38_spill] sm:$0xff] }
 0x427   : > { %17490 = vmatmul.mubr.msk.f32.vlgmr.msra.gmra.mrb[176].mxu0 %vm3408_vm8, %v28051_v57  ;;  %28081 = vst [vmem:[#allocation61_spill] sm:$0xff] %v24541_v30  ;;  %v5460_v14 = vpop.f32.mrb[62].mxu1 }
 0x428   : > { %19189 = vmatpush1.bf16.msra.mxu0 %v19188_v8  ;;  %9577 = vmatprep.mubr.f32.mxu0 %v27784_v6  ;;  %v24536_v8 = vadd.f32 %v5456_v2, %v28079_v1  ;;  %v24547_v35 = vadd.f32 %v5460_v14, %v24340_v29  ;;  %v28088_v14 = vld [vmem:[#allocation57_spill] sm:$0xff] }
 0x429   : > { %17481 = vmatmul.mubr.msk.f32.gmra.mrb[166].mxu1 %vm3408_vm8, %v27952_v11  ;;  %19195 = vmatprep.subr.bf16.mxu0 %v19194_v23  ;;  %v5462_v11 = vpop.f32.mrb[63].mxu1  ;;  %v19190_v23 = vpack.c.bf16 %v27480_v28, %v27481_v47  ;;  %v6025_v55 = vpop.f32.mrb[74].mxu0  ;;  %v4906_v28 = vld [vmem:[#allocation3 + $0x58] sm:$0xff] }
 0x42a   : > { %28080 = vst [vmem:[#allocation33_spill] sm:$0xff] %v24536_v8  ;;  %9482 = vmatprep.mubr.f32.mxu1 %v27784_v6  ;;  %28082 = vst [vmem:[#allocation51_spill] sm:$0xff] %v24547_v35  ;;  %v24556_v60 = vadd.f32 %v5462_v11, %v24343_v27  ;;  %v24560_v29 = vadd.f32 %v6025_v55, %v24369_v9  ;;  %v6027_v38 = vpop.f32.mrb[75].mxu0  ;;  %v20177_v9 = vunpack.i.l.bf16 %v28088_v14  ;;  %v28089_v11 = vld [vmem:[#allocation26_spill] sm:$0xff]  ;;  %v28102_v8 = vld [vmem:[#allocation49_spill] sm:$0xff] }
 0x42b   : > { %17491 = vmatmul.mubr.msk.f32.gmra.mrb[178].mxu0 %vm3408_vm8, %v28060_v42  ;;  %v24569_v27 = vadd.f32 %v6027_v38, %v24399_v18  ;;  %v28090_v18 = vunpack.i.l.bf16 %v28064_v51  ;;  %v20188_v30 = vunpack.i.h.bf16 %v28102_v8 }
 0x42c   : > { %9583 = vmatprep.mubr.f32.mxu0 %v27784_v6  ;;  %28083 = vst [vmem:[#allocation10_spill] sm:$0xff] %v24556_v60  ;;  %28084 = vst [vmem:[#allocation7_spill] sm:$0xff] %v24560_v29  ;;  %v24566_v1 = vpop.f32.mrb[64].mxu1  ;;  %v28101_v60 = vld [vmem:[#allocation35_spill] sm:$0xff] }
 0x42d   : > { %17486 = vmatmul.mubr.msk.f32.vlgmr.msra.gmra.mrb[168].mxu1 %vm3408_vm8, %v28051_v57  ;;  %28086 = vst [vmem:[#allocation12_spill] sm:$0xff] %v24566_v1  ;;  %28087 = vst [vmem:[#allocation15_spill] sm:$0xff] %v24569_v27  ;;  %v5622_v47 = vpop.f32.mrb[65].mxu1  ;;  %v28091_v27 = vld [vmem:[#allocation80_spill] sm:$0xff] }
 0x42e   : > { %19185 = vmatpush1.bf16.msra.mxu1 %v19184_v45  ;;  %9488 = vmatprep.mubr.f32.mxu1 %v27784_v6  ;;  %v20178_v45 = vunpack.i.h.bf16 %v28088_v14  ;;  %v5654_v2 = vadd.f32 %v5622_v47, %v4906_v28  ;;  %v6031_v58 = vpop.f32.mrb[76].mxu0  ;;  %v28095_v47 = vunpack.i.h.bf16 %v28085_v63  ;;  %v28096_v28 = vunpack.i.l.bf16 %v28085_v63 }
 0x42f   : > { %19191 = vmatprep.subr.bf16.mxu1 %v19190_v23  ;;  %17492 = vmatmul.mubr.msk.f32.gmra.mrb[180].mxu0 %vm3408_vm8, %v28063_v41  ;;  %v24583_v29 = vadd.f32 %v6031_v58, %v28091_v27  ;;  %v6033_v14 = vpop.f32.mrb[77].mxu0  ;;  %v28093_v23 = vld [vmem:[#allocation70_spill] sm:$0xff]  ;;  %v28097_v58 = vunpack.i.l.bf16 %v28066_v43 }
 0x430   : > { %9589 = vmatprep.mubr.f32.mxu0 %v27784_v6  ;;  %v10118_v38 = vsel %vm3090_vm7, %v20178_v45, %v28090_v18  ;;  %5702 = vst.msk [vmem:[#allocation3 + $0x58] sm:$0xff] %vm3294_vm9, %v5654_v2  ;;  %v5626_v55 = vpop.f32.mrb[66].mxu1  ;;  %v24589_v1 = vadd.f32 %v6033_v14, %v28093_v23  ;;  %v10123_v45 = vsel %vm3090_vm7, %v28096_v28, %v28095_v47  ;;  %v4918_v2 = vld [vmem:[#allocation3 + $0xb8] sm:$0xff]  ;;  %v28099_v23 = vunpack.i.h.bf16 %v28089_v11 }
 0x431   : > { %17487 = vmatmul.mubr.msk.f32.gmra.mrb[170].mxu1 %vm3408_vm8, %v28060_v42  ;;  %28092 = vst [vmem:[#allocation22_spill] sm:$0xff] %v24583_v29  ;;  %v10107_v27 = vsel %vm3090_vm7, %v20177_v9, %v28097_v58  ;;  %v24601_v18 = vadd.f32 %v5626_v55, %v24383_v33  ;;  %v5628_v29 = vpop.f32.mrb[67].mxu1  ;;  %v28100_v14 = vunpack.i.l.bf16 %v28089_v11  ;;  %v20193_v47 = vunpack.i.h.bf16 %v28101_v60 }
 0x432   : > { %9494 = vmatprep.mubr.f32.mxu1 %v27784_v6  ;;  %28094 = vst [vmem:[#allocation46_spill] sm:$0xff] %v24589_v1  ;;  %v27485_v28 = vunpack.i.l.bf16 %v28101_v60  ;;  %v5666_v35 = vadd.f32 %v5628_v29, %v4918_v2  ;;  %v6037_v9 = vpop.f32.mrb[78].mxu0  ;;  %v19196_v33 = vpack.c.bf16 %v10118_v38, %v10107_v27  ;;  %v28104_v38 = vunpack.i.h.bf16 %v23715_v5  ;;  %v4930_v2 = vld [vmem:[#allocation3 + $0x118] sm:$0xff] }
 0x433   : > { %17493 = vmatmul.mubr.msk.f32.gmra.mrb[182].mxu0 %vm3408_vm8, %v28069_v34  ;;  %28098 = vst [vmem:[#allocation14_spill] sm:$0xff] %v24601_v18  ;;  %v10112_v1 = vsel %vm3090_vm7, %v28100_v14, %v28099_v23  ;;  %v24614_v55 = vadd.f32 %v6037_v9, %v24281_v20  ;;  %v6039_v58 = vpop.f32.mrb[79].mxu0  ;;  %v27484_v23 = vunpack.i.l.bf16 %v28102_v8  ;;  %v28103_v20 = vunpack.i.l.bf16 %v28077_v15 }
 0x434   : > { %9749 = vmatprep.mubr.f32.mxu0 %v27784_v6  ;;  %v19202_v18 = vpack.c.bf16 %v10123_v45, %v10112_v1  ;;  %5714 = vst.msk [vmem:[#allocation3 + $0xb8] sm:$0xff] %vm3294_vm9, %v5666_v35  ;;  %v24621_v14 = vpop.f32.mrb[68].mxu1  ;;  %v24624_v29 = vadd.f32 %v6039_v58, %v24284_v4  ;;  %v28105_v45 = vunpack.i.h.bf16 %v28077_v15  ;;  %v28106_v27 = vunpack.i.h.bf16 %v23810_v26 }
 0x435   : > { %17488 = vmatmul.mubr.msk.f32.gmra.mrb[172].mxu1 %vm3408_vm8, %v28063_v41  ;;  %v9285_v1 = vsel %vm2784_vm6, %v28104_v38, %v28103_v20  ;;  %v5634_v9 = vpop.f32.mrb[69].mxu1  ;;  %v10121_v5 = vsel %vm3090_vm7, %v27485_v28, %v20193_v47  ;;  %v10110_v38 = vsel %vm3090_vm7, %v27484_v23, %v20188_v30 }
 0x436   : > { %9500 = vmatprep.mubr.f32.mxu1 %v27784_v6  ;;  %v9296_v35 = vsel %vm2784_vm6, %v28106_v27, %v28105_v45  ;;  %v5678_v4 = vadd.f32 %v5634_v9, %v4930_v2  ;;  %v4942_v45 = vld [vmem:[#allocation3 + $0x178] sm:$0xff]  ;;  %v19198_v2 = vpack.c.bf16 %v10121_v5, %v10110_v38  ;;  %vm13821_vm6 = vcmask 572832  }
 0x437   : > { %17498 = vmatmul.mubr.msk.f32.vlgmr.msra.gmra.mrb[184].mxu0 %vm3408_vm8, %v28051_v57  ;;  %v19192_v20 = vpack.c.bf16 %v9296_v35, %v9285_v1 }
 0x438   : > { %19197 = vmatpush1.bf16.msra.mxu0 %v19196_v33  ;;  %9755 = vmatprep.mubr.f32.mxu0 %v27784_v6  ;;  %v6197_v33 = vpop.f32.mrb[80].mxu0  ;;  %5726 = vst.msk [vmem:[#allocation3 + $0x118] sm:$0xff] %vm3294_vm9, %v5678_v4 }
 0x439   : > { %17489 = vmatmul.mubr.msk.f32.gmra.mrb[174].mxu1 %vm3408_vm8, %v28069_v34  ;;  %19203 = vmatprep.subr.bf16.mxu0 %v19202_v18  ;;  %v24646_v26 = vadd.f32 %v6197_v33, %v24260_v53  ;;  %v6199_v15 = vpop.f32.mrb[81].mxu0  ;;  %v5638_v18 = vpop.f32.mrb[70].mxu1 }
 0x43a   : > { %9660 = vmatprep.mubr.f32.mxu1 %v27784_v6  ;;  %v24652_v58 = vadd.f32 %v6199_v15, %v24267_v44  ;;  %v24661_v53 = vadd.f32 %v5638_v18, %v24257_v3  ;;  %v5640_v27 = vpop.f32.mrb[71].mxu1  ;;  %v6203_v1 = vpop.f32.mrb[82].mxu0  ;;  %v28107_v3 = vld [vmem:[#allocation73_spill] sm:$0xff] }
 0x43b   : > { %17499 = vmatmul.mubr.msk.f32.gmra.mrb[186].mxu0 %vm3408_vm8, %v28060_v42  ;;  %v5690_v44 = vadd.f32 %v5640_v27, %v4942_v45  ;;  %v24667_v35 = vadd.f32 %v6203_v1, %v24310_v52  ;;  %v6205_v9 = vpop.f32.mrb[83].mxu0  ;;  %v27482_v4 = vunpack.i.h.bf16 %v28107_v3  ;;  %v27483_v33 = vunpack.i.l.bf16 %v28107_v3  ;;  %v28108_v18 = vld [vmem:[#allocation45_spill] sm:$0xff] }
 0x43c   : > { %9761 = vmatprep.mubr.f32.mxu0 %v27784_v6  ;;  %v6108_v5 = vpop.f32.mrb[72].mxu1  ;;  %v24675_v15 = vadd.f32 %v6205_v9, %v24316_v17  ;;  %v27487_v52 = vunpack.i.l.bf16 %v28108_v18  ;;  %v28109_v17 = vunpack.i.l.bf16 %v28085_v63 }
 0x43d   : > { %17494 = vmatmul.mubr.msk.f32.vlgmr.msra.gmra.mrb[176].mxu1 %vm3408_vm8, %v28051_v57  ;;  %5738 = vst.msk [vmem:[#allocation3 + $0x178] sm:$0xff] %vm3294_vm9, %v5690_v44  ;;  %v24681_v38 = vadd.f32 %v6108_v5, %v24325_v59  ;;  %v6110_v45 = vpop.f32.mrb[73].mxu1  ;;  %v24706_v5 = vld [vmem:[%s27224_s4 + $0x8] sm:$0xff] }
 0x43e   : > { %19193 = vmatpush1.bf16.msra.mxu1 %v19192_v20  ;;  %9666 = vmatprep.mubr.f32.mxu1 %v27784_v6  ;;  %v27486_v20 = vunpack.i.h.bf16 %v28108_v18  ;;  %v24686_v27 = vadd.f32 %v6110_v45, %v24336_v24  ;;  %v10122_v44 = vsel %vm3090_vm7, %v20193_v47, %v28109_v17  ;;  %v28110_v47 = vunpack.i.l.bf16 %v28089_v11 }
 0x43f   : > { %19199 = vmatprep.subr.bf16.mxu1 %v19198_v2  ;;  %17500 = vmatmul.mubr.msk.f32.gmra.mrb[188].mxu0 %vm3408_vm8, %v28063_v41  ;;  %v6209_v2 = vpop.f32.mrb[84].mxu0 }
 0x440   : > { %9767 = vmatprep.mubr.f32.mxu0 %v27784_v6  ;;  %v24695_v1 = vadd.f32 %v6209_v2, %v24353_v10  ;;  %v6211_v59 = vpop.f32.mrb[85].mxu0  ;;  %v6114_v9 = vpop.f32.mrb[74].mxu1  ;;  %v10127_v10 = vsel %vm3090_vm7, %v27483_v33, %v27482_v4  ;;  %v10116_v17 = vsel %vm3090_vm7, %v27487_v52, %v27486_v20  ;;  %v28113_v20 = vld [vmem:[#allocation27_spill] sm:$0xff] }
 0x441   : > { %17495 = vmatmul.mubr.msk.f32.gmra.mrb[178].mxu1 %vm3408_vm8, %v28060_v42  ;;  %v24700_v24 = vadd.f32 %v6211_v59, %v24360_v13  ;;  %v10111_v13 = vsel %vm3090_vm7, %v20188_v30, %v28110_v47  ;;  %v24719_v45 = vadd.f32 %v6114_v9, %v24372_v21  ;;  %v6116_v2 = vpop.f32.mrb[75].mxu1  ;;  %v28112_v59 = vld [vmem:[#allocation50_spill] sm:$0xff]  ;;  %v19210_v28 = vpack.c.bf16 %v10127_v10, %v10116_v17 }
 0x442   : > { %9672 = vmatprep.mubr.f32.mxu1 %v27784_v6  ;;  %v20213_v4 = vunpack.i.h.bf16 %v28112_v59  ;;  %v24731_v23 = vadd.f32 %v6116_v2, %v24388_v56  ;;  %v6215_v30 = vpop.f32.mrb[86].mxu0  ;;  %v19204_v21 = vpack.c.bf16 %v10122_v44, %v10111_v13  ;;  %v20208_v52 = vunpack.i.h.bf16 %v28113_v20 }
 0x443   : > { %17501 = vmatmul.mubr.msk.f32.gmra.mrb[190].mxu0 %vm3408_vm8, %v28069_v34  ;;  %28111 = vst [vmem:[#allocation19_spill] sm:$0xff] %v24719_v45  ;;  %v24735_v9 = vadd.f32 %v6215_v30, %v24394_v36  ;;  %v6217_v47 = vpop.f32.mrb[87].mxu0  ;;  %v20207_v45 = vunpack.i.l.bf16 %v28113_v20  ;;  %v24748_v36 = vld [vmem:[%s27224_s4 + $0x18] sm:$0xff]  ;;  %v28114_v44 = vunpack.i.l.bf16 %v28101_v60  ;;  %v28115_v10 = vunpack.i.h.bf16 %v28064_v51 }
 0x444   : > { %10229 = vmatprep.mubr.f32.mxu0 %v27784_v6  ;;  %v6120_v33 = vpop.f32.mrb[76].mxu1  ;;  %v24742_v56 = vadd.f32 %v6217_v47, %v24404_v12  ;;  %v28116_v60 = vunpack.i.l.bf16 %v28112_v59 }
 0x445   : > { %17496 = vmatmul.mubr.msk.f32.gmra.mrb[180].mxu1 %vm3408_vm8, %v28063_v41  ;;  %v10120_v13 = vsel %vm3090_vm7, %v28115_v10, %v28114_v44  ;;  %v24756_v2 = vadd.f32 %v6120_v33, %v24419_v7  ;;  %v6122_v17 = vpop.f32.mrb[77].mxu1  ;;  %v28118_v7 = vunpack.i.h.bf16 %v28066_v43 }
 0x446   : > { %9678 = vmatprep.mubr.f32.mxu1 %v27784_v6  ;;  %v24761_v12 = vadd.f32 %v6122_v17, %v24424_v40  ;;  %v6375_v30 = vpop.f32.mrb[88].mxu0  ;;  %v10125_v51 = vsel %vm3090_vm7, %v28116_v60, %v20213_v4 }
 0x447   : > { %17506 = vmatmul.mubr.msk.f32.vlgmr.msra.gmra.mrb[192].mxu0 %vm3408_vm8, %v24706_v5  ;;  %v24773_v47 = vadd.f32 %v6375_v30, %v24435_v54  ;;  %v24787_v54 = vld [vmem:[%s27224_s4 + $0x28] sm:$0xff] }
 0x448   : > { %19205 = vmatpush1.bf16.msra.mxu0 %v19204_v21  ;;  %10235 = vmatprep.mubr.f32.mxu0 %v27784_v6  ;;  %v28117_v21 = vunpack.i.l.bf16 %v28102_v8  ;;  %v6126_v40 = vpop.f32.mrb[78].mxu1  ;;  %v10114_v8 = vsel %vm3090_vm7, %v20207_v45, %v20208_v52 }
 0x449   : > { %17497 = vmatmul.mubr.msk.f32.gmra.mrb[182].mxu1 %vm3408_vm8, %v28069_v34  ;;  %19211 = vmatprep.subr.bf16.mxu0 %v19210_v28  ;;  %v6377_v28 = vpop.f32.mrb[89].mxu0  ;;  %v24790_v43 = vadd.f32 %v6126_v40, %v24445_v61  ;;  %v6128_v17 = vpop.f32.mrb[79].mxu1 }
 0x44a   : > { %9838 = vmatprep.mubr.f32.mxu1 %v27784_v6  ;;  %v10109_v33 = vsel %vm3090_vm7, %v28118_v7, %v28117_v21  ;;  %v24778_v44 = vadd.f32 %v6377_v28, %v24440_v32  ;;  %v19206_v32 = vpack.c.bf16 %v10125_v51, %v10114_v8  ;;  %v6381_v30 = vpop.f32.mrb[90].mxu0 }
 0x44b   : > { %17507 = vmatmul.mubr.msk.f32.gmra.mrb[194].mxu0 %vm3408_vm8, %v24748_v36  ;;  %v19200_v10 = vpack.c.bf16 %v10120_v13, %v10109_v33  ;;  %v24795_v13 = vadd.f32 %v6128_v17, %v24450_v25  ;;  %v24799_v60 = vadd.f32 %v6381_v30, %v24454_v48  ;;  %v6383_v21 = vpop.f32.mrb[91].mxu0 }
 0x44c   : > { %10241 = vmatprep.mubr.f32.mxu0 %v27784_v6  ;;  %v6286_v61 = vpop.f32.mrb[80].mxu1  ;;  %v24804_v7 = vadd.f32 %v6383_v21, %v24461_v16  ;;  %v28119_v16 = vunpack.i.l.bf16 %v28107_v3 }
 0x44d   : > { %17502 = vmatmul.mubr.msk.f32.vlgmr.msra.gmra.mrb[184].mxu1 %vm3408_vm8, %v28051_v57  ;;  %v24810_v57 = vld [vmem:[%s27224_s4 + $0x38] sm:$0xff]  ;;  %v24813_v25 = vadd.f32 %v6286_v61, %v24465_v22  ;;  %v6288_v48 = vpop.f32.mrb[81].mxu1 }
 0x44e   : > { %19201 = vmatpush1.bf16.msra.mxu1 %v19200_v10  ;;  %9844 = vmatprep.mubr.f32.mxu1 %v27784_v6  ;;  %v24818_v51 = vadd.f32 %v6288_v48, %v24472_v46  ;;  %v6387_v33 = vpop.f32.mrb[92].mxu0  ;;  %v10126_v28 = vsel %vm3090_vm7, %v20213_v4, %v28119_v16  ;;  %v28120_v46 = vunpack.i.l.bf16 %v28108_v18  ;;  %v5739_v48 = vld [vmem:[#allocation3] sm:$0xff] }
 0x44f   : > { %19207 = vmatprep.subr.bf16.mxu1 %v19206_v32  ;;  %17508 = vmatmul.mubr.msk.f32.gmra.mrb[196].mxu0 %vm3408_vm8, %v24787_v54  ;;  %v24825_v40 = vadd.f32 %v6387_v33, %v24479_v62  ;;  %v6389_v10 = vpop.f32.mrb[93].mxu0  ;;  %v24841_v62 = vpop.permute.xlu0 %20225 }
 0x450   : > { %10247 = vmatprep.mubr.f32.mxu0 %v27784_v6  ;;  %v6292_v22 = vpop.f32.mrb[82].mxu1  ;;  %v10115_v8 = vsel %vm3090_vm7, %v20208_v52, %v28120_v46  ;;  %v20227_v16 = vunpack.i.l.bf16 %v24841_v62  ;;  %v28124_v46 = vld [vmem:[#allocation33_spill] sm:$0xff] }
 0x451   : > { %17503 = vmatmul.mubr.msk.f32.gmra.mrb[186].mxu1 %vm3408_vm8, %v28060_v42  ;;  %v24830_v42 = vadd.f32 %v6389_v10, %v24484_v31  ;;  %v24837_v17 = vadd.f32 %v6292_v22, %v24496_v19  ;;  %v6294_v4 = vpop.f32.mrb[83].mxu1  ;;  %v19212_v30 = vpack.c.bf16 %v10126_v28, %v10115_v8  ;;  %v28121_v19 = vunpack.i.l.bf16 %v28112_v59  ;;  %v5740_v10 = vld [vmem:[#allocation3 + $0x8] sm:$0xff]  ;;  %v28123_v22 = vld [vmem:[#allocation61_spill] sm:$0xff] }
 0x452   : > { %9850 = vmatprep.mubr.f32.mxu1 %v27784_v6  ;;  %v24844_v32 = vadd.f32 %v6294_v4, %v24501_v39  ;;  %v6393_v31 = vpop.f32.mrb[94].mxu0  ;;  %v6487_v28 = vadd.f32 %v24538_v37, %v5739_v48  ;;  %v28125_v37 = vunpack.i.h.bf16 %v28089_v11 }
 0x453   : > { %17509 = vmatmul.mubr.msk.f32.gmra.mrb[198].mxu0 %vm3408_vm8, %v24810_v57  ;;  %v24848_v21 = vadd.f32 %v6393_v31, %v24510_v49  ;;  %v6395_v52 = vpop.f32.mrb[95].mxu0  ;;  %v20228_v49 = vunpack.i.h.bf16 %v24841_v62 }
 0x454   : > { %10407 = vmatprep.mubr.f32.mxu0 %v27784_v6  ;;  %v6298_v39 = vpop.f32.mrb[84].mxu1  ;;  %v24858_v33 = vadd.f32 %v6395_v52, %v24520_v0  ;;  %v6488_v0 = vadd.f32 %v28123_v22, %v5740_v10  ;;  %v10113_v31 = vsel %vm3090_vm7, %v28125_v37, %v20207_v45  ;;  %v4905_v45 = vld [vmem:[#allocation3 + $0x50] sm:$0xff]  ;;  %v28128_v10 = vld [vmem:[#allocation12_spill] sm:$0xff] }
 0x455   : > { %17504 = vmatmul.mubr.msk.f32.gmra.mrb[188].mxu1 %vm3408_vm8, %v28063_v41  ;;  %v28122_v41 = vunpack.i.h.bf16 %v28085_v63  ;;  %v24865_v59 = vadd.f32 %v6298_v39, %v24531_v50  ;;  %v6300_v63 = vpop.f32.mrb[85].mxu1  ;;  %v19214_v11 = vpack.c.bf16 %v20228_v49, %v20227_v16  ;;  %v28127_v39 = vld [vmem:[#allocation10_spill] sm:$0xff]  ;;  %v28129_v22 = vld [vmem:[#allocation7_spill] sm:$0xff] }
 0x456   : > { %9856 = vmatprep.mubr.f32.mxu1 %v27784_v6  ;;  %v24871_v8 = vadd.f32 %v6300_v63, %v28124_v46  ;;  %v6863_v4 = vpop.f32.mrb[96].mxu0  ;;  %v5653_v63 = vadd.f32 %v28128_v10, %v4905_v45  ;;  %v28130_v37 = vld [vmem:[#allocation15_spill] sm:$0xff]  ;;  %v28132_v10 = vld [vmem:[#allocation46_spill] sm:$0xff] }
 0x457   : > { %17514 = vmatmul.mubr.msk.f32.vlgmr.msra.gmra.mrb[200].mxu0 %vm3408_vm8, %v24706_v5  ;;  %v10124_v61 = vsel %vm3090_vm7, %v28122_v41, %v28121_v19  ;;  %v24879_v50 = vadd.f32 %v6863_v4, %v6487_v28  ;;  %v28126_v41 = vld [vmem:[#allocation51_spill] sm:$0xff] }
 0x458   : > { %19213 = vmatpush1.bf16.msra.mxu0 %v19212_v30  ;;  %10413 = vmatprep.mubr.f32.mxu0 %v27784_v6  ;;  %v6865_v30 = vpop.f32.mrb[97].mxu0  ;;  %v19208_v19 = vpack.c.bf16 %v10124_v61, %v10113_v31 }
 0x459   : > { %17505 = vmatmul.mubr.msk.f32.gmra.mrb[190].mxu1 %vm3408_vm8, %v28069_v34  ;;  %v6304_v34 = vpop.f32.mrb[86].mxu1  ;;  %v24883_v52 = vadd.f32 %v6865_v30, %v6488_v0 }
 0x45a   : > { %10318 = vmatprep.mubr.f32.mxu1 %v27784_v6  ;;  %v24887_v48 = vadd.f32 %v6304_v34, %v28126_v41  ;;  %v6306_v20 = vpop.f32.mrb[87].mxu1  ;;  %v6869_v61 = vpop.f32.mrb[98].mxu0  ;;  %v5750_v34 = vld [vmem:[#allocation3 + $0x58] sm:$0xff] }
 0x45b   : > { %17515 = vmatmul.mubr.msk.f32.gmra.mrb[202].mxu0 %vm3408_vm8, %v24748_v36  ;;  %v24896_v28 = vadd.f32 %v6306_v20, %v28127_v39  ;;  %v24901_v0 = vadd.f32 %v6869_v61, %v28129_v22  ;;  %v6871_v46 = vpop.f32.mrb[99].mxu0  ;;  %v28133_v22 = vld [vmem:[#allocation14_spill] sm:$0xff] }
 0x45c   : > { %10419 = vmatprep.mubr.f32.mxu0 %v27784_v6  ;;  %v6464_v4 = vpop.f32.mrb[88].mxu1  ;;  %v24906_v31 = vadd.f32 %v6871_v46, %v28130_v37 }
 0x45d   : > { %17510 = vmatmul.mubr.msk.f32.vlgmr.msra.gmra.mrb[192].mxu1 %vm3408_vm8, %v24706_v5  ;;  %v24909_v30 = vadd.f32 %v6464_v4, %v5653_v63  ;;  %v5762_v4 = vld [vmem:[#allocation3 + $0xb8] sm:$0xff] }
 0x45e   : > { %19209 = vmatpush1.bf16.msra.mxu1 %v19208_v19  ;;  %10324 = vmatprep.mubr.f32.mxu1 %v27784_v6  ;;  %v6466_v19 = vpop.f32.mrb[89].mxu1  ;;  %v6875_v20 = vpop.f32.mrb[100].mxu0 }
 0x45f   : > { %19215 = vmatprep.subr.bf16.mxu1 %v19214_v11  ;;  %17516 = vmatmul.mubr.msk.f32.gmra.mrb[204].mxu0 %vm3408_vm8, %v24787_v54  ;;  %v6498_v41 = vadd.f32 %v6466_v19, %v5750_v34  ;;  %v28131_v11 = vld [vmem:[#allocation22_spill] sm:$0xff]  ;;  %v6877_v39 = vpop.f32.mrb[101].mxu0  ;;  %v4929_v34 = vld [vmem:[#allocation3 + $0x110] sm:$0xff] }
 0x460   : > { %10425 = vmatprep.mubr.f32.mxu0 %v27784_v6  ;;  %v24915_v45 = vadd.f32 %v6875_v20, %v28131_v11  ;;  %v6470_v61 = vpop.f32.mrb[90].mxu1  ;;  %v24921_v63 = vadd.f32 %v6877_v39, %v28132_v10 }
 0x461   : > { %17511 = vmatmul.mubr.msk.f32.gmra.mrb[194].mxu1 %vm3408_vm8, %v24748_v36  ;;  %6546 = vst.msk [vmem:[#allocation3 + $0x58] sm:$0xff] %vm3294_vm9, %v6498_v41  ;;  %v24925_v46 = vadd.f32 %v6470_v61, %v28133_v22  ;;  %v6472_v37 = vpop.f32.mrb[91].mxu1  ;;  %v5677_v41 = vadd.f32 %v24621_v14, %v4929_v34  ;;  %v28134_v22 = vunpack.i.h.bf16 %v28108_v18  ;;  %v5774_v34 = vld [vmem:[#allocation3 + $0x118] sm:$0xff] }
 0x462   : > { %10330 = vmatprep.mubr.f32.mxu1 %v27784_v6  ;;  %v6510_v19 = vadd.f32 %v6472_v37, %v5762_v4  ;;  %v6881_v20 = vpop.f32.mrb[102].mxu0 }
 0x463   : > { %17517 = vmatmul.mubr.msk.f32.gmra.mrb[206].mxu0 %vm3408_vm8, %v24810_v57  ;;  %v24932_v11 = vadd.f32 %v6881_v20, %v24614_v55  ;;  %v6883_v39 = vpop.f32.mrb[103].mxu0  ;;  %v10117_v14 = vsel %vm3090_vm7, %v28134_v22, %v20227_v16  ;;  %v28135_v55 = vunpack.i.h.bf16 %v28107_v3 }
 0x464   : > { %10585 = vmatprep.mubr.f32.mxu0 %v27784_v6  ;;  %6558 = vst.msk [vmem:[#allocation3 + $0xb8] sm:$0xff] %vm3294_vm9, %v6510_v19  ;;  %v6476_v61 = vpop.f32.mrb[92].mxu1  ;;  %v24938_v10 = vadd.f32 %v6883_v39, %v24624_v29  ;;  %v5786_v39 = vld [vmem:[#allocation3 + $0x178] sm:$0xff] }
 0x465   : > { %17512 = vmatmul.mubr.msk.f32.gmra.mrb[196].mxu1 %vm3408_vm8, %v24787_v54  ;;  %v10128_v4 = vsel %vm3090_vm7, %v28135_v55, %v20228_v49  ;;  %v24951_v37 = vadd.f32 %v6476_v61, %v5677_v41  ;;  %v6478_v19 = vpop.f32.mrb[93].mxu1  ;;  %vm14100_vm7 = vcmask 720432  }
 0x466   : > { %10336 = vmatprep.mubr.f32.mxu1 %v27784_v6  ;;  %v6522_v29 = vadd.f32 %v6478_v19, %v5774_v34  ;;  %v7041_v20 = vpop.f32.mrb[104].mxu0  ;;  %v19216_v49 = vpack.c.bf16 %v10128_v4, %v10117_v14 }
 0x467   : > { %17522 = vmatmul.mubr.msk.f32.vlgmr.msra.gmra.mrb[208].mxu0 %vm3408_vm8, %v24706_v5  ;;  %v24957_v18 = vadd.f32 %v7041_v20, %v24646_v26  ;;  %v7043_v16 = vpop.f32.mrb[105].mxu0 }
 0x468   : > { %10591 = vmatprep.mubr.f32.mxu0 %v27784_v6  ;;  %6570 = vst.msk [vmem:[#allocation3 + $0x118] sm:$0xff] %vm3294_vm9, %v6522_v29  ;;  %v6482_v3 = vpop.f32.mrb[94].mxu1  ;;  %v24963_v62 = vadd.f32 %v7043_v16, %v24652_v58  ;;  %v28136_v16 = vld [vmem:[#allocation19_spill] sm:$0xff] }
 0x469   : > { %17513 = vmatmul.mubr.msk.f32.gmra.mrb[198].mxu1 %vm3408_vm8, %v24810_v57  ;;  %v24967_v41 = vadd.f32 %v6482_v3, %v24661_v53  ;;  %v6484_v61 = vpop.f32.mrb[95].mxu1 }
 0x46a   : > { %10496 = vmatprep.mubr.f32.mxu1 %v27784_v6  ;;  %v6534_v26 = vadd.f32 %v6484_v61, %v5786_v39  ;;  %v7047_v22 = vpop.f32.mrb[106].mxu0 }
 0x46b   : > { %17523 = vmatmul.mubr.msk.f32.gmra.mrb[210].mxu0 %vm3408_vm8, %v24748_v36  ;;  %v24973_v55 = vadd.f32 %v7047_v22, %v24667_v35  ;;  %v7049_v58 = vpop.f32.mrb[107].mxu0 }
 0x46c   : > { %10597 = vmatprep.mubr.f32.mxu0 %v27784_v6  ;;  %6582 = vst.msk [vmem:[#allocation3 + $0x178] sm:$0xff] %vm3294_vm9, %v6534_v26  ;;  %v6952_v53 = vpop.f32.mrb[96].mxu1  ;;  %v24979_v14 = vadd.f32 %v7049_v58, %v24675_v15 }
 0x46d   : > { %17518 = vmatmul.mubr.msk.f32.vlgmr.msra.gmra.mrb[200].mxu1 %vm3408_vm8, %v24706_v5  ;;  %v24983_v4 = vadd.f32 %v6952_v53, %v24681_v38  ;;  %v6954_v34 = vpop.f32.mrb[97].mxu1 }
 0x46e   : > { %19217 = vmatpush1.bf16.msra.mxu1 %v19216_v49  ;;  %10502 = vmatprep.mubr.f32.mxu1 %v27784_v6  ;;  %v24988_v35 = vadd.f32 %v6954_v34, %v24686_v27  ;;  %v7053_v19 = vpop.f32.mrb[108].mxu0 }
 0x46f   : > { %17524 = vmatmul.mubr.msk.f32.gmra.mrb[212].mxu0 %vm3408_vm8, %v24787_v54  ;;  %v24992_v29 = vadd.f32 %v7053_v19, %v24695_v1  ;;  %v7055_v15 = vpop.f32.mrb[109].mxu0 }
 0x470   : > { %10603 = vmatprep.mubr.f32.mxu0 %v27784_v6  ;;  %v6958_v20 = vpop.f32.mrb[98].mxu1  ;;  %v24997_v38 = vadd.f32 %v7055_v15, %v24700_v24 }
 0x471   : > { %17519 = vmatmul.mubr.msk.f32.gmra.mrb[202].mxu1 %vm3408_vm8, %v24748_v36  ;;  %v25000_v3 = vadd.f32 %v6958_v20, %v28136_v16  ;;  %v6960_v49 = vpop.f32.mrb[99].mxu1 }
 0x472   : > { %10508 = vmatprep.mubr.f32.mxu1 %v27784_v6  ;;  %v25005_v27 = vadd.f32 %v6960_v49, %v24731_v23  ;;  %v7059_v1 = vpop.f32.mrb[110].mxu0 }
 0x473   : > { %17525 = vmatmul.mubr.msk.f32.gmra.mrb[214].mxu0 %vm3408_vm8, %v24810_v57  ;;  %v25009_v39 = vadd.f32 %v7059_v1, %v24735_v9  ;;  %v7061_v61 = vpop.f32.mrb[111].mxu0 }
 0x474   : > { %v6964_v26 = vpop.f32.mrb[100].mxu1  ;;  %v25012_v24 = vadd.f32 %v7061_v61, %v24742_v56 }
 0x475   : > { %17520 = vmatmul.mubr.msk.f32.gmra.mrb[204].mxu1 %vm3408_vm8, %v24787_v54  ;;  %v25015_v22 = vadd.f32 %v6964_v26, %v24756_v2  ;;  %v6966_v58 = vpop.f32.mrb[101].mxu1 }
 0x476   : > { %10514 = vmatprep.mubr.f32.mxu1 %v27784_v6  ;;  %v25020_v23 = vadd.f32 %v6966_v58, %v24761_v12  ;;  %v7219_v53 = vpop.f32.mrb[112].mxu0 }
 0x477   : > { %v25024_v9 = vadd.f32 %v7219_v53, %v24773_v47  ;;  %v7221_v34 = vpop.f32.mrb[113].mxu0 }
 0x478   : > { %v6970_v19 = vpop.f32.mrb[102].mxu1  ;;  %v25027_v56 = vadd.f32 %v7221_v34, %v24778_v44 }
 0x479   : > { %17521 = vmatmul.mubr.msk.f32.gmra.mrb[206].mxu1 %vm3408_vm8, %v24810_v57  ;;  %v25030_v2 = vadd.f32 %v6970_v19, %v24790_v43  ;;  %v6972_v15 = vpop.f32.mrb[103].mxu1 }
 0x47a   : > { %10674 = vmatprep.mubr.f32.mxu1 %v27784_v6  ;;  %v25035_v12 = vadd.f32 %v6972_v15, %v24795_v13  ;;  %v7225_v20 = vpop.f32.mrb[114].mxu0 }
 0x47b   : > { %v25039_v47 = vadd.f32 %v7225_v20, %v24799_v60  ;;  %v7227_v16 = vpop.f32.mrb[115].mxu0 }
 0x47c   : > { %v7130_v49 = vpop.f32.mrb[104].mxu1  ;;  %v25042_v44 = vadd.f32 %v7227_v16, %v24804_v7 }
 0x47d   : > { %17526 = vmatmul.mubr.msk.f32.vlgmr.msra.gmra.mrb[208].mxu1 %vm3408_vm8, %v24706_v5  ;;  %v25045_v43 = vadd.f32 %v7130_v49, %v24813_v25  ;;  %v7132_v1 = vpop.f32.mrb[105].mxu1 }
 0x47e   : > { %10680 = vmatprep.mubr.f32.mxu1 %v27784_v6  ;;  %v25050_v5 = vadd.f32 %v7132_v1, %v24818_v51  ;;  %v7231_v13 = vpop.f32.mrb[116].mxu0 }
 0x47f   : > { %v25054_v60 = vadd.f32 %v7231_v13, %v24825_v40  ;;  %v7233_v61 = vpop.f32.mrb[117].mxu0 }
 0x480   : > { %v7136_v26 = vpop.f32.mrb[106].mxu1  ;;  %v25057_v7 = vadd.f32 %v7233_v61, %v24830_v42 }
 0x481   : > { %17527 = vmatmul.mubr.msk.f32.gmra.mrb[210].mxu1 %vm3408_vm8, %v24748_v36  ;;  %v25060_v25 = vadd.f32 %v7136_v26, %v24837_v17  ;;  %v7138_v58 = vpop.f32.mrb[107].mxu1 }
 0x482   : > { %10686 = vmatprep.mubr.f32.mxu1 %v27784_v6  ;;  %v25065_v36 = vadd.f32 %v7138_v58, %v24844_v32  ;;  %v7237_v51 = vpop.f32.mrb[118].mxu0 }
 0x483   : > { %v25069_v40 = vadd.f32 %v7237_v51, %v24848_v21  ;;  %v7239_v53 = vpop.f32.mrb[119].mxu0 }
 0x484   : > { %v7142_v34 = vpop.f32.mrb[108].mxu1  ;;  %v25072_v42 = vadd.f32 %v7239_v53, %v24858_v33 }
 0x485   : > { %17528 = vmatmul.mubr.msk.f32.gmra.mrb[212].mxu1 %vm3408_vm8, %v24787_v54  ;;  %v25075_v17 = vadd.f32 %v7142_v34, %v24865_v59  ;;  %v7144_v19 = vpop.f32.mrb[109].mxu1  ;;  %v6606_v34 = vld [vmem:[#allocation3 + $0xb8] sm:$0xff] }
 0x486   : > { %10692 = vmatprep.mubr.f32.mxu1 %v27784_v6  ;;  %v25080_v54 = vadd.f32 %v7144_v19, %v24871_v8  ;;  %v7707_v32 = vpop.f32.mrb[120].mxu0 }
 0x487   : > { %v25083_v15 = vadd.f32 %v7707_v32, %v24879_v50  ;;  %v7709_v21 = vpop.f32.mrb[121].mxu0 }
 0x488   : > { %v7148_v20 = vpop.f32.mrb[110].mxu1  ;;  %v25086_v16 = vadd.f32 %v7709_v21, %v24883_v52  ;;  %v6594_v52 = vld [vmem:[#allocation3 + $0x58] sm:$0xff] }
 0x489   : > { %17529 = vmatmul.mubr.msk.f32.gmra.mrb[214].mxu1 %vm3408_vm8, %v24810_v57  ;;  %v25089_v33 = vadd.f32 %v7148_v20, %v24887_v48  ;;  %v7150_v59 = vpop.f32.mrb[111].mxu1 }
 0x48a   : > { %v25092_v49 = vadd.f32 %v7150_v59, %v24896_v28  ;;  %v7713_v57 = vpop.f32.mrb[122].mxu0 }
 0x48b   : > { %v25095_v8 = vadd.f32 %v7713_v57, %v24901_v0  ;;  %v7715_v1 = vpop.f32.mrb[123].mxu0  ;;  %v6618_v57 = vld [vmem:[#allocation3 + $0x118] sm:$0xff] }
 0x48c   : > { %v7308_v13 = vpop.f32.mrb[112].mxu1  ;;  %v25098_v50 = vadd.f32 %v7715_v1, %v24906_v31 }
 0x48d   : > { %v25101_v61 = vadd.f32 %v7308_v13, %v24909_v30  ;;  %v7310_v26 = vpop.f32.mrb[113].mxu1 }
 0x48e   : > { %v7342_v48 = vadd.f32 %v7310_v26, %v6594_v52  ;;  %v7719_v58 = vpop.f32.mrb[124].mxu0 }
 0x48f   : > { %v25104_v51 = vadd.f32 %v7719_v58, %v24915_v45  ;;  %v7721_v28 = vpop.f32.mrb[125].mxu0  ;;  %v6630_v58 = vld [vmem:[#allocation3 + $0x178] sm:$0xff] }
 0x490   : > { %7390 = vst.msk [vmem:[#allocation3 + $0x58] sm:$0xff] %vm3294_vm9, %v7342_v48  ;;  %v7314_v0 = vpop.f32.mrb[114].mxu1  ;;  %v25108_v53 = vadd.f32 %v7721_v28, %v24921_v63 }
 0x491   : > { %v25111_v31 = vadd.f32 %v7314_v0, %v24925_v46  ;;  %v7316_v30 = vpop.f32.mrb[115].mxu1 }
 0x492   : > { %v7354_v19 = vadd.f32 %v7316_v30, %v6606_v34  ;;  %v7725_v32 = vpop.f32.mrb[126].mxu0 }
 0x493   : > { %v25114_v21 = vadd.f32 %v7725_v32, %v24932_v11  ;;  %v7727_v20 = vpop.f32.mrb[127].mxu0 }
 0x494   : > { %7402 = vst.msk [vmem:[#allocation3 + $0xb8] sm:$0xff] %vm3294_vm9, %v7354_v19  ;;  %v7320_v45 = vpop.f32.mrb[116].mxu1  ;;  %v25118_v59 = vadd.f32 %v7727_v20, %v24938_v10 }
 0x495   : > { %v25121_v63 = vadd.f32 %v7320_v45, %v24951_v37  ;;  %v7322_v46 = vpop.f32.mrb[117].mxu1 }
 0x496   : > { %v7366_v1 = vadd.f32 %v7322_v46, %v6618_v57  ;;  %v7885_v13 = vpop.f32.mrb[128].mxu0 }
 0x497   : > { %v25124_v52 = vadd.f32 %v7885_v13, %v24957_v18  ;;  %v7887_v26 = vpop.f32.mrb[129].mxu0 }
 0x498   : > { %7414 = vst.msk [vmem:[#allocation3 + $0x118] sm:$0xff] %vm3294_vm9, %v7366_v1  ;;  %v7326_v11 = vpop.f32.mrb[118].mxu1  ;;  %v25128_v48 = vadd.f32 %v7887_v26, %v24963_v62 }
 0x499   : > { %v25131_v10 = vadd.f32 %v7326_v11, %v24967_v41  ;;  %v7328_v37 = vpop.f32.mrb[119].mxu1 }
 0x49a   : > { %v7378_v28 = vadd.f32 %v7328_v37, %v6630_v58  ;;  %v7891_v0 = vpop.f32.mrb[130].mxu0 }
 0x49b   : > { %v25134_v34 = vadd.f32 %v7891_v0, %v24973_v55  ;;  %v7893_v30 = vpop.f32.mrb[131].mxu0 }
 0x49c   : > { %7426 = vst.msk [vmem:[#allocation3 + $0x178] sm:$0xff] %vm3294_vm9, %v7378_v28  ;;  %v7796_v18 = vpop.f32.mrb[120].mxu1  ;;  %v25138_v19 = vadd.f32 %v7893_v30, %v24979_v14 }
 0x49d   : > { %v25141_v62 = vadd.f32 %v7796_v18, %v24983_v4  ;;  %v7798_v32 = vpop.f32.mrb[121].mxu1 }
 0x49e   : > { %v25144_v41 = vadd.f32 %v7798_v32, %v24988_v35  ;;  %v7897_v20 = vpop.f32.mrb[132].mxu0 }
 0x49f   : > { %v25147_v45 = vadd.f32 %v7897_v20, %v24992_v29  ;;  %v7899_v55 = vpop.f32.mrb[133].mxu0 }
 0x4a0   : > { %v7802_v57 = vpop.f32.mrb[122].mxu1  ;;  %v25150_v46 = vadd.f32 %v7899_v55, %v24997_v38 }
 0x4a1   : > { %v25153_v1 = vadd.f32 %v7802_v57, %v25000_v3  ;;  %v7804_v14 = vpop.f32.mrb[123].mxu1 }
 0x4a2   : > { %v25156_v4 = vadd.f32 %v7804_v14, %v25005_v27  ;;  %v7903_v13 = vpop.f32.mrb[134].mxu0 }
 0x4a3   : > { %v25159_v35 = vadd.f32 %v7903_v13, %v25009_v39  ;;  %v7905_v26 = vpop.f32.mrb[135].mxu0 }
 0x4a4   : > { %v7808_v11 = vpop.f32.mrb[124].mxu1  ;;  %v25162_v29 = vadd.f32 %v7905_v26, %v25012_v24 }
 0x4a5   : > { %v25165_v58 = vadd.f32 %v7808_v11, %v25015_v22  ;;  %v7810_v38 = vpop.f32.mrb[125].mxu1 }
 0x4a6   : > { %v25168_v3 = vadd.f32 %v7810_v38, %v25020_v23  ;;  %v8063_v37 = vpop.f32.mrb[136].mxu0 }
 0x4a7   : > { %v25171_v27 = vadd.f32 %v8063_v37, %v25024_v9  ;;  %v8065_v28 = vpop.f32.mrb[137].mxu0 }
 0x4a8   : > { %v7814_v0 = vpop.f32.mrb[126].mxu1  ;;  %v25174_v39 = vadd.f32 %v8065_v28, %v25027_v56 }
 0x4a9   : > { %v25177_v30 = vadd.f32 %v7814_v0, %v25030_v2  ;;  %v7816_v24 = vpop.f32.mrb[127].mxu1 }
 0x4aa   : > { %v25180_v22 = vadd.f32 %v7816_v24, %v25035_v12  ;;  %v8069_v18 = vpop.f32.mrb[138].mxu0 }
 0x4ab   : > { %v25183_v23 = vadd.f32 %v8069_v18, %v25039_v47  ;;  %v8071_v32 = vpop.f32.mrb[139].mxu0 }
 0x4ac   : > { %v7974_v20 = vpop.f32.mrb[128].mxu1  ;;  %v25186_v9 = vadd.f32 %v8071_v32, %v25042_v44 }
 0x4ad   : > { %v25189_v55 = vadd.f32 %v7974_v20, %v25045_v43  ;;  %v7976_v56 = vpop.f32.mrb[129].mxu1 }
 0x4ae   : > { %v25192_v2 = vadd.f32 %v7976_v56, %v25050_v5  ;;  %v8075_v57 = vpop.f32.mrb[140].mxu0 }
 0x4af   : > { %v25195_v12 = vadd.f32 %v8075_v57, %v25054_v60  ;;  %v8077_v14 = vpop.f32.mrb[141].mxu0 }
 0x4b0   : > { %v7980_v13 = vpop.f32.mrb[130].mxu1  ;;  %v25198_v47 = vadd.f32 %v8077_v14, %v25057_v7 }
 0x4b1   : > { %v25201_v26 = vadd.f32 %v7980_v13, %v25060_v25  ;;  %v7982_v44 = vpop.f32.mrb[131].mxu1 }
 0x4b2   : > { %v25204_v43 = vadd.f32 %v7982_v44, %v25065_v36  ;;  %v8081_v11 = vpop.f32.mrb[142].mxu0 }
 0x4b3   : > { %v25207_v5 = vadd.f32 %v8081_v11, %v25069_v40  ;;  %v8083_v38 = vpop.f32.mrb[143].mxu0 }
 0x4b4   : > { %v7986_v37 = vpop.f32.mrb[132].mxu1  ;;  %v25210_v60 = vadd.f32 %v8083_v38, %v25072_v42 }
 0x4b5   : > { %v25213_v28 = vadd.f32 %v7986_v37, %v25075_v17  ;;  %v7988_v7 = vpop.f32.mrb[133].mxu1  ;;  %v7450_v37 = vld [vmem:[#allocation3 + $0xb8] sm:$0xff] }
 0x4b6   : > { %v25216_v25 = vadd.f32 %v7988_v7, %v25080_v54  ;;  %v8551_v0 = vpop.f32.mrb[144].mxu0 }
 0x4b7   : > { %v25219_v36 = vadd.f32 %v8551_v0, %v25083_v15  ;;  %v8553_v24 = vpop.f32.mrb[145].mxu0 }
 0x4b8   : > { %v7992_v18 = vpop.f32.mrb[134].mxu1  ;;  %v25222_v40 = vadd.f32 %v8553_v24, %v25086_v16  ;;  %v7438_v16 = vld [vmem:[#allocation3 + $0x58] sm:$0xff] }
 0x4b9   : > { %v25225_v32 = vadd.f32 %v7992_v18, %v25089_v33  ;;  %v7994_v42 = vpop.f32.mrb[135].mxu1 }
 0x4ba   : > { %v25228_v17 = vadd.f32 %v7994_v42, %v25092_v49  ;;  %v8557_v20 = vpop.f32.mrb[146].mxu0 }
 0x4bb   : > { %v25231_v54 = vadd.f32 %v8557_v20, %v25095_v8  ;;  %v8559_v56 = vpop.f32.mrb[147].mxu0  ;;  %v7462_v20 = vld [vmem:[#allocation3 + $0x118] sm:$0xff] }
 0x4bc   : > { %v8152_v57 = vpop.f32.mrb[136].mxu1  ;;  %v25234_v15 = vadd.f32 %v8559_v56, %v25098_v50 }
 0x4bd   : > { %v25237_v14 = vadd.f32 %v8152_v57, %v25101_v61  ;;  %v8154_v13 = vpop.f32.mrb[137].mxu1 }
 0x4be   : > { %v8186_v33 = vadd.f32 %v8154_v13, %v7438_v16  ;;  %v8563_v44 = vpop.f32.mrb[148].mxu0 }
 0x4bf   : > { %v25240_v11 = vadd.f32 %v8563_v44, %v25104_v51  ;;  %v8565_v49 = vpop.f32.mrb[149].mxu0  ;;  %v7474_v44 = vld [vmem:[#allocation3 + $0x178] sm:$0xff] }
 0x4c0   : > { %8234 = vst.msk [vmem:[#allocation3 + $0x58] sm:$0xff] %vm3294_vm9, %v8186_v33  ;;  %v8158_v8 = vpop.f32.mrb[138].mxu1  ;;  %v25244_v38 = vadd.f32 %v8565_v49, %v25108_v53 }
 0x4c1   : > { %v25247_v50 = vadd.f32 %v8158_v8, %v25111_v31  ;;  %v8160_v61 = vpop.f32.mrb[139].mxu1 }
 0x4c2   : > { %v8198_v7 = vadd.f32 %v8160_v61, %v7450_v37  ;;  %v8569_v0 = vpop.f32.mrb[150].mxu0 }
 0x4c3   : > { %v25250_v24 = vadd.f32 %v8569_v0, %v25114_v21  ;;  %v8571_v18 = vpop.f32.mrb[151].mxu0 }
 0x4c4   : > { %8246 = vst.msk [vmem:[#allocation3 + $0xb8] sm:$0xff] %vm3294_vm9, %v8198_v7  ;;  %v8164_v51 = vpop.f32.mrb[140].mxu1  ;;  %v25254_v42 = vadd.f32 %v8571_v18, %v25118_v59 }
 0x4c5   : > { %v25257_v53 = vadd.f32 %v8164_v51, %v25121_v63  ;;  %v8166_v31 = vpop.f32.mrb[141].mxu1 }
 0x4c6   : > { %v8210_v56 = vadd.f32 %v8166_v31, %v7462_v20  ;;  %v8729_v57 = vpop.f32.mrb[152].mxu0 }
 0x4c7   : > { %v25260_v16 = vadd.f32 %v8729_v57, %v25124_v52  ;;  %v8731_v13 = vpop.f32.mrb[153].mxu0 }
 0x4c8   : > { %8258 = vst.msk [vmem:[#allocation3 + $0x118] sm:$0xff] %vm3294_vm9, %v8210_v56  ;;  %v8170_v21 = vpop.f32.mrb[142].mxu1  ;;  %v25264_v33 = vadd.f32 %v8731_v13, %v25128_v48 }
 0x4c9   : > { %v25267_v59 = vadd.f32 %v8170_v21, %v25131_v10  ;;  %v8172_v63 = vpop.f32.mrb[143].mxu1 }
 0x4ca   : > { %v8222_v49 = vadd.f32 %v8172_v63, %v7474_v44 }
 0x4cb   : > { %v8735_v8 = vpop.f32.mrb[154].mxu0 }
 0x4cc   : > { %v25270_v37 = vadd.f32 %v8735_v8, %v25134_v34  ;;  %v8737_v61 = vpop.f32.mrb[155].mxu0  ;;  %8270 = vst.msk [vmem:[#allocation3 + $0x178] sm:$0xff] %vm3294_vm9, %v8222_v49  ;;  %v8640_v52 = vpop.f32.mrb[144].mxu1 }
 0x4cd   : > { %v25274_v7 = vadd.f32 %v8737_v61, %v25138_v19  ;;  %v25277_v48 = vadd.f32 %v8640_v52, %v25141_v62  ;;  %v8642_v0 = vpop.f32.mrb[145].mxu1 }
 0x4ce   : > { %v25280_v10 = vadd.f32 %v8642_v0, %v25144_v41 }
 0x4cf   : > { %v8741_v18 = vpop.f32.mrb[156].mxu0 }
 0x4d0   : > { %v25283_v51 = vadd.f32 %v8741_v18, %v25147_v45  ;;  %v8743_v34 = vpop.f32.mrb[157].mxu0 }
 0x4d1   : > { %v8646_v20 = vpop.f32.mrb[146].mxu1  ;;  %v25286_v31 = vadd.f32 %v8743_v34, %v25150_v46 }
 0x4d2   : > { %v25289_v56 = vadd.f32 %v8646_v20, %v25153_v1  ;;  %v8648_v19 = vpop.f32.mrb[147].mxu1 }
 0x4d3   : > { %v25292_v62 = vadd.f32 %v8648_v19, %v25156_v4  ;;  %v8747_v57 = vpop.f32.mrb[158].mxu0 }
 0x4d4   : > { %v25295_v41 = vadd.f32 %v8747_v57, %v25159_v35  ;;  %v8749_v13 = vpop.f32.mrb[159].mxu0 }
 0x4d5   : > { %v8652_v21 = vpop.f32.mrb[148].mxu1  ;;  %v25298_v45 = vadd.f32 %v8749_v13, %v25162_v29 }
 0x4d6   : > { %v25301_v44 = vadd.f32 %v8652_v21, %v25165_v58  ;;  %v8654_v46 = vpop.f32.mrb[149].mxu1 }
 0x4d7   : > { %v25304_v1 = vadd.f32 %v8654_v46, %v25168_v3  ;;  %v8907_v63 = vpop.f32.mrb[160].mxu0 }
 0x4d8   : > { %v25307_v4 = vadd.f32 %v8907_v63, %v25171_v27  ;;  %v8909_v49 = vpop.f32.mrb[161].mxu0 }
 0x4d9   : > { %v8658_v8 = vpop.f32.mrb[150].mxu1  ;;  %v25310_v35 = vadd.f32 %v8909_v49, %v25174_v39 }
 0x4da   : > { %v25313_v61 = vadd.f32 %v8658_v8, %v25177_v30  ;;  %v8660_v29 = vpop.f32.mrb[151].mxu1 }
 0x4db   : > { %v25316_v58 = vadd.f32 %v8660_v29, %v25180_v22 }
 0x4dc   : > { %v8913_v52 = vpop.f32.mrb[162].mxu0 }
 0x4dd   : > { %v25319_v3 = vadd.f32 %v8913_v52, %v25183_v23  ;;  %v8915_v0 = vpop.f32.mrb[163].mxu0 }
 0x4de   : > { %v8818_v18 = vpop.f32.mrb[152].mxu1  ;;  %v25322_v27 = vadd.f32 %v8915_v0, %v25186_v9 }
 0x4df   : > { %v25325_v34 = vadd.f32 %v8818_v18, %v25189_v55  ;;  %v8820_v39 = vpop.f32.mrb[153].mxu1 }
 0x4e0   : > { %v25328_v30 = vadd.f32 %v8820_v39, %v25192_v2  ;;  %v8919_v20 = vpop.f32.mrb[164].mxu0 }
 0x4e1   : > { %v25331_v22 = vadd.f32 %v8919_v20, %v25195_v12  ;;  %v8921_v19 = vpop.f32.mrb[165].mxu0 }
 0x4e2   : > { %v25334_v23 = vadd.f32 %v8921_v19, %v25198_v47 }
 0x4e3   : > { %v8824_v57 = vpop.f32.mrb[154].mxu1 }
 0x4e4   : > { %v25337_v13 = vadd.f32 %v8824_v57, %v25201_v26  ;;  %v8826_v9 = vpop.f32.mrb[155].mxu1 }
 0x4e5   : > { %v25340_v55 = vadd.f32 %v8826_v9, %v25204_v43  ;;  %v8925_v21 = vpop.f32.mrb[166].mxu0 }
 0x4e6   : > { %v25343_v2 = vadd.f32 %v8925_v21, %v25207_v5  ;;  %v8927_v46 = vpop.f32.mrb[167].mxu0 }
 0x4e7   : > { %v8830_v63 = vpop.f32.mrb[156].mxu1  ;;  %v25346_v12 = vadd.f32 %v8927_v46, %v25210_v60 }
 0x4e8   : > { %v25349_v49 = vadd.f32 %v8830_v63, %v25213_v28  ;;  %v8832_v47 = vpop.f32.mrb[157].mxu1  ;;  %v8294_v63 = vld [vmem:[#allocation3 + $0xb8] sm:$0xff] }
 0x4e9   : > { %v25352_v26 = vadd.f32 %v8832_v47, %v25216_v25  ;;  %v9395_v8 = vpop.f32.mrb[168].mxu0 }
 0x4ea   : > { %v25355_v43 = vadd.f32 %v9395_v8, %v25219_v36  ;;  %v9397_v29 = vpop.f32.mrb[169].mxu0 }
 0x4eb   : > { %v8836_v52 = vpop.f32.mrb[158].mxu1  ;;  %v25358_v5 = vadd.f32 %v9397_v29, %v25222_v40  ;;  %v8282_v40 = vld [vmem:[#allocation3 + $0x58] sm:$0xff] }
 0x4ec   : > { %v25361_v0 = vadd.f32 %v8836_v52, %v25225_v32  ;;  %v8838_v60 = vpop.f32.mrb[159].mxu1 }
 0x4ed   : > { %v25364_v28 = vadd.f32 %v8838_v60, %v25228_v17 }
 0x4ee   : > { %v9401_v18 = vpop.f32.mrb[170].mxu0 }
 0x4ef   : > { %v25367_v25 = vadd.f32 %v9401_v18, %v25231_v54  ;;  %v9403_v39 = vpop.f32.mrb[171].mxu0  ;;  %v8996_v20 = vpop.f32.mrb[160].mxu1  ;;  %v8306_v18 = vld [vmem:[#allocation3 + $0x118] sm:$0xff] }
 0x4f0   : > { %v25370_v36 = vadd.f32 %v9403_v39, %v25234_v15  ;;  %v25373_v19 = vadd.f32 %v8996_v20, %v25237_v14  ;;  %v8998_v57 = vpop.f32.mrb[161].mxu1 }
 0x4f1   : > { %v9030_v32 = vadd.f32 %v8998_v57, %v8282_v40 }
 0x4f2   : > { %v9407_v9 = vpop.f32.mrb[172].mxu0 }
 0x4f3   : > { %v25376_v21 = vadd.f32 %v9407_v9, %v25240_v11  ;;  %v9409_v17 = vpop.f32.mrb[173].mxu0  ;;  %9078 = vst.msk [vmem:[#allocation3 + $0x58] sm:$0xff] %vm3294_vm9, %v9030_v32  ;;  %v9002_v54 = vpop.f32.mrb[162].mxu1  ;;  %v8318_v9 = vld [vmem:[#allocation3 + $0x178] sm:$0xff] }
 0x4f4   : > { %v25380_v46 = vadd.f32 %v9409_v17, %v25244_v38  ;;  %v25383_v15 = vadd.f32 %v9002_v54, %v25247_v50  ;;  %v9004_v14 = vpop.f32.mrb[163].mxu1 }
 0x4f5   : > { %v9042_v47 = vadd.f32 %v9004_v14, %v8294_v63 }
 0x4f6   : > { %v9413_v8 = vpop.f32.mrb[174].mxu0 }
 0x4f7   : > { %v25386_v29 = vadd.f32 %v9413_v8, %v25250_v24  ;;  %v9415_v52 = vpop.f32.mrb[175].mxu0  ;;  %9090 = vst.msk [vmem:[#allocation3 + $0xb8] sm:$0xff] %vm3294_vm9, %v9042_v47  ;;  %v9008_v11 = vpop.f32.mrb[164].mxu1 }
 0x4f8   : > { %v25390_v60 = vadd.f32 %v9415_v52, %v25254_v42  ;;  %v25393_v38 = vadd.f32 %v9008_v11, %v25257_v53  ;;  %v9010_v50 = vpop.f32.mrb[165].mxu1 }
 0x4f9   : > { %v9054_v39 = vadd.f32 %v9010_v50, %v8306_v18 }
 0x4fa   : > { %v9573_v20 = vpop.f32.mrb[176].mxu0 }
 0x4fb   : > { %v25396_v40 = vadd.f32 %v9573_v20, %v25260_v16  ;;  %v9575_v57 = vpop.f32.mrb[177].mxu0  ;;  %9102 = vst.msk [vmem:[#allocation3 + $0x118] sm:$0xff] %vm3294_vm9, %v9054_v39 }
 0x4fc   : > { %v9014_v24 = vpop.f32.mrb[166].mxu1  ;;  %v25400_v32 = vadd.f32 %v9575_v57, %v25264_v33 }
 0x4fd   : > { %v25403_v42 = vadd.f32 %v9014_v24, %v25267_v59  ;;  %v9016_v53 = vpop.f32.mrb[167].mxu1 }
 0x4fe   : > { %v9066_v17 = vadd.f32 %v9016_v53, %v8318_v9  ;;  %v9579_v54 = vpop.f32.mrb[178].mxu0 }
 0x4ff   : > { %v25406_v63 = vadd.f32 %v9579_v54, %v25270_v37  ;;  %v9581_v14 = vpop.f32.mrb[179].mxu0 }
 0x500   : > { %9114 = vst.msk [vmem:[#allocation3 + $0x178] sm:$0xff] %vm3294_vm9, %v9066_v17  ;;  %v9484_v16 = vpop.f32.mrb[168].mxu1  ;;  %v25410_v47 = vadd.f32 %v9581_v14, %v25274_v7 }
 0x501   : > { %v25413_v33 = vadd.f32 %v9484_v16, %v25277_v48  ;;  %v9486_v8 = vpop.f32.mrb[169].mxu1 }
 0x502   : > { %v25416_v59 = vadd.f32 %v9486_v8, %v25280_v10  ;;  %v9585_v52 = vpop.f32.mrb[180].mxu0 }
 0x503   : > { %v25419_v11 = vadd.f32 %v9585_v52, %v25283_v51  ;;  %v9587_v37 = vpop.f32.mrb[181].mxu0 }
 0x504   : > { %v9490_v18 = vpop.f32.mrb[170].mxu1  ;;  %v25422_v50 = vadd.f32 %v9587_v37, %v25286_v31 }
 0x505   : > { %v25425_v39 = vadd.f32 %v9490_v18, %v25289_v56  ;;  %v9492_v7 = vpop.f32.mrb[171].mxu1 }
 0x506   : > { %v25428_v48 = vadd.f32 %v9492_v7, %v25292_v62  ;;  %v9591_v20 = vpop.f32.mrb[182].mxu0 }
 0x507   : > { %v25431_v10 = vadd.f32 %v9591_v20, %v25295_v41  ;;  %v9593_v57 = vpop.f32.mrb[183].mxu0 }
 0x508   : > { %v9496_v24 = vpop.f32.mrb[172].mxu1  ;;  %v25434_v51 = vadd.f32 %v9593_v57, %v25298_v45 }
 0x509   : > { %v25437_v9 = vadd.f32 %v9496_v24, %v25301_v44  ;;  %v9498_v31 = vpop.f32.mrb[173].mxu1 }
 0x50a   : > { %v25440_v56 = vadd.f32 %v9498_v31, %v25304_v1  ;;  %v9751_v53 = vpop.f32.mrb[184].mxu0 }
 0x50b   : > { %v25443_v62 = vadd.f32 %v9751_v53, %v25307_v4  ;;  %v9753_v17 = vpop.f32.mrb[185].mxu0 }
 0x50c   : > { %v9502_v54 = vpop.f32.mrb[174].mxu1  ;;  %v25446_v41 = vadd.f32 %v9753_v17, %v25310_v35 }
 0x50d   : > { %v25449_v14 = vadd.f32 %v9502_v54, %v25313_v61  ;;  %v9504_v45 = vpop.f32.mrb[175].mxu1 }
 0x50e   : > { %v25452_v44 = vadd.f32 %v9504_v45, %v25316_v58  ;;  %v9757_v16 = vpop.f32.mrb[186].mxu0 }
 0x50f   : > { %v25455_v1 = vadd.f32 %v9757_v16, %v25319_v3  ;;  %v9759_v8 = vpop.f32.mrb[187].mxu0 }
 0x510   : > { %v9662_v52 = vpop.f32.mrb[176].mxu1  ;;  %v25458_v4 = vadd.f32 %v9759_v8, %v25322_v27 }
 0x511   : > { %v25461_v37 = vadd.f32 %v9662_v52, %v25325_v34  ;;  %v9664_v35 = vpop.f32.mrb[177].mxu1 }
 0x512   : > { %v25464_v61 = vadd.f32 %v9664_v35, %v25328_v30  ;;  %v9763_v18 = vpop.f32.mrb[188].mxu0 }
 0x513   : > { %v25467_v58 = vadd.f32 %v9763_v18, %v25331_v22  ;;  %v9765_v7 = vpop.f32.mrb[189].mxu0 }
 0x514   : > { %v9668_v20 = vpop.f32.mrb[178].mxu1  ;;  %v25470_v3 = vadd.f32 %v9765_v7, %v25334_v23 }
 0x515   : > { %v25473_v57 = vadd.f32 %v9668_v20, %v25337_v13  ;;  %v9670_v27 = vpop.f32.mrb[179].mxu1  ;;  %v9126_v20 = vld [vmem:[#allocation3 + $0x58] sm:$0xff] }
 0x516   : > { %v25476_v34 = vadd.f32 %v9670_v27, %v25340_v55  ;;  %v9769_v24 = vpop.f32.mrb[190].mxu0 }
 0x517   : > { %v25479_v30 = vadd.f32 %v9769_v24, %v25343_v2  ;;  %v9771_v31 = vpop.f32.mrb[191].mxu0 }
 0x518   : > { %v9674_v53 = vpop.f32.mrb[180].mxu1  ;;  %v25482_v22 = vadd.f32 %v9771_v31, %v25346_v12 }
 0x519   : > { %v25485_v17 = vadd.f32 %v9674_v53, %v25349_v49  ;;  %v9676_v23 = vpop.f32.mrb[181].mxu1 }
 0x51a   : > { %v25488_v13 = vadd.f32 %v9676_v23, %v25352_v26  ;;  %v10231_v54 = vpop.f32.mrb[192].mxu0 }
 0x51b   : > { %v10699_v55 = vadd.f32 %v10231_v54, %v25355_v43  ;;  %v10233_v45 = vpop.f32.mrb[193].mxu0 }
 0x51c   : > { %v9680_v16 = vpop.f32.mrb[182].mxu1  ;;  %v10700_v2 = vadd.f32 %v10233_v45, %v25358_v5  ;;  %v9138_v45 = vld [vmem:[#allocation3 + $0xb8] sm:$0xff] }
 0x51d   : > { %v25492_v8 = vmax.f32 %v10699_v55, 0.0  ;;  %v25495_v52 = vadd.f32 %v9680_v16, %v25361_v0  ;;  %v9682_v12 = vpop.f32.mrb[183].mxu1 }
 0x51e   : > { %v25497_v35 = vmax.f32 %v10700_v2, 0.0  ;;  %v25500_v49 = vadd.f32 %v9682_v12, %v25364_v28  ;;  %v10237_v26 = vpop.f32.mrb[194].mxu0 }
 0x51f   : > { %10891 = vst [vmem:[#allocation3] sm:$0xff] %v25492_v8  ;;  %v10711_v43 = vadd.f32 %v10237_v26, %v25367_v25  ;;  %v10239_v18 = vpop.f32.mrb[195].mxu0  ;;  %11188 = vrot.lane.b32.xlu1 %v25492_v8, %s20345_s25 }
 0x520   : > { %10892 = vst [vmem:[#allocation3 + $0x8] sm:$0xff] %v25497_v35  ;;  %v9840_v5 = vpop.f32.mrb[184].mxu1  ;;  %v10712_v0 = vadd.f32 %v10239_v18, %v25370_v36  ;;  %11190 = vrot.lane.b32.xlu0 %v25497_v35, %s20345_s25 }
 0x521   : > { %v25510_v7 = vmax.f32 %v10711_v43, 0.0  ;;  %v25513_v28 = vadd.f32 %v9840_v5, %v25373_v19  ;;  %v9842_v27 = vpop.f32.mrb[185].mxu1  ;;  %v10964_v5 = vld [vmem:[%s27229_s9 + $0x8] sm:$0xff] }
 0x522   : > { %v25515_v25 = vmax.f32 %v10712_v0, 0.0  ;;  %v9874_v24 = vadd.f32 %v9842_v27, %v9126_v20  ;;  %v10243_v31 = vpop.f32.mrb[196].mxu0  ;;  %v9150_v27 = vld [vmem:[#allocation3 + $0x118] sm:$0xff] }
 0x523   : > { %v10723_v53 = vadd.f32 %v10243_v31, %v25376_v21  ;;  %v10245_v23 = vpop.f32.mrb[197].mxu0  ;;  %v11071_v31 = vld [vmem:[%s27230_s10 + $0x8] sm:$0xff] }
 0x524   : > { %10904 = vst [vmem:[#allocation3 + $0x68] sm:$0xff] %v25515_v25  ;;  %9922 = vst.msk [vmem:[#allocation3 + $0x58] sm:$0xff] %vm3294_vm9, %v9874_v24  ;;  %v9846_v36 = vpop.f32.mrb[186].mxu1  ;;  %v10724_v54 = vadd.f32 %v10245_v23, %v25380_v46 }
 0x525   : > { %v25521_v55 = vmax.f32 %v10723_v53, 0.0  ;;  %v25524_v19 = vadd.f32 %v9846_v36, %v25383_v15  ;;  %v9848_v16 = vpop.f32.mrb[187].mxu1  ;;  %v10963_v15 = vld [vmem:[%s27229_s9] sm:$0xff] }
 0x526   : > { %v25526_v2 = vmax.f32 %v10724_v54, 0.0  ;;  %v9886_v12 = vadd.f32 %v9848_v16, %v9138_v45  ;;  %v10249_v26 = vpop.f32.mrb[198].mxu0 }
 0x527   : > { %v10735_v21 = vadd.f32 %v10249_v26, %v25386_v29  ;;  %v10251_v43 = vpop.f32.mrb[199].mxu0  ;;  %v11070_v29 = vld [vmem:[%s27230_s10] sm:$0xff]  ;;  %v9162_v26 = vld [vmem:[#allocation3 + $0x178] sm:$0xff] }
 0x528   : > { %10916 = vst [vmem:[#allocation3 + $0xc8] sm:$0xff] %v25526_v2  ;;  %9934 = vst.msk [vmem:[#allocation3 + $0xb8] sm:$0xff] %vm3294_vm9, %v9886_v12  ;;  %v9852_v18 = vpop.f32.mrb[188].mxu1  ;;  %v10736_v46 = vadd.f32 %v10251_v43, %v25390_v60  ;;  %v25546_v60 = vpack.c.bf16 %v10964_v5, %v10963_v15  ;;  %v25553_v54 = vpack.c.bf16 %v11071_v31, %v11070_v29 }
 0x529   : > { %v25541_v0 = vmax.f32 %v10735_v21, 0.0  ;;  %v25544_v20 = vadd.f32 %v9852_v18, %v25393_v38  ;;  %v9854_v24 = vpop.f32.mrb[189].mxu1  ;;  %v10965_v18 = vld [vmem:[%s27229_s9 + $0x10] sm:$0xff] }
 0x52a   : > { %v25551_v53 = vmax.f32 %v10736_v46, 0.0  ;;  %v9898_v23 = vadd.f32 %v9854_v24, %v9150_v27  ;;  %v10409_v36 = vpop.f32.mrb[200].mxu0  ;;  %19219 = vmatprep.subr.bf16.mxu0 %v25546_v60  ;;  %19227 = vmatprep.subr.bf16.mxu1 %v25553_v54  ;;  %v11072_v46 = vld [vmem:[%s27230_s10 + $0x10] sm:$0xff]  ;;  %v11073_v27 = vld [vmem:[%s27230_s10 + $0x18] sm:$0xff] }
 0x52b   : > { %v10703_v45 = vadd.f32 %v10409_v36, %v25396_v40  ;;  %v10411_v16 = vpop.f32.mrb[201].mxu0  ;;  %19221 = vmatpush3.bf16.msra.mxu0 %v25546_v60  ;;  %19229 = vmatpush3.bf16.msra.mxu1 %v25553_v54 }
 0x52c   : > { %10928 = vst [vmem:[#allocation3 + $0x128] sm:$0xff] %v25551_v53  ;;  %9946 = vst.msk [vmem:[#allocation3 + $0x118] sm:$0xff] %vm3294_vm9, %v9898_v23  ;;  %v9858_v38 = vpop.f32.mrb[190].mxu1  ;;  %v10704_v12 = vadd.f32 %v10411_v16, %v25400_v32  ;;  %v10966_v32 = vld [vmem:[%s27229_s9 + $0x18] sm:$0xff]  ;;  %v25585_v23 = vpack.c.bf16 %v11073_v27, %v11072_v46 }
 0x52d   : > { %v25562_v21 = vmax.f32 %v10703_v45, 0.0  ;;  %v25565_v43 = vadd.f32 %v9858_v38, %v25403_v42  ;;  %v9860_v40 = vpop.f32.mrb[191].mxu1  ;;  %v25579_v29 = vpack.c.bf16 %v10966_v32, %v10965_v18 }
 0x52e   : > { %v25577_v15 = vmax.f32 %v10704_v12, 0.0  ;;  %v9910_v5 = vadd.f32 %v9860_v40, %v9162_v26  ;;  %v10415_v42 = vpop.f32.mrb[202].mxu0  ;;  %19231 = vmatprep.subr.bf16.mxu1 %v25585_v23 }
 0x52f   : > { %v10715_v24 = vadd.f32 %v10415_v42, %v25406_v63  ;;  %v10417_v31 = vpop.f32.mrb[203].mxu0  ;;  %19223 = vmatprep.subr.bf16.mxu0 %v25579_v29  ;;  %v10967_v63 = vld [vmem:[%s27229_s9 + $0x20] sm:$0xf]  ;;  %19233 = vmatpush3.bf16.msra.mxu1 %v25585_v23 }
 0x530   : > { %10896 = vst [vmem:[#allocation3 + $0x28] sm:$0xff] %v25577_v15  ;;  %9958 = vst.msk [vmem:[#allocation3 + $0x178] sm:$0xff] %vm3294_vm9, %v9910_v5  ;;  %v10320_v36 = vpop.f32.mrb[192].mxu1  ;;  %v10716_v45 = vadd.f32 %v10417_v31, %v25410_v47  ;;  %19225 = vmatpush3.bf16.msra.mxu0 %v25579_v29 }
 0x531   : > { %v25591_v16 = vmax.f32 %v10715_v24, 0.0  ;;  %v10701_v38 = vadd.f32 %v10320_v36, %v25413_v33  ;;  %v10322_v12 = vpop.f32.mrb[193].mxu1  ;;  %18245 = vmatprep.subr.msk.mxu0 %vm10981_vm10, %v10967_v63  ;;  %v11074_v33 = vld [vmem:[%s27230_s10 + $0x20] sm:$0xf] }
 0x532   : > { %v25599_v26 = vmax.f32 %v10716_v45, 0.0  ;;  %v10702_v47 = vadd.f32 %v10322_v12, %v25416_v59  ;;  %v10421_v40 = vpop.f32.mrb[204].mxu0  ;;  %18261 = vmatprep.subr.msk.mxu1 %vm10981_vm10, %v11074_v33 }
 0x533   : > { %v25607_v18 = vmax.f32 %v10701_v38, 0.0  ;;  %v10727_v32 = vadd.f32 %v10421_v40, %v25419_v11  ;;  %v10423_v46 = vpop.f32.mrb[205].mxu0  ;;  %18262 = vmatpush3.msk.msra.mxu1 %vm10981_vm10, %v11074_v33 }
 0x534   : > { %10908 = vst [vmem:[#allocation3 + $0x88] sm:$0xff] %v25599_v26  ;;  %v25612_v5 = vmax.f32 %v10702_v47, 0.0  ;;  %v10326_v59 = vpop.f32.mrb[194].mxu1  ;;  %v10728_v42 = vadd.f32 %v10423_v46, %v25422_v50  ;;  %18246 = vmatpush3.msk.msra.mxu0 %vm10981_vm10, %v10967_v63  ;;  %19243 = vmatprep.subr.bf16.mxu1 %v25553_v54 }
 0x535   : > { %v25615_v27 = vmax.f32 %v10727_v32, 0.0  ;;  %v10713_v24 = vadd.f32 %v10326_v59, %v25425_v39  ;;  %v10328_v31 = vpop.f32.mrb[195].mxu1  ;;  %11714 = vrot.lane.b32.xlu1 %v25607_v18, %s20345_s25  ;;  %19235 = vmatprep.subr.bf16.mxu0 %v25546_v60 }
 0x536   : > { %v25621_v11 = vmax.f32 %v10728_v42, 0.0  ;;  %v10714_v36 = vadd.f32 %v10328_v31, %v25428_v48  ;;  %v10427_v45 = vpop.f32.mrb[206].mxu0  ;;  %11999 = vrot.lane.b32.xlu0 %v25612_v5, %s20345_s25 }
 0x537   : > { %v25627_v50 = vmax.f32 %v10713_v24, 0.0  ;;  %v10739_v39 = vadd.f32 %v10427_v45, %v25431_v10  ;;  %v10429_v38 = vpop.f32.mrb[207].mxu0 }
 0x538   : > { %10920 = vst [vmem:[#allocation3 + $0xe8] sm:$0xff] %v25621_v11  ;;  %v25633_v12 = vmax.f32 %v10714_v36, 0.0  ;;  %v10332_v48 = vpop.f32.mrb[196].mxu1  ;;  %v10740_v63 = vadd.f32 %v10429_v38, %v25434_v51 }
 0x539   : > { %v25636_v47 = vmax.f32 %v10739_v39, 0.0  ;;  %v10725_v40 = vadd.f32 %v10332_v48, %v25437_v9  ;;  %v10334_v33 = vpop.f32.mrb[197].mxu1  ;;  %11997 = vrot.lane.b32.xlu1 %v25607_v18, %s20345_s25 }
 0x53a   : > { %v25641_v10 = vmax.f32 %v10740_v63, 0.0  ;;  %v10726_v32 = vadd.f32 %v10334_v33, %v25440_v56  ;;  %v10587_v46 = vpop.f32.mrb[208].mxu0  ;;  %11716 = vrot.lane.b32.xlu0 %v25627_v50, %s20345_s25 }
 0x53b   : > { %v25646_v59 = vmax.f32 %v10725_v40, 0.0  ;;  %v10707_v51 = vadd.f32 %v10587_v46, %v25443_v62  ;;  %v10589_v42 = vpop.f32.mrb[209].mxu0 }
 0x53c   : > { %10932 = vst [vmem:[#allocation3 + $0x148] sm:$0xff] %v25641_v10  ;;  %v25650_v9 = vmax.f32 %v10726_v32, 0.0  ;;  %v10338_v24 = vpop.f32.mrb[198].mxu1  ;;  %v10708_v31 = vadd.f32 %v10589_v42, %v25446_v41 }
 0x53d   : > { %v25653_v36 = vmax.f32 %v10707_v51, 0.0  ;;  %v10737_v56 = vadd.f32 %v10338_v24, %v25449_v14  ;;  %v10340_v45 = vpop.f32.mrb[199].mxu1  ;;  %10947 = vrot.lane.b32.xlu1 %v25492_v8, %s20345_s25 }
 0x53e   : > { %v25658_v39 = vmax.f32 %v10708_v31, 0.0  ;;  %v10738_v62 = vadd.f32 %v10340_v45, %v25452_v44  ;;  %v10593_v38 = vpop.f32.mrb[210].mxu0  ;;  %10949 = vrot.lane.b32.xlu0 %v25510_v7, %s20345_s25 }
 0x53f   : > { %10899 = vst [vmem:[#allocation3 + $0x40] sm:$0xff] %v25653_v36  ;;  %v25664_v48 = vmax.f32 %v10737_v56, 0.0  ;;  %v10719_v41 = vadd.f32 %v10593_v38, %v25455_v1  ;;  %v10595_v63 = vpop.f32.mrb[211].mxu0 }
 0x540   : > { %10900 = vst [vmem:[#allocation3 + $0x48] sm:$0xff] %v25658_v39  ;;  %v25668_v14 = vmax.f32 %v10738_v62, 0.0  ;;  %v10498_v40 = vpop.f32.mrb[200].mxu1  ;;  %v10720_v33 = vadd.f32 %v10595_v63, %v25458_v4 }
 0x541   : > { %v25671_v32 = vmax.f32 %v10719_v41, 0.0  ;;  %v10705_v44 = vadd.f32 %v10498_v40, %v25461_v37  ;;  %v10500_v46 = vpop.f32.mrb[201].mxu1  ;;  %11455 = vrot.lane.b32.xlu1 %v25497_v35, %s20345_s25 }
 0x542   : > { %v25676_v51 = vmax.f32 %v10720_v33, 0.0  ;;  %v10706_v1 = vadd.f32 %v10500_v46, %v25464_v61  ;;  %v10599_v42 = vpop.f32.mrb[212].mxu0  ;;  %11194 = vrot.lane.b32.xlu0 %v25515_v25, %s20345_s25 }
 0x543   : > { %10911 = vst [vmem:[#allocation3 + $0xa0] sm:$0xff] %v25671_v32  ;;  %v25682_v24 = vmax.f32 %v10705_v44, 0.0  ;;  %v10731_v4 = vadd.f32 %v10599_v42, %v25467_v58  ;;  %v10601_v31 = vpop.f32.mrb[213].mxu0 }
 0x544   : > { %10912 = vst [vmem:[#allocation3 + $0xa8] sm:$0xff] %v25676_v51  ;;  %v25686_v37 = vmax.f32 %v10706_v1, 0.0  ;;  %v10504_v56 = vpop.f32.mrb[202].mxu1  ;;  %v10732_v45 = vadd.f32 %v10601_v31, %v25470_v3 }
 0x545   : > { %v25689_v62 = vmax.f32 %v10731_v4, 0.0  ;;  %v10717_v61 = vadd.f32 %v10504_v56, %v25473_v57  ;;  %v10506_v38 = vpop.f32.mrb[203].mxu1  ;;  %12264 = vrot.lane.b32.xlu1 %v25612_v5, %s20345_s25 }
 0x546   : > { %v25694_v41 = vmax.f32 %v10732_v45, 0.0  ;;  %v10718_v58 = vadd.f32 %v10506_v38, %v25476_v34  ;;  %v10605_v63 = vpop.f32.mrb[214].mxu0  ;;  %11457 = vrot.lane.b32.xlu0 %v25515_v25, %s20345_s25 }
 0x547   : > { %10923 = vst [vmem:[#allocation3 + $0x100] sm:$0xff] %v25689_v62  ;;  %v25700_v40 = vmax.f32 %v10717_v61, 0.0  ;;  %v10743_v3 = vadd.f32 %v10605_v63, %v25479_v30  ;;  %v10607_v33 = vpop.f32.mrb[215].mxu0 }
 0x548   : > { %10924 = vst [vmem:[#allocation3 + $0x108] sm:$0xff] %v25694_v41  ;;  %v25704_v57 = vmax.f32 %v10718_v58, 0.0  ;;  %v10510_v44 = vpop.f32.mrb[204].mxu1  ;;  %v10744_v46 = vadd.f32 %v10607_v33, %v25482_v22 }
 0x549   : > { %v25707_v1 = vmax.f32 %v10743_v3, 0.0  ;;  %v10729_v34 = vadd.f32 %v10510_v44, %v25485_v17  ;;  %v10512_v42 = vpop.f32.mrb[205].mxu1  ;;  %11192 = vrot.lane.b32.xlu1 %v25510_v7, %s20345_s25 }
 0x54a   : > { %v25712_v4 = vmax.f32 %v10744_v46, 0.0  ;;  %v10730_v30 = vadd.f32 %v10512_v42, %v25488_v13  ;;  %12003 = vrot.lane.b32.xlu0 %v25633_v12, %s20345_s25  ;;  %v9982_v46 = vld [vmem:[#allocation3 + $0xb8] sm:$0xff] }
 0x54b   : > { %10935 = vst [vmem:[#allocation3 + $0x160] sm:$0xff] %v25707_v1  ;;  %v25718_v31 = vmax.f32 %v10729_v34, 0.0 }
 0x54c   : > { %10936 = vst [vmem:[#allocation3 + $0x168] sm:$0xff] %v25712_v4  ;;  %v25721_v22 = vmax.f32 %v10730_v30, 0.0  ;;  %v10516_v17 = vpop.f32.mrb[206].mxu1 }
 0x54d   : > { %10921 = vst [vmem:[#allocation3 + $0xf0] sm:$0xff] %v25718_v31  ;;  %v10741_v56 = vadd.f32 %v10516_v17, %v25495_v52  ;;  %v10518_v45 = vpop.f32.mrb[207].mxu1  ;;  %12001 = vrot.lane.b32.xlu1 %v25627_v50, %s20345_s25  ;;  %v9970_v52 = vld [vmem:[#allocation3 + $0x58] sm:$0xff] }
 0x54e   : > { %10922 = vst [vmem:[#allocation3 + $0xf8] sm:$0xff] %v25721_v22  ;;  %v10742_v13 = vadd.f32 %v10518_v45, %v25500_v49  ;;  %12266 = vrot.lane.b32.xlu0 %v25633_v12, %s20345_s25 }
 0x54f   : > { %v25731_v61 = vmax.f32 %v10741_v56, 0.0  ;;  %v9994_v56 = vld [vmem:[#allocation3 + $0x118] sm:$0xff] }
 0x550   : > { %v25733_v38 = vmax.f32 %v10742_v13, 0.0  ;;  %v10676_v58 = vpop.f32.mrb[208].mxu1 }
 0x551   : > { %v25736_v63 = vadd.f32 %v10676_v58, %v25513_v28  ;;  %v10678_v3 = vpop.f32.mrb[209].mxu1  ;;  %11196 = vrot.lane.b32.xlu1 %v25521_v55, %s20345_s25 }
 0x552   : > { %v10710_v33 = vadd.f32 %v10678_v3, %v9970_v52  ;;  %11198 = vrot.lane.b32.xlu0 %v25526_v2, %s20345_s25 }
 0x553   : > { %v27499_v49 = vmax.f32 %v25736_v63, 0.0 }
 0x554   : > { %10758 = vst.msk [vmem:[#allocation3 + $0x58] sm:$0xff] %vm3294_vm9, %v10710_v33  ;;  %v10682_v44 = vpop.f32.mrb[210].mxu1 }
 0x555   : > { %10901 = vst [vmem:[#allocation3 + $0x50] sm:$0xff] %v27499_v49  ;;  %v25747_v28 = vadd.f32 %v10682_v44, %v25524_v19  ;;  %v10684_v34 = vpop.f32.mrb[211].mxu1  ;;  %11718 = vrot.lane.b32.xlu1 %v25646_v59, %s20345_s25  ;;  %v10006_v44 = vld [vmem:[#allocation3 + $0x178] sm:$0xff] }
 0x556   : > { %v10722_v42 = vadd.f32 %v10684_v34, %v9982_v46  ;;  %12007 = vrot.lane.b32.xlu0 %v25650_v9, %s20345_s25 }
 0x557   : > { %v27498_v30 = vmax.f32 %v25747_v28, 0.0 }
 0x558   : > { %10770 = vst.msk [vmem:[#allocation3 + $0xb8] sm:$0xff] %vm3294_vm9, %v10722_v42  ;;  %v10688_v17 = vpop.f32.mrb[212].mxu1 }
 0x559   : > { %10913 = vst [vmem:[#allocation3 + $0xb0] sm:$0xff] %v27498_v30  ;;  %v25758_v19 = vadd.f32 %v10688_v17, %v25544_v20  ;;  %v10690_v45 = vpop.f32.mrb[213].mxu1  ;;  %12005 = vrot.lane.b32.xlu1 %v25646_v59, %s20345_s25 }
 0x55a   : > { %v10734_v13 = vadd.f32 %v10690_v45, %v9994_v56  ;;  %11720 = vrot.lane.b32.xlu0 %v25664_v48, %s20345_s25 }
 0x55b   : > { %v10806_v58 = vld [vmem:[#allocation3 + $0x58] sm:$0xff]  ;;  %v27497_v52 = vmax.f32 %v25758_v19, 0.0 }
 0x55c   : > { %v10854_v3 = vmax.f32 %v10806_v58, 0.0  ;;  %10782 = vst.msk [vmem:[#allocation3 + $0x118] sm:$0xff] %vm3294_vm9, %v10734_v13  ;;  %v10694_v33 = vpop.f32.mrb[214].mxu1 }
 0x55d   : > { %10925 = vst [vmem:[#allocation3 + $0x110] sm:$0xff] %v27497_v52  ;;  %v25769_v20 = vadd.f32 %v10694_v33, %v25565_v43  ;;  %v10696_v46 = vpop.f32.mrb[215].mxu1  ;;  %10951 = vrot.lane.b32.xlu1 %v25521_v55, %s20345_s25 }
 0x55e   : > { %10902 = vst.msk [vmem:[#allocation3 + $0x58] sm:$0xff] %vm3294_vm9, %v10854_v3  ;;  %v10746_v34 = vadd.f32 %v10696_v46, %v10006_v44  ;;  %10953 = vrot.lane.b32.xlu0 %v25541_v0, %s20345_s25 }
 0x55f   : > { %v10818_v42 = vld [vmem:[#allocation3 + $0xb8] sm:$0xff]  ;;  %v27496_v17 = vmax.f32 %v25769_v20, 0.0 }
 0x560   : > { %v10866_v56 = vmax.f32 %v10818_v42, 0.0  ;;  %10794 = vst.msk [vmem:[#allocation3 + $0x178] sm:$0xff] %vm3294_vm9, %v10746_v34 }
 0x561   : > { %10937 = vst [vmem:[#allocation3 + $0x170] sm:$0xff] %v27496_v17  ;;  %11459 = vrot.lane.b32.xlu1 %v25526_v2, %s20345_s25 }
 0x562   : > { %10914 = vst.msk [vmem:[#allocation3 + $0xb8] sm:$0xff] %vm3294_vm9, %v10866_v56  ;;  %11202 = vrot.lane.b32.xlu0 %v25551_v53, %s20345_s25 }
 0x563   : > { %v10830_v43 = vld [vmem:[#allocation3 + $0x118] sm:$0xff] }
 0x564   : > { %v10878_v45 = vmax.f32 %v10830_v43, 0.0 }
 0x565   : > { %12268 = vrot.lane.b32.xlu1 %v25650_v9, %s20345_s25 }
 0x566   : > { %10926 = vst.msk [vmem:[#allocation3 + $0x118] sm:$0xff] %vm3294_vm9, %v10878_v45  ;;  %11461 = vrot.lane.b32.xlu0 %v25551_v53, %s20345_s25 }
 0x567   : > { %v10842_v13 = vld [vmem:[#allocation3 + $0x178] sm:$0xff] }
 0x568   : > { %v10890_v58 = vmax.f32 %v10842_v13, 0.0 }
 0x569   : > { %11200 = vrot.lane.b32.xlu1 %v25541_v0, %s20345_s25 }
 0x56a   : > { %10938 = vst.msk [vmem:[#allocation3 + $0x178] sm:$0xff] %vm3294_vm9, %v10890_v58  ;;  %12011 = vrot.lane.b32.xlu0 %v25668_v14, %s20345_s25 }
 0x56d   : > { %12009 = vrot.lane.b32.xlu1 %v25664_v48, %s20345_s25 }
 0x56e   : > { %12270 = vrot.lane.b32.xlu0 %v25668_v14, %s20345_s25 }
 0x571   : > { %12523 = vrot.lane.b32.xlu1 %v25562_v21, %s20345_s25 }
 0x572   : > { %12798 = vrot.lane.b32.xlu0 %v25562_v21, %s20345_s25 }
 0x575   : > { %13312 = vrot.lane.b32.xlu1 %v25577_v15, %s20345_s25 }
 0x576   : > { %13314 = vrot.lane.b32.xlu0 %v25682_v24, %s20345_s25 }
 0x579   : > { %13838 = vrot.lane.b32.xlu1 %v25686_v37, %s20345_s25 }
 0x57a   : > { %13579 = vrot.lane.b32.xlu0 %v25682_v24, %s20345_s25 }
 0x57d   : > { %14121 = vrot.lane.b32.xlu1 %v25686_v37, %s20345_s25 }
 0x57e   : > { %12525 = vrot.lane.b32.xlu0 %v25591_v16, %s20345_s25 }
 0x581   : > { %13057 = vrot.lane.b32.xlu1 %v25577_v15, %s20345_s25 }
 0x582   : > { %12800 = vrot.lane.b32.xlu0 %v25591_v16, %s20345_s25 }
 0x585   : > { %13316 = vrot.lane.b32.xlu1 %v25599_v26, %s20345_s25 }
 0x586   : > { %13318 = vrot.lane.b32.xlu0 %v25700_v40, %s20345_s25 }
 0x589   : > { %13840 = vrot.lane.b32.xlu1 %v25704_v57, %s20345_s25 }
 0x58a   : > { %13581 = vrot.lane.b32.xlu0 %v25700_v40, %s20345_s25 }
 0x58d   : > { %14125 = vrot.lane.b32.xlu1 %v25704_v57, %s20345_s25 }
 0x58e   : > { %13059 = vrot.lane.b32.xlu0 %v25599_v26, %s20345_s25 }
 0x591   : > { %12527 = vrot.lane.b32.xlu1 %v25615_v27, %s20345_s25  ;;  %v11189_v3 = vpop.permute.xlu1 %11188 }
 0x592   : > { %12802 = vrot.lane.b32.xlu0 %v25615_v27, %s20345_s25  ;;  %v11191_v33 = vpop.permute.xlu0 %11190 }
 0x595   : > { %13320 = vrot.lane.b32.xlu1 %v25621_v11, %s20345_s25 }
 0x596   : > { %13322 = vrot.lane.b32.xlu0 %v25718_v31, %s20345_s25 }
 0x599   : > { %13842 = vrot.lane.b32.xlu1 %v25721_v22, %s20345_s25 }
 0x59a   : > { %13583 = vrot.lane.b32.xlu0 %v25718_v31, %s20345_s25 }
 0x59d   : > { %14129 = vrot.lane.b32.xlu1 %v25721_v22, %s20345_s25 }
 0x59e   : > { %12529 = vrot.lane.b32.xlu0 %v25636_v47, %s20345_s25 }
 0x5a1   : > { %13324 = vrot.lane.b32.xlu1 %v25641_v10, %s20345_s25 }
 0x5a2   : > { %12804 = vrot.lane.b32.xlu0 %v25636_v47, %s20345_s25 }
 0x5a5   : > { %13844 = vrot.lane.b32.xlu1 %v25733_v38, %s20345_s25 }
 0x5a6   : > { %13326 = vrot.lane.b32.xlu0 %v25731_v61, %s20345_s25 }
 0x5a7   : > { %v25855_v44 = vpop.permute.xlu1 %11714 }
 0x5a8   : > { %v12000_v46 = vpop.permute.xlu0 %11999  ;;  %v11726_v56 = vmax.f32 %v25497_v35, %v25855_v44 }
 0x5a9   : > { %14133 = vrot.lane.b32.xlu1 %v25733_v38, %s20345_s25 }
 0x5aa   : > { %13585 = vrot.lane.b32.xlu0 %v25731_v61, %s20345_s25 }
 0x5ab   : > { %v11998_v34 = vpop.permute.xlu1 %11997 }
 0x5ac   : > { %v25861_v42 = vpop.permute.xlu0 %11716 }
 0x5ad   : > { %14647 = vrot.lane.b32.xlu1 %v25658_v39, %s20345_s25 }
 0x5ae   : > { %14123 = vrot.lane.b32.xlu0 %v25653_v36, %s20345_s25 }
 0x5af   : > { %v10948_v43 = vpop.permute.xlu1 %10947 }
 0x5b0   : > { %v10959_v45 = vmax.f32 %v25492_v8, %v10948_v43  ;;  %v10950_v13 = vpop.permute.xlu0 %10949 }
 0x5b1   : > { %v10960_v58 = vmax.f32 %v25510_v7, %v10950_v13  ;;  %11747 = vrot.lane.b32.xlu1 %v11726_v56, %s20357_s27  ;;  %v11204_v13 = vsel %vm1560_vm2, %v11189_v3, %v11191_v33 }
 0x5b2   : > { %18247 = vmatprep.mubr.msk.f32.mxu0 %vm10968_vm11, %v10959_v45  ;;  %18263 = vmatprep.mubr.msk.f32.mxu1 %vm10968_vm11, %v10959_v45  ;;  %v11212_v3 = vmax.f32 %v25492_v8, %v11204_v13 }
 0x5b3   : > { %14388 = vrot.lane.b32.xlu0 %v25653_v36, %s20345_s25  ;;  %v11456_v17 = vpop.permute.xlu1 %11455  ;;  %18248 = vmatmul.mubr.msk.f32.vlgmr.msra.gmra.mrb[216].mxu0 %vm10968_vm11, %v10960_v58 }
 0x5b4   : > { %v11467_v52 = vmax.f32 %v25497_v35, %v11456_v17  ;;  %18264 = vmatmul.mubr.msk.f32.vlgmr.msra.gmra.mrb[216].mxu1 %vm10968_vm11, %v10960_v58  ;;  %v11195_v43 = vpop.permute.xlu0 %11194  ;;  %19237 = vmatpush3.bf16.msra.mxu0 %v25546_v60  ;;  %v11220_v35 = vld [vmem:[%s27229_s9 + $0x20] sm:$0xf] }
 0x5b5   : > { %19245 = vmatpush3.bf16.msra.mxu1 %v25553_v54  ;;  %19239 = vmatprep.subr.bf16.mxu0 %v25579_v29  ;;  %v11333_v17 = vld [vmem:[%s27230_s10 + $0x20] sm:$0xf] }
 0x5b6   : > { %11480 = vrot.lane.b32.xlu1 %v11467_v52, %s27503_s20  ;;  %19247 = vmatprep.subr.bf16.mxu1 %v25585_v23  ;;  %v12013_v52 = vsel %vm1560_vm2, %v11998_v34, %v12000_v46  ;;  %v11728_v34 = vmax.f32 %v25515_v25, %v25861_v42 }
 0x5b7   : > { %14127 = vrot.lane.b32.xlu0 %v25671_v32, %s20345_s25  ;;  %v12265_v56 = vpop.permute.xlu1 %12264  ;;  %v12021_v8 = vmax.f32 %v25607_v18, %v12013_v52 }
 0x5b8   : > { %v25894_v33 = vpop.permute.xlu0 %11457  ;;  %19241 = vmatpush3.bf16.msra.mxu0 %v25579_v29 }
 0x5b9   : > { %19249 = vmatpush3.bf16.msra.mxu1 %v25585_v23  ;;  %18277 = vmatprep.subr.msk.mxu0 %vm10981_vm10, %v11220_v35 }
 0x5ba   : > { %11225 = vrot.lane.b32.xlu1 %v11212_v3, %s20348_s28  ;;  %18293 = vmatprep.subr.msk.mxu1 %vm10981_vm10, %v11333_v17 }
 0x5bb   : > { %14390 = vrot.lane.b32.xlu0 %v25671_v32, %s20345_s25  ;;  %v11193_v45 = vpop.permute.xlu1 %11192 }
 0x5bc   : > { %v12004_v58 = vpop.permute.xlu0 %12003  ;;  %18278 = vmatpush3.msk.msra.mxu0 %vm10981_vm10, %v11220_v35  ;;  %v11205_v3 = vsel %vm1560_vm2, %v11193_v45, %v11195_v43  ;;  %v11706_v45 = vld [vmem:[#allocation3 + $0xc8] sm:$0xff] }
 0x5bd   : > { %18294 = vmatpush3.msk.msra.mxu1 %vm10981_vm10, %v11333_v17  ;;  %19251 = vmatprep.subr.bf16.mxu0 %v25546_v60  ;;  %v11213_v17 = vmax.f32 %v25510_v7, %v11205_v3 }
 0x5be   : > { %12034 = vrot.lane.b32.xlu1 %v12021_v8, %s27501_s23  ;;  %19259 = vmatprep.subr.bf16.mxu1 %v25553_v54 }
 0x5bf   : > { %14131 = vrot.lane.b32.xlu0 %v25689_v62, %s20345_s25  ;;  %v12002_v46 = vpop.permute.xlu1 %12001 }
 0x5c0   : > { %v12267_v13 = vpop.permute.xlu0 %12266  ;;  %v12014_v8 = vsel %vm1560_vm2, %v12002_v46, %v12004_v58  ;;  %v11727_v58 = vmax.f32 %v25607_v18, %v25855_v44 }
 0x5c1   : > { %v12022_v49 = vmax.f32 %v25627_v50, %v12014_v8 }
 0x5c2   : > { %11751 = vrot.lane.b32.xlu1 %v11728_v34, %s20357_s27 }
 0x5c3   : > { %14392 = vrot.lane.b32.xlu0 %v25689_v62, %s20345_s25  ;;  %v11197_v35 = vpop.permute.xlu1 %11196 }
 0x5c4   : > { %v11199_v52 = vpop.permute.xlu0 %11198 }
 0x5c6   : > { %11227 = vrot.lane.b32.xlu1 %v11213_v17, %s20348_s28 }
 0x5c7   : > { %14135 = vrot.lane.b32.xlu0 %v25707_v1, %s20345_s25  ;;  %v11719_v30 = vpop.permute.xlu1 %11718 }
 0x5c8   : > { %v12008_v43 = vpop.permute.xlu0 %12007  ;;  %v11730_v7 = vmax.f32 %v11706_v45, %v11719_v30 }
 0x5ca   : > { %12036 = vrot.lane.b32.xlu1 %v12022_v49, %s27501_s23  ;;  %v12276_v49 = vmax.f32 %v25612_v5, %v12265_v56  ;;  %v11206_v56 = vsel %vm1560_vm2, %v11197_v35, %v11199_v52  ;;  %v12277_v35 = vmax.f32 %v25633_v12, %v12267_v13  ;;  %v11708_v52 = vld [vmem:[#allocation3 + $0x128] sm:$0xff] }
 0x5cb   : > { %14394 = vrot.lane.b32.xlu0 %v25707_v1, %s20345_s25  ;;  %v12006_v34 = vpop.permute.xlu1 %12005 }
 0x5cc   : > { %v11721_v3 = vpop.permute.xlu0 %11720 }
 0x5ce   : > { %11755 = vrot.lane.b32.xlu1 %v11730_v7, %s20357_s27  ;;  %v11729_v7 = vmax.f32 %v25627_v50, %v25861_v42 }
 0x5cf   : > { %11749 = vrot.lane.b32.xlu0 %v11727_v58, %s20357_s27  ;;  %v10952_v46 = vpop.permute.xlu1 %10951 }
 0x5d0   : > { %v10961_v17 = vmax.f32 %v25521_v55, %v10952_v46  ;;  %v10954_v8 = vpop.permute.xlu0 %10953  ;;  %v11214_v46 = vmax.f32 %v25521_v55, %v11206_v56 }
 0x5d1   : > { %v10962_v6 = vmax.f32 %v25541_v0, %v10954_v8  ;;  %v11468_v8 = vmax.f32 %v25515_v25, %v25894_v33  ;;  %v11731_v33 = vmax.f32 %v25646_v59, %v11719_v30 }
 0x5d2   : > { %18250 = vmatprep.mubr.msk.f32.mxu0 %vm10968_vm11, %v10961_v17  ;;  %18266 = vmatprep.mubr.msk.f32.mxu1 %vm10968_vm11, %v10961_v17 }
 0x5d3   : > { %12289 = vrot.lane.b32.xlu0 %v12276_v49, %s28137_s0  ;;  %v11460_v45 = vpop.permute.xlu1 %11459  ;;  %18251 = vmatmul.mubr.msk.f32.gmra.mrb[218].mxu0 %vm10968_vm11, %v10962_v6  ;;  %v11732_v49 = vmax.f32 %v11708_v52, %v11721_v3 }
 0x5d4   : > { %v11469_v18 = vmax.f32 %v25526_v2, %v11460_v45  ;;  %18267 = vmatmul.mubr.msk.f32.gmra.mrb[218].mxu1 %vm10968_vm11, %v10962_v6  ;;  %v11203_v44 = vpop.permute.xlu0 %11202  ;;  %v12015_v2 = vsel %vm1560_vm2, %v12006_v34, %v12008_v43 }
 0x5d5   : > { %v12023_v50 = vmax.f32 %v25646_v59, %v12015_v2  ;;  %v11733_v59 = vmax.f32 %v25664_v48, %v11721_v3 }
 0x5d6   : > { %11484 = vrot.lane.b32.xlu1 %v11469_v18, %s27503_s20 }
 0x5d7   : > { %11753 = vrot.lane.b32.xlu0 %v11729_v7, %s20357_s27  ;;  %v12269_v58 = vpop.permute.xlu1 %12268 }
 0x5d8   : > { %v11462_v17 = vpop.permute.xlu0 %11461  ;;  %v12278_v18 = vmax.f32 %v25650_v9, %v12269_v58 }
 0x5da   : > { %11229 = vrot.lane.b32.xlu1 %v11214_v46, %s20348_s28 }
 0x5db   : > { %11482 = vrot.lane.b32.xlu0 %v11468_v8, %s27503_s20  ;;  %v11201_v6 = vpop.permute.xlu1 %11200 }
 0x5dc   : > { %v12012_v42 = vpop.permute.xlu0 %12011  ;;  %v11207_v43 = vsel %vm1560_vm2, %v11201_v6, %v11203_v44 }
 0x5dd   : > { %v11215_v45 = vmax.f32 %v25541_v0, %v11207_v43  ;;  %v11470_v0 = vmax.f32 %v25551_v53, %v11462_v17 }
 0x5de   : > { %12038 = vrot.lane.b32.xlu1 %v12023_v50, %s27501_s23 }
 0x5df   : > { %12291 = vrot.lane.b32.xlu0 %v12277_v35, %s28137_s0  ;;  %v12010_v55 = vpop.permute.xlu1 %12009 }
 0x5e0   : > { %v12271_v25 = vpop.permute.xlu0 %12270  ;;  %v12016_v58 = vsel %vm1560_vm2, %v12010_v55, %v12012_v42 }
 0x5e1   : > { %v12024_v3 = vmax.f32 %v25664_v48, %v12016_v58  ;;  %v12279_v6 = vmax.f32 %v25668_v14, %v12271_v25 }
 0x5e2   : > { %11759 = vrot.lane.b32.xlu1 %v11732_v49, %s20357_s27 }
 0x5e3   : > { %11757 = vrot.lane.b32.xlu0 %v11731_v33, %s20357_s27  ;;  %v12524_v34 = vpop.permute.xlu1 %12523 }
 0x5e4   : > { %v12799_v13 = vpop.permute.xlu0 %12798  ;;  %v12535_v53 = vmax.f32 %v25612_v5, %v12524_v34 }
 0x5e5   : > { %v12810_v48 = vmax.f32 %v25562_v21, %v12799_v13 }
 0x5e6   : > { %11231 = vrot.lane.b32.xlu1 %v11215_v45, %s20348_s28 }
 0x5e7   : > { %12293 = vrot.lane.b32.xlu0 %v12278_v18, %s28137_s0  ;;  %v13313_v7 = vpop.permute.xlu1 %13312 }
 0x5e8   : > { %v13315_v56 = vpop.permute.xlu0 %13314 }
 0x5e9   : > { %v13328_v35 = vsel %vm1560_vm2, %v13313_v7, %v13315_v56  ;;  %v12536_v56 = vmax.f32 %v25562_v21, %v12524_v34 }
 0x5ea   : > { %13061 = vrot.lane.b32.xlu1 %v25621_v11, %s20345_s25  ;;  %v13336_v5 = vmax.f32 %v25577_v15, %v13328_v35 }
 0x5eb   : > { %11761 = vrot.lane.b32.xlu0 %v11733_v59, %s20357_s27  ;;  %v25967_v30 = vpop.permute.xlu1 %13838 }
 0x5ec   : > { %v25969_v44 = vpop.permute.xlu0 %13579 }
 0x5ee   : > { %14651 = vrot.lane.b32.xlu1 %v25694_v41, %s20345_s25 }
 0x5ef   : > { %11486 = vrot.lane.b32.xlu0 %v11470_v0, %s27503_s20  ;;  %v25976_v46 = vpop.permute.xlu1 %14121 }
 0x5f0   : > { %v12526_v8 = vpop.permute.xlu0 %12525 }
 0x5f1   : > { %v12537_v25 = vmax.f32 %v25633_v12, %v12526_v8 }
 0x5f2   : > { %12040 = vrot.lane.b32.xlu1 %v12024_v3, %s27501_s23  ;;  %v12538_v3 = vmax.f32 %v25591_v16, %v12526_v8 }
 0x5f3   : > { %14649 = vrot.lane.b32.xlu0 %v25676_v51, %s20345_s25  ;;  %v25982_v2 = vpop.permute.xlu1 %13057 }
 0x5f4   : > { %v12801_v17 = vpop.permute.xlu0 %12800 }
 0x5f5   : > { %v12811_v15 = vmax.f32 %v25591_v16, %v12801_v17 }
 0x5f6   : > { %12556 = vrot.lane.b32.xlu1 %v12535_v53, %s28138_s24 }
 0x5f7   : > { %12295 = vrot.lane.b32.xlu0 %v12279_v6, %s28137_s0  ;;  %v13317_v50 = vpop.permute.xlu1 %13316 }
 0x5f8   : > { %v13319_v42 = vpop.permute.xlu0 %13318 }
 0x5f9   : > { %v13329_v13 = vsel %vm1560_vm2, %v13317_v50, %v13319_v42 }
 0x5fa   : > { %12823 = vrot.lane.b32.xlu1 %v12810_v48, %s28139_s19  ;;  %v13337_v12 = vmax.f32 %v25599_v26, %v13329_v13  ;;  %v15425_v13 = vld [vmem:[#allocation3 + $0x58] sm:$0xff] }
 0x5fb   : > { %13063 = vrot.lane.b32.xlu0 %v25641_v10, %s20345_s25  ;;  %v25993_v52 = vpop.permute.xlu1 %13840 }
 0x5fc   : > { %v13582_v55 = vpop.permute.xlu0 %13581 }
 0x5fe   : > { %13349 = vrot.lane.b32.xlu1 %v13336_v5, %s20348_s28 }
 0x5ff   : > { %14653 = vrot.lane.b32.xlu0 %v25712_v4, %s20345_s25  ;;  %v25999_v49 = vpop.permute.xlu1 %14125 }
 0x600   : > { %v26002_v33 = vpop.permute.xlu0 %13059 }
 0x602   : > { %12560 = vrot.lane.b32.xlu1 %v12537_v25, %s28138_s24 }
 0x603   : > { %14927 = vrot.lane.b32.xlu0 %v25658_v39, %s20345_s25  ;;  %v12528_v43 = vpop.permute.xlu1 %12527 }
 0x604   : > { %v12803_v45 = vpop.permute.xlu0 %12802  ;;  %v12539_v0 = vmax.f32 %v25650_v9, %v12528_v43  ;;  %v12540_v34 = vmax.f32 %v25615_v27, %v12528_v43  ;;  %v13592_v43 = vmax.f32 %v25700_v40, %v13582_v55  ;;  %v13851_v55 = vmax.f32 %v25686_v37, %v25967_v30 }
 0x605   : > { %v12812_v26 = vmax.f32 %v25615_v27, %v12803_v45 }
 0x606   : > { %12825 = vrot.lane.b32.xlu1 %v12811_v15, %s28139_s19 }
 0x607   : > { %14929 = vrot.lane.b32.xlu0 %v25676_v51, %s20345_s25  ;;  %v13321_v18 = vpop.permute.xlu1 %13320 }
 0x608   : > { %v13323_v7 = vpop.permute.xlu0 %13322 }
 0x609   : > { %v13330_v17 = vsel %vm1560_vm2, %v13321_v18, %v13323_v7  ;;  %v13850_v7 = vmax.f32 %v25682_v24, %v25967_v30 }
 0x60a   : > { %13351 = vrot.lane.b32.xlu1 %v13337_v12, %s20348_s28  ;;  %v13338_v16 = vmax.f32 %v25621_v11, %v13330_v17  ;;  %v13591_v11 = vmax.f32 %v25682_v24, %v25969_v44  ;;  %v28140_v12 = vmax.f32 %v25736_v63, 0.0  ;;  %v28141_v24 = vmax.f32 %v25747_v28, 0.0 }
 0x60b   : > { %12558 = vrot.lane.b32.xlu0 %v12536_v56, %s28138_s24  ;;  %v26016_v59 = vpop.permute.xlu1 %13842  ;;  %v13853_v17 = vmax.f32 %v25704_v57, %v25993_v52 }
 0x60c   : > { %v13584_v58 = vpop.permute.xlu0 %13583 }
 0x60d   : > { %v13593_v44 = vmax.f32 %v25718_v31, %v13584_v58  ;;  %v15426_v58 = vld [vmem:[#allocation3 + $0xb8] sm:$0xff] }
 0x60e   : > { %12564 = vrot.lane.b32.xlu1 %v12539_v0, %s28138_s24 }
 0x60f   : > { %12562 = vrot.lane.b32.xlu0 %v12538_v3, %s28138_s24  ;;  %v26022_v53 = vpop.permute.xlu1 %14129 }
 0x610   : > { %v12530_v21 = vpop.permute.xlu0 %12529 }
 0x611   : > { %v12542_v6 = vmax.f32 %v25636_v47, %v12530_v21  ;;  %v12541_v27 = vmax.f32 %v25668_v14, %v12530_v21 }
 0x612   : > { %12827 = vrot.lane.b32.xlu1 %v12812_v26, %s28139_s19 }
 0x613   : > { %12566 = vrot.lane.b32.xlu0 %v12540_v34, %s28138_s24  ;;  %v13325_v9 = vpop.permute.xlu1 %13324 }
 0x614   : > { %v12805_v8 = vpop.permute.xlu0 %12804 }
 0x615   : > { %v12813_v14 = vmax.f32 %v25636_v47, %v12805_v8 }
 0x616   : > { %13353 = vrot.lane.b32.xlu1 %v13338_v16, %s20348_s28 }
 0x617   : > { %12570 = vrot.lane.b32.xlu0 %v12542_v6, %s28138_s24  ;;  %v26033_v50 = vpop.permute.xlu1 %13844  ;;  %v11588_v6 = vld [vmem:[%s27230_s10 + $0x20] sm:$0xf] }
 0x618   : > { %v13327_v48 = vpop.permute.xlu0 %13326 }
 0x619   : > { %v13331_v63 = vsel %vm1560_vm2, %v13325_v9, %v13327_v48  ;;  %v13852_v9 = vmax.f32 %v25700_v40, %v25993_v52  ;;  %v11475_v52 = vld [vmem:[%s27229_s9 + $0x20] sm:$0xf]  ;;  %v28142_v48 = vmax.f32 %v25758_v19, 0.0  ;;  %v28143_v19 = vmax.f32 %v25769_v20, 0.0 }
 0x61a   : > { %12568 = vrot.lane.b32.xlu1 %v12541_v27, %s28138_s24  ;;  %v13339_v30 = vmax.f32 %v25641_v10, %v13331_v63  ;;  %v15427_v10 = vld [vmem:[#allocation3 + $0x118] sm:$0xff] }
 0x61b   : > { %14931 = vrot.lane.b32.xlu0 %v25694_v41, %s20345_s25  ;;  %v26039_v42 = vpop.permute.xlu1 %14133 }
 0x61c   : > { %v13586_v35 = vpop.permute.xlu0 %13585 }
 0x61d   : > { %v13594_v26 = vmax.f32 %v25731_v61, %v13586_v35  ;;  %v13855_v35 = vmax.f32 %v25721_v22, %v26016_v59 }
 0x61e   : > { %13604 = vrot.lane.b32.xlu1 %v13591_v11, %s27503_s20  ;;  %v15428_v11 = vld [vmem:[#allocation3 + $0x178] sm:$0xff] }
 0x61f   : > { %14933 = vrot.lane.b32.xlu0 %v25712_v4, %s20345_s25  ;;  %v26046_v5 = vpop.permute.xlu1 %14647 }
 0x620   : > { %v26049_v25 = vpop.permute.xlu0 %14123 }
 0x622   : > { %12829 = vrot.lane.b32.xlu1 %v12813_v14, %s28139_s19 }
 0x623   : > { %13606 = vrot.lane.b32.xlu0 %v13592_v43, %s27503_s20  ;;  %v26054_v15 = vpop.permute.xlu1 %11747  ;;  %v13854_v43 = vmax.f32 %v25718_v31, %v26016_v59  ;;  %v13856_v31 = vmax.f32 %v25731_v61, %v26033_v50 }
 0x625   : > { %v26057_v45 = vpop.permute.xlu0 %14388 }
 0x626   : > { %13608 = vrot.lane.b32.xlu1 %v13593_v44, %s27503_s20 }
 0x627   : > { %15439 = vrot.lane.b32.xlu0 %v15425_v13, %s20345_s25  ;;  %v13857_v13 = vmax.f32 %v25733_v38, %v26033_v50 }
 0x628   : > { %v26061_v47 = vpop.permute.xlu1 %11480 }
 0x629   : > { %v14128_v18 = vpop.permute.xlu0 %14127 }
 0x62a   : > { %15437 = vrot.lane.b32.xlu1 %v28140_v12, %s20345_s25  ;;  %v14137_v12 = vsel %vm1560_vm2, %v25976_v46, %v26049_v25  ;;  %v14400_v46 = vmax.f32 %v25653_v36, %v26057_v45 }
 0x62b   : > { %13873 = vrot.lane.b32.xlu0 %v13851_v55, %s20357_s27  ;;  %v14138_v55 = vsel %vm1560_vm2, %v25999_v49, %v14128_v18  ;;  %v14145_v49 = vmax.f32 %v25686_v37, %v14137_v12 }
 0x62c   : > { %v11226_v56 = vpop.permute.xlu1 %11225 }
 0x62d   : > { %v26071_v0 = vpop.permute.xlu0 %14390  ;;  %18279 = vmatprep.mubr.msk.f32.mxu0 %vm10968_vm11, %v11226_v56  ;;  %18295 = vmatprep.mubr.msk.f32.mxu1 %vm10968_vm11, %v11226_v56 }
 0x62e   : > { %13871 = vrot.lane.b32.xlu1 %v13850_v7, %s20357_s27  ;;  %v14146_v7 = vmax.f32 %v25704_v57, %v14138_v55 }
 0x62f   : > { %15443 = vrot.lane.b32.xlu0 %v15426_v58, %s20345_s25  ;;  %v14401_v58 = vmax.f32 %v25671_v32, %v26071_v0 }
 0x630   : > { %v26077_v3 = vpop.permute.xlu1 %12034 }
 0x631   : > { %v26081_v21 = vpop.permute.xlu0 %14131 }
 0x632   : > { %15441 = vrot.lane.b32.xlu1 %v28141_v24, %s20345_s25  ;;  %v14139_v32 = vsel %vm1560_vm2, %v26022_v53, %v26081_v21  ;;  %v11738_v21 = vld [vmem:[%s27229_s9 + $0x20] sm:$0xf] }
 0x633   : > { %13610 = vrot.lane.b32.xlu0 %v13594_v26, %s27503_s20  ;;  %v11867_v24 = vld [vmem:[%s27230_s10 + $0x20] sm:$0xf]  ;;  %s20359_s20 = smov 36  }
 0x634   : > { %v26088_v34 = vpop.permute.xlu1 %11751 }
 0x635   : > { %v26092_v16 = vpop.permute.xlu0 %14392 }
 0x636   : > { %13355 = vrot.lane.b32.xlu1 %v13339_v30, %s20348_s28  ;;  %v14402_v53 = vmax.f32 %v25689_v62, %v26092_v16 }
 0x637   : > { %13877 = vrot.lane.b32.xlu0 %v13853_v17, %s20357_s27 }
 0x638   : > { %v11228_v28 = vpop.permute.xlu1 %11227 }
 0x639   : > { %v14136_v8 = vpop.permute.xlu0 %14135  ;;  %18280 = vmatmul.mubr.msk.f32.vlgmr.msra.gmra.mrb[220].mxu0 %vm10968_vm11, %v11228_v28  ;;  %18296 = vmatmul.mubr.msk.f32.vlgmr.msra.gmra.mrb[220].mxu1 %vm10968_vm11, %v11228_v28 }
 0x63a   : > { %13875 = vrot.lane.b32.xlu1 %v13852_v9, %s20357_s27  ;;  %19253 = vmatpush3.bf16.msra.mxu0 %v25546_v60  ;;  %v14140_v57 = vsel %vm1560_vm2, %v26039_v42, %v14136_v8  ;;  %v14147_v42 = vmax.f32 %v25721_v22, %v14139_v32  ;;  %v12546_v32 = vld [vmem:[%s27229_s9 + $0x18] sm:$0xff] }
 0x63b   : > { %15447 = vrot.lane.b32.xlu0 %v15427_v10, %s20345_s25  ;;  %19261 = vmatpush3.bf16.msra.mxu1 %v25553_v54  ;;  %v14148_v50 = vmax.f32 %v25733_v38, %v14140_v57  ;;  %v14660_v38 = vmax.f32 %v25658_v39, %v26046_v5  ;;  %v14635_v39 = vld [vmem:[#allocation3 + $0x40] sm:$0xff] }
 0x63c   : > { %19255 = vmatprep.subr.bf16.mxu0 %v25579_v29  ;;  %19263 = vmatprep.subr.bf16.mxu1 %v25585_v23  ;;  %v26112_v27 = vpop.permute.xlu1 %12036  ;;  %v14659_v62 = vmax.f32 %v14635_v39, %v26046_v5 }
 0x63d   : > { %v14395_v40 = vpop.permute.xlu0 %14394 }
 0x63e   : > { %15445 = vrot.lane.b32.xlu1 %v28142_v48, %s20345_s25  ;;  %19257 = vmatpush3.bf16.msra.mxu0 %v25579_v29  ;;  %v14403_v63 = vmax.f32 %v25707_v1, %v14395_v40  ;;  %v14639_v48 = vld [vmem:[#allocation3 + $0x100] sm:$0xff] }
 0x63f   : > { %15451 = vrot.lane.b32.xlu0 %v15428_v11, %s20345_s25  ;;  %19265 = vmatpush3.bf16.msra.mxu1 %v25585_v23 }
 0x640   : > { %18309 = vmatprep.subr.msk.mxu0 %vm10981_vm10, %v11475_v52  ;;  %18325 = vmatprep.subr.msk.mxu1 %vm10981_vm10, %v11588_v6  ;;  %v26134_v44 = vpop.permute.xlu1 %11755 }
 0x641   : > { %v26124_v14 = vpop.permute.xlu0 %11749 }
 0x642   : > { %15449 = vrot.lane.b32.xlu1 %v28143_v19, %s20345_s25  ;;  %18310 = vmatpush3.msk.msra.mxu0 %vm10981_vm10, %v11475_v52  ;;  %v11763_v30 = vsel %vm3408_vm8, %v26054_v15, %v26124_v14  ;;  %v14637_v15 = vld [vmem:[#allocation3 + $0xa0] sm:$0xff] }
 0x643   : > { %13881 = vrot.lane.b32.xlu0 %v13855_v35, %s20357_s27  ;;  %18326 = vmatpush3.msk.msra.mxu1 %vm10981_vm10, %v11588_v6  ;;  %v12029_v14 = vld [vmem:[%s27229_s9 + $0x20] sm:$0xf] }
 0x644   : > { %19267 = vmatprep.subr.bf16.mxu0 %v25546_v60  ;;  %19275 = vmatprep.subr.bf16.mxu1 %v25553_v54  ;;  %v12142_v19 = vld [vmem:[%s27230_s10 + $0x20] sm:$0xf] }
 0x645   : > { %v26140_v20 = vpop.permute.xlu0 %12289 }
 0x646   : > { %13879 = vrot.lane.b32.xlu1 %v13854_v43, %s20357_s27 }
 0x647   : > { %13885 = vrot.lane.b32.xlu0 %v13857_v13, %s20357_s27 }
 0x648   : > { %v11485_v59 = vpop.permute.xlu1 %11484 }
 0x649   : > { %v26152_v56 = vpop.permute.xlu0 %11753 }
 0x64a   : > { %13883 = vrot.lane.b32.xlu1 %v13856_v31, %s20357_s27  ;;  %v11764_v9 = vsel %vm3408_vm8, %v26088_v34, %v26152_v56  ;;  %v12397_v56 = vld [vmem:[%s27230_s10 + $0x20] sm:$0xf] }
 0x64b   : > { %14160 = vrot.lane.b32.xlu0 %v14146_v7, %s27501_s23  ;;  %v12544_v7 = vld [vmem:[%s27229_s9 + $0x8] sm:$0xff] }
 0x64c   : > { %v11230_v18 = vpop.permute.xlu1 %11229 }
 0x64d   : > { %v11483_v61 = vpop.permute.xlu0 %11482  ;;  %18282 = vmatprep.mubr.msk.f32.mxu0 %vm10968_vm11, %v11230_v18  ;;  %18298 = vmatprep.mubr.msk.f32.mxu1 %vm10968_vm11, %v11230_v18 }
 0x64e   : > { %14158 = vrot.lane.b32.xlu1 %v14145_v49, %s27501_s23  ;;  %v20315_v49 = vld [vmem:[#allocation3 + $0xa8] sm:$0xff] }
 0x64f   : > { %14415 = vrot.lane.b32.xlu0 %v14401_v58, %s28137_s0  ;;  %v12672_v58 = vld [vmem:[%s27230_s10] sm:$0xff] }
 0x650   : > { %v26167_v37 = vpop.permute.xlu1 %12038 }
 0x651   : > { %v26173_v25 = vpop.permute.xlu0 %12291 }
 0x652   : > { %14413 = vrot.lane.b32.xlu1 %v14400_v46, %s28137_s0 }
 0x653   : > { %14164 = vrot.lane.b32.xlu0 %v14148_v50, %s27501_s23  ;;  %v12675_v50 = vld [vmem:[%s27230_s10 + $0x18] sm:$0xff] }
 0x654   : > { %v11760_v0 = vpop.permute.xlu1 %11759 }
 0x655   : > { %v11758_v36 = vpop.permute.xlu0 %11757 }
 0x656   : > { %14162 = vrot.lane.b32.xlu1 %v14147_v42, %s27501_s23  ;;  %v11765_v40 = vsel %vm3408_vm8, %v26134_v44, %v11758_v36  ;;  %v14641_v44 = vld [vmem:[#allocation3 + $0x160] sm:$0xff]  ;;  %s20373_s23 = smov 122  }
 0x657   : > { %14419 = vrot.lane.b32.xlu0 %v14403_v63, %s28137_s0 }
 0x658   : > { %v11232_v45 = vpop.permute.xlu1 %11231 }
 0x659   : > { %v26185_v26 = vpop.permute.xlu0 %12293  ;;  %18283 = vmatmul.mubr.msk.f32.gmra.mrb[222].mxu0 %vm10968_vm11, %v11232_v45  ;;  %18299 = vmatmul.mubr.msk.f32.gmra.mrb[222].mxu1 %vm10968_vm11, %v11232_v45 }
 0x65a   : > { %18311 = vmatprep.mubr.msk.f32.mxu0 %vm10968_vm11, %v26061_v47  ;;  %18327 = vmatprep.mubr.msk.f32.mxu1 %vm10968_vm11, %v26061_v47 }
 0x65b   : > { %14417 = vrot.lane.b32.xlu1 %v14402_v53, %s28137_s0  ;;  %14682 = vrot.lane.b32.xlu0 %v14660_v38, %s28138_s24  ;;  %v12547_v38 = vld [vmem:[%s27229_s9 + $0x20] sm:$0xf]  ;;  %s20362_s0 = smov 90  }
 0x65c   : > { %v26195_v1 = vpop.permute.xlu1 %13061 }
 0x65d   : > { %v11762_v22 = vpop.permute.xlu0 %11761  ;;  %18312 = vmatmul.mubr.msk.f32.vlgmr.msra.gmra.mrb[224].mxu0 %vm10968_vm11, %v11483_v61  ;;  %18328 = vmatmul.mubr.msk.f32.vlgmr.msra.gmra.mrb[224].mxu1 %vm10968_vm11, %v11483_v61  ;;  %v12673_v61 = vld [vmem:[%s27230_s10 + $0x8] sm:$0xff] }
 0x65e   : > { %19269 = vmatpush3.bf16.msra.mxu0 %v25546_v60  ;;  %19277 = vmatpush3.bf16.msra.mxu1 %v25553_v54 }
 0x65f   : > { %14680 = vrot.lane.b32.xlu1 %v14659_v62, %s28138_s24  ;;  %18314 = vmatprep.mubr.msk.f32.mxu0 %vm10968_vm11, %v11485_v59 }
 0x660   : > { %18330 = vmatprep.mubr.msk.f32.mxu1 %vm10968_vm11, %v11485_v59  ;;  %v14652_v47 = vpop.permute.xlu1 %14651  ;;  %19271 = vmatprep.subr.bf16.mxu0 %v25579_v29 }
 0x661   : > { %19279 = vmatprep.subr.bf16.mxu1 %v25585_v23  ;;  %v11487_v5 = vpop.permute.xlu0 %11486  ;;  %v14663_v11 = vmax.f32 %v14639_v48, %v14652_v47  ;;  %v14664_v35 = vmax.f32 %v25694_v41, %v14652_v47  ;;  %v12931_v48 = vld [vmem:[%s27230_s10 + $0x20] sm:$0xf] }
 0x662   : > { %18315 = vmatmul.mubr.msk.f32.gmra.mrb[226].mxu0 %vm10968_vm11, %v11487_v5  ;;  %18331 = vmatmul.mubr.msk.f32.gmra.mrb[226].mxu1 %vm10968_vm11, %v11487_v5 }
 0x663   : > { %19273 = vmatpush3.bf16.msra.mxu0 %v25579_v29  ;;  %19281 = vmatpush3.bf16.msra.mxu1 %v25585_v23 }
 0x664   : > { %18343 = vmatprep.mubr.msk.f32.mxu0 %vm10968_vm11, %v11763_v30  ;;  %18359 = vmatprep.mubr.msk.f32.mxu1 %vm10968_vm11, %v11763_v30  ;;  %v26222_v17 = vpop.permute.xlu1 %12040 }
 0x665   : > { %18341 = vmatprep.subr.msk.mxu0 %vm10981_vm10, %v11738_v21  ;;  %18357 = vmatprep.subr.msk.mxu1 %vm10981_vm10, %v11867_v24  ;;  %v14650_v16 = vpop.permute.xlu0 %14649 }
 0x666   : > { %v14661_v28 = vmax.f32 %v14637_v15, %v14650_v16  ;;  %v14662_v8 = vmax.f32 %v25676_v51, %v14650_v16  ;;  %v11766_v51 = vsel %vm3408_vm8, %v11760_v0, %v11762_v22 }
 0x667   : > { %18342 = vmatpush3.msk.msra.mxu0 %vm10981_vm10, %v11738_v21  ;;  %18358 = vmatpush3.msk.msra.mxu1 %vm10981_vm10, %v11867_v24 }
 0x668   : > { %18344 = vmatmul.mubr.msk.f32.vlgmr.msra.gmra.mrb[228].mxu0 %vm10968_vm11, %v11764_v9  ;;  %18360 = vmatmul.mubr.msk.f32.vlgmr.msra.gmra.mrb[228].mxu1 %vm10968_vm11, %v11764_v9  ;;  %v26234_v10 = vpop.permute.xlu1 %12556 }
 0x669   : > { %19283 = vmatprep.subr.bf16.mxu0 %v25546_v60  ;;  %19291 = vmatprep.subr.bf16.mxu1 %v25553_v54  ;;  %v26240_v34 = vpop.permute.xlu0 %12295 }
 0x66a   : > { %18346 = vmatprep.mubr.msk.f32.mxu0 %vm10968_vm11, %v11765_v40  ;;  %18362 = vmatprep.mubr.msk.f32.mxu1 %vm10968_vm11, %v11765_v40 }
 0x66b   : > { %19285 = vmatpush3.bf16.msra.mxu0 %v25546_v60  ;;  %19293 = vmatpush3.bf16.msra.mxu1 %v25553_v54 }
 0x66c   : > { %14684 = vrot.lane.b32.xlu1 %v14661_v28, %s28138_s24  ;;  %14686 = vrot.lane.b32.xlu0 %v14662_v8, %s28138_s24  ;;  %v26249_v52 = vpop.permute.xlu1 %12823 }
 0x66d   : > { %18347 = vmatmul.mubr.msk.f32.gmra.mrb[230].mxu0 %vm10968_vm11, %v11766_v51  ;;  %18363 = vmatmul.mubr.msk.f32.gmra.mrb[230].mxu1 %vm10968_vm11, %v11766_v51  ;;  %v26253_v6 = vpop.permute.xlu0 %13063 }
 0x66e   : > { %19287 = vmatprep.subr.bf16.mxu0 %v25579_v29  ;;  %19295 = vmatprep.subr.bf16.mxu1 %v25585_v23 }
 0x66f   : > { %19289 = vmatpush3.bf16.msra.mxu0 %v25579_v29  ;;  %18375 = vmatprep.mubr.msk.f32.mxu0 %vm10968_vm11, %v26077_v3 }
 0x670   : > { %19297 = vmatpush3.bf16.msra.mxu1 %v25585_v23  ;;  %18391 = vmatprep.mubr.msk.f32.mxu1 %vm10968_vm11, %v26077_v3  ;;  %v26270_v43 = vpop.permute.xlu1 %13349 }
 0x671   : > { %14688 = vrot.lane.b32.xlu1 %v14663_v11, %s28138_s24  ;;  %14690 = vrot.lane.b32.xlu0 %v14664_v35, %s28138_s24  ;;  %v14654_v41 = vpop.permute.xlu0 %14653  ;;  %v20317_v11 = vld [vmem:[#allocation3 + $0x168] sm:$0xff] }
 0x672   : > { %18373 = vmatprep.subr.msk.mxu0 %vm10981_vm10, %v12029_v14  ;;  %18389 = vmatprep.subr.msk.mxu1 %vm10981_vm10, %v12142_v19  ;;  %v14666_v3 = vmax.f32 %v25712_v4, %v14654_v41  ;;  %v14665_v55 = vmax.f32 %v14641_v44, %v14654_v41  ;;  %v26445_v44 = vld [vmem:[#allocation3 + $0x50] sm:$0xff] }
 0x673   : > { %18374 = vmatpush3.msk.msra.mxu0 %vm10981_vm10, %v12029_v14 }
 0x674   : > { %18390 = vmatpush3.msk.msra.mxu1 %vm10981_vm10, %v12142_v19  ;;  %18376 = vmatmul.mubr.msk.f32.vlgmr.msra.gmra.mrb[232].mxu0 %vm10968_vm11, %v26112_v27  ;;  %v26281_v13 = vpop.permute.xlu1 %12560 }
 0x675   : > { %18392 = vmatmul.mubr.msk.f32.vlgmr.msra.gmra.mrb[232].mxu1 %vm10968_vm11, %v26112_v27  ;;  %19299 = vmatprep.subr.bf16.mxu0 %v25546_v60  ;;  %v14928_v31 = vpop.permute.xlu0 %14927  ;;  %v20314_v27 = vld [vmem:[#allocation3 + $0x48] sm:$0xff] }
 0x676   : > { %19307 = vmatprep.subr.bf16.mxu1 %v25553_v54  ;;  %18378 = vmatprep.mubr.msk.f32.mxu0 %vm10968_vm11, %v26167_v37  ;;  %v14939_v59 = vmax.f32 %v20314_v27, %v14928_v31  ;;  %v13182_v27 = vld [vmem:[%s27230_s10 + $0x20] sm:$0xf] }
 0x677   : > { %18394 = vmatprep.mubr.msk.f32.mxu1 %vm10968_vm11, %v26167_v37  ;;  %19301 = vmatpush3.bf16.msra.mxu0 %v25546_v60  ;;  %v12284_v60 = vld [vmem:[%s27229_s9 + $0x20] sm:$0xf]  ;;  %v26334_v37 = vpack.c.bf16 %v12673_v61, %v12672_v58 }
 0x678   : > { %19309 = vmatpush3.bf16.msra.mxu1 %v25553_v54  ;;  %14694 = vrot.lane.b32.xlu0 %v14666_v3, %s28138_s24  ;;  %v26294_v4 = vpop.permute.xlu1 %12825  ;;  %v12543_v54 = vld [vmem:[%s27229_s9] sm:$0xff] }
 0x679   : > { %14692 = vrot.lane.b32.xlu1 %v14665_v55, %s28138_s24  ;;  %18379 = vmatmul.mubr.msk.f32.gmra.mrb[234].mxu0 %vm10968_vm11, %v26222_v17  ;;  %v14930_v12 = vpop.permute.xlu0 %14929  ;;  %v26330_v57 = vpack.c.bf16 %v12544_v7, %v12543_v54  ;;  %v20318_v55 = vld [vmem:[#allocation3 + $0x28] sm:$0xff] }
 0x67a   : > { %18395 = vmatmul.mubr.msk.f32.gmra.mrb[234].mxu1 %vm10968_vm11, %v26222_v17  ;;  %19303 = vmatprep.subr.bf16.mxu0 %v25579_v29  ;;  %v14940_v18 = vmax.f32 %v20315_v49, %v14930_v12  ;;  %v13069_v31 = vmax.f32 %v20318_v55, %v25982_v2  ;;  %v26468_v2 = vld [vmem:[#allocation3 + $0x110] sm:$0xff]  ;;  %v20319_v54 = vld [vmem:[#allocation3 + $0x88] sm:$0xff] }
 0x67b   : > { %19311 = vmatprep.subr.bf16.mxu1 %v25585_v23  ;;  %19305 = vmatpush3.bf16.msra.mxu0 %v25579_v29  ;;  %v13070_v7 = vmax.f32 %v20319_v54, %v26002_v33  ;;  %v26488_v33 = vld [vmem:[#allocation3 + $0x170] sm:$0xff] }
 0x67c   : > { %18407 = vmatprep.mubr.msk.f32.mxu0 %vm10968_vm11, %v26140_v20  ;;  %19313 = vmatpush3.bf16.msra.mxu1 %v25585_v23  ;;  %v26325_v29 = vpop.permute.xlu1 %13351  ;;  %v12545_v23 = vld [vmem:[%s27229_s9 + $0x10] sm:$0xff] }
 0x67d   : > { %18423 = vmatprep.mubr.msk.f32.mxu1 %vm10968_vm11, %v26140_v20  ;;  %14952 = vrot.lane.b32.xlu1 %v14939_v59, %s28139_s19  ;;  %v12559_v46 = vpop.permute.xlu0 %12558  ;;  %v12674_v20 = vld [vmem:[%s27230_s10 + $0x10] sm:$0xff]  ;;  %v26356_v0 = vpack.c.bf16 %v12546_v32, %v12545_v23 }
 0x67e   : > { %18405 = vmatprep.subr.msk.mxu0 %vm10981_vm10, %v12284_v60  ;;  %18421 = vmatprep.subr.msk.mxu1 %vm10981_vm10, %v12397_v56  ;;  %v26361_v36 = vpack.c.bf16 %v12675_v50, %v12674_v20  ;;  %v26470_v59 = vld [vmem:[#allocation3 + $0xb0] sm:$0xff] }
 0x67f   : > { %18406 = vmatpush3.msk.msra.mxu0 %vm10981_vm10, %v12284_v60  ;;  %14954 = vrot.lane.b32.xlu0 %v14940_v18, %s28139_s19 }
 0x680   : > { %18422 = vmatpush3.msk.msra.mxu1 %vm10981_vm10, %v12397_v56  ;;  %18408 = vmatmul.mubr.msk.f32.vlgmr.msra.gmra.mrb[236].mxu0 %vm10968_vm11, %v26173_v25  ;;  %v12565_v42 = vpop.permute.xlu1 %12564  ;;  %v20320_v56 = vld [vmem:[#allocation3 + $0xe8] sm:$0xff] }
 0x681   : > { %18424 = vmatmul.mubr.msk.f32.vlgmr.msra.gmra.mrb[236].mxu1 %vm10968_vm11, %v26173_v25  ;;  %19315 = vmatprep.subr.bf16.mxu0 %v26330_v57  ;;  %v12563_v63 = vpop.permute.xlu0 %12562  ;;  %v12572_v25 = vsel %vm3294_vm9, %v26234_v10, %v12559_v46  ;;  %v20316_v10 = vld [vmem:[#allocation3 + $0x108] sm:$0xff]  ;;  %v13071_v49 = vmax.f32 %v20320_v56, %v26195_v1  ;;  %v14521_v56 = vld [vmem:[%s27230_s10 + $0x20] sm:$0xf] }
 0x682   : > { %19323 = vmatprep.subr.bf16.mxu1 %v26334_v37  ;;  %18410 = vmatprep.mubr.msk.f32.mxu0 %vm10968_vm11, %v26185_v26  ;;  %v12573_v16 = vsel %vm3294_vm9, %v26281_v13, %v12563_v63  ;;  %v20321_v46 = vld [vmem:[#allocation3 + $0x148] sm:$0xff] }
 0x683   : > { %18426 = vmatprep.mubr.msk.f32.mxu1 %vm10968_vm11, %v26185_v26  ;;  %19317 = vmatpush3.bf16.msra.mxu0 %v26330_v57  ;;  %v12676_v26 = vld [vmem:[%s27230_s10 + $0x20] sm:$0xf]  ;;  %v13072_v23 = vmax.f32 %v20321_v46, %v26253_v6 }
 0x684   : > { %19325 = vmatpush3.bf16.msra.mxu1 %v26334_v37  ;;  %18411 = vmatmul.mubr.msk.f32.gmra.mrb[238].mxu0 %vm10968_vm11, %v26240_v34  ;;  %v26371_v45 = vpop.permute.xlu1 %12827 }
 0x685   : > { %18427 = vmatmul.mubr.msk.f32.gmra.mrb[238].mxu1 %vm10968_vm11, %v26240_v34  ;;  %19319 = vmatprep.subr.bf16.mxu0 %v26356_v0  ;;  %v12567_v53 = vpop.permute.xlu0 %12566  ;;  %v12818_v34 = vld [vmem:[%s27229_s9 + $0x20] sm:$0xf] }
 0x686   : > { %19327 = vmatprep.subr.bf16.mxu1 %v26361_v36  ;;  %18439 = vmatprep.mubr.msk.f32.mxu0 %vm10968_vm11, %v12572_v25  ;;  %v18249_v39 = vpop.f32.mrb[216].mxu0  ;;  %v12574_v17 = vsel %vm3294_vm9, %v12565_v42, %v12567_v53  ;;  %v20322_v42 = vld [vmem:[#allocation3 + $0x50] sm:$0xff] }
 0x687   : > { %19321 = vmatpush3.bf16.msra.mxu0 %v26356_v0  ;;  %18455 = vmatprep.mubr.msk.f32.mxu1 %vm10968_vm11, %v12572_v25  ;;  %v18265_v62 = vpop.f32.mrb[216].mxu1  ;;  %v11051_v22 = vpop.f32.mrb[217].mxu0 }
 0x688   : > { %19329 = vmatpush3.bf16.msra.mxu1 %v26361_v36  ;;  %18437 = vmatprep.subr.msk.mxu0 %vm10981_vm10, %v12547_v38  ;;  %v11164_v47 = vmax.f32 %v18249_v39, %v18265_v62  ;;  %v11144_v5 = vpop.f32.mrb[217].mxu1  ;;  %v26388_v21 = vpop.permute.xlu1 %13353  ;;  %v13457_v39 = vld [vmem:[%s27230_s10 + $0x20] sm:$0xf]  ;;  %v20323_v62 = vld [vmem:[#allocation3 + $0xb0] sm:$0xff] }
 0x689   : > { %18453 = vmatprep.subr.msk.mxu1 %vm10981_vm10, %v12676_v26  ;;  %v11163_v24 = vmax.f32 %v11051_v22, %v11144_v5  ;;  %v12571_v30 = vpop.permute.xlu0 %12570 }
 0x68a   : > { %11169 = vst.msk [vmem:[#allocation4 + $0x18] sm:$0xff] %vm11167_vm12, %v11164_v47 }
 0x68b   : > { %18438 = vmatpush3.msk.msra.mxu0 %vm10981_vm10, %v12547_v38  ;;  %11168 = vst.msk [vmem:[#allocation4] sm:$0xff] %vm11167_vm12, %v11163_v24 }
 0x68c   : > { %18454 = vmatpush3.msk.msra.mxu1 %vm10981_vm10, %v12676_v26  ;;  %18440 = vmatmul.mubr.msk.f32.vlgmr.msra.gmra.mrb[240].mxu0 %vm10968_vm11, %v12573_v16  ;;  %v12569_v9 = vpop.permute.xlu1 %12568  ;;  %v13344_v26 = vld [vmem:[%s27229_s9 + $0x20] sm:$0xf] }
 0x68d   : > { %18456 = vmatmul.mubr.msk.f32.vlgmr.msra.gmra.mrb[240].mxu1 %vm10968_vm11, %v12573_v16  ;;  %18442 = vmatprep.mubr.msk.f32.mxu0 %vm10968_vm11, %v12574_v17  ;;  %v14932_v15 = vpop.permute.xlu0 %14931  ;;  %v12575_v28 = vsel %vm3294_vm9, %v12569_v9, %v12571_v30  ;;  %v20324_v16 = vld [vmem:[#allocation3 + $0x110] sm:$0xff] }
 0x68e   : > { %18458 = vmatprep.mubr.msk.f32.mxu1 %vm10968_vm11, %v12574_v17  ;;  %19331 = vmatprep.subr.bf16.mxu0 %v26330_v57  ;;  %v14941_v40 = vmax.f32 %v20316_v10, %v14932_v15  ;;  %v13599_v17 = vld [vmem:[%s27229_s9 + $0x20] sm:$0xf] }
 0x68f   : > { %19339 = vmatprep.subr.bf16.mxu1 %v26334_v37  ;;  %19333 = vmatpush3.bf16.msra.mxu0 %v26330_v57 }
 0x690   : > { %19341 = vmatpush3.bf16.msra.mxu1 %v26334_v37  ;;  %19335 = vmatprep.subr.bf16.mxu0 %v26356_v0  ;;  %v26408_v8 = vpop.permute.xlu1 %13604 }
 0x691   : > { %19343 = vmatprep.subr.bf16.mxu1 %v26361_v36  ;;  %18443 = vmatmul.mubr.msk.f32.gmra.mrb[242].mxu0 %vm10968_vm11, %v12575_v28  ;;  %v14934_v51 = vpop.permute.xlu0 %14933 }
 0x692   : > { %18459 = vmatmul.mubr.msk.f32.gmra.mrb[242].mxu1 %vm10968_vm11, %v12575_v28  ;;  %18471 = vmatprep.mubr.msk.f32.mxu0 %vm10968_vm11, %v26249_v52  ;;  %v14942_v35 = vmax.f32 %v20317_v11, %v14934_v51  ;;  %v20325_v28 = vld [vmem:[#allocation3 + $0x170] sm:$0xff]  ;;  %v13862_v11 = vld [vmem:[%s27229_s9 + $0x20] sm:$0xf] }
 0x693   : > { %19337 = vmatpush3.bf16.msra.mxu0 %v26356_v0  ;;  %18487 = vmatprep.mubr.msk.f32.mxu1 %vm10968_vm11, %v26249_v52 }
 0x694   : > { %19345 = vmatpush3.bf16.msra.mxu1 %v26361_v36  ;;  %18469 = vmatprep.subr.msk.mxu0 %vm10981_vm10, %v12818_v34  ;;  %v12830_v14 = vpop.permute.xlu1 %12829 }
 0x695   : > { %18485 = vmatprep.subr.msk.mxu1 %vm10981_vm10, %v12931_v48  ;;  %14956 = vrot.lane.b32.xlu1 %v14941_v40, %s28139_s19  ;;  %v26428_v19 = vpop.permute.xlu0 %13606 }
 0x696   : > { %14958 = vrot.lane.b32.xlu0 %v14942_v35, %s28139_s19  ;;  %v13991_v35 = vld [vmem:[%s27230_s10 + $0x20] sm:$0xf]  ;;  %s20374_s19 = smov 121  }
 0x697   : > { %18470 = vmatpush3.msk.msra.mxu0 %vm10981_vm10, %v12818_v34 }
 0x698   : > { %18486 = vmatpush3.msk.msra.mxu1 %vm10981_vm10, %v12931_v48  ;;  %19347 = vmatprep.subr.bf16.mxu0 %v26330_v57  ;;  %v26434_v52 = vpop.permute.xlu1 %13608 }
 0x699   : > { %19355 = vmatprep.subr.bf16.mxu1 %v26334_v37  ;;  %18472 = vmatmul.mubr.msk.f32.vlgmr.msra.gmra.mrb[244].mxu0 %vm10968_vm11, %v26294_v4  ;;  %v15440_v41 = vpop.permute.xlu0 %15439 }
 0x69a   : > { %18488 = vmatmul.mubr.msk.f32.vlgmr.msra.gmra.mrb[244].mxu1 %vm10968_vm11, %v26294_v4  ;;  %19349 = vmatpush3.bf16.msra.mxu0 %v26330_v57  ;;  %v13077_v4 = vld [vmem:[%s27229_s9 + $0x20] sm:$0xf] }
 0x69b   : > { %19357 = vmatpush3.bf16.msra.mxu1 %v26334_v37  ;;  %18474 = vmatprep.mubr.msk.f32.mxu0 %vm10968_vm11, %v26371_v45 }
 0x69c   : > { %18490 = vmatprep.mubr.msk.f32.mxu1 %vm10968_vm11, %v26371_v45  ;;  %15182 = vrot.lane.b32.xlu1 %v26445_v44, %s20345_s25  ;;  %v15438_v3 = vpop.permute.xlu1 %15437 }
 0x69d   : > { %19351 = vmatprep.subr.bf16.mxu0 %v26356_v0  ;;  %19359 = vmatprep.subr.bf16.mxu1 %v26361_v36  ;;  %v26453_v13 = vpop.permute.xlu0 %13873  ;;  %v15453_v58 = vsel %vm1560_vm2, %v15438_v3, %v15440_v41 }
 0x69e   : > { %18475 = vmatmul.mubr.msk.f32.gmra.mrb[246].mxu0 %vm10968_vm11, %v12830_v14  ;;  %18491 = vmatmul.mubr.msk.f32.gmra.mrb[246].mxu1 %vm10968_vm11, %v12830_v14  ;;  %v15461_v63 = vmax.f32 %v20322_v42, %v15453_v58 }
 0x69f   : > { %19353 = vmatpush3.bf16.msra.mxu0 %v26356_v0  ;;  %19361 = vmatpush3.bf16.msra.mxu1 %v26361_v36 }
 0x6a0   : > { %18503 = vmatprep.mubr.msk.f32.mxu0 %vm10968_vm11, %v13069_v31  ;;  %18519 = vmatprep.mubr.msk.f32.mxu1 %vm10968_vm11, %v13069_v31  ;;  %v26472_v12 = vpop.permute.xlu1 %13871  ;;  %v14153_v31 = vld [vmem:[%s27229_s9 + $0x20] sm:$0xf] }
 0x6a1   : > { %15186 = vrot.lane.b32.xlu1 %v26468_v2, %s20345_s25  ;;  %15184 = vrot.lane.b32.xlu0 %v26470_v59, %s20345_s25  ;;  %v15444_v60 = vpop.permute.xlu0 %15443  ;;  %v13887_v48 = vsel %vm3408_vm8, %v26472_v12, %v26453_v13 }
 0x6a2   : > { %18501 = vmatprep.subr.msk.mxu0 %vm10981_vm10, %v13077_v4  ;;  %18517 = vmatprep.subr.msk.mxu1 %vm10981_vm10, %v13182_v27 }
 0x6a3   : > { %18502 = vmatpush3.msk.msra.mxu0 %vm10981_vm10, %v13077_v4  ;;  %18518 = vmatpush3.msk.msra.mxu1 %vm10981_vm10, %v13182_v27  ;;  %v14266_v4 = vld [vmem:[%s27230_s10 + $0x20] sm:$0xf] }
 0x6a4   : > { %18504 = vmatmul.mubr.msk.f32.vlgmr.msra.gmra.mrb[248].mxu0 %vm10968_vm11, %v13070_v7  ;;  %18520 = vmatmul.mubr.msk.f32.vlgmr.msra.gmra.mrb[248].mxu1 %vm10968_vm11, %v13070_v7  ;;  %v15442_v18 = vpop.permute.xlu1 %15441  ;;  %v14408_v7 = vld [vmem:[%s27229_s9 + $0x20] sm:$0xf] }
 0x6a5   : > { %19363 = vmatprep.subr.bf16.mxu0 %v26330_v57  ;;  %19371 = vmatprep.subr.bf16.mxu1 %v26334_v37  ;;  %v26491_v61 = vpop.permute.xlu0 %13610  ;;  %v15454_v32 = vsel %vm1560_vm2, %v15442_v18, %v15444_v60 }
 0x6a6   : > { %15188 = vrot.lane.b32.xlu0 %v26488_v33, %s20345_s25  ;;  %18506 = vmatprep.mubr.msk.f32.mxu0 %vm10968_vm11, %v13071_v49  ;;  %v18252_v1 = vpop.f32.mrb[218].mxu0  ;;  %v15462_v22 = vmax.f32 %v20323_v62, %v15454_v32  ;;  %v15307_v62 = vld [vmem:[%s27230_s10 + $0x20] sm:$0xf] }
 0x6a7   : > { %18522 = vmatprep.mubr.msk.f32.mxu1 %vm10968_vm11, %v13071_v49  ;;  %19365 = vmatpush3.bf16.msra.mxu0 %v26330_v57  ;;  %v18268_v20 = vpop.f32.mrb[218].mxu1  ;;  %v11061_v50 = vpop.f32.mrb[219].mxu0 }
 0x6a8   : > { %19373 = vmatpush3.bf16.msra.mxu1 %v26334_v37  ;;  %18507 = vmatmul.mubr.msk.f32.gmra.mrb[250].mxu0 %vm10968_vm11, %v13072_v23  ;;  %v11166_v6 = vmax.f32 %v18252_v1, %v18268_v20  ;;  %v11154_v25 = vpop.f32.mrb[219].mxu1  ;;  %v13356_v45 = vpop.permute.xlu1 %13355  ;;  %v14800_v1 = vld [vmem:[%s27230_s10 + $0x20] sm:$0xf] }
 0x6a9   : > { %18523 = vmatmul.mubr.msk.f32.gmra.mrb[250].mxu1 %vm10968_vm11, %v13072_v23  ;;  %19367 = vmatprep.subr.bf16.mxu0 %v26356_v0  ;;  %v11165_v38 = vmax.f32 %v11061_v50, %v11154_v25  ;;  %v26504_v53 = vpop.permute.xlu0 %13877  ;;  %v14671_v23 = vld [vmem:[%s27229_s9 + $0x20] sm:$0xf] }
 0x6aa   : > { %19375 = vmatprep.subr.bf16.mxu1 %v26361_v36  ;;  %18535 = vmatprep.mubr.msk.f32.mxu0 %vm10968_vm11, %v26270_v43  ;;  %11171 = vst.msk [vmem:[#allocation4 + $0x48] sm:$0xff] %vm11167_vm12, %v11166_v6 }
 0x6ab   : > { %19369 = vmatpush3.bf16.msra.mxu0 %v26356_v0  ;;  %18551 = vmatprep.mubr.msk.f32.mxu1 %vm10968_vm11, %v26270_v43  ;;  %11170 = vst.msk [vmem:[#allocation4 + $0x30] sm:$0xff] %vm11167_vm12, %v11165_v38  ;;  %v14947_v38 = vld [vmem:[%s27229_s9 + $0x20] sm:$0xf]  ;;  %vm14909_vm12 = vcmask 1048544  }
 0x6ac   : > { %19377 = vmatpush3.bf16.msra.mxu1 %v26361_v36  ;;  %15474 = vrot.lane.b32.xlu1 %v15461_v63, %s20348_s28  ;;  %v26522_v47 = vpop.permute.xlu1 %13875 }
 0x6ad   : > { %18533 = vmatprep.subr.msk.mxu0 %vm10981_vm10, %v13344_v26  ;;  %18549 = vmatprep.subr.msk.mxu1 %vm10981_vm10, %v13457_v39  ;;  %v15448_v5 = vpop.permute.xlu0 %15447 }
 0x6ae   : > { %15476 = vrot.lane.b32.xlu0 %v15462_v22, %s20348_s28 }
 0x6af   : > { %18534 = vmatpush3.msk.msra.mxu0 %vm10981_vm10, %v13344_v26 }
 0x6b0   : > { %18550 = vmatpush3.msk.msra.mxu1 %vm10981_vm10, %v13457_v39  ;;  %18536 = vmatmul.mubr.msk.f32.vlgmr.msra.gmra.mrb[252].mxu0 %vm10968_vm11, %v26325_v29  ;;  %v15446_v43 = vpop.permute.xlu1 %15445  ;;  %v15202_v39 = vld [vmem:[%s27229_s9 + $0x20] sm:$0xf] }
 0x6b1   : > { %18552 = vmatmul.mubr.msk.f32.vlgmr.msra.gmra.mrb[252].mxu1 %vm10968_vm11, %v26325_v29  ;;  %19379 = vmatprep.subr.bf16.mxu0 %v26330_v57  ;;  %v15455_v24 = vsel %vm1560_vm2, %v15446_v43, %v15448_v5  ;;  %v15452_v30 = vpop.permute.xlu0 %15451 }
 0x6b2   : > { %19387 = vmatprep.subr.bf16.mxu1 %v26334_v37  ;;  %18538 = vmatprep.mubr.msk.f32.mxu0 %vm10968_vm11, %v26388_v21  ;;  %v15463_v9 = vmax.f32 %v20324_v16, %v15455_v24 }
 0x6b3   : > { %18554 = vmatprep.mubr.msk.f32.mxu1 %vm10968_vm11, %v26388_v21  ;;  %19381 = vmatpush3.bf16.msra.mxu0 %v26330_v57  ;;  %v13712_v21 = vld [vmem:[%s27230_s10 + $0x20] sm:$0xf] }
 0x6b4   : > { %19389 = vmatpush3.bf16.msra.mxu1 %v26334_v37  ;;  %18539 = vmatmul.mubr.msk.f32.gmra.mrb[254].mxu0 %vm10968_vm11, %v13356_v45  ;;  %v15450_v29 = vpop.permute.xlu1 %15449 }
 0x6b5   : > { %18555 = vmatmul.mubr.msk.f32.gmra.mrb[254].mxu1 %vm10968_vm11, %v13356_v45  ;;  %19383 = vmatprep.subr.bf16.mxu0 %v26356_v0  ;;  %v15456_v15 = vsel %vm1560_vm2, %v15450_v29, %v15452_v30  ;;  %v13882_v40 = vpop.permute.xlu0 %13881  ;;  %vm12785_vm2 = vcmask 1032032  }
 0x6b6   : > { %19391 = vmatprep.subr.bf16.mxu1 %v26361_v36  ;;  %18567 = vmatprep.mubr.msk.f32.mxu0 %vm10968_vm11, %v26408_v8  ;;  %v15464_v10 = vmax.f32 %v20325_v28, %v15456_v15 }
 0x6b7   : > { %19385 = vmatpush3.bf16.msra.mxu0 %v26356_v0  ;;  %18583 = vmatprep.mubr.msk.f32.mxu1 %vm10968_vm11, %v26408_v8 }
 0x6b8   : > { %19393 = vmatpush3.bf16.msra.mxu1 %v26361_v36  ;;  %18565 = vmatprep.subr.msk.mxu0 %vm10981_vm10, %v13599_v17  ;;  %v13880_v34 = vpop.permute.xlu1 %13879 }
 0x6b9   : > { %18581 = vmatprep.subr.msk.mxu1 %vm10981_vm10, %v13712_v21  ;;  %15478 = vrot.lane.b32.xlu1 %v15463_v9, %s20348_s28  ;;  %v13886_v8 = vpop.permute.xlu0 %13885  ;;  %v13889_v41 = vsel %vm3408_vm8, %v13880_v34, %v13882_v40 }
 0x6ba   : > { %15480 = vrot.lane.b32.xlu0 %v15464_v10, %s20348_s28  ;;  %s20360_s28 = smov 54  }
 0x6bb   : > { %18566 = vmatpush3.msk.msra.mxu0 %vm10981_vm10, %v13599_v17 }
 0x6bc   : > { %18582 = vmatpush3.msk.msra.mxu1 %vm10981_vm10, %v13712_v21  ;;  %18568 = vmatmul.mubr.msk.f32.vlgmr.msra.gmra.mrb[0].mxu0 %vm10968_vm11, %v26428_v19  ;;  %v13884_v51 = vpop.permute.xlu1 %13883 }
 0x6bd   : > { %18584 = vmatmul.mubr.msk.f32.vlgmr.msra.gmra.mrb[0].mxu1 %vm10968_vm11, %v26428_v19  ;;  %19395 = vmatprep.subr.bf16.mxu0 %v26330_v57  ;;  %v14161_v14 = vpop.permute.xlu0 %14160  ;;  %v13890_v3 = vsel %vm3408_vm8, %v13884_v51, %v13886_v8 }
 0x6be   : > { %19403 = vmatprep.subr.bf16.mxu1 %v26334_v37  ;;  %18570 = vmatprep.mubr.msk.f32.mxu0 %vm10968_vm11, %v26434_v52 }
 0x6bf   : > { %18586 = vmatprep.mubr.msk.f32.mxu1 %vm10968_vm11, %v26434_v52  ;;  %19397 = vmatpush3.bf16.msra.mxu0 %v26330_v57  ;;  %v13888_v52 = vsel %vm3408_vm8, %v26522_v47, %v26504_v53  ;;  %v15060_v53 = vld [vmem:[%s27230_s10 + $0x20] sm:$0xf] }
 0x6c0   : > { %19405 = vmatpush3.bf16.msra.mxu1 %v26334_v37  ;;  %18571 = vmatmul.mubr.msk.f32.gmra.mrb[2].mxu0 %vm10968_vm11, %v26491_v61  ;;  %v14159_v19 = vpop.permute.xlu1 %14158 }
 0x6c1   : > { %18587 = vmatmul.mubr.msk.f32.gmra.mrb[2].mxu1 %vm10968_vm11, %v26491_v61  ;;  %19399 = vmatprep.subr.bf16.mxu0 %v26356_v0  ;;  %v14416_v13 = vpop.permute.xlu0 %14415 }
 0x6c2   : > { %19407 = vmatprep.subr.bf16.mxu1 %v26361_v36  ;;  %18599 = vmatprep.mubr.msk.f32.mxu0 %vm10968_vm11, %v13887_v48 }
 0x6c3   : > { %19401 = vmatpush3.bf16.msra.mxu0 %v26356_v0  ;;  %18615 = vmatprep.mubr.msk.f32.mxu1 %vm10968_vm11, %v13887_v48 }
 0x6c4   : > { %19409 = vmatpush3.bf16.msra.mxu1 %v26361_v36  ;;  %18597 = vmatprep.subr.msk.mxu0 %vm10981_vm10, %v13862_v11  ;;  %v14414_v55 = vpop.permute.xlu1 %14413 }
 0x6c5   : > { %18613 = vmatprep.subr.msk.mxu1 %vm10981_vm10, %v13991_v35  ;;  %v14165_v27 = vpop.permute.xlu0 %14164 }
 0x6c7   : > { %18598 = vmatpush3.msk.msra.mxu0 %vm10981_vm10, %v13862_v11 }
 0x6c8   : > { %18614 = vmatpush3.msk.msra.mxu1 %vm10981_vm10, %v13991_v35  ;;  %18600 = vmatmul.mubr.msk.f32.vlgmr.msra.gmra.mrb[4].mxu0 %vm10968_vm11, %v13888_v52  ;;  %v14163_v12 = vpop.permute.xlu1 %14162 }
 0x6c9   : > { %18616 = vmatmul.mubr.msk.f32.vlgmr.msra.gmra.mrb[4].mxu1 %vm10968_vm11, %v13888_v52  ;;  %19411 = vmatprep.subr.bf16.mxu0 %v26330_v57  ;;  %v14420_v60 = vpop.permute.xlu0 %14419 }
 0x6ca   : > { %19419 = vmatprep.subr.bf16.mxu1 %v26334_v37  ;;  %18602 = vmatprep.mubr.msk.f32.mxu0 %vm10968_vm11, %v13889_v41 }
 0x6cb   : > { %18618 = vmatprep.mubr.msk.f32.mxu1 %vm10968_vm11, %v13889_v41  ;;  %19413 = vmatpush3.bf16.msra.mxu0 %v26330_v57 }
 0x6cc   : > { %19421 = vmatpush3.bf16.msra.mxu1 %v26334_v37  ;;  %19415 = vmatprep.subr.bf16.mxu0 %v26356_v0 }
 0x6cd   : > { %19423 = vmatprep.subr.bf16.mxu1 %v26361_v36  ;;  %18603 = vmatmul.mubr.msk.f32.gmra.mrb[6].mxu0 %vm10968_vm11, %v13890_v3  ;;  %v14418_v54 = vpop.permute.xlu1 %14417  ;;  %v14683_v49 = vpop.permute.xlu0 %14682 }
 0x6ce   : > { %18619 = vmatmul.mubr.msk.f32.gmra.mrb[6].mxu1 %vm10968_vm11, %v13890_v3  ;;  %18631 = vmatprep.mubr.msk.f32.mxu0 %vm10968_vm11, %v14159_v19 }
 0x6cf   : > { %19417 = vmatpush3.bf16.msra.mxu0 %v26356_v0  ;;  %18647 = vmatprep.mubr.msk.f32.mxu1 %vm10968_vm11, %v14159_v19 }
 0x6d0   : > { %19425 = vmatpush3.bf16.msra.mxu1 %v26361_v36  ;;  %18629 = vmatprep.subr.msk.mxu0 %vm10981_vm10, %v14153_v31 }
 0x6d1   : > { %18645 = vmatprep.subr.msk.mxu1 %vm10981_vm10, %v14266_v4  ;;  %v14681_v18 = vpop.permute.xlu1 %14680 }
 0x6d2   : > { %v14696_v46 = vsel %vm3294_vm9, %v14681_v18, %v14683_v49 }
 0x6d3   : > { %18630 = vmatpush3.msk.msra.mxu0 %vm10981_vm10, %v14153_v31 }
 0x6d4   : > { %18646 = vmatpush3.msk.msra.mxu1 %vm10981_vm10, %v14266_v4  ;;  %18632 = vmatmul.mubr.msk.f32.vlgmr.msra.gmra.mrb[8].mxu0 %vm10968_vm11, %v14161_v14 }
 0x6d5   : > { %18648 = vmatmul.mubr.msk.f32.vlgmr.msra.gmra.mrb[8].mxu1 %vm10968_vm11, %v14161_v14  ;;  %19427 = vmatprep.subr.bf16.mxu0 %v26330_v57 }
 0x6d6   : > { %19435 = vmatprep.subr.bf16.mxu1 %v26334_v37  ;;  %19429 = vmatpush3.bf16.msra.mxu0 %v26330_v57 }
 0x6d7   : > { %19437 = vmatpush3.bf16.msra.mxu1 %v26334_v37  ;;  %19431 = vmatprep.subr.bf16.mxu0 %v26356_v0 }
 0x6d8   : > { %19439 = vmatprep.subr.bf16.mxu1 %v26361_v36  ;;  %18634 = vmatprep.mubr.msk.f32.mxu0 %vm10968_vm11, %v14163_v12 }
 0x6d9   : > { %18650 = vmatprep.mubr.msk.f32.mxu1 %vm10968_vm11, %v14163_v12  ;;  %18635 = vmatmul.mubr.msk.f32.gmra.mrb[10].mxu0 %vm10968_vm11, %v14165_v27 }
 0x6da   : > { %19433 = vmatpush3.bf16.msra.mxu0 %v26356_v0  ;;  %18651 = vmatmul.mubr.msk.f32.gmra.mrb[10].mxu1 %vm10968_vm11, %v14165_v27 }
 0x6db   : > { %19441 = vmatpush3.bf16.msra.mxu1 %v26361_v36  ;;  %18663 = vmatprep.mubr.msk.f32.mxu0 %vm10968_vm11, %v14414_v55 }
 0x6dc   : > { %18679 = vmatprep.mubr.msk.f32.mxu1 %vm10968_vm11, %v14414_v55  ;;  %18661 = vmatprep.subr.msk.mxu0 %vm10981_vm10, %v14408_v7 }
 0x6dd   : > { %18677 = vmatprep.subr.msk.mxu1 %vm10981_vm10, %v14521_v56 }
 0x6de   : > { %18662 = vmatpush3.msk.msra.mxu0 %vm10981_vm10, %v14408_v7  ;;  %v14685_v58 = vpop.permute.xlu1 %14684  ;;  %v14687_v61 = vpop.permute.xlu0 %14686 }
 0x6df   : > { %18678 = vmatpush3.msk.msra.mxu1 %vm10981_vm10, %v14521_v56  ;;  %18664 = vmatmul.mubr.msk.f32.vlgmr.msra.gmra.mrb[12].mxu0 %vm10968_vm11, %v14416_v13  ;;  %v14697_v50 = vsel %vm3294_vm9, %v14685_v58, %v14687_v61 }
 0x6e0   : > { %18680 = vmatmul.mubr.msk.f32.vlgmr.msra.gmra.mrb[12].mxu1 %vm10968_vm11, %v14416_v13  ;;  %18666 = vmatprep.mubr.msk.f32.mxu0 %vm10968_vm11, %v14418_v54 }
 0x6e1   : > { %18682 = vmatprep.mubr.msk.f32.mxu1 %vm10968_vm11, %v14418_v54  ;;  %19443 = vmatprep.subr.bf16.mxu0 %v26330_v57 }
 0x6e2   : > { %19451 = vmatprep.subr.bf16.mxu1 %v26334_v37  ;;  %19445 = vmatpush3.bf16.msra.mxu0 %v26330_v57 }
 0x6e3   : > { %18667 = vmatmul.mubr.msk.f32.gmra.mrb[14].mxu0 %vm10968_vm11, %v14420_v60  ;;  %19453 = vmatpush3.bf16.msra.mxu1 %v26334_v37  ;;  %v14689_v32 = vpop.permute.xlu1 %14688  ;;  %v14691_v20 = vpop.permute.xlu0 %14690 }
 0x6e4   : > { %18683 = vmatmul.mubr.msk.f32.gmra.mrb[14].mxu1 %vm10968_vm11, %v14420_v60  ;;  %18695 = vmatprep.mubr.msk.f32.mxu0 %vm10968_vm11, %v14696_v46  ;;  %v14698_v42 = vsel %vm3294_vm9, %v14689_v32, %v14691_v20 }
 0x6e5   : > { %18711 = vmatprep.mubr.msk.f32.mxu1 %vm10968_vm11, %v14696_v46  ;;  %19447 = vmatprep.subr.bf16.mxu0 %v26356_v0 }
 0x6e6   : > { %19455 = vmatprep.subr.bf16.mxu1 %v26361_v36  ;;  %19449 = vmatpush3.bf16.msra.mxu0 %v26356_v0 }
 0x6e7   : > { %19457 = vmatpush3.bf16.msra.mxu1 %v26361_v36  ;;  %18693 = vmatprep.subr.msk.mxu0 %vm10981_vm10, %v14671_v23 }
 0x6e8   : > { %18709 = vmatprep.subr.msk.mxu1 %vm10981_vm10, %v14800_v1 }
 0x6ea   : > { %18694 = vmatpush3.msk.msra.mxu0 %vm10981_vm10, %v14671_v23  ;;  %v14695_v63 = vpop.permute.xlu0 %14694 }
 0x6eb   : > { %18710 = vmatpush3.msk.msra.mxu1 %vm10981_vm10, %v14800_v1  ;;  %18696 = vmatmul.mubr.msk.f32.vlgmr.msra.gmra.mrb[16].mxu0 %vm10968_vm11, %v14697_v50  ;;  %v14693_v6 = vpop.permute.xlu1 %14692 }
 0x6ec   : > { %18712 = vmatmul.mubr.msk.f32.vlgmr.msra.gmra.mrb[16].mxu1 %vm10968_vm11, %v14697_v50  ;;  %18698 = vmatprep.mubr.msk.f32.mxu0 %vm10968_vm11, %v14698_v42  ;;  %v14699_v25 = vsel %vm3294_vm9, %v14693_v6, %v14695_v63 }
 0x6ed   : > { %18714 = vmatprep.mubr.msk.f32.mxu1 %vm10968_vm11, %v14698_v42  ;;  %19459 = vmatprep.subr.bf16.mxu0 %v26330_v57 }
 0x6ee   : > { %19467 = vmatprep.subr.bf16.mxu1 %v26334_v37  ;;  %19461 = vmatpush3.bf16.msra.mxu0 %v26330_v57 }
 0x6ef   : > { %19469 = vmatpush3.bf16.msra.mxu1 %v26334_v37  ;;  %18699 = vmatmul.mubr.msk.f32.gmra.mrb[18].mxu0 %vm10968_vm11, %v14699_v25  ;;  %v14953_v45 = vpop.permute.xlu1 %14952 }
 0x6f0   : > { %18715 = vmatmul.mubr.msk.f32.gmra.mrb[18].mxu1 %vm10968_vm11, %v14699_v25  ;;  %19463 = vmatprep.subr.bf16.mxu0 %v26356_v0 }
 0x6f1   : > { %19471 = vmatprep.subr.bf16.mxu1 %v26361_v36  ;;  %18727 = vmatprep.mubr.msk.f32.mxu0 %vm10968_vm11, %v14953_v45  ;;  %v14955_v26 = vpop.permute.xlu0 %14954 }
 0x6f2   : > { %19465 = vmatpush3.bf16.msra.mxu0 %v26356_v0  ;;  %18743 = vmatprep.mubr.msk.f32.mxu1 %vm10968_vm11, %v14953_v45 }
 0x6f3   : > { %19473 = vmatpush3.bf16.msra.mxu1 %v26361_v36  ;;  %18725 = vmatprep.subr.msk.mxu0 %vm10981_vm10, %v14947_v38 }
 0x6f4   : > { %18741 = vmatprep.subr.msk.mxu1 %vm10981_vm10, %v15060_v53 }
 0x6f6   : > { %18726 = vmatpush3.msk.msra.mxu0 %vm10981_vm10, %v14947_v38 }
 0x6f7   : > { %18742 = vmatpush3.msk.msra.mxu1 %vm10981_vm10, %v15060_v53  ;;  %18728 = vmatmul.mubr.msk.f32.vlgmr.msra.gmra.mrb[20].mxu0 %vm10968_vm11, %v14955_v26 }
 0x6f8   : > { %18744 = vmatmul.mubr.msk.f32.vlgmr.msra.gmra.mrb[20].mxu1 %vm10968_vm11, %v14955_v26  ;;  %19475 = vmatprep.subr.bf16.mxu0 %v26330_v57 }
 0x6f9   : > { %19483 = vmatprep.subr.bf16.mxu1 %v26334_v37  ;;  %19477 = vmatpush3.bf16.msra.mxu0 %v26330_v57 }
 0x6fa   : > { %19485 = vmatpush3.bf16.msra.mxu1 %v26334_v37  ;;  %19479 = vmatprep.subr.bf16.mxu0 %v26356_v0 }
 0x6fb   : > { %19487 = vmatprep.subr.bf16.mxu1 %v26361_v36 }
 0x6fd   : > { %19481 = vmatpush3.bf16.msra.mxu0 %v26356_v0 }
 0x6fe   : > { %19489 = vmatpush3.bf16.msra.mxu1 %v26361_v36  ;;  %18757 = vmatprep.subr.msk.mxu0 %vm10981_vm10, %v15202_v39 }
 0x6ff   : > { %18773 = vmatprep.subr.msk.mxu1 %vm10981_vm10, %v15307_v62 }
 0x701   : > { %18758 = vmatpush3.msk.msra.mxu0 %vm10981_vm10, %v15202_v39 }
 0x702   : > { %18774 = vmatpush3.msk.msra.mxu1 %vm10981_vm10, %v15307_v62  ;;  %19491 = vmatprep.subr.bf16.mxu0 %v26330_v57 }
 0x703   : > { %19499 = vmatprep.subr.bf16.mxu1 %v26334_v37 }
 0x707   : > { %v14957_v22 = vpop.permute.xlu1 %14956 }
 0x708   : > { %18730 = vmatprep.mubr.msk.f32.mxu0 %vm10968_vm11, %v14957_v22  ;;  %18746 = vmatprep.mubr.msk.f32.mxu1 %vm10968_vm11, %v14957_v22  ;;  %v14959_v47 = vpop.permute.xlu0 %14958 }
 0x709   : > { %18731 = vmatmul.mubr.msk.f32.gmra.mrb[22].mxu0 %vm10968_vm11, %v14959_v47  ;;  %18747 = vmatmul.mubr.msk.f32.gmra.mrb[22].mxu1 %vm10968_vm11, %v14959_v47 }
 0x70c   : > { %v18281_v5 = vpop.f32.mrb[220].mxu0  ;;  %v18297_v43 = vpop.f32.mrb[220].mxu1 }
 0x70d   : > { %v11423_v24 = vmax.f32 %v18281_v5, %v18297_v43  ;;  %v11310_v30 = vpop.f32.mrb[221].mxu0  ;;  %v11403_v29 = vpop.f32.mrb[221].mxu1 }
 0x70e   : > { %v15183_v17 = vpop.permute.xlu1 %15182  ;;  %v11422_v16 = vmax.f32 %v11310_v30, %v11403_v29 }
 0x70f   : > { %v15194_v9 = vmax.f32 %v26445_v44, %v15183_v17  ;;  %11432 = vrot.lane.b32.xlu1 %v11423_v24, %s20358_s17 }
 0x711   : > { %18759 = vmatprep.mubr.msk.f32.mxu0 %vm10968_vm11, %v15194_v9  ;;  %18775 = vmatprep.mubr.msk.f32.mxu1 %vm10968_vm11, %v15194_v9 }
 0x713   : > { %v15187_v15 = vpop.permute.xlu1 %15186  ;;  %v15185_v21 = vpop.permute.xlu0 %15184  ;;  %11430 = vrot.lane.b32.xlu1 %v11422_v16, %s20358_s17 }
 0x714   : > { %v15196_v28 = vmax.f32 %v26468_v2, %v15187_v15  ;;  %v15195_v10 = vmax.f32 %v26470_v59, %v15185_v21  ;;  %v15469_v2 = vld [vmem:[%s27229_s9 + $0x20] sm:$0xf] }
 0x715   : > { %v15582_v59 = vld [vmem:[%s27230_s10 + $0x20] sm:$0xf] }
 0x716   : > { %18760 = vmatmul.mubr.msk.f32.vlgmr.msra.gmra.mrb[24].mxu0 %vm10968_vm11, %v15195_v10  ;;  %18776 = vmatmul.mubr.msk.f32.vlgmr.msra.gmra.mrb[24].mxu1 %vm10968_vm11, %v15195_v10 }
 0x717   : > { %18762 = vmatprep.mubr.msk.f32.mxu0 %vm10968_vm11, %v15196_v28  ;;  %18778 = vmatprep.mubr.msk.f32.mxu1 %vm10968_vm11, %v15196_v28 }
 0x718   : > { %v15189_v44 = vpop.permute.xlu0 %15188  ;;  %19493 = vmatpush3.bf16.msra.mxu0 %v26330_v57  ;;  %19501 = vmatpush3.bf16.msra.mxu1 %v26334_v37 }
 0x719   : > { %v15197_v40 = vmax.f32 %v26488_v33, %v15189_v44  ;;  %19495 = vmatprep.subr.bf16.mxu0 %v26356_v0  ;;  %19503 = vmatprep.subr.bf16.mxu1 %v26361_v36 }
 0x71b   : > { %18763 = vmatmul.mubr.msk.f32.gmra.mrb[26].mxu0 %vm10968_vm11, %v15197_v40  ;;  %18779 = vmatmul.mubr.msk.f32.gmra.mrb[26].mxu1 %vm10968_vm11, %v15197_v40 }
 0x71c   : > { %19497 = vmatpush3.bf16.msra.mxu0 %v26356_v0  ;;  %19505 = vmatpush3.bf16.msra.mxu1 %v26361_v36 }
 0x71d   : > { %18789 = vmatprep.subr.msk.mxu0 %vm10981_vm10, %v15469_v2  ;;  %18805 = vmatprep.subr.msk.mxu1 %vm10981_vm10, %v15582_v59 }
 0x71e   : > { %v15475_v57 = vpop.permute.xlu1 %15474 }
 0x71f   : > { %18791 = vmatprep.mubr.msk.f32.mxu0 %vm10968_vm11, %v15475_v57  ;;  %18807 = vmatprep.mubr.msk.f32.mxu1 %vm10968_vm11, %v15475_v57 }
 0x720   : > { %18790 = vmatpush3.msk.msra.mxu0 %vm10981_vm10, %v15469_v2  ;;  %18806 = vmatpush3.msk.msra.mxu1 %vm10981_vm10, %v15582_v59  ;;  %v15477_v37 = vpop.permute.xlu0 %15476 }
 0x721   : > { %18792 = vmatmul.mubr.msk.f32.vlgmr.msra.gmra.mrb[28].mxu0 %vm10968_vm11, %v15477_v37  ;;  %18808 = vmatmul.mubr.msk.f32.vlgmr.msra.gmra.mrb[28].mxu1 %vm10968_vm11, %v15477_v37 }
 0x72b   : > { %v15479_v0 = vpop.permute.xlu1 %15478 }
 0x72c   : > { %18794 = vmatprep.mubr.msk.f32.mxu0 %vm10968_vm11, %v15479_v0  ;;  %18810 = vmatprep.mubr.msk.f32.mxu1 %vm10968_vm11, %v15479_v0  ;;  %v15481_v36 = vpop.permute.xlu0 %15480  ;;  %v18284_v33 = vpop.f32.mrb[222].mxu0 }
 0x72d   : > { %18795 = vmatmul.mubr.msk.f32.gmra.mrb[30].mxu0 %vm10968_vm11, %v15481_v36  ;;  %18811 = vmatmul.mubr.msk.f32.gmra.mrb[30].mxu1 %vm10968_vm11, %v15481_v36  ;;  %v18300_v34 = vpop.f32.mrb[222].mxu1  ;;  %v11320_v8 = vpop.f32.mrb[223].mxu0  ;;  %vm14630_vm11 = vcmask 1015632  }
 0x72e   : > { %v11425_v51 = vmax.f32 %v18284_v33, %v18300_v34  ;;  %v11413_v48 = vpop.f32.mrb[223].mxu1 }
 0x72f   : > { %v11424_v11 = vmax.f32 %v11320_v8, %v11413_v48 }
 0x730   : > { %11436 = vrot.lane.b32.xlu1 %v11425_v51, %s20358_s17  ;;  %v18313_v35 = vpop.f32.mrb[224].mxu0  ;;  %v18329_v14 = vpop.f32.mrb[224].mxu1 }
 0x731   : > { %v11678_v19 = vmax.f32 %v18313_v35, %v18329_v14  ;;  %v11565_v52 = vpop.f32.mrb[225].mxu0  ;;  %v11658_v41 = vpop.f32.mrb[225].mxu1 }
 0x732   : > { %v11677_v3 = vmax.f32 %v11565_v52, %v11658_v41 }
 0x734   : > { %11434 = vrot.lane.b32.xlu1 %v11424_v11, %s20358_s17  ;;  %s28144_s17 = smov 126  }
 0x735   : > { %v18316_v13 = vpop.f32.mrb[226].mxu0  ;;  %v18332_v55 = vpop.f32.mrb[226].mxu1 }
 0x736   : > { %v11680_v31 = vmax.f32 %v18316_v13, %v18332_v55  ;;  %v11575_v4 = vpop.f32.mrb[227].mxu0  ;;  %v11668_v27 = vpop.f32.mrb[227].mxu1 }
 0x737   : > { %v11679_v12 = vmax.f32 %v11575_v4, %v11668_v27 }
 0x738   : > { %11687 = vrot.lane.b32.xlu1 %v11678_v19, %s20359_s20 }
 0x73b   : > { %v18345_v60 = vpop.f32.mrb[228].mxu0  ;;  %v18361_v54 = vpop.f32.mrb[228].mxu1 }
 0x73c   : > { %v11957_v7 = vmax.f32 %v18345_v60, %v18361_v54  ;;  %v11844_v56 = vpop.f32.mrb[229].mxu0  ;;  %v11937_v49 = vpop.f32.mrb[229].mxu1  ;;  %11685 = vrot.lane.b32.xlu1 %v11677_v3, %s20359_s20 }
 0x73d   : > { %v11956_v18 = vmax.f32 %v11844_v56, %v11937_v49 }
 0x740   : > { %v18348_v58 = vpop.f32.mrb[230].mxu0  ;;  %v18364_v61 = vpop.f32.mrb[230].mxu1  ;;  %11691 = vrot.lane.b32.xlu1 %v11680_v31, %s20359_s20 }
 0x741   : > { %v11959_v46 = vmax.f32 %v18348_v58, %v18364_v61  ;;  %v11854_v23 = vpop.f32.mrb[231].mxu0  ;;  %v11947_v1 = vpop.f32.mrb[231].mxu1 }
 0x742   : > { %v11958_v32 = vmax.f32 %v11854_v23, %v11947_v1 }
 0x744   : > { %11689 = vrot.lane.b32.xlu1 %v11679_v12, %s20359_s20 }
 0x747   : > { %v18377_v20 = vpop.f32.mrb[232].mxu0 }
 0x748   : > { %v18393_v50 = vpop.f32.mrb[232].mxu1  ;;  %v12119_v42 = vpop.f32.mrb[233].mxu0  ;;  %11966 = vrot.lane.b32.xlu1 %v11957_v7, %s20360_s28 }
 0x749   : > { %v12232_v63 = vmax.f32 %v18377_v20, %v18393_v50  ;;  %v12212_v6 = vpop.f32.mrb[233].mxu1 }
 0x74a   : > { %v12231_v25 = vmax.f32 %v12119_v42, %v12212_v6 }
 0x74b   : > { %12241 = vrot.lane.b32.xlu0 %v12232_v63, %s20361_s29 }
 0x74c   : > { %v18380_v45 = vpop.f32.mrb[234].mxu0  ;;  %11964 = vrot.lane.b32.xlu1 %v11956_v18, %s20360_s28 }
 0x74d   : > { %v18396_v38 = vpop.f32.mrb[234].mxu1  ;;  %v12129_v53 = vpop.f32.mrb[235].mxu0 }
 0x74e   : > { %v12234_v26 = vmax.f32 %v18380_v45, %v18396_v38  ;;  %v12222_v39 = vpop.f32.mrb[235].mxu1 }
 0x74f   : > { %v12233_v62 = vmax.f32 %v12129_v53, %v12222_v39 }
 0x750   : > { %11970 = vrot.lane.b32.xlu1 %v11959_v46, %s20360_s28 }
 0x751   : > { %12243 = vrot.lane.b32.xlu0 %v12233_v62, %s20361_s29 }
 0x753   : > { %v18409_v22 = vpop.f32.mrb[236].mxu0 }
 0x754   : > { %v18425_v47 = vpop.f32.mrb[236].mxu1  ;;  %v12374_v5 = vpop.f32.mrb[237].mxu0  ;;  %11968 = vrot.lane.b32.xlu1 %v11958_v32, %s20360_s28 }
 0x755   : > { %v12487_v43 = vmax.f32 %v18409_v22, %v18425_v47  ;;  %v12467_v24 = vpop.f32.mrb[237].mxu1 }
 0x756   : > { %v12486_v30 = vmax.f32 %v12374_v5, %v12467_v24 }
 0x757   : > { %12496 = vrot.lane.b32.xlu0 %v12487_v43, %s20362_s0  ;;  %v18412_v29 = vpop.f32.mrb[238].mxu0 }
 0x758   : > { %v18428_v17 = vpop.f32.mrb[238].mxu1  ;;  %v12384_v16 = vpop.f32.mrb[239].mxu0  ;;  %12239 = vrot.lane.b32.xlu1 %v12231_v25, %s20361_s29 }
 0x759   : > { %v12489_v9 = vmax.f32 %v18412_v29, %v18428_v17  ;;  %v12477_v15 = vpop.f32.mrb[239].mxu1 }
 0x75a   : > { %v12488_v21 = vmax.f32 %v12384_v16, %v12477_v15 }
 0x75b   : > { %12494 = vrot.lane.b32.xlu0 %v12486_v30, %s20362_s0 }
 0x75c   : > { %12245 = vrot.lane.b32.xlu1 %v12234_v26, %s20361_s29  ;;  %s20371_s29 = smov 125  }
 0x75f   : > { %v18441_v28 = vpop.f32.mrb[240].mxu0  ;;  %12498 = vrot.lane.b32.xlu0 %v12488_v21, %s20362_s0 }
 0x760   : > { %v18457_v10 = vpop.f32.mrb[240].mxu1  ;;  %v12653_v44 = vpop.f32.mrb[241].mxu0  ;;  %12500 = vrot.lane.b32.xlu1 %v12489_v9, %s20362_s0  ;;  %s28145_s0 = smov 96  }
 0x761   : > { %v12766_v40 = vmax.f32 %v18441_v28, %v18457_v10  ;;  %v12746_v2 = vpop.f32.mrb[241].mxu1 }
 0x762   : > { %v12765_v59 = vmax.f32 %v12653_v44, %v12746_v2 }
 0x763   : > { %12775 = vrot.lane.b32.xlu0 %v12766_v40, %s20363_s26 }
 0x764   : > { %v18444_v57 = vpop.f32.mrb[242].mxu0 }
 0x765   : > { %v18460_v37 = vpop.f32.mrb[242].mxu1  ;;  %v12663_v0 = vpop.f32.mrb[243].mxu0 }
 0x766   : > { %v12768_v36 = vmax.f32 %v18444_v57, %v18460_v37  ;;  %v12756_v33 = vpop.f32.mrb[243].mxu1 }
 0x767   : > { %12773 = vrot.lane.b32.xlu0 %v12765_v59, %s20363_s26  ;;  %v12767_v34 = vmax.f32 %v12663_v0, %v12756_v33 }
 0x768   : > { %12779 = vrot.lane.b32.xlu1 %v12768_v36, %s20363_s26 }
 0x76b   : > { %12777 = vrot.lane.b32.xlu0 %v12767_v34, %s20363_s26  ;;  %s20372_s26 = smov 123  }
 0x76c   : > { %v18473_v8 = vpop.f32.mrb[244].mxu0 }
 0x76d   : > { %v18489_v51 = vpop.f32.mrb[244].mxu1  ;;  %v12908_v48 = vpop.f32.mrb[245].mxu0 }
 0x76e   : > { %v13021_v11 = vmax.f32 %v18473_v8, %v18489_v51  ;;  %v13001_v35 = vpop.f32.mrb[245].mxu1  ;;  %v15724_v51 = vld [vmem:[%s27228_s8 + $0x80] sm:$0xff] }
 0x76f   : > { %v13020_v14 = vmax.f32 %v12908_v48, %v13001_v35  ;;  %v15725_v48 = vld [vmem:[%s27228_s8 + $0x88] sm:$0xff] }
 0x770   : > { %13030 = vrot.lane.b32.xlu0 %v13021_v11, %s28144_s17  ;;  %v15708_v11 = vld [vmem:[%s27228_s8] sm:$0xff] }
 0x771   : > { %v18476_v19 = vpop.f32.mrb[246].mxu0  ;;  %v18492_v52 = vpop.f32.mrb[246].mxu1  ;;  %13028 = vrot.lane.b32.xlu1 %v13020_v14, %s28144_s17 }
 0x772   : > { %v13023_v41 = vmax.f32 %v18476_v19, %v18492_v52  ;;  %v12918_v3 = vpop.f32.mrb[247].mxu0  ;;  %v13011_v13 = vpop.f32.mrb[247].mxu1  ;;  %v19506_v19 = vpack.c.bf16 %v15725_v48, %v15724_v51  ;;  %v15709_v52 = vld [vmem:[%s27228_s8 + $0x8] sm:$0xff] }
 0x773   : > { %v13022_v55 = vmax.f32 %v12918_v3, %v13011_v13  ;;  %v19508_v13 = vpack.c.bf16 %v15709_v52, %v15708_v11  ;;  %v15737_v52 = vld [vmem:[%s27228_s8 + $0xe8] sm:$0xff] }
 0x774   : > { %13034 = vrot.lane.b32.xlu0 %v13023_v41, %s28144_s17  ;;  %19507 = vmatprep.subr.bf16.mxu0 %v19506_v19  ;;  %v15736_v19 = vld [vmem:[%s27228_s8 + $0xe0] sm:$0xff] }
 0x775   : > { %19509 = vmatpush3.bf16.msra.mxu0 %v19508_v13 }
 0x777   : > { %v18505_v31 = vpop.f32.mrb[248].mxu0  ;;  %v18521_v4 = vpop.f32.mrb[248].mxu1 }
 0x778   : > { %v13272_v27 = vmax.f32 %v18505_v31, %v18521_v4  ;;  %v13159_v12 = vpop.f32.mrb[249].mxu0  ;;  %v13252_v60 = vpop.f32.mrb[249].mxu1  ;;  %13032 = vrot.lane.b32.xlu0 %v13022_v55, %s28144_s17  ;;  %v15726_v4 = vld [vmem:[%s27228_s8 + $0x90] sm:$0xff] }
 0x779   : > { %v13271_v54 = vmax.f32 %v13159_v12, %v13252_v60  ;;  %v15710_v12 = vld [vmem:[%s27228_s8 + $0x10] sm:$0xff] }
 0x77a   : > { %13281 = vrot.lane.b32.xlu1 %v13272_v27, %s20357_s27  ;;  %v15727_v27 = vld [vmem:[%s27228_s8 + $0x98] sm:$0xff] }
 0x77b   : > { %v18508_v7 = vpop.f32.mrb[250].mxu0 }
 0x77c   : > { %v18524_v56 = vpop.f32.mrb[250].mxu1  ;;  %v13169_v49 = vpop.f32.mrb[251].mxu0  ;;  %13279 = vrot.lane.b32.xlu0 %v13271_v54, %s20357_s27  ;;  %v19510_v54 = vpack.c.bf16 %v15727_v27, %v15726_v4 }
 0x77d   : > { %v13274_v18 = vmax.f32 %v18508_v7, %v18524_v56  ;;  %v13262_v58 = vpop.f32.mrb[251].mxu1  ;;  %v15711_v7 = vld [vmem:[%s27228_s8 + $0x18] sm:$0xff] }
 0x77e   : > { %v13273_v61 = vmax.f32 %v13169_v49, %v13262_v58  ;;  %19511 = vmatprep.subr.bf16.mxu0 %v19510_v54 }
 0x77f   : > { %13285 = vrot.lane.b32.xlu1 %v13274_v18, %s20357_s27  ;;  %v19512_v18 = vpack.c.bf16 %v15711_v7, %v15710_v12 }
 0x781   : > { %v11433_v46 = vpop.permute.xlu1 %11432  ;;  %19513 = vmatpush3.bf16.msra.mxu0 %v19512_v18  ;;  %v15722_v18 = vld [vmem:[%s27228_s8 + $0x70] sm:$0xff] }
 0x782   : > { %11444 = vst.msk [vmem:[#allocation4 + $0x18] sm:$0xff] %vm11442_vm13, %v11433_v46 }
 0x783   : > { %v18537_v23 = vpop.f32.mrb[252].mxu0  ;;  %13283 = vrot.lane.b32.xlu1 %v13273_v61, %s20357_s27  ;;  %s20365_s27 = smov 52  }
 0x784   : > { %v18553_v1 = vpop.f32.mrb[252].mxu1  ;;  %v13434_v32 = vpop.f32.mrb[253].mxu0 }
 0x785   : > { %v13547_v20 = vmax.f32 %v18537_v23, %v18553_v1  ;;  %v13527_v50 = vpop.f32.mrb[253].mxu1  ;;  %v11431_v42 = vpop.permute.xlu1 %11430  ;;  %v15728_v1 = vld [vmem:[%s27228_s8 + $0xa0] sm:$0xff] }
 0x786   : > { %v13546_v63 = vmax.f32 %v13434_v32, %v13527_v50  ;;  %11443 = vst.msk [vmem:[#allocation4] sm:$0xff] %vm11442_vm13, %v11431_v42  ;;  %v15729_v32 = vld [vmem:[%s27228_s8 + $0xa8] sm:$0xff] }
 0x787   : > { %v18540_v6 = vpop.f32.mrb[254].mxu0  ;;  %13556 = vrot.lane.b32.xlu1 %v13547_v20, %s20364_s30  ;;  %v15712_v20 = vld [vmem:[%s27228_s8 + $0x20] sm:$0xff]  ;;  %v19514_v50 = vpack.c.bf16 %v15729_v32, %v15728_v1  ;;  %v15713_v42 = vld [vmem:[%s27228_s8 + $0x28] sm:$0xff]  ;;  %v15723_v1 = vld [vmem:[%s27228_s8 + $0x78] sm:$0xff] }
 0x788   : > { %v18556_v25 = vpop.f32.mrb[254].mxu1  ;;  %13554 = vrot.lane.b32.xlu0 %v13546_v63, %s20364_s30  ;;  %v13444_v45 = vpop.f32.mrb[255].mxu0  ;;  %v19516_v63 = vpack.c.bf16 %v15713_v42, %v15712_v20  ;;  %v19536_v20 = vpack.c.bf16 %v15723_v1, %v15722_v18 }
 0x789   : > { %v13549_v38 = vmax.f32 %v18540_v6, %v18556_v25  ;;  %v13537_v53 = vpop.f32.mrb[255].mxu1  ;;  %19515 = vmatprep.subr.bf16.mxu0 %v19514_v50 }
 0x78a   : > { %v13548_v26 = vmax.f32 %v13444_v45, %v13537_v53  ;;  %19517 = vmatpush3.bf16.msra.mxu0 %v19516_v63  ;;  %v15730_v53 = vld [vmem:[%s27228_s8 + $0xb0] sm:$0xff] }
 0x78b   : > { %13560 = vrot.lane.b32.xlu1 %v13549_v38, %s20364_s30 }
 0x78f   : > { %v18569_v39 = vpop.f32.mrb[0].mxu0  ;;  %13558 = vrot.lane.b32.xlu1 %v13548_v26, %s20364_s30  ;;  %v15731_v26 = vld [vmem:[%s27228_s8 + $0xb8] sm:$0xff]  ;;  %s20367_s30 = smov 106  }
 0x790   : > { %v18585_v62 = vpop.f32.mrb[0].mxu1  ;;  %v13689_v22 = vpop.f32.mrb[1].mxu0 }
 0x791   : > { %v13802_v47 = vmax.f32 %v18569_v39, %v18585_v62  ;;  %v13782_v5 = vpop.f32.mrb[1].mxu1  ;;  %v15714_v39 = vld [vmem:[%s27228_s8 + $0x30] sm:$0xff] }
 0x792   : > { %v13801_v43 = vmax.f32 %v13689_v22, %v13782_v5  ;;  %v15715_v5 = vld [vmem:[%s27228_s8 + $0x38] sm:$0xff] }
 0x793   : > { %13811 = vrot.lane.b32.xlu0 %v13802_v47, %s20365_s27  ;;  %v18572_v24 = vpop.f32.mrb[2].mxu0  ;;  %v19518_v47 = vpack.c.bf16 %v15731_v26, %v15730_v53 }
 0x794   : > { %v18588_v30 = vpop.f32.mrb[2].mxu1  ;;  %v13699_v29 = vpop.f32.mrb[3].mxu0 }
 0x795   : > { %v13804_v17 = vmax.f32 %v18572_v24, %v18588_v30  ;;  %v13792_v16 = vpop.f32.mrb[3].mxu1  ;;  %v19520_v24 = vpack.c.bf16 %v15715_v5, %v15714_v39  ;;  %19519 = vmatprep.subr.bf16.mxu0 %v19518_v47 }
 0x796   : > { %v13803_v9 = vmax.f32 %v13699_v29, %v13792_v16 }
 0x797   : > { %13815 = vrot.lane.b32.xlu1 %v13804_v17, %s20365_s27  ;;  %13809 = vrot.lane.b32.xlu0 %v13801_v43, %s20365_s27 }
 0x798   : > { %19521 = vmatpush3.bf16.msra.mxu0 %v19520_v24 }
 0x79b   : > { %v18601_v15 = vpop.f32.mrb[4].mxu0  ;;  %13813 = vrot.lane.b32.xlu1 %v13803_v9, %s20365_s27  ;;  %v15732_v9 = vld [vmem:[%s27228_s8 + $0xc0] sm:$0xff] }
 0x79c   : > { %v18617_v21 = vpop.f32.mrb[4].mxu1  ;;  %v13968_v28 = vpop.f32.mrb[5].mxu0 }
 0x79d   : > { %v14081_v10 = vmax.f32 %v18601_v15, %v18617_v21  ;;  %v14061_v44 = vpop.f32.mrb[5].mxu1  ;;  %v15733_v15 = vld [vmem:[%s27228_s8 + $0xc8] sm:$0xff]  ;;  %v15716_v21 = vld [vmem:[%s27228_s8 + $0x40] sm:$0xff] }
 0x79e   : > { %v14080_v40 = vmax.f32 %v13968_v28, %v14061_v44  ;;  %v19522_v44 = vpack.c.bf16 %v15733_v15, %v15732_v9 }
 0x79f   : > { %14090 = vrot.lane.b32.xlu1 %v14081_v10, %s20366_s18 }
 0x7a0   : > { %14088 = vrot.lane.b32.xlu0 %v14080_v40, %s20366_s18  ;;  %v18604_v2 = vpop.f32.mrb[6].mxu0  ;;  %v15717_v40 = vld [vmem:[%s27228_s8 + $0x48] sm:$0xff]  ;;  %19523 = vmatprep.subr.bf16.mxu0 %v19522_v44  ;;  %v15740_v44 = vld [vmem:[%s27228_s8 + $0x100] sm:$0xff] }
 0x7a1   : > { %v18620_v59 = vpop.f32.mrb[6].mxu1  ;;  %v13978_v57 = vpop.f32.mrb[7].mxu0 }
 0x7a2   : > { %v14083_v37 = vmax.f32 %v18604_v2, %v18620_v59  ;;  %v14071_v0 = vpop.f32.mrb[7].mxu1  ;;  %v11437_v36 = vpop.permute.xlu1 %11436  ;;  %v19524_v59 = vpack.c.bf16 %v15717_v40, %v15716_v21  ;;  %v15741_v40 = vld [vmem:[%s27228_s8 + $0x108] sm:$0xff] }
 0x7a3   : > { %v14082_v33 = vmax.f32 %v13978_v57, %v14071_v0  ;;  %11446 = vst.msk [vmem:[#allocation4 + $0x48] sm:$0xff] %vm11442_vm13, %v11437_v36  ;;  %v15735_v0 = vld [vmem:[%s27228_s8 + $0xd8] sm:$0xff]  ;;  %v15718_v36 = vld [vmem:[%s27228_s8 + $0x50] sm:$0xff] }
 0x7a4   : > { %14094 = vrot.lane.b32.xlu0 %v14083_v37, %s20366_s18  ;;  %19525 = vmatpush3.bf16.msra.mxu0 %v19524_v59  ;;  %v15734_v37 = vld [vmem:[%s27228_s8 + $0xd0] sm:$0xff]  ;;  %v26925_v59 = vpack.c.bf16 %v15741_v40, %v15740_v44  ;;  %v15745_v44 = vld [vmem:[%s27228_s8 + $0x128] sm:$0xff] }
 0x7a5   : > { %14092 = vrot.lane.b32.xlu1 %v14082_v33, %s20366_s18  ;;  %v19526_v33 = vpack.c.bf16 %v15735_v0, %v15734_v37  ;;  %s20370_s18 = smov 50  }
 0x7a6   : > { %v11435_v34 = vpop.permute.xlu1 %11434 }
 0x7a7   : > { %v18633_v8 = vpop.f32.mrb[8].mxu0  ;;  %11445 = vst.msk [vmem:[#allocation4 + $0x30] sm:$0xff] %vm11442_vm13, %v11435_v34  ;;  %v15719_v34 = vld [vmem:[%s27228_s8 + $0x58] sm:$0xff]  ;;  %19527 = vmatprep.subr.bf16.mxu0 %v19526_v33  ;;  %vm14911_vm13 = vcmask 113664  }
 0x7a8   : > { %v18649_v35 = vpop.f32.mrb[8].mxu1  ;;  %v14243_v14 = vpop.f32.mrb[9].mxu0  ;;  %v19528_v51 = vpack.c.bf16 %v15719_v34, %v15718_v36 }
 0x7a9   : > { %v14356_v41 = vmax.f32 %v18633_v8, %v18649_v35  ;;  %v14336_v3 = vpop.f32.mrb[9].mxu1 }
 0x7aa   : > { %v14355_v55 = vmax.f32 %v14243_v14, %v14336_v3  ;;  %v11688_v31 = vpop.permute.xlu1 %11687  ;;  %19529 = vmatpush3.bf16.msra.mxu0 %v19528_v51 }
 0x7ab   : > { %14365 = vrot.lane.b32.xlu0 %v14356_v41, %s20345_s25  ;;  %11699 = vst.msk [vmem:[#allocation4 + $0x18] sm:$0xff] %vm11697_vm14, %v11688_v31  ;;  %v15720_v41 = vld [vmem:[%s27228_s8 + $0x60] sm:$0xff]  ;;  %v15721_v31 = vld [vmem:[%s27228_s8 + $0x68] sm:$0xff] }
 0x7ac   : > { %14363 = vrot.lane.b32.xlu1 %v14355_v55, %s20345_s25  ;;  %v18636_v60 = vpop.f32.mrb[10].mxu0  ;;  %v19530_v55 = vpack.c.bf16 %v15737_v52, %v15736_v19  ;;  %v19532_v27 = vpack.c.bf16 %v15721_v31, %v15720_v41 }
 0x7ad   : > { %v18652_v56 = vpop.f32.mrb[10].mxu1  ;;  %v14253_v49 = vpop.f32.mrb[11].mxu0 }
 0x7ae   : > { %v14358_v58 = vmax.f32 %v18636_v60, %v18652_v56  ;;  %v14346_v61 = vpop.f32.mrb[11].mxu1  ;;  %v11686_v46 = vpop.permute.xlu1 %11685  ;;  %19531 = vmatprep.subr.bf16.mxu0 %v19530_v55  ;;  %v15738_v56 = vld [vmem:[%s27228_s8 + $0xf0] sm:$0xff] }
 0x7af   : > { %v14357_v23 = vmax.f32 %v14253_v49, %v14346_v61  ;;  %11698 = vst.msk [vmem:[#allocation4] sm:$0xff] %vm11697_vm14, %v11686_v46  ;;  %19533 = vmatpush3.bf16.msra.mxu0 %v19532_v27  ;;  %v15739_v49 = vld [vmem:[%s27228_s8 + $0xf8] sm:$0xff] }
 0x7b0   : > { %14369 = vrot.lane.b32.xlu0 %v14358_v58, %s20345_s25 }
 0x7b2   : > { %v18665_v6 = vpop.f32.mrb[12].mxu0  ;;  %v11692_v25 = vpop.permute.xlu1 %11691 }
 0x7b3   : > { %v18681_v45 = vpop.f32.mrb[12].mxu1  ;;  %v14498_v38 = vpop.f32.mrb[13].mxu0  ;;  %11701 = vst.msk [vmem:[#allocation4 + $0x48] sm:$0xff] %vm11697_vm14, %v11692_v25 }
 0x7b4   : > { %v14611_v62 = vmax.f32 %v18665_v6, %v18681_v45  ;;  %v14591_v22 = vpop.f32.mrb[13].mxu1  ;;  %14367 = vrot.lane.b32.xlu0 %v14357_v23, %s20345_s25  ;;  %v19534_v23 = vpack.c.bf16 %v15739_v49, %v15738_v56  ;;  %s20368_s25 = smov 124  }
 0x7b5   : > { %v14610_v43 = vmax.f32 %v14498_v38, %v14591_v22 }
 0x7b6   : > { %v18668_v30 = vpop.f32.mrb[14].mxu0  ;;  %v11690_v29 = vpop.permute.xlu1 %11689  ;;  %19535 = vmatprep.subr.bf16.mxu0 %v19534_v23 }
 0x7b7   : > { %v18684_v17 = vpop.f32.mrb[14].mxu1  ;;  %v14508_v16 = vpop.f32.mrb[15].mxu0  ;;  %11700 = vst.msk [vmem:[#allocation4 + $0x30] sm:$0xff] %vm11697_vm14, %v11690_v29  ;;  %19537 = vmatpush3.bf16.msra.mxu0 %v19536_v20  ;;  %vm15169_vm14 = vcmask 261232  }
 0x7b8   : > { %v14613_v28 = vmax.f32 %v18668_v30, %v18684_v17  ;;  %v14601_v10 = vpop.f32.mrb[15].mxu1  ;;  %14620 = vrot.lane.b32.xlu0 %v14611_v62, %s20367_s30  ;;  %19539 = vmatprep.subr.bf16.mxu0 %v26925_v59 }
 0x7b9   : > { %v14612_v2 = vmax.f32 %v14508_v16, %v14601_v10 }
 0x7ba   : > { %v11967_v57 = vpop.permute.xlu1 %11966 }
 0x7bb   : > { %11978 = vst.msk [vmem:[#allocation4 + $0x18] sm:$0xff] %vm11976_vm15, %v11967_v57 }
 0x7bc   : > { %14618 = vrot.lane.b32.xlu0 %v14610_v43, %s20367_s30 }
 0x7bd   : > { %v12242_v8 = vpop.permute.xlu0 %12241 }
 0x7be   : > { %v18697_v48 = vpop.f32.mrb[16].mxu0  ;;  %v11965_v11 = vpop.permute.xlu1 %11964  ;;  %12253 = vst.msk [vmem:[#allocation4 + $0x18] sm:$0xff] %vm12251_vm0, %v12242_v8 }
 0x7bf   : > { %v18713_v35 = vpop.f32.mrb[16].mxu1  ;;  %v14777_v14 = vpop.f32.mrb[17].mxu0  ;;  %11977 = vst.msk [vmem:[#allocation4] sm:$0xff] %vm11976_vm15, %v11965_v11 }
 0x7c0   : > { %v14890_v3 = vmax.f32 %v18697_v48, %v18713_v35  ;;  %v14870_v13 = vpop.f32.mrb[17].mxu1  ;;  %14624 = vrot.lane.b32.xlu0 %v14613_v28, %s20367_s30 }
 0x7c1   : > { %v14889_v4 = vmax.f32 %v14777_v14, %v14870_v13 }
 0x7c2   : > { %v18700_v12 = vpop.f32.mrb[18].mxu0  ;;  %v11971_v60 = vpop.permute.xlu1 %11970 }
 0x7c3   : > { %v18716_v54 = vpop.f32.mrb[18].mxu1  ;;  %v14787_v7 = vpop.f32.mrb[19].mxu0  ;;  %11980 = vst.msk [vmem:[#allocation4 + $0x48] sm:$0xff] %vm11976_vm15, %v11971_v60 }
 0x7c4   : > { %14622 = vrot.lane.b32.xlu0 %v14612_v2, %s20367_s30  ;;  %v14892_v58 = vmax.f32 %v18700_v12, %v18716_v54  ;;  %v14880_v61 = vpop.f32.mrb[19].mxu1  ;;  %v12244_v46 = vpop.permute.xlu0 %12243  ;;  %s20369_s30 = smov 14  }
 0x7c5   : > { %v14891_v32 = vmax.f32 %v14787_v7, %v14880_v61 }
 0x7c6   : > { %v11969_v50 = vpop.permute.xlu1 %11968 }
 0x7c7   : > { %11979 = vst.msk [vmem:[#allocation4 + $0x30] sm:$0xff] %vm11976_vm15, %v11969_v50  ;;  %vm15416_vm15 = vcmask 408832  }
 0x7c8   : > { %14899 = vrot.lane.b32.xlu0 %v14890_v3, %s20368_s25  ;;  %12254 = vst.msk [vmem:[#allocation4 + $0x30] sm:$0xff] %vm12251_vm0, %v12244_v46 }
 0x7c9   : > { %v12497_v42 = vpop.permute.xlu0 %12496 }
 0x7ca   : > { %v18729_v63 = vpop.f32.mrb[20].mxu0  ;;  %12508 = vst.msk [vmem:[#allocation4 + $0x18] sm:$0xff] %vm12506_vm1, %v12497_v42  ;;  %v12240_v6 = vpop.permute.xlu1 %12239 }
 0x7cb   : > { %v18745_v25 = vpop.f32.mrb[20].mxu1  ;;  %v15037_v45 = vpop.f32.mrb[21].mxu0  ;;  %12252 = vst.msk [vmem:[#allocation4] sm:$0xff] %vm12251_vm0, %v12240_v6 }
 0x7cc   : > { %14897 = vrot.lane.b32.xlu0 %v14889_v4, %s20368_s25  ;;  %v15150_v38 = vmax.f32 %v18729_v63, %v18745_v25  ;;  %v15130_v53 = vpop.f32.mrb[21].mxu1 }
 0x7cd   : > { %v15149_v26 = vmax.f32 %v15037_v45, %v15130_v53  ;;  %v12495_v39 = vpop.permute.xlu0 %12494 }
 0x7ce   : > { %12507 = vst.msk [vmem:[#allocation4] sm:$0xff] %vm12506_vm1, %v12495_v39  ;;  %v12246_v62 = vpop.permute.xlu1 %12245 }
 0x7cf   : > { %15157 = vrot.lane.b32.xlu1 %v15149_v26, %s20369_s30  ;;  %12255 = vst.msk [vmem:[#allocation4 + $0x48] sm:$0xff] %vm12251_vm0, %v12246_v62  ;;  %vm15691_vm0 = vcmask 556432  }
 0x7d0   : > { %14903 = vrot.lane.b32.xlu0 %v14892_v58, %s20368_s25 }
 0x7d1   : > { %v12499_v22 = vpop.permute.xlu0 %12498 }
 0x7d2   : > { %12509 = vst.msk [vmem:[#allocation4 + $0x30] sm:$0xff] %vm12506_vm1, %v12499_v22  ;;  %v12501_v47 = vpop.permute.xlu1 %12500 }
 0x7d3   : > { %12510 = vst.msk [vmem:[#allocation4 + $0x48] sm:$0xff] %vm12506_vm1, %v12501_v47  ;;  %vm15749_vm1 = vcmask 556032  }
 0x7d4   : > { %14901 = vrot.lane.b32.xlu0 %v14891_v32, %s20368_s25 }
 0x7d5   : > { %v12776_v5 = vpop.permute.xlu0 %12775 }
 0x7d6   : > { %12787 = vst.msk [vmem:[#allocation4 + $0x18] sm:$0xff] %vm12785_vm2, %v12776_v5 }
 0x7d8   : > { %15159 = vrot.lane.b32.xlu0 %v15150_v38, %s20369_s30 }
 0x7d9   : > { %v12774_v43 = vpop.permute.xlu0 %12773 }
 0x7da   : > { %12786 = vst.msk [vmem:[#allocation4] sm:$0xff] %vm12785_vm2, %v12774_v43  ;;  %v12780_v24 = vpop.permute.xlu1 %12779 }
 0x7db   : > { %12789 = vst.msk [vmem:[#allocation4 + $0x48] sm:$0xff] %vm12785_vm2, %v12780_v24 }
 0x7dc   : > { %v18732_v30 = vpop.f32.mrb[22].mxu0  ;;  %v18748_v29 = vpop.f32.mrb[22].mxu1 }
 0x7dd   : > { %v12778_v17 = vpop.permute.xlu0 %12777  ;;  %v15152_v16 = vmax.f32 %v18732_v30, %v18748_v29  ;;  %v15047_v9 = vpop.f32.mrb[23].mxu0 }
 0x7de   : > { %12788 = vst.msk [vmem:[#allocation4 + $0x30] sm:$0xff] %vm12785_vm2, %v12778_v17  ;;  %v15140_v15 = vpop.f32.mrb[23].mxu1  ;;  %v15742_v17 = vld [vmem:[%s27228_s8 + $0x110] sm:$0xff]  ;;  %vm17244_vm2 = vcmask 1024  }
 0x7df   : > { %v15151_v21 = vmax.f32 %v15047_v9, %v15140_v15  ;;  %15163 = vrot.lane.b32.xlu0 %v15152_v16, %s20369_s30  ;;  %v15743_v16 = vld [vmem:[%s27228_s8 + $0x118] sm:$0xff] }
 0x7e1   : > { %15161 = vrot.lane.b32.xlu1 %v15151_v21, %s20369_s30  ;;  %v19542_v21 = vpack.c.bf16 %v15743_v16, %v15742_v17  ;;  %s28147_s30 = smov 127   ;;  %v27024_v17 = vld [vmem:[%s27226_s6 + $0x20] sm:$0xff]  ;;  %v27032_v16 = vld [vmem:[%s27226_s6 + $0x38] sm:$0xff] }
 0x7e2   : > { %v13031_v28 = vpop.permute.xlu0 %13030 }
 0x7e3   : > { %v13029_v10 = vpop.permute.xlu1 %13028  ;;  %13043 = vst.msk [vmem:[#allocation4 + $0x18] sm:$0xff] %vm13040_vm3, %v13031_v28 }
 0x7e4   : > { %13044 = vst.msk [vmem:[#allocation4 + $0x20] sm:$0xff] %vm3408_vm8, %v13031_v28  ;;  %13042 = vst.msk [vmem:[#allocation4 + $0x8] sm:$0xff] %vm3408_vm8, %v13029_v10 }
 0x7e5   : > { %13041 = vst.msk [vmem:[#allocation4] sm:$0xff] %vm13040_vm3, %v13029_v10  ;;  %v15744_v10 = vld [vmem:[%s27228_s8 + $0x120] sm:$0xff] }
 0x7e6   : > { %v13035_v2 = vpop.permute.xlu0 %13034 }
 0x7e7   : > { %13047 = vst.msk [vmem:[#allocation4 + $0x48] sm:$0xff] %vm13040_vm3, %v13035_v2 }
 0x7e8   : > { %13048 = vst.msk [vmem:[#allocation4 + $0x50] sm:$0xff] %vm3408_vm8, %v13035_v2 }
 0x7e9   : > { %v18761_v57 = vpop.f32.mrb[24].mxu0  ;;  %v18777_v37 = vpop.f32.mrb[24].mxu1 }
 0x7ea   : > { %v15397_v0 = vmax.f32 %v18761_v57, %v18777_v37  ;;  %v15284_v36 = vpop.f32.mrb[25].mxu0  ;;  %v15377_v33 = vpop.f32.mrb[25].mxu1  ;;  %v19546_v57 = vpack.c.bf16 %v15745_v44, %v15744_v10  ;;  %v15699_v37 = vld [vmem:[#allocation4 + $0x18] sm:$0xff] }
 0x7eb   : > { %v15396_v34 = vmax.f32 %v15284_v36, %v15377_v33  ;;  %v13033_v8 = vpop.permute.xlu0 %13032  ;;  %v15747_v36 = vld [vmem:[%s27228_s8 + $0x138] sm:$0xff] }
 0x7ec   : > { %15406 = vrot.lane.b32.xlu0 %v15397_v0, %s28138_s24  ;;  %v13282_v51 = vpop.permute.xlu1 %13281  ;;  %13045 = vst.msk [vmem:[#allocation4 + $0x30] sm:$0xff] %vm13040_vm3, %v13033_v8  ;;  %v15696_v28 = vld [vmem:[#allocation4] sm:$0xff]  ;;  %v15746_v0 = vld [vmem:[%s27228_s8 + $0x130] sm:$0xff] }
 0x7ed   : > { %13046 = vst.msk [vmem:[#allocation4 + $0x38] sm:$0xff] %vm3408_vm8, %v13033_v8  ;;  %15404 = vrot.lane.b32.xlu1 %v15396_v34, %s28138_s24  ;;  %vm14375_vm8 = vcmask 868032   ;;  %v19550_v34 = vpack.c.bf16 %v15747_v36, %v15746_v0 }
 0x7ee   : > { %13293 = vst.msk [vmem:[#allocation4 + $0x20] sm:$0xff] %vm13291_vm4, %v13282_v51  ;;  %v18764_v48 = vpop.f32.mrb[26].mxu0  ;;  %v18780_v11 = vpop.f32.mrb[26].mxu1 }
 0x7ef   : > { %v15399_v35 = vmax.f32 %v18764_v48, %v18780_v11  ;;  %v15294_v14 = vpop.f32.mrb[27].mxu0  ;;  %v15387_v19 = vpop.f32.mrb[27].mxu1  ;;  %v15705_v48 = vld [vmem:[#allocation4 + $0x48] sm:$0xff] }
 0x7f0   : > { %v15398_v52 = vmax.f32 %v15294_v14, %v15387_v19  ;;  %v13280_v41 = vpop.permute.xlu0 %13279 }
 0x7f1   : > { %15410 = vrot.lane.b32.xlu0 %v15399_v35, %s28138_s24  ;;  %v13286_v3 = vpop.permute.xlu1 %13285  ;;  %13292 = vst.msk [vmem:[#allocation4 + $0x8] sm:$0xff] %vm13291_vm4, %v13280_v41  ;;  %v15748_v35 = vld [vmem:[%s27228_s8 + $0x140] sm:$0xf] }
 0x7f2   : > { %13295 = vst.msk [vmem:[#allocation4 + $0x50] sm:$0xff] %vm13291_vm4, %v13286_v3  ;;  %15408 = vrot.lane.b32.xlu1 %v15398_v52, %s28138_s24 }
 0x7f4   : > { %v18793_v13 = vpop.f32.mrb[28].mxu0  ;;  %v18809_v55 = vpop.f32.mrb[28].mxu1 }
 0x7f5   : > { %v13284_v31 = vpop.permute.xlu1 %13283  ;;  %v15672_v4 = vmax.f32 %v18793_v13, %v18809_v55  ;;  %v15559_v27 = vpop.f32.mrb[29].mxu0 }
 0x7f6   : > { %13294 = vst.msk [vmem:[#allocation4 + $0x38] sm:$0xff] %vm13291_vm4, %v13284_v31  ;;  %v15652_v12 = vpop.f32.mrb[29].mxu1 }
 0x7f7   : > { %v15671_v60 = vmax.f32 %v15559_v27, %v15652_v12  ;;  %15681 = vrot.lane.b32.xlu0 %v15672_v4, %s20370_s18 }
 0x7f9   : > { %v13557_v54 = vpop.permute.xlu1 %13556  ;;  %15679 = vrot.lane.b32.xlu1 %v15671_v60, %s20370_s18 }
 0x7fa   : > { %v13555_v7 = vpop.permute.xlu0 %13554  ;;  %13568 = vst.msk [vmem:[#allocation4 + $0x20] sm:$0xff] %vm13566_vm5, %v13557_v54  ;;  %v15940_v54 = vld [vmem:[%s27226_s6 + $0x18] sm:$0xff] }
 0x7fb   : > { %13567 = vst.msk [vmem:[#allocation4 + $0x8] sm:$0xff] %vm13566_vm5, %v13555_v7  ;;  %v15941_v7 = vld [vmem:[%s27226_s6 + $0x30] sm:$0xff] }
 0x7fd   : > { %v13561_v56 = vpop.permute.xlu1 %13560 }
 0x7fe   : > { %13570 = vst.msk [vmem:[#allocation4 + $0x50] sm:$0xff] %vm13566_vm5, %v13561_v56  ;;  %v15939_v56 = vld [vmem:[%s27226_s6] sm:$0xff] }
 0x7ff   : > { %18845 = vmatprep.mubr.msk.f32.mxu1 %vm3294_vm9, %v15939_v56 }
 0x800   : > { %v18796_v49 = vpop.f32.mrb[30].mxu0  ;;  %v18812_v18 = vpop.f32.mrb[30].mxu1 }
 0x801   : > { %v13559_v58 = vpop.permute.xlu1 %13558  ;;  %v15674_v61 = vmax.f32 %v18796_v49, %v18812_v18  ;;  %v15569_v46 = vpop.f32.mrb[31].mxu0  ;;  %v15942_v49 = vld [vmem:[%s27226_s6 + $0x48] sm:$0xff] }
 0x802   : > { %13569 = vst.msk [vmem:[#allocation4 + $0x38] sm:$0xff] %vm13566_vm5, %v13559_v58  ;;  %v15662_v23 = vpop.f32.mrb[31].mxu1 }
 0x803   : > { %v15673_v1 = vmax.f32 %v15569_v46, %v15662_v23  ;;  %15685 = vrot.lane.b32.xlu0 %v15674_v61, %s20370_s18 }
 0x805   : > { %v13812_v32 = vpop.permute.xlu0 %13811  ;;  %15683 = vrot.lane.b32.xlu1 %v15673_v1, %s20370_s18  ;;  %s28146_s18 = smov 64  }
 0x806   : > { %13823 = vst.msk [vmem:[#allocation4 + $0x20] sm:$0xff] %vm13821_vm6, %v13812_v32 }
 0x807   : > { %16044 = vrot.lane.b32.xlu0 %v15939_v56, %s28145_s0 }
 0x809   : > { %v13816_v20 = vpop.permute.xlu1 %13815  ;;  %v13810_v50 = vpop.permute.xlu0 %13809  ;;  %16046 = vrot.lane.b32.xlu1 %v15940_v54, %s28145_s0 }
 0x80a   : > { %13825 = vst.msk [vmem:[#allocation4 + $0x50] sm:$0xff] %vm13821_vm6, %v13816_v20  ;;  %13822 = vst.msk [vmem:[#allocation4 + $0x8] sm:$0xff] %vm13821_vm6, %v13810_v50 }
 0x80b   : > { %16050 = vrot.lane.b32.xlu0 %v15942_v49, %s28145_s0 }
 0x80d   : > { %v13814_v42 = vpop.permute.xlu1 %13813  ;;  %16048 = vrot.lane.b32.xlu1 %v15941_v7, %s28145_s0 }
 0x80e   : > { %13824 = vst.msk [vmem:[#allocation4 + $0x38] sm:$0xff] %vm13821_vm6, %v13814_v42 }
 0x80f   : > { %16165 = vrot.lane.b32.xlu0 %v15939_v56, %s28146_s18 }
 0x811   : > { %v14091_v63 = vpop.permute.xlu1 %14090  ;;  %16167 = vrot.lane.b32.xlu1 %v15940_v54, %s28146_s18 }
 0x812   : > { %v14089_v6 = vpop.permute.xlu0 %14088  ;;  %14102 = vst.msk [vmem:[#allocation4 + $0x20] sm:$0xff] %vm14100_vm7, %v14091_v63 }
 0x813   : > { %14101 = vst.msk [vmem:[#allocation4 + $0x8] sm:$0xff] %vm14100_vm7, %v14089_v6  ;;  %16171 = vrot.lane.b32.xlu0 %v15942_v49, %s28146_s18 }
 0x816   : > { %v14095_v25 = vpop.permute.xlu0 %14094 }
 0x817   : > { %14104 = vst.msk [vmem:[#allocation4 + $0x50] sm:$0xff] %vm14100_vm7, %v14095_v25  ;;  %v14093_v45 = vpop.permute.xlu1 %14092 }
 0x818   : > { %14103 = vst.msk [vmem:[#allocation4 + $0x38] sm:$0xff] %vm14100_vm7, %v14093_v45 }
 0x81d   : > { %v14366_v38 = vpop.permute.xlu0 %14365 }
 0x81e   : > { %14377 = vst.msk [vmem:[#allocation4 + $0x20] sm:$0xff] %vm14375_vm8, %v14366_v38  ;;  %v14364_v53 = vpop.permute.xlu1 %14363 }
 0x81f   : > { %14376 = vst.msk [vmem:[#allocation4 + $0x8] sm:$0xff] %vm14375_vm8, %v14364_v53 }
 0x822   : > { %v14370_v26 = vpop.permute.xlu0 %14369 }
 0x823   : > { %14379 = vst.msk [vmem:[#allocation4 + $0x50] sm:$0xff] %vm14375_vm8, %v14370_v26 }
 0x826   : > { %v14368_v39 = vpop.permute.xlu0 %14367 }
 0x827   : > { %14378 = vst.msk [vmem:[#allocation4 + $0x38] sm:$0xff] %vm14375_vm8, %v14368_v39 }
 0x82a   : > { %v14621_v62 = vpop.permute.xlu0 %14620 }
 0x82b   : > { %14632 = vst.msk [vmem:[#allocation4 + $0x20] sm:$0xff] %vm14630_vm11, %v14621_v62 }
 0x82e   : > { %v14619_v22 = vpop.permute.xlu0 %14618 }
 0x82f   : > { %14631 = vst.msk [vmem:[#allocation4 + $0x8] sm:$0xff] %vm14630_vm11, %v14619_v22 }
 0x832   : > { %v14625_v47 = vpop.permute.xlu0 %14624 }
 0x833   : > { %14634 = vst.msk [vmem:[#allocation4 + $0x50] sm:$0xff] %vm14630_vm11, %v14625_v47 }
 0x836   : > { %v14623_v5 = vpop.permute.xlu0 %14622 }
 0x837   : > { %14633 = vst.msk [vmem:[#allocation4 + $0x38] sm:$0xff] %vm14630_vm11, %v14623_v5 }
 0x83a   : > { %v14900_v43 = vpop.permute.xlu0 %14899 }
 0x83b   : > { %14913 = vst.msk [vmem:[#allocation4 + $0x20] sm:$0xff] %vm14909_vm12, %v14900_v43 }
 0x83c   : > { %14914 = vst.msk [vmem:[#allocation4 + $0x28] sm:$0xff] %vm14911_vm13, %v14900_v43 }
 0x83e   : > { %v14898_v24 = vpop.permute.xlu0 %14897 }
 0x83f   : > { %14910 = vst.msk [vmem:[#allocation4 + $0x8] sm:$0xff] %vm14909_vm12, %v14898_v24 }
 0x840   : > { %14912 = vst.msk [vmem:[#allocation4 + $0x10] sm:$0xff] %vm14911_vm13, %v14898_v24 }
 0x841   : > { %v15158_v30 = vpop.permute.xlu1 %15157 }
 0x842   : > { %v14904_v29 = vpop.permute.xlu0 %14903  ;;  %15170 = vst.msk [vmem:[#allocation4 + $0x10] sm:$0xff] %vm15169_vm14, %v15158_v30  ;;  %v15700_v40 = vld [vmem:[#allocation4 + $0x20] sm:$0xff] }
 0x843   : > { %14917 = vst.msk [vmem:[#allocation4 + $0x50] sm:$0xff] %vm14909_vm12, %v14904_v29 }
 0x844   : > { %14918 = vst.msk [vmem:[#allocation4 + $0x58] sm:$0xff] %vm14911_vm13, %v14904_v29  ;;  %v27017_v29 = vld [vmem:[%s27226_s6 + $0x8] sm:$0xff] }
 0x846   : > { %v14902_v9 = vpop.permute.xlu0 %14901  ;;  %v15697_v15 = vld [vmem:[#allocation4 + $0x8] sm:$0xff] }
 0x847   : > { %14915 = vst.msk [vmem:[#allocation4 + $0x38] sm:$0xff] %vm14909_vm12, %v14902_v9  ;;  %15829 = vmatprep.mubr.f32.mxu0 %v15697_v15 }
 0x848   : > { %14916 = vst.msk [vmem:[#allocation4 + $0x40] sm:$0xff] %vm14911_vm13, %v14902_v9  ;;  %15830 = vmatmul.mubr.f32.vlgmr.msra.gmra.mrb[32].mxu0 %v15696_v28  ;;  %v27037_v9 = vld [vmem:[%s27226_s6 + $0x50] sm:$0xff] }
 0x849   : > { %15834 = vmatprep.mubr.f32.mxu0 %v15700_v40  ;;  %19541 = vmatpush3.bf16.msra.mxu0 %v26925_v59  ;;  %v15702_v59 = vld [vmem:[#allocation4 + $0x30] sm:$0xff] }
 0x84a   : > { %v15160_v2 = vpop.permute.xlu0 %15159  ;;  %19543 = vmatprep.subr.bf16.mxu0 %v19542_v21  ;;  %v15706_v8 = vld [vmem:[#allocation4 + $0x50] sm:$0xff] }
 0x84b   : > { %15171 = vst.msk [vmem:[#allocation4 + $0x28] sm:$0xff] %vm15169_vm14, %v15160_v2 }
 0x84c   : > { %15835 = vmatmul.mubr.f32.gmra.mrb[34].mxu0 %v15699_v37 }
 0x84d   : > { %19545 = vmatpush3.bf16.msra.mxu0 %v19542_v21 }
 0x84e   : > { %v15703_v33 = vld [vmem:[#allocation4 + $0x38] sm:$0xff]  ;;  %19547 = vmatprep.subr.bf16.mxu0 %v19546_v57 }
 0x84f   : > { %15839 = vmatprep.mubr.f32.mxu0 %v15703_v33 }
 0x850   : > { %15840 = vmatmul.mubr.f32.gmra.mrb[36].mxu0 %v15702_v59 }
 0x851   : > { %15844 = vmatprep.mubr.f32.mxu0 %v15706_v8  ;;  %v15164_v51 = vpop.permute.xlu0 %15163  ;;  %19549 = vmatpush3.bf16.msra.mxu0 %v19546_v57 }
 0x852   : > { %15173 = vst.msk [vmem:[#allocation4 + $0x58] sm:$0xff] %vm15169_vm14, %v15164_v51  ;;  %19551 = vmatprep.subr.bf16.mxu0 %v19550_v34 }
 0x853   : > { %v15162_v11 = vpop.permute.xlu1 %15161 }
 0x854   : > { %15845 = vmatmul.mubr.f32.gmra.mrb[38].mxu0 %v15705_v48  ;;  %15172 = vst.msk [vmem:[#allocation4 + $0x40] sm:$0xff] %vm15169_vm14, %v15162_v11 }
 0x855   : > { %19553 = vmatpush3.bf16.msra.mxu0 %v19550_v34 }
 0x856   : > { %18829 = vmatprep.subr.msk.mxu0 %vm10981_vm10, %v15748_v35 }
 0x859   : > { %18830 = vmatpush3.msk.msra.mxu0 %vm10981_vm10, %v15748_v35  ;;  %vm20377_vm10 = vmmov 0  }
 0x85e   : > { %v15407_v14 = vpop.permute.xlu0 %15406 }
 0x85f   : > { %15418 = vst.msk [vmem:[#allocation4 + $0x28] sm:$0xff] %vm15416_vm15, %v15407_v14  ;;  %v15405_v19 = vpop.permute.xlu1 %15404 }
 0x860   : > { %15417 = vst.msk [vmem:[#allocation4 + $0x10] sm:$0xff] %vm15416_vm15, %v15405_v19 }
 0x863   : > { %v15411_v52 = vpop.permute.xlu0 %15410 }
 0x864   : > { %15420 = vst.msk [vmem:[#allocation4 + $0x58] sm:$0xff] %vm15416_vm15, %v15411_v52  ;;  %v15409_v41 = vpop.permute.xlu1 %15408 }
 0x865   : > { %15419 = vst.msk [vmem:[#allocation4 + $0x40] sm:$0xff] %vm15416_vm15, %v15409_v41 }
 0x869   : > { %v15682_v3 = vpop.permute.xlu0 %15681 }
 0x86a   : > { %15693 = vst.msk [vmem:[#allocation4 + $0x28] sm:$0xff] %vm15691_vm0, %v15682_v3 }
 0x86b   : > { %v15680_v13 = vpop.permute.xlu1 %15679 }
 0x86c   : > { %15692 = vst.msk [vmem:[#allocation4 + $0x10] sm:$0xff] %vm15691_vm0, %v15680_v13 }
 0x871   : > { %v15701_v31 = vld [vmem:[#allocation4 + $0x28] sm:$0xff] }
 0x873   : > { %v15698_v55 = vld [vmem:[#allocation4 + $0x10] sm:$0xff] }
 0x874   : > { %18831 = vmatprep.mubr.msk.f32.mxu0 %vm15749_vm1, %v15698_v55 }
 0x875   : > { %18832 = vmatmul.mubr.msk.f32.vlgmr.msra.gmra.mrb[40].mxu0 %vm15749_vm1, %v15701_v31  ;;  %v15686_v4 = vpop.permute.xlu0 %15685 }
 0x876   : > { %15695 = vst.msk [vmem:[#allocation4 + $0x58] sm:$0xff] %vm15691_vm0, %v15686_v4 }
 0x877   : > { %v15684_v27 = vpop.permute.xlu1 %15683 }
 0x878   : > { %15694 = vst.msk [vmem:[#allocation4 + $0x40] sm:$0xff] %vm15691_vm0, %v15684_v27 }
 0x879   : > { %v16045_v30 = vpop.permute.xlu0 %16044 }
 0x87b   : > { %v16047_v15 = vpop.permute.xlu1 %16046 }
 0x87d   : > { %v15707_v60 = vld [vmem:[#allocation4 + $0x58] sm:$0xff]  ;;  %v16051_v10 = vpop.permute.xlu0 %16050 }
 0x87f   : > { %v15704_v12 = vld [vmem:[#allocation4 + $0x40] sm:$0xff]  ;;  %v16049_v21 = vpop.permute.xlu1 %16048 }
 0x880   : > { %18834 = vmatprep.mubr.msk.f32.mxu0 %vm15749_vm1, %v15704_v12 }
 0x881   : > { %18835 = vmatmul.mubr.msk.f32.gmra.mrb[42].mxu0 %vm15749_vm1, %v15707_v60  ;;  %v16166_v40 = vpop.permute.xlu0 %16165 }
 0x883   : > { %v16168_v28 = vpop.permute.xlu1 %16167 }
 0x885   : > { %v16172_v36 = vpop.permute.xlu0 %16171 }
 0x91b   : > { %v18119_v18 = vpop.f32.mrb[32].mxu0 }
 0x91c   : > { %v18120_v58 = vpop.f32.mrb[33].mxu0 }
 0x91d   : > { %v18121_v61 = vadd.f32 %v18120_v58, %v18119_v18 }
 0x91f   : > { %v18122_v46 = vpop.f32.mrb[34].mxu0 }
 0x920   : > { %v18123_v23 = vpop.f32.mrb[35].mxu0 }
 0x921   : > { %v18124_v1 = vadd.f32 %v18123_v23, %v18122_v46 }
 0x923   : > { %v18125_v32 = vpop.f32.mrb[36].mxu0 }
 0x924   : > { %v18126_v20 = vpop.f32.mrb[37].mxu0 }
 0x925   : > { %v18127_v50 = vadd.f32 %v18126_v20, %v18125_v32 }
 0x927   : > { %v18128_v42 = vpop.f32.mrb[38].mxu0 }
 0x928   : > { %v18129_v63 = vpop.f32.mrb[39].mxu0 }
 0x929   : > { %v18130_v6 = vadd.f32 %v18129_v63, %v18128_v42 }
 0x948   : > { %v18833_v25 = vpop.f32.mrb[40].mxu0 }
 0x949   : > { %v15922_v45 = vadd.f32 %v18833_v25, %v18124_v1  ;;  %v15916_v38 = vpop.f32.mrb[41].mxu0 }
 0x94a   : > { %v15917_v53 = vadd.f32 %v18121_v61, %v15916_v38 }
 0x94c   : > { %v20229_v26 = vpack.i.bf16 %v15922_v45, %v15917_v53  ;;  %v19554_v39 = vpack.c.bf16 %v15922_v45, %v15917_v53 }
 0x94e   : > { %20230 = vrot.lane.b32.xlu1 %v20229_v26, %s28147_s30  ;;  %19555 = vmatprep.subr.bf16.mxu1 %v19554_v39 }
 0x94f   : > { %19557 = vmatpush3.bf16.msra.mxu1 %v19554_v39 }
 0x952   : > { %16169 = vrot.lane.b32.xlu1 %v15941_v7, %s28146_s18 }
 0x954   : > { %v18836_v62 = vpop.f32.mrb[42].mxu0 }
 0x955   : > { %v15932_v22 = vadd.f32 %v18836_v62, %v18130_v6  ;;  %v15926_v47 = vpop.f32.mrb[43].mxu0 }
 0x956   : > { %20235 = vrot.lane.b32.xlu1 %v20229_v26, %s28144_s17  ;;  %v15927_v5 = vadd.f32 %v18127_v50, %v15926_v47 }
 0x958   : > { %v20249_v43 = vpack.i.bf16 %v15932_v22, %v15927_v5  ;;  %v19558_v24 = vpack.c.bf16 %v15932_v22, %v15927_v5 }
 0x95a   : > { %20240 = vrot.lane.b32.xlu1 %v20229_v26, %s20371_s29  ;;  %20250 = vrot.lane.b32.xlu0 %v20249_v43, %s28147_s30  ;;  %s526_s30 = scalar_lea.vmem %s27221_s1, %s28150_s22 }
 0x95b   : > { %19559 = vmatprep.subr.bf16.mxu1 %v19558_v24 }
 0x95c   : > { %19561 = vmatpush3.bf16.msra.mxu1 %v19558_v24 }
 0x95e   : > { %20245 = vrot.lane.b32.xlu1 %v20229_v26, %s20368_s25  ;;  %16282 = vrot.lane.b32.xlu0 %v15939_v56, %s28138_s24 }
 0x95f   : > { %18846 = vmatmul.mubr.msk.f32.vlgmr.msra.gmra.mrb[32].mxu1 %vm3294_vm9, %v15940_v54 }
 0x960   : > { %18848 = vmatprep.mubr.msk.f32.mxu1 %vm3294_vm9, %v15941_v7 }
 0x962   : > { %16284 = vrot.lane.b32.xlu1 %v15940_v54, %s28138_s24  ;;  %20255 = vrot.lane.b32.xlu0 %v20249_v43, %s28144_s17 }
 0x963   : > { %18849 = vmatmul.mubr.msk.f32.gmra.mrb[34].mxu1 %vm3294_vm9, %v15942_v49 }
 0x964   : > { %18859 = vmatprep.mubr.msk.f32.mxu1 %vm3294_vm9, %v16045_v30 }
 0x966   : > { %16286 = vrot.lane.b32.xlu1 %v15941_v7, %s28138_s24  ;;  %16288 = vrot.lane.b32.xlu0 %v15942_v49, %s28138_s24 }
 0x96a   : > { %20260 = vrot.lane.b32.xlu1 %v20229_v26, %s20372_s26  ;;  %20270 = vrot.lane.b32.xlu0 %v20249_v43, %s20371_s29 }
 0x96e   : > { %20265 = vrot.lane.b32.xlu1 %v20229_v26, %s20373_s23  ;;  %16516 = vrot.lane.b32.xlu0 %v27017_v29, %s28145_s0 }
 0x972   : > { %16518 = vrot.lane.b32.xlu1 %v27024_v17, %s28145_s0  ;;  %20275 = vrot.lane.b32.xlu0 %v20249_v43, %s20368_s25  ;;  %s20375_s25 = smov 120  }
 0x976   : > { %16520 = vrot.lane.b32.xlu1 %v27032_v16, %s28145_s0  ;;  %16522 = vrot.lane.b32.xlu0 %v27037_v9, %s28145_s0 }
 0x97a   : > { %20280 = vrot.lane.b32.xlu1 %v20229_v26, %s20374_s19  ;;  %20285 = vrot.lane.b32.xlu0 %v20249_v43, %s20372_s26 }
 0x97e   : > { %16635 = vrot.lane.b32.xlu1 %v27024_v17, %s28146_s18  ;;  %16633 = vrot.lane.b32.xlu0 %v27017_v29, %s28146_s18 }
 0x982   : > { %16637 = vrot.lane.b32.xlu1 %v27032_v16, %s28146_s18  ;;  %20290 = vrot.lane.b32.xlu0 %v20249_v43, %s20373_s23  ;;  %s17313_s23 = sshll.u32 %s28150_s22, 1 }
 0x983   : > { %s530_s29 = scalar_lea.vmem %s27236_s16, %s17313_s23 }
 0x986   : > { %20295 = vrot.lane.b32.xlu1 %v20229_v26, %s20375_s25  ;;  %16639 = vrot.lane.b32.xlu0 %v27037_v9, %s28146_s18 }
 0x98a   : > { %20300 = vrot.lane.b32.xlu0 %v20249_v43, %s20374_s19  ;;  %16752 = vrot.lane.b32.xlu1 %v27024_v17, %s28138_s24 }
 0x98e   : > { %16750 = vrot.lane.b32.xlu0 %v27017_v29, %s28138_s24  ;;  %16754 = vrot.lane.b32.xlu1 %v27032_v16, %s28138_s24 }
 0x992   : > { %20305 = vrot.lane.b32.xlu0 %v20249_v43, %s20375_s25 }
 0x996   : > { %16756 = vrot.lane.b32.xlu0 %v27037_v9, %s28138_s24 }
 0x9c0   : > { %v20231_v44 = vpop.permute.xlu1 %20230 }
 0x9c1   : > { %v20233_v2 = vunpack.i.h.bf16 %v20231_v44  ;;  %v20232_v57 = vunpack.i.l.bf16 %v20231_v44 }
 0x9c3   : > { %v19562_v37 = vpack.c.bf16 %v20233_v2, %v20232_v57 }
 0x9c4   : > { %v16170_v0 = vpop.permute.xlu1 %16169 }
 0x9c5   : > { %19563 = vmatprep.subr.bf16.mxu1 %v19562_v37 }
 0x9c6   : > { %19565 = vmatpush3.bf16.msra.mxu1 %v19562_v37 }
 0x9c8   : > { %v20236_v33 = vpop.permute.xlu1 %20235 }
 0x9c9   : > { %v20238_v8 = vunpack.i.h.bf16 %v20236_v33  ;;  %v20237_v51 = vunpack.i.l.bf16 %v20236_v33 }
 0x9cb   : > { %v19570_v52 = vpack.c.bf16 %v20238_v8, %v20237_v51 }
 0x9cc   : > { %v20241_v34 = vpop.permute.xlu1 %20240  ;;  %v20251_v59 = vpop.permute.xlu0 %20250 }
 0x9cd   : > { %v20253_v48 = vunpack.i.h.bf16 %v20251_v59  ;;  %v20252_v11 = vunpack.i.l.bf16 %v20251_v59  ;;  %v20243_v13 = vunpack.i.h.bf16 %v20241_v34  ;;  %v20242_v55 = vunpack.i.l.bf16 %v20241_v34 }
 0x9cf   : > { %v19566_v35 = vpack.c.bf16 %v20253_v48, %v20252_v11  ;;  %v19578_v54 = vpack.c.bf16 %v20243_v13, %v20242_v55  ;;  %v16868_v13 = vld [vmem:[%s27226_s6 + $0x28] sm:$0xff]  ;;  %v16869_v55 = vld [vmem:[%s27226_s6 + $0x40] sm:$0xff] }
 0x9d0   : > { %v20246_v14 = vpop.permute.xlu1 %20245  ;;  %v16283_v19 = vpop.permute.xlu0 %16282 }
 0x9d1   : > { %19567 = vmatprep.subr.bf16.mxu1 %v19566_v35  ;;  %v20248_v49 = vunpack.i.h.bf16 %v20246_v14  ;;  %v20247_v18 = vunpack.i.l.bf16 %v20246_v14 }
 0x9d2   : > { %19569 = vmatpush3.bf16.msra.mxu1 %v19566_v35 }
 0x9d3   : > { %19571 = vmatprep.subr.bf16.mxu1 %v19570_v52  ;;  %v19586_v32 = vpack.c.bf16 %v20248_v49, %v20247_v18  ;;  %v15938_v49 = vld [vmem:[%s27227_s7 + $0x18] sm:$0xff]  ;;  %v15937_v18 = vld [vmem:[%s27227_s7 + $0x10] sm:$0xff] }
 0x9d4   : > { %v16285_v41 = vpop.permute.xlu1 %16284  ;;  %v20256_v3 = vpop.permute.xlu0 %20255 }
 0x9d5   : > { %v20258_v31 = vunpack.i.h.bf16 %v20256_v3  ;;  %v20257_v4 = vunpack.i.l.bf16 %v20256_v3  ;;  %18860 = vmatmul.mubr.msk.f32.vlgmr.msra.gmra.mrb[32].mxu1 %vm3294_vm9, %v16047_v15 }
 0x9d6   : > { %18862 = vmatprep.mubr.msk.f32.mxu1 %vm3294_vm9, %v16049_v21  ;;  %19573 = vmatpush3.bf16.msra.mxu1 %v19570_v52 }
 0x9d7   : > { %v19574_v27 = vpack.c.bf16 %v20258_v31, %v20257_v4  ;;  %v16870_v31 = vld [vmem:[%s27226_s6 + $0x58] sm:$0xff]  ;;  %v16984_v4 = vld [vmem:[%s27231_s11] sm:$0xff] }
 0x9d8   : > { %v16287_v12 = vpop.permute.xlu1 %16286  ;;  %v16289_v60 = vpop.permute.xlu0 %16288  ;;  %18971 = vmatprep.mubr.msk.f32.mxu0 %vm3294_vm9, %v16984_v4 }
 0x9d9   : > { %18863 = vmatmul.mubr.msk.f32.gmra.mrb[34].mxu1 %vm3294_vm9, %v16051_v10  ;;  %19575 = vmatprep.subr.bf16.mxu1 %v19574_v27 }
 0x9da   : > { %19577 = vmatpush3.bf16.msra.mxu1 %v19574_v27  ;;  %18873 = vmatprep.mubr.msk.f32.mxu1 %vm3294_vm9, %v16166_v40  ;;  %v15936_v27 = vld [vmem:[%s27227_s7 + $0x8] sm:$0xff] }
 0x9db   : > { %19579 = vmatprep.subr.bf16.mxu1 %v19578_v54 }
 0x9dc   : > { %v20261_v7 = vpop.permute.xlu1 %20260  ;;  %v20271_v56 = vpop.permute.xlu0 %20270 }
 0x9dd   : > { %v20273_v58 = vunpack.i.h.bf16 %v20271_v56  ;;  %v20272_v61 = vunpack.i.l.bf16 %v20271_v56  ;;  %18874 = vmatmul.mubr.msk.f32.vlgmr.msra.gmra.mrb[32].mxu1 %vm3294_vm9, %v16168_v28  ;;  %v20263_v42 = vunpack.i.h.bf16 %v20261_v7  ;;  %v20262_v63 = vunpack.i.l.bf16 %v20261_v7 }
 0x9de   : > { %18876 = vmatprep.mubr.msk.f32.mxu1 %vm3294_vm9, %v16170_v0  ;;  %19581 = vmatpush3.bf16.msra.mxu1 %v19578_v54 }
 0x9df   : > { %v19582_v46 = vpack.c.bf16 %v20273_v58, %v20272_v61  ;;  %v19594_v26 = vpack.c.bf16 %v20263_v42, %v20262_v63  ;;  %v16987_v42 = vld [vmem:[%s27231_s11 + $0x18] sm:$0xff]  ;;  %v16988_v63 = vld [vmem:[%s27231_s11 + $0x20] sm:$0xff] }
 0x9e0   : > { %v20266_v23 = vpop.permute.xlu1 %20265  ;;  %v16517_v1 = vpop.permute.xlu0 %16516 }
 0x9e1   : > { %18877 = vmatmul.mubr.msk.f32.gmra.mrb[34].mxu1 %vm3294_vm9, %v16172_v36  ;;  %19583 = vmatprep.subr.bf16.mxu1 %v19582_v46  ;;  %v20268_v22 = vunpack.i.h.bf16 %v20266_v23  ;;  %v20267_v47 = vunpack.i.l.bf16 %v20266_v23 }
 0x9e2   : > { %19585 = vmatpush3.bf16.msra.mxu1 %v19582_v46  ;;  %18887 = vmatprep.mubr.msk.f32.mxu1 %vm3294_vm9, %v16283_v19 }
 0x9e3   : > { %19587 = vmatprep.subr.bf16.mxu1 %v19586_v32  ;;  %v19602_v21 = vpack.c.bf16 %v20268_v22, %v20267_v47 }
 0x9e4   : > { %v16519_v20 = vpop.permute.xlu1 %16518  ;;  %v20276_v50 = vpop.permute.xlu0 %20275 }
 0x9e5   : > { %v20278_v6 = vunpack.i.h.bf16 %v20276_v50  ;;  %v20277_v25 = vunpack.i.l.bf16 %v20276_v50  ;;  %18888 = vmatmul.mubr.msk.f32.vlgmr.msra.gmra.mrb[32].mxu1 %vm3294_vm9, %v16285_v41  ;;  %v16867_v41 = vld [vmem:[%s27226_s6 + $0x10] sm:$0xff] }
 0x9e6   : > { %19589 = vmatpush3.bf16.msra.mxu1 %v19586_v32  ;;  %18890 = vmatprep.mubr.msk.f32.mxu1 %vm3294_vm9, %v16287_v12  ;;  %v15935_v12 = vld [vmem:[%s27227_s7] sm:$0xff]  ;;  %v16986_v50 = vld [vmem:[%s27231_s11 + $0x10] sm:$0xff] }
 0x9e7   : > { %v19590_v45 = vpack.c.bf16 %v20278_v6, %v20277_v25  ;;  %v16989_v6 = vld [vmem:[%s27231_s11 + $0x28] sm:$0xff]  ;;  %v16990_v25 = vld [vmem:[%s27231_s11 + $0x30] sm:$0xff] }
 0x9e8   : > { %v16521_v38 = vpop.permute.xlu1 %16520  ;;  %v16523_v53 = vpop.permute.xlu0 %16522 }
 0x9e9   : > { %18891 = vmatmul.mubr.msk.f32.gmra.mrb[34].mxu1 %vm3294_vm9, %v16289_v60  ;;  %19591 = vmatprep.subr.bf16.mxu1 %v19590_v45 }
 0x9ea   : > { %19593 = vmatpush3.bf16.msra.mxu1 %v19590_v45  ;;  %18901 = vmatprep.mubr.msk.f32.mxu1 %vm3294_vm9, %v27017_v29  ;;  %v16991_v45 = vld [vmem:[%s27231_s11 + $0x38] sm:$0xff] }
 0x9eb   : > { %19595 = vmatprep.subr.bf16.mxu1 %v19594_v26 }
 0x9ec   : > { %v20281_v39 = vpop.permute.xlu1 %20280  ;;  %v20286_v62 = vpop.permute.xlu0 %20285 }
 0x9ed   : > { %v20288_v5 = vunpack.i.h.bf16 %v20286_v62  ;;  %v20287_v43 = vunpack.i.l.bf16 %v20286_v62  ;;  %18902 = vmatmul.mubr.msk.f32.vlgmr.msra.gmra.mrb[32].mxu1 %vm3294_vm9, %v27024_v17  ;;  %v20283_v10 = vunpack.i.h.bf16 %v20281_v39  ;;  %v20282_v17 = vunpack.i.l.bf16 %v20281_v39  ;;  %v17751_v39 = vld [vmem:[%s526_s30] ss:$0 sm:$0xff] }
 0x9ee   : > { %19597 = vmatpush3.bf16.msra.mxu1 %v19594_v26  ;;  %18904 = vmatprep.mubr.msk.f32.mxu1 %vm3294_vm9, %v27032_v16  ;;  %v16993_v26 = vld [vmem:[%s27232_s12 + $0x8] sm:$0xff]  ;;  %v16992_v62 = vld [vmem:[%s27232_s12] sm:$0xff] }
 0x9ef   : > { %v19598_v24 = vpack.c.bf16 %v20288_v5, %v20287_v43  ;;  %v19610_v57 = vpack.c.bf16 %v20283_v10, %v20282_v17  ;;  %v17008_v22 = vmul.f32 %v17751_v39, %v16993_v26  ;;  %v17007_v47 = vmul.f32 %v17751_v39, %v16992_v62  ;;  %v16995_v5 = vld [vmem:[%s27232_s12 + $0x18] sm:$0xff]  ;;  %v16994_v43 = vld [vmem:[%s27232_s12 + $0x10] sm:$0xff] }
 0x9f0   : > { %v16636_v30 = vpop.permute.xlu1 %16635  ;;  %v16634_v15 = vpop.permute.xlu0 %16633  ;;  %v17009_v17 = vmul.f32 %v17751_v39, %v16994_v43 }
 0x9f1   : > { %18905 = vmatmul.mubr.msk.f32.gmra.mrb[34].mxu1 %vm3294_vm9, %v27037_v9  ;;  %19599 = vmatprep.subr.bf16.mxu1 %v19598_v24 }
 0x9f2   : > { %19601 = vmatpush3.bf16.msra.mxu1 %v19598_v24  ;;  %18915 = vmatprep.mubr.msk.f32.mxu1 %vm3294_vm9, %v16517_v1 }
 0x9f3   : > { %19603 = vmatprep.subr.bf16.mxu1 %v19602_v21 }
 0x9f4   : > { %v16638_v29 = vpop.permute.xlu1 %16637  ;;  %v20291_v28 = vpop.permute.xlu0 %20290 }
 0x9f5   : > { %v20293_v44 = vunpack.i.h.bf16 %v20291_v28  ;;  %v20292_v40 = vunpack.i.l.bf16 %v20291_v28  ;;  %18916 = vmatmul.mubr.msk.f32.vlgmr.msra.gmra.mrb[32].mxu1 %vm3294_vm9, %v16519_v20  ;;  %v16985_v20 = vld [vmem:[%s27231_s11 + $0x8] sm:$0xff]  ;;  %v17010_v28 = vmul.f32 %v17751_v39, %v16995_v5 }
 0x9f6   : > { %19605 = vmatpush3.bf16.msra.mxu1 %v19602_v21  ;;  %18918 = vmatprep.mubr.msk.f32.mxu1 %vm3294_vm9, %v16521_v38  ;;  %v20376_v38 = vmov 0.0|0.0  }
 0x9f7   : > { %v19606_v16 = vpack.c.bf16 %v20293_v44, %v20292_v40  ;;  %v16997_v44 = vld [vmem:[%s27232_s12 + $0x28] sm:$0xff] }
 0x9f8   : > { %v16640_v2 = vpop.permute.xlu0 %16639  ;;  %v20296_v9 = vpop.permute.xlu1 %20295 }
 0x9f9   : > { %18919 = vmatmul.mubr.msk.f32.gmra.mrb[34].mxu1 %vm3294_vm9, %v16523_v53  ;;  %19607 = vmatprep.subr.bf16.mxu1 %v19606_v16  ;;  %v20298_v0 = vunpack.i.h.bf16 %v20296_v9  ;;  %v20297_v36 = vunpack.i.l.bf16 %v20296_v9  ;;  %v28148_v53 = vmov 0.0   ;;  %v17147_v9 = vld [vmem:[%s27233_s13 + $0x18] sm:$0xff] }
 0x9fa   : > { %19609 = vmatpush3.bf16.msra.mxu1 %v19606_v16  ;;  %18929 = vmatprep.mubr.msk.f32.mxu1 %vm3294_vm9, %v16634_v15  ;;  %v16996_v16 = vld [vmem:[%s27232_s12 + $0x20] sm:$0xff] }
 0x9fb   : > { %19611 = vmatprep.subr.bf16.mxu1 %v19610_v57  ;;  %v19618_v48 = vpack.c.bf16 %v20298_v0, %v20297_v36 }
 0x9fc   : > { %v20301_v37 = vpop.permute.xlu0 %20300  ;;  %v16753_v59 = vpop.permute.xlu1 %16752 }
 0x9fd   : > { %v20303_v33 = vunpack.i.h.bf16 %v20301_v37  ;;  %v20302_v34 = vunpack.i.l.bf16 %v20301_v37  ;;  %18930 = vmatmul.mubr.msk.f32.vlgmr.msra.gmra.mrb[32].mxu1 %vm3294_vm9, %v16636_v30  ;;  %v17145_v30 = vld [vmem:[%s27233_s13 + $0x8] sm:$0xff] }
 0x9fe   : > { %19613 = vmatpush3.bf16.msra.mxu1 %v19610_v57  ;;  %18932 = vmatprep.mubr.msk.f32.mxu1 %vm3294_vm9, %v16638_v29  ;;  %v17144_v29 = vld [vmem:[%s27233_s13] sm:$0xff] }
 0x9ff   : > { %v19614_v8 = vpack.c.bf16 %v20303_v33, %v20302_v34  ;;  %v17146_v33 = vld [vmem:[%s27233_s13 + $0x10] sm:$0xff]  ;;  %v17012_v34 = vmul.f32 %v17751_v39, %v16997_v44 }
 0xa00   : > { %v16751_v51 = vpop.permute.xlu0 %16750  ;;  %v16755_v11 = vpop.permute.xlu1 %16754 }
 0xa01   : > { %18933 = vmatmul.mubr.msk.f32.gmra.mrb[34].mxu1 %vm3294_vm9, %v16640_v2  ;;  %19615 = vmatprep.subr.bf16.mxu1 %v19614_v8 }
 0xa02   : > { %19617 = vmatpush3.bf16.msra.mxu1 %v19614_v8  ;;  %18943 = vmatprep.mubr.msk.f32.mxu1 %vm3294_vm9, %v16751_v51  ;;  %v17011_v51 = vmul.f32 %v17751_v39, %v16996_v16 }
 0xa03   : > { %19619 = vmatprep.subr.bf16.mxu1 %v19618_v48 }
 0xa04   : > { %v20306_v35 = vpop.permute.xlu0 %20305 }
 0xa05   : > { %v20308_v14 = vunpack.i.h.bf16 %v20306_v35  ;;  %v20307_v19 = vunpack.i.l.bf16 %v20306_v35  ;;  %18944 = vmatmul.mubr.msk.f32.vlgmr.msra.gmra.mrb[32].mxu1 %vm3294_vm9, %v16753_v59  ;;  %v16998_v35 = vld [vmem:[%s27232_s12 + $0x30] sm:$0xff] }
 0xa06   : > { %19621 = vmatpush3.bf16.msra.mxu1 %v19618_v48  ;;  %18946 = vmatprep.mubr.msk.f32.mxu1 %vm3294_vm9, %v16755_v11  ;;  %v16999_v48 = vld [vmem:[%s27232_s12 + $0x38] sm:$0xff] }
 0xa07   : > { %v19622_v52 = vpack.c.bf16 %v20308_v14, %v20307_v19  ;;  %v17014_v4 = vmul.f32 %v17751_v39, %v16999_v48 }
 0xa08   : > { %v16757_v3 = vpop.permute.xlu0 %16756 }
 0xa09   : > { %18947 = vmatmul.mubr.msk.f32.gmra.mrb[34].mxu1 %vm3294_vm9, %v16757_v3  ;;  %19623 = vmatprep.subr.bf16.mxu1 %v19622_v52 }
 0xa0a   : > { %19625 = vmatpush3.bf16.msra.mxu1 %v19622_v52  ;;  %18957 = vmatprep.mubr.msk.f32.mxu1 %vm3294_vm9, %v16867_v41  ;;  %v17149_v41 = vld [vmem:[%s27233_s13 + $0x28] sm:$0xff] }
 0xa0d   : > { %18958 = vmatmul.mubr.msk.f32.vlgmr.msra.gmra.mrb[32].mxu1 %vm3294_vm9, %v16868_v13 }
 0xa0e   : > { %18960 = vmatprep.mubr.msk.f32.mxu1 %vm3294_vm9, %v16869_v55 }
 0xa11   : > { %18961 = vmatmul.mubr.msk.f32.gmra.mrb[34].mxu1 %vm3294_vm9, %v16870_v31  ;;  %v17148_v31 = vld [vmem:[%s27233_s13 + $0x20] sm:$0xff] }
 0xae0   : > { %v18959_v60 = vpop.f32.mrb[32].mxu1 }
 0xae1   : > { %v19646_v54 = vadd.f32 %v18959_v60, %v15936_v27  ;;  %v16961_v7 = vpop.f32.mrb[33].mxu1  ;;  %v17013_v60 = vmul.f32 %v17751_v39, %v16998_v35 }
 0xae2   : > { %v19647_v56 = vadd.f32 %v16961_v7, %v15935_v12 }
 0xae4   : > { %v19626_v58 = vpack.c.bf16 %v19646_v54, %v19647_v56  ;;  %v18962_v61 = vpop.f32.mrb[34].mxu1 }
 0xae5   : > { %v19648_v46 = vadd.f32 %v18962_v61, %v15938_v49  ;;  %v16971_v23 = vpop.f32.mrb[35].mxu1 }
 0xae6   : > { %v19649_v1 = vadd.f32 %v16971_v23, %v15937_v18  ;;  %19627 = vmatprep.subr.bf16.mxu0 %v19626_v58  ;;  %v17151_v18 = vld [vmem:[%s27233_s13 + $0x38] sm:$0xff]  ;;  %v17150_v23 = vld [vmem:[%s27233_s13 + $0x30] sm:$0xff] }
 0xae7   : > { %19629 = vmatpush3.bf16.msra.mxu0 %v19626_v58 }
 0xae8   : > { %v19630_v32 = vpack.c.bf16 %v19648_v46, %v19649_v1 }
 0xaea   : > { %19631 = vmatprep.subr.bf16.mxu0 %v19630_v32 }
 0xaeb   : > { %19633 = vmatpush3.bf16.msra.mxu0 %v19630_v32 }
 0xaec   : > { %19634 = vmatprep.subr.bf16.mxu0 %v20376_v38 }
 0xaee   : > { %18972 = vmatmul.mubr.msk.f32.vlgmr.msra.gmra.mrb[44].mxu0 %vm3294_vm9, %v16985_v20 }
 0xaef   : > { %18974 = vmatprep.mubr.msk.f32.mxu0 %vm3294_vm9, %v16986_v50 }
 0xaf2   : > { %18975 = vmatmul.mubr.msk.f32.gmra.mrb[46].mxu0 %vm3294_vm9, %v16987_v42 }
 0xaf3   : > { %18977 = vmatprep.mubr.msk.f32.mxu0 %vm3294_vm9, %v16988_v63 }
 0xaf6   : > { %18978 = vmatmul.mubr.msk.f32.gmra.mrb[48].mxu0 %vm3294_vm9, %v16989_v6 }
 0xaf7   : > { %18980 = vmatprep.mubr.msk.f32.mxu0 %vm3294_vm9, %v16990_v25 }
 0xafa   : > { %18981 = vmatmul.mubr.msk.f32.gmra.mrb[50].mxu0 %vm3294_vm9, %v16991_v45  ;;  %v17168_v45 = vld [vmem:[%s27234_s14] sm:$0x3]  ;;  %vm17170_vm9 = vcmask 523264  }
 0xafb   : > { %18999 = vmatprep.mubr.msk.f32.mxu0 %vm20377_vm10, %v28148_v53  ;;  %v17169_v53 = vld [vmem:[%s27235_s15] sm:$0x3] }
 0xbc1   : > { %v18973_v24 = vpop.f32.mrb[44].mxu0 }
 0xbc2   : > { %v17111_v15 = vadd.f32 %v18973_v24, %v17008_v22  ;;  %v17105_v21 = vpop.f32.mrb[45].mxu0 }
 0xbc3   : > { %v17106_v10 = vadd.f32 %v17105_v21, %v17007_v47 }
 0xbc4   : > { %v17153_v40 = vadd.f32 %v17145_v30, %v17111_v15 }
 0xbc5   : > { %v17152_v2 = vadd.f32 %v17144_v29, %v17106_v10  ;;  %v18976_v57 = vpop.f32.mrb[46].mxu0 }
 0xbc6   : > { %v17161_v37 = vmax.f32 %v17153_v40, 0.0  ;;  %v17121_v0 = vadd.f32 %v18976_v57, %v17010_v28  ;;  %v17115_v36 = vpop.f32.mrb[47].mxu0 }
 0xbc7   : > { %v17160_v59 = vmax.f32 %v17152_v2, 0.0  ;;  %v17116_v8 = vadd.f32 %v17115_v36, %v17009_v17 }
 0xbc8   : > { %v17155_v11 = vadd.f32 %v17147_v9, %v17121_v0 }
 0xbc9   : > { %v19635_v14 = vpack.c.bf16 %v17161_v37, %v17160_v59  ;;  %v17154_v19 = vadd.f32 %v17146_v33, %v17116_v8  ;;  %v18979_v52 = vpop.f32.mrb[48].mxu0 }
 0xbca   : > { %v17163_v3 = vmax.f32 %v17155_v11, 0.0  ;;  %v17131_v13 = vadd.f32 %v18979_v52, %v17012_v34  ;;  %v17125_v55 = vpop.f32.mrb[49].mxu0 }
 0xbcb   : > { %v17162_v27 = vmax.f32 %v17154_v19, 0.0  ;;  %v17126_v12 = vadd.f32 %v17125_v55, %v17011_v51  ;;  %19636 = vmatpush3.bf16.msra.mxu0 %v19635_v14 }
 0xbcc   : > { %v17157_v54 = vadd.f32 %v17149_v41, %v17131_v13  ;;  %19637 = vmatprep.subr.bf16.mxu0 %v20376_v38 }
 0xbcd   : > { %v19638_v7 = vpack.c.bf16 %v17163_v3, %v17162_v27  ;;  %v17156_v56 = vadd.f32 %v17148_v31, %v17126_v12  ;;  %v18982_v49 = vpop.f32.mrb[50].mxu0 }
 0xbce   : > { %v17165_v58 = vmax.f32 %v17157_v54, 0.0  ;;  %v17141_v61 = vadd.f32 %v18982_v49, %v17014_v4  ;;  %v17135_v46 = vpop.f32.mrb[51].mxu0 }
 0xbcf   : > { %v17164_v1 = vmax.f32 %v17156_v56, 0.0  ;;  %v17136_v32 = vadd.f32 %v17135_v46, %v17013_v60  ;;  %19639 = vmatpush3.bf16.msra.mxu0 %v19638_v7 }
 0xbd0   : > { %v17159_v20 = vadd.f32 %v17151_v18, %v17141_v61  ;;  %19640 = vmatprep.subr.bf16.mxu0 %v20376_v38 }
 0xbd1   : > { %v19641_v50 = vpack.c.bf16 %v17165_v58, %v17164_v1  ;;  %v17158_v42 = vadd.f32 %v17150_v23, %v17136_v32 }
 0xbd2   : > { %v17167_v63 = vmax.f32 %v17159_v20, 0.0 }
 0xbd3   : > { %v17166_v6 = vmax.f32 %v17158_v42, 0.0  ;;  %19642 = vmatpush3.bf16.msra.mxu0 %v19641_v50 }
 0xbd4   : > { %19643 = vmatprep.subr.bf16.mxu0 %v20376_v38 }
 0xbd5   : > { %v19644_v25 = vpack.c.bf16 %v17167_v63, %v17166_v6 }
 0xbd7   : > { %19645 = vmatpush3.bf16.msra.mxu0 %v19644_v25 }
 0xbda   : > { %19000 = vmatmul.mubr.msk.f32.vlgmr.msra.gmra.mrb[52].mxu0 %vm17170_vm9, %v17168_v45 }
 0xcad   : > { %v17240_v26 = vpop.f32.mrb[52].mxu0 }
 0xcae   : > { %v17241_v38 = vadd.f32 %v17240_v26, %v17169_v53  ;;  %v19001_v39 = vpop.f32.mrb[53].mxu0 }
 0xcb0   : > { %17245 = vst.msk [vmem:[%s530_s29] sm:$0x3] %vm17244_vm2, %v17241_v38 }
 0xcb1 PF: > { %s26_s21 = sadd.s32 1, %s20332_s21  }
 0xcb2   : > { %p23_p4 = scmp.ge.s32.totalorder %s26_s21, 4  }
 0xcb4   :  { %25 = sbr.rel (!%p23_p4) target bundleno = 2 (0x2), region = 117 }

</bundles_post_ra>
